<compile_context>
chip_gen: v6e
topology: v6e:2x2x1
jax: 0.10.0
libtpu: 0.0.40
codegen_flags: <defaults>
</compile_context>

<pallas_src>
import functools

import jax
import jax.numpy as jnp
from jax.experimental import pallas as pl
from jax.experimental.pallas import tpu as pltpu

LANE = 128      # feature dims are padded to multiples of the 128-lane axis
SUBLANE = 8     # fp32 sublane width: batch tiles must be a multiple of 8


def _round_up(x, m):
    return (x + m - 1) // m * m


def _vmem_capacity_bytes():
    """Physical VMEM per TensorCore; generation-aware, with safe fallbacks."""
    try:
        info = pltpu.get_tpu_info()
        cap = getattr(info, "vmem_capacity_bytes", None)
        if cap:
            return int(cap)
    except Exception:
        pass
    try:
        kind = jax.devices()[0].device_kind.lower()
        if "v7" in kind:
            return 64 << 20
    except Exception:
        pass
    return 128 << 20  # v5e / v6e


# ---------------- fused autoencoder kernel ----------------

def _ae_fused_kernel(*refs, acts):
    """refs = (x_ref, w0, b0, w1, b1, ..., w11, b11, o_ref).

    One batch tile flows through all 12 layers without leaving VMEM: bf16 MXU matmuls
    with fp32 accumulation, fp32 bias + activation on the VPU/EUP, intermediate
    activations kept as in-kernel values (Mosaic holds them in vregs / VMEM).
    """
    x_ref = refs[0]
    o_ref = refs[-1]
    n_layers = len(acts)

    h = x_ref[...]                                    # bf16 [TILE_B, K0_pad]
    for li in range(n_layers):                        # statically unrolled layer loop
        w_ref = refs[1 + 2 * li]                      # bf16 [K_pad, N_pad], VMEM-resident
        b_ref = refs[2 + 2 * li]                      # fp32 [1, N_pad]
        y = jnp.dot(h, w_ref[...], preferred_element_type=jnp.float32)
        # fp32 bias + activation epilogue. TODO(synk): on v6e/v7x a bf16 epilogue for the
        # ReLU layers halves VPU/store traffic -- only worth it if profiling shows the
        # vst/VALU slot binding behind the MXU.
        y = y + b_ref[...]                            # broadcast over batch
        if acts[li] == "relu":
            y = jnp.maximum(y, 0.0)
        else:
            # Sigmoid via tanh (EUP): numerically safe for any y, no approx-recip error.
            y = 0.5 * jnp.tanh(0.5 * y) + 0.5
        if li + 1 < n_layers:
            h = y.astype(jnp.bfloat16)                # bf16 operand for the next MXU pass
        else:
            o_ref[...] = y.astype(o_ref.dtype)


def autoencoder_forward(x, packed, *, tile_b=None):
    """Fused forward pass. x: fp32 [B, input_dim]. Returns fp32 [B, input_dim]."""
    layers, acts = packed["layers"], packed["acts"]
    in_dim, out_dim = packed["in_dim"], packed["out_dim"]
    B = x.shape[0]
    assert x.shape[1] == in_dim
    k0_pad = layers[0][0].shape[0]
    out_pad = layers[-1][0].shape[1]

    # Batch tiling: tiny batches -> one sublane-aligned tile; medium batches -> at least
    # two grid steps so both v7x TensorCores get work; large batches -> 512-row tiles.
    if tile_b is None:
        if B < 256:
            tile_b = _round_up(B, SUBLANE)
        elif B < 512:
            tile_b = _round_up(-(-B // 2), SUBLANE)   # >= 2 grid steps (v7x megacore)
        else:
            tile_b = 512
    b_pad = _round_up(B, tile_b)

    # Input: skip the extra pad/copy HBM pass when shapes already line up.
    if b_pad == B and k0_pad == in_dim:
        x_p = x.astype(jnp.bfloat16)
    else:
        x_p = jnp.zeros((b_pad, k0_pad), jnp.bfloat16).at[:B, :in_dim].set(
            x.astype(jnp.bfloat16))

    flat = []
    for (w, b) in layers:
        flat += [w, b]
    param_bytes = sum(a.size * a.dtype.itemsize for a in flat)

    # Per-tile I/O + activation budget: double-buffered x/out tiles + widest fp32
    # intermediate, plus Mosaic internal scratch headroom.
    io_bytes = (2 * tile_b * k0_pad * 2        # bf16 x tile, double-buffered
                + 2 * tile_b * out_pad * 4     # fp32 out tile, double-buffered
                + 2 * tile_b * 1024 * 4)       # fp32 intermediates of the unrolled body

    # Generation-aware hard cap: ~48 MiB on v7x (64 MiB VMEM), ~100 MiB on v5e/v6e.
    vmem_cap = _vmem_capacity_bytes()
    hard_cap = max(32 << 20, min(vmem_cap - (16 << 20), 100 << 20))
    # TODO(synk): for very large input_dim (boundary weights >~12 MiB each) stream the
    # first-encoder / last-decoder weights with pltpu.emit_pipeline (K-tile / N-tile the
    # boundary matmuls) instead of keeping them fully VMEM-resident; optionally fp8
    # boundary weights on v7x.

    def run(single_buffer_weights):
        weight_factor = 1 if single_buffer_weights else 2
        vmem_limit = int(min(hard_cap, max(
            32 << 20, weight_factor * param_bytes + io_bytes + (8 << 20))))
        # Constant index_map -> weights/biases stay VMEM-resident across batch tiles;
        # Buffered(1) removes their pointless second pipeline buffer.
        wb_kw = {"pipeline_mode": pl.Buffered(1)} if single_buffer_weights else {}
        in_specs = [pl.BlockSpec((tile_b, k0_pad), lambda i: (i, 0))]
        for (w, b) in layers:
            kp, np_ = w.shape
            in_specs.append(pl.BlockSpec((kp, np_), lambda i: (0, 0), **wb_kw))
            in_specs.append(pl.BlockSpec((1, np_), lambda i: (0, 0), **wb_kw))
        out_spec = pl.BlockSpec((tile_b, out_pad), lambda i: (i, 0))
        kernel = functools.partial(_ae_fused_kernel, acts=tuple(acts))
        return pl.pallas_call(
            kernel,
            out_shape=jax.ShapeDtypeStruct((b_pad, out_pad), jnp.float32),
            grid=(b_pad // tile_b,),
            in_specs=in_specs,
            out_specs=out_spec,
            compiler_params=pltpu.CompilerParams(
                dimension_semantics=("parallel",),   # batch tiles shard across v7x's 2 TCs
                vmem_limit_bytes=vmem_limit,
            ),
        )(x_p, *flat)

    try:
        out_p = run(True)
    except Exception:
        # pipeline_mode / Buffered(1) unsupported on this JAX build: fall back to the
        # default double-buffered (known-good) spec.
        out_p = run(False)

    if b_pad == B and out_pad == out_dim:
        return out_p
    return out_p[:B, :out_dim]


# ---------------- parameter construction (deterministic, in-script) ----------------

def _init_linear(key, in_f, out_f, dtype=jnp.float32):
    # PyTorch nn.Linear default init: U(-1/sqrt(in_f), 1/sqrt(in_f)) for weight and bias.
    kw, kb = jax.random.split(key)
    bound = 1.0 / float(in_f) ** 0.5
    w_pt = jax.random.uniform(kw, (out_f, in_f), dtype, minval=-bound, maxval=bound)
    b = jax.random.uniform(kb, (out_f,), dtype, minval=-bound, maxval=bound)
    return w_pt.T, b  # [in_f, out_f], [out_f]


def make_autoencoder_params(input_dim, key):
    enc_dims = [input_dim, 1024, 512, 256, 128, 64, 20]
    dec_dims = [20, 64, 128, 256, 512, 1024, input_dim]
    keys = jax.random.split(key, 12)
    enc = [_init_linear(keys[i], enc_dims[i], enc_dims[i + 1]) for i in range(6)]
    dec = [_init_linear(keys[6 + i], dec_dims[i], dec_dims[i + 1]) for i in range(6)]
    return enc, dec


def pack_autoencoder_params(enc_params, dec_params):
    """Zero-pad every feature dim to a multiple of 128 lanes; weights in bf16, biases fp32.

    Zero padding preserves semantics: padded input columns hit zero weight rows, padded
    output columns get zero weight + zero bias (ReLU(0)=0 feeds zero rows of the next
    layer), and any padded final columns are sliced off in the wrapper.
    """
    all_layers = list(enc_params) + list(dec_params)
    acts = ["relu"] * len(enc_params) + ["relu"] * (len(dec_params) - 1) + ["sigmoid"]
    layers = []
    for (w, b) in all_layers:
        k, n = w.shape
        kp, np_ = _round_up(k, LANE), _round_up(n, LANE)
        w_p = jnp.zeros((kp, np_), jnp.bfloat16).at[:k, :n].set(w.astype(jnp.bfloat16))
        b_p = jnp.zeros((1, np_), jnp.float32).at[0, :n].set(b.astype(jnp.float32))
        layers.append((w_p, b_p))
    return dict(
        layers=layers,
        acts=acts,
        in_dim=all_layers[0][0].shape[0],
        out_dim=all_layers[-1][0].shape[1],
    )


# ---------------- pure-JAX reference (same padded bf16 params) ----------------

def autoencoder_ref(x, packed):
    layers, acts = packed["layers"], packed["acts"]
    in_dim, out_dim = packed["in_dim"], packed["out_dim"]
    k0_pad = layers[0][0].shape[0]
    h = jnp.zeros((x.shape[0], k0_pad), jnp.bfloat16).at[:, :in_dim].set(
        x.astype(jnp.bfloat16))
    n = len(layers)
    for i, ((w, b), act) in enumerate(zip(layers, acts)):
        y = jnp.dot(h, w, preferred_element_type=jnp.float32) + b
        y = jnp.maximum(y, 0.0) if act == "relu" else jax.nn.sigmoid(y)
        h = y.astype(jnp.bfloat16) if i + 1 < n else y
    return h[:, :out_dim].astype(jnp.float32)


if __name__ == "__main__":
    key = jax.random.PRNGKey(0)
    k_x, k_p = jax.random.split(key)

    batch = 8
    input_dim = 256  # stands in for train_data.shape[1] in the original script

    x = jax.random.uniform(k_x, (batch, input_dim), jnp.float32)  # MinMax-scaled data in [0,1]
    enc_params, dec_params = make_autoencoder_params(input_dim, k_p)
    packed = pack_autoencoder_params(enc_params, dec_params)

    out = autoencoder_forward(x, packed)
    out = jax.block_until_ready(out)

    ref = autoencoder_ref(x, packed)
    assert out.shape == (batch, input_dim), out.shape
    # bf16 weights + bf16 inter-layer activations over 12 layers -> modest tolerance
    assert jnp.allclose(out, ref, atol=1e-2, rtol=1e-2), float(jnp.max(jnp.abs(out - ref)))

    print("KERNEL_OK")
</pallas_src>

<mosaic_0001>
module attributes {stable_mosaic.version = 11 : i64} {
  func.func @_ae_fused_kernel(%arg0: i32, %arg1: memref<8x256xbf16, #tpu.memory_space<vmem>>, %arg2: memref<256x1024xbf16, #tpu.memory_space<vmem>>, %arg3: memref<1x1024xf32, #tpu.memory_space<vmem>>, %arg4: memref<1024x512xbf16, #tpu.memory_space<vmem>>, %arg5: memref<1x512xf32, #tpu.memory_space<vmem>>, %arg6: memref<512x256xbf16, #tpu.memory_space<vmem>>, %arg7: memref<1x256xf32, #tpu.memory_space<vmem>>, %arg8: memref<256x128xbf16, #tpu.memory_space<vmem>>, %arg9: memref<1x128xf32, #tpu.memory_space<vmem>>, %arg10: memref<128x128xbf16, #tpu.memory_space<vmem>>, %arg11: memref<1x128xf32, #tpu.memory_space<vmem>>, %arg12: memref<128x128xbf16, #tpu.memory_space<vmem>>, %arg13: memref<1x128xf32, #tpu.memory_space<vmem>>, %arg14: memref<128x128xbf16, #tpu.memory_space<vmem>>, %arg15: memref<1x128xf32, #tpu.memory_space<vmem>>, %arg16: memref<128x128xbf16, #tpu.memory_space<vmem>>, %arg17: memref<1x128xf32, #tpu.memory_space<vmem>>, %arg18: memref<128x256xbf16, #tpu.memory_space<vmem>>, %arg19: memref<1x256xf32, #tpu.memory_space<vmem>>, %arg20: memref<256x512xbf16, #tpu.memory_space<vmem>>, %arg21: memref<1x512xf32, #tpu.memory_space<vmem>>, %arg22: memref<512x1024xbf16, #tpu.memory_space<vmem>>, %arg23: memref<1x1024xf32, #tpu.memory_space<vmem>>, %arg24: memref<1024x256xbf16, #tpu.memory_space<vmem>>, %arg25: memref<1x256xf32, #tpu.memory_space<vmem>>, %arg26: memref<8x256xf32, #tpu.memory_space<vmem>>) attributes {dimension_semantics = [#tpu.dimension_semantics<parallel>], iteration_bounds = array<i64: 1>, scalar_prefetch = 0 : i64, scratch_operands = 0 : i64, tpu.core_type = #tpu.core_type<tc>, window_params = [{transform_indices = @transform_0, window_bounds = array<i64: 8, 256>}, {pipeline_mode = #tpu.pipeline_mode<synchronous>, transform_indices = @transform_1, window_bounds = array<i64: 256, 1024>}, {pipeline_mode = #tpu.pipeline_mode<synchronous>, transform_indices = @transform_2, window_bounds = array<i64: 1, 1024>}, {pipeline_mode = #tpu.pipeline_mode<synchronous>, transform_indices = @transform_3, window_bounds = array<i64: 1024, 512>}, {pipeline_mode = #tpu.pipeline_mode<synchronous>, transform_indices = @transform_4, window_bounds = array<i64: 1, 512>}, {pipeline_mode = #tpu.pipeline_mode<synchronous>, transform_indices = @transform_5, window_bounds = array<i64: 512, 256>}, {pipeline_mode = #tpu.pipeline_mode<synchronous>, transform_indices = @transform_6, window_bounds = array<i64: 1, 256>}, {pipeline_mode = #tpu.pipeline_mode<synchronous>, transform_indices = @transform_7, window_bounds = array<i64: 256, 128>}, {pipeline_mode = #tpu.pipeline_mode<synchronous>, transform_indices = @transform_8, window_bounds = array<i64: 1, 128>}, {pipeline_mode = #tpu.pipeline_mode<synchronous>, transform_indices = @transform_9, window_bounds = array<i64: 128, 128>}, {pipeline_mode = #tpu.pipeline_mode<synchronous>, transform_indices = @transform_10, window_bounds = array<i64: 1, 128>}, {pipeline_mode = #tpu.pipeline_mode<synchronous>, transform_indices = @transform_11, window_bounds = array<i64: 128, 128>}, {pipeline_mode = #tpu.pipeline_mode<synchronous>, transform_indices = @transform_12, window_bounds = array<i64: 1, 128>}, {pipeline_mode = #tpu.pipeline_mode<synchronous>, transform_indices = @transform_13, window_bounds = array<i64: 128, 128>}, {pipeline_mode = #tpu.pipeline_mode<synchronous>, transform_indices = @transform_14, window_bounds = array<i64: 1, 128>}, {pipeline_mode = #tpu.pipeline_mode<synchronous>, transform_indices = @transform_15, window_bounds = array<i64: 128, 128>}, {pipeline_mode = #tpu.pipeline_mode<synchronous>, transform_indices = @transform_16, window_bounds = array<i64: 1, 128>}, {pipeline_mode = #tpu.pipeline_mode<synchronous>, transform_indices = @transform_17, window_bounds = array<i64: 128, 256>}, {pipeline_mode = #tpu.pipeline_mode<synchronous>, transform_indices = @transform_18, window_bounds = array<i64: 1, 256>}, {pipeline_mode = #tpu.pipeline_mode<synchronous>, transform_indices = @transform_19, window_bounds = array<i64: 256, 512>}, {pipeline_mode = #tpu.pipeline_mode<synchronous>, transform_indices = @transform_20, window_bounds = array<i64: 1, 512>}, {pipeline_mode = #tpu.pipeline_mode<synchronous>, transform_indices = @transform_21, window_bounds = array<i64: 512, 1024>}, {pipeline_mode = #tpu.pipeline_mode<synchronous>, transform_indices = @transform_22, window_bounds = array<i64: 1, 1024>}, {pipeline_mode = #tpu.pipeline_mode<synchronous>, transform_indices = @transform_23, window_bounds = array<i64: 1024, 256>}, {pipeline_mode = #tpu.pipeline_mode<synchronous>, transform_indices = @transform_24, window_bounds = array<i64: 1, 256>}, {transform_indices = @transform_25, window_bounds = array<i64: 8, 256>}]} {
    %c0 = arith.constant 0 : index
    %c0_0 = arith.constant 0 : index
    %0 = vector.load %arg1[%c0, %c0_0] : memref<8x256xbf16, #tpu.memory_space<vmem>>, vector<8x256xbf16>
    %c0_1 = arith.constant 0 : index
    %c0_2 = arith.constant 0 : index
    %1 = vector.load %arg2[%c0_1, %c0_2] : memref<256x1024xbf16, #tpu.memory_space<vmem>>, vector<256x1024xbf16>
    %cst = arith.constant dense<0.000000e+00> : vector<8x1024xf32>
    %2 = tpu.matmul %0, %1, %cst {dimension_numbers = #tpu.dot_dimension_numbers<[1], [0], [0], [1], [0, 0, 1, 1], [], []>} : vector<8x256xbf16>, vector<256x1024xbf16>, vector<8x1024xf32> -> vector<8x1024xf32>
    %c0_3 = arith.constant 0 : index
    %c0_4 = arith.constant 0 : index
    %3 = vector.load %arg3[%c0_3, %c0_4] : memref<1x1024xf32, #tpu.memory_space<vmem>>, vector<1x1024xf32>
    %4 = vector.broadcast %3 : vector<1x1024xf32> to vector<8x1024xf32>
    %5 = arith.addf %2, %4 : vector<8x1024xf32>
    %cst_5 = arith.constant 0.000000e+00 : f32
    %6 = vector.broadcast %cst_5 : f32 to vector<8x1024xf32>
    %7 = arith.maximumf %5, %6 : vector<8x1024xf32>
    %8 = arith.truncf %7 : vector<8x1024xf32> to vector<8x1024xbf16>
    %c0_6 = arith.constant 0 : index
    %c0_7 = arith.constant 0 : index
    %9 = vector.load %arg4[%c0_6, %c0_7] : memref<1024x512xbf16, #tpu.memory_space<vmem>>, vector<1024x512xbf16>
    %cst_8 = arith.constant dense<0.000000e+00> : vector<8x512xf32>
    %10 = tpu.matmul %8, %9, %cst_8 {dimension_numbers = #tpu.dot_dimension_numbers<[1], [0], [0], [1], [0, 0, 1, 1], [], []>} : vector<8x1024xbf16>, vector<1024x512xbf16>, vector<8x512xf32> -> vector<8x512xf32>
    %c0_9 = arith.constant 0 : index
    %c0_10 = arith.constant 0 : index
    %11 = vector.load %arg5[%c0_9, %c0_10] : memref<1x512xf32, #tpu.memory_space<vmem>>, vector<1x512xf32>
    %12 = vector.broadcast %11 : vector<1x512xf32> to vector<8x512xf32>
    %13 = arith.addf %10, %12 : vector<8x512xf32>
    %cst_11 = arith.constant 0.000000e+00 : f32
    %14 = vector.broadcast %cst_11 : f32 to vector<8x512xf32>
    %15 = arith.maximumf %13, %14 : vector<8x512xf32>
    %16 = arith.truncf %15 : vector<8x512xf32> to vector<8x512xbf16>
    %c0_12 = arith.constant 0 : index
    %c0_13 = arith.constant 0 : index
    %17 = vector.load %arg6[%c0_12, %c0_13] : memref<512x256xbf16, #tpu.memory_space<vmem>>, vector<512x256xbf16>
    %cst_14 = arith.constant dense<0.000000e+00> : vector<8x256xf32>
    %18 = tpu.matmul %16, %17, %cst_14 {dimension_numbers = #tpu.dot_dimension_numbers<[1], [0], [0], [1], [0, 0, 1, 1], [], []>} : vector<8x512xbf16>, vector<512x256xbf16>, vector<8x256xf32> -> vector<8x256xf32>
    %c0_15 = arith.constant 0 : index
    %c0_16 = arith.constant 0 : index
    %19 = vector.load %arg7[%c0_15, %c0_16] : memref<1x256xf32, #tpu.memory_space<vmem>>, vector<1x256xf32>
    %20 = vector.broadcast %19 : vector<1x256xf32> to vector<8x256xf32>
    %21 = arith.addf %18, %20 : vector<8x256xf32>
    %cst_17 = arith.constant 0.000000e+00 : f32
    %22 = vector.broadcast %cst_17 : f32 to vector<8x256xf32>
    %23 = arith.maximumf %21, %22 : vector<8x256xf32>
    %24 = arith.truncf %23 : vector<8x256xf32> to vector<8x256xbf16>
    %c0_18 = arith.constant 0 : index
    %c0_19 = arith.constant 0 : index
    %25 = vector.load %arg8[%c0_18, %c0_19] : memref<256x128xbf16, #tpu.memory_space<vmem>>, vector<256x128xbf16>
    %cst_20 = arith.constant dense<0.000000e+00> : vector<8x128xf32>
    %26 = tpu.matmul %24, %25, %cst_20 {dimension_numbers = #tpu.dot_dimension_numbers<[1], [0], [0], [1], [0, 0, 1, 1], [], []>} : vector<8x256xbf16>, vector<256x128xbf16>, vector<8x128xf32> -> vector<8x128xf32>
    %c0_21 = arith.constant 0 : index
    %c0_22 = arith.constant 0 : index
    %27 = vector.load %arg9[%c0_21, %c0_22] : memref<1x128xf32, #tpu.memory_space<vmem>>, vector<1x128xf32>
    %28 = vector.broadcast %27 : vector<1x128xf32> to vector<8x128xf32>
    %29 = arith.addf %26, %28 : vector<8x128xf32>
    %cst_23 = arith.constant 0.000000e+00 : f32
    %30 = vector.broadcast %cst_23 : f32 to vector<8x128xf32>
    %31 = arith.maximumf %29, %30 : vector<8x128xf32>
    %32 = arith.truncf %31 : vector<8x128xf32> to vector<8x128xbf16>
    %c0_24 = arith.constant 0 : index
    %c0_25 = arith.constant 0 : index
    %33 = vector.load %arg10[%c0_24, %c0_25] : memref<128x128xbf16, #tpu.memory_space<vmem>>, vector<128x128xbf16>
    %cst_26 = arith.constant dense<0.000000e+00> : vector<8x128xf32>
    %34 = tpu.matmul %32, %33, %cst_26 {dimension_numbers = #tpu.dot_dimension_numbers<[1], [0], [0], [1], [0, 0, 1, 1], [], []>} : vector<8x128xbf16>, vector<128x128xbf16>, vector<8x128xf32> -> vector<8x128xf32>
    %c0_27 = arith.constant 0 : index
    %c0_28 = arith.constant 0 : index
    %35 = vector.load %arg11[%c0_27, %c0_28] : memref<1x128xf32, #tpu.memory_space<vmem>>, vector<1x128xf32>
    %36 = vector.broadcast %35 : vector<1x128xf32> to vector<8x128xf32>
    %37 = arith.addf %34, %36 : vector<8x128xf32>
    %cst_29 = arith.constant 0.000000e+00 : f32
    %38 = vector.broadcast %cst_29 : f32 to vector<8x128xf32>
    %39 = arith.maximumf %37, %38 : vector<8x128xf32>
    %40 = arith.truncf %39 : vector<8x128xf32> to vector<8x128xbf16>
    %c0_30 = arith.constant 0 : index
    %c0_31 = arith.constant 0 : index
    %41 = vector.load %arg12[%c0_30, %c0_31] : memref<128x128xbf16, #tpu.memory_space<vmem>>, vector<128x128xbf16>
    %cst_32 = arith.constant dense<0.000000e+00> : vector<8x128xf32>
    %42 = tpu.matmul %40, %41, %cst_32 {dimension_numbers = #tpu.dot_dimension_numbers<[1], [0], [0], [1], [0, 0, 1, 1], [], []>} : vector<8x128xbf16>, vector<128x128xbf16>, vector<8x128xf32> -> vector<8x128xf32>
    %c0_33 = arith.constant 0 : index
    %c0_34 = arith.constant 0 : index
    %43 = vector.load %arg13[%c0_33, %c0_34] : memref<1x128xf32, #tpu.memory_space<vmem>>, vector<1x128xf32>
    %44 = vector.broadcast %43 : vector<1x128xf32> to vector<8x128xf32>
    %45 = arith.addf %42, %44 : vector<8x128xf32>
    %cst_35 = arith.constant 0.000000e+00 : f32
    %46 = vector.broadcast %cst_35 : f32 to vector<8x128xf32>
    %47 = arith.maximumf %45, %46 : vector<8x128xf32>
    %48 = arith.truncf %47 : vector<8x128xf32> to vector<8x128xbf16>
    %c0_36 = arith.constant 0 : index
    %c0_37 = arith.constant 0 : index
    %49 = vector.load %arg14[%c0_36, %c0_37] : memref<128x128xbf16, #tpu.memory_space<vmem>>, vector<128x128xbf16>
    %cst_38 = arith.constant dense<0.000000e+00> : vector<8x128xf32>
    %50 = tpu.matmul %48, %49, %cst_38 {dimension_numbers = #tpu.dot_dimension_numbers<[1], [0], [0], [1], [0, 0, 1, 1], [], []>} : vector<8x128xbf16>, vector<128x128xbf16>, vector<8x128xf32> -> vector<8x128xf32>
    %c0_39 = arith.constant 0 : index
    %c0_40 = arith.constant 0 : index
    %51 = vector.load %arg15[%c0_39, %c0_40] : memref<1x128xf32, #tpu.memory_space<vmem>>, vector<1x128xf32>
    %52 = vector.broadcast %51 : vector<1x128xf32> to vector<8x128xf32>
    %53 = arith.addf %50, %52 : vector<8x128xf32>
    %cst_41 = arith.constant 0.000000e+00 : f32
    %54 = vector.broadcast %cst_41 : f32 to vector<8x128xf32>
    %55 = arith.maximumf %53, %54 : vector<8x128xf32>
    %56 = arith.truncf %55 : vector<8x128xf32> to vector<8x128xbf16>
    %c0_42 = arith.constant 0 : index
    %c0_43 = arith.constant 0 : index
    %57 = vector.load %arg16[%c0_42, %c0_43] : memref<128x128xbf16, #tpu.memory_space<vmem>>, vector<128x128xbf16>
    %cst_44 = arith.constant dense<0.000000e+00> : vector<8x128xf32>
    %58 = tpu.matmul %56, %57, %cst_44 {dimension_numbers = #tpu.dot_dimension_numbers<[1], [0], [0], [1], [0, 0, 1, 1], [], []>} : vector<8x128xbf16>, vector<128x128xbf16>, vector<8x128xf32> -> vector<8x128xf32>
    %c0_45 = arith.constant 0 : index
    %c0_46 = arith.constant 0 : index
    %59 = vector.load %arg17[%c0_45, %c0_46] : memref<1x128xf32, #tpu.memory_space<vmem>>, vector<1x128xf32>
    %60 = vector.broadcast %59 : vector<1x128xf32> to vector<8x128xf32>
    %61 = arith.addf %58, %60 : vector<8x128xf32>
    %cst_47 = arith.constant 0.000000e+00 : f32
    %62 = vector.broadcast %cst_47 : f32 to vector<8x128xf32>
    %63 = arith.maximumf %61, %62 : vector<8x128xf32>
    %64 = arith.truncf %63 : vector<8x128xf32> to vector<8x128xbf16>
    %c0_48 = arith.constant 0 : index
    %c0_49 = arith.constant 0 : index
    %65 = vector.load %arg18[%c0_48, %c0_49] : memref<128x256xbf16, #tpu.memory_space<vmem>>, vector<128x256xbf16>
    %cst_50 = arith.constant dense<0.000000e+00> : vector<8x256xf32>
    %66 = tpu.matmul %64, %65, %cst_50 {dimension_numbers = #tpu.dot_dimension_numbers<[1], [0], [0], [1], [0, 0, 1, 1], [], []>} : vector<8x128xbf16>, vector<128x256xbf16>, vector<8x256xf32> -> vector<8x256xf32>
    %c0_51 = arith.constant 0 : index
    %c0_52 = arith.constant 0 : index
    %67 = vector.load %arg19[%c0_51, %c0_52] : memref<1x256xf32, #tpu.memory_space<vmem>>, vector<1x256xf32>
    %68 = vector.broadcast %67 : vector<1x256xf32> to vector<8x256xf32>
    %69 = arith.addf %66, %68 : vector<8x256xf32>
    %cst_53 = arith.constant 0.000000e+00 : f32
    %70 = vector.broadcast %cst_53 : f32 to vector<8x256xf32>
    %71 = arith.maximumf %69, %70 : vector<8x256xf32>
    %72 = arith.truncf %71 : vector<8x256xf32> to vector<8x256xbf16>
    %c0_54 = arith.constant 0 : index
    %c0_55 = arith.constant 0 : index
    %73 = vector.load %arg20[%c0_54, %c0_55] : memref<256x512xbf16, #tpu.memory_space<vmem>>, vector<256x512xbf16>
    %cst_56 = arith.constant dense<0.000000e+00> : vector<8x512xf32>
    %74 = tpu.matmul %72, %73, %cst_56 {dimension_numbers = #tpu.dot_dimension_numbers<[1], [0], [0], [1], [0, 0, 1, 1], [], []>} : vector<8x256xbf16>, vector<256x512xbf16>, vector<8x512xf32> -> vector<8x512xf32>
    %c0_57 = arith.constant 0 : index
    %c0_58 = arith.constant 0 : index
    %75 = vector.load %arg21[%c0_57, %c0_58] : memref<1x512xf32, #tpu.memory_space<vmem>>, vector<1x512xf32>
    %76 = vector.broadcast %75 : vector<1x512xf32> to vector<8x512xf32>
    %77 = arith.addf %74, %76 : vector<8x512xf32>
    %cst_59 = arith.constant 0.000000e+00 : f32
    %78 = vector.broadcast %cst_59 : f32 to vector<8x512xf32>
    %79 = arith.maximumf %77, %78 : vector<8x512xf32>
    %80 = arith.truncf %79 : vector<8x512xf32> to vector<8x512xbf16>
    %c0_60 = arith.constant 0 : index
    %c0_61 = arith.constant 0 : index
    %81 = vector.load %arg22[%c0_60, %c0_61] : memref<512x1024xbf16, #tpu.memory_space<vmem>>, vector<512x1024xbf16>
    %cst_62 = arith.constant dense<0.000000e+00> : vector<8x1024xf32>
    %82 = tpu.matmul %80, %81, %cst_62 {dimension_numbers = #tpu.dot_dimension_numbers<[1], [0], [0], [1], [0, 0, 1, 1], [], []>} : vector<8x512xbf16>, vector<512x1024xbf16>, vector<8x1024xf32> -> vector<8x1024xf32>
    %c0_63 = arith.constant 0 : index
    %c0_64 = arith.constant 0 : index
    %83 = vector.load %arg23[%c0_63, %c0_64] : memref<1x1024xf32, #tpu.memory_space<vmem>>, vector<1x1024xf32>
    %84 = vector.broadcast %83 : vector<1x1024xf32> to vector<8x1024xf32>
    %85 = arith.addf %82, %84 : vector<8x1024xf32>
    %cst_65 = arith.constant 0.000000e+00 : f32
    %86 = vector.broadcast %cst_65 : f32 to vector<8x1024xf32>
    %87 = arith.maximumf %85, %86 : vector<8x1024xf32>
    %88 = arith.truncf %87 : vector<8x1024xf32> to vector<8x1024xbf16>
    %c0_66 = arith.constant 0 : index
    %c0_67 = arith.constant 0 : index
    %89 = vector.load %arg24[%c0_66, %c0_67] : memref<1024x256xbf16, #tpu.memory_space<vmem>>, vector<1024x256xbf16>
    %cst_68 = arith.constant dense<0.000000e+00> : vector<8x256xf32>
    %90 = tpu.matmul %88, %89, %cst_68 {dimension_numbers = #tpu.dot_dimension_numbers<[1], [0], [0], [1], [0, 0, 1, 1], [], []>} : vector<8x1024xbf16>, vector<1024x256xbf16>, vector<8x256xf32> -> vector<8x256xf32>
    %c0_69 = arith.constant 0 : index
    %c0_70 = arith.constant 0 : index
    %91 = vector.load %arg25[%c0_69, %c0_70] : memref<1x256xf32, #tpu.memory_space<vmem>>, vector<1x256xf32>
    %92 = vector.broadcast %91 : vector<1x256xf32> to vector<8x256xf32>
    %93 = arith.addf %90, %92 : vector<8x256xf32>
    %cst_71 = arith.constant 5.000000e-01 : f32
    %94 = vector.broadcast %cst_71 : f32 to vector<8x256xf32>
    %95 = arith.mulf %94, %93 : vector<8x256xf32>
    %96 = math.tanh %95 : vector<8x256xf32>
    %cst_72 = arith.constant 5.000000e-01 : f32
    %97 = vector.broadcast %cst_72 : f32 to vector<8x256xf32>
    %98 = arith.mulf %97, %96 : vector<8x256xf32>
    %cst_73 = arith.constant 5.000000e-01 : f32
    %99 = vector.broadcast %cst_73 : f32 to vector<8x256xf32>
    %100 = arith.addf %98, %99 : vector<8x256xf32>
    %c0_74 = arith.constant 0 : index
    %c0_75 = arith.constant 0 : index
    %101 = vector.load %arg26[%c0_74, %c0_75] : memref<8x256xf32, #tpu.memory_space<vmem>>, vector<8x256xf32>
    tpu.vector_store %arg26[%c0_74, %c0_75], %100 {strides = array<i32>} : memref<8x256xf32, #tpu.memory_space<vmem>>, vector<8x256xf32>,
    return
  }
  func.func @transform_0(%arg0: i32) -> (i32, i32) {
    %c0_i32 = arith.constant 0 : i32
    %c0_i32_0 = arith.constant 0 : i32
    return %arg0, %c0_i32 : i32, i32
  }
  func.func @transform_1(%arg0: i32) -> (i32, i32) {
    %c0_i32 = arith.constant 0 : i32
    %c0_i32_0 = arith.constant 0 : i32
    %c0_i32_1 = arith.constant 0 : i32
    return %c0_i32, %c0_i32_0 : i32, i32
  }
  func.func @transform_2(%arg0: i32) -> (i32, i32) {
    %c0_i32 = arith.constant 0 : i32
    %c0_i32_0 = arith.constant 0 : i32
    %c0_i32_1 = arith.constant 0 : i32
    return %c0_i32, %c0_i32_0 : i32, i32
  }
  func.func @transform_3(%arg0: i32) -> (i32, i32) {
    %c0_i32 = arith.constant 0 : i32
    %c0_i32_0 = arith.constant 0 : i32
    %c0_i32_1 = arith.constant 0 : i32
    return %c0_i32, %c0_i32_0 : i32, i32
  }
  func.func @transform_4(%arg0: i32) -> (i32, i32) {
    %c0_i32 = arith.constant 0 : i32
    %c0_i32_0 = arith.constant 0 : i32
    %c0_i32_1 = arith.constant 0 : i32
    return %c0_i32, %c0_i32_0 : i32, i32
  }
  func.func @transform_5(%arg0: i32) -> (i32, i32) {
    %c0_i32 = arith.constant 0 : i32
    %c0_i32_0 = arith.constant 0 : i32
    %c0_i32_1 = arith.constant 0 : i32
    return %c0_i32, %c0_i32_0 : i32, i32
  }
  func.func @transform_6(%arg0: i32) -> (i32, i32) {
    %c0_i32 = arith.constant 0 : i32
    %c0_i32_0 = arith.constant 0 : i32
    %c0_i32_1 = arith.constant 0 : i32
    return %c0_i32, %c0_i32_0 : i32, i32
  }
  func.func @transform_7(%arg0: i32) -> (i32, i32) {
    %c0_i32 = arith.constant 0 : i32
    %c0_i32_0 = arith.constant 0 : i32
    %c0_i32_1 = arith.constant 0 : i32
    return %c0_i32, %c0_i32_0 : i32, i32
  }
  func.func @transform_8(%arg0: i32) -> (i32, i32) {
    %c0_i32 = arith.constant 0 : i32
    %c0_i32_0 = arith.constant 0 : i32
    %c0_i32_1 = arith.constant 0 : i32
    return %c0_i32, %c0_i32_0 : i32, i32
  }
  func.func @transform_9(%arg0: i32) -> (i32, i32) {
    %c0_i32 = arith.constant 0 : i32
    %c0_i32_0 = arith.constant 0 : i32
    %c0_i32_1 = arith.constant 0 : i32
    return %c0_i32, %c0_i32_0 : i32, i32
  }
  func.func @transform_10(%arg0: i32) -> (i32, i32) {
    %c0_i32 = arith.constant 0 : i32
    %c0_i32_0 = arith.constant 0 : i32
    %c0_i32_1 = arith.constant 0 : i32
    return %c0_i32, %c0_i32_0 : i32, i32
  }
  func.func @transform_11(%arg0: i32) -> (i32, i32) {
    %c0_i32 = arith.constant 0 : i32
    %c0_i32_0 = arith.constant 0 : i32
    %c0_i32_1 = arith.constant 0 : i32
    return %c0_i32, %c0_i32_0 : i32, i32
  }
  func.func @transform_12(%arg0: i32) -> (i32, i32) {
    %c0_i32 = arith.constant 0 : i32
    %c0_i32_0 = arith.constant 0 : i32
    %c0_i32_1 = arith.constant 0 : i32
    return %c0_i32, %c0_i32_0 : i32, i32
  }
  func.func @transform_13(%arg0: i32) -> (i32, i32) {
    %c0_i32 = arith.constant 0 : i32
    %c0_i32_0 = arith.constant 0 : i32
    %c0_i32_1 = arith.constant 0 : i32
    return %c0_i32, %c0_i32_0 : i32, i32
  }
  func.func @transform_14(%arg0: i32) -> (i32, i32) {
    %c0_i32 = arith.constant 0 : i32
    %c0_i32_0 = arith.constant 0 : i32
    %c0_i32_1 = arith.constant 0 : i32
    return %c0_i32, %c0_i32_0 : i32, i32
  }
  func.func @transform_15(%arg0: i32) -> (i32, i32) {
    %c0_i32 = arith.constant 0 : i32
    %c0_i32_0 = arith.constant 0 : i32
    %c0_i32_1 = arith.constant 0 : i32
    return %c0_i32, %c0_i32_0 : i32, i32
  }
  func.func @transform_16(%arg0: i32) -> (i32, i32) {
    %c0_i32 = arith.constant 0 : i32
    %c0_i32_0 = arith.constant 0 : i32
    %c0_i32_1 = arith.constant 0 : i32
    return %c0_i32, %c0_i32_0 : i32, i32
  }
  func.func @transform_17(%arg0: i32) -> (i32, i32) {
    %c0_i32 = arith.constant 0 : i32
    %c0_i32_0 = arith.constant 0 : i32
    %c0_i32_1 = arith.constant 0 : i32
    return %c0_i32, %c0_i32_0 : i32, i32
  }
  func.func @transform_18(%arg0: i32) -> (i32, i32) {
    %c0_i32 = arith.constant 0 : i32
    %c0_i32_0 = arith.constant 0 : i32
    %c0_i32_1 = arith.constant 0 : i32
    return %c0_i32, %c0_i32_0 : i32, i32
  }
  func.func @transform_19(%arg0: i32) -> (i32, i32) {
    %c0_i32 = arith.constant 0 : i32
    %c0_i32_0 = arith.constant 0 : i32
    %c0_i32_1 = arith.constant 0 : i32
    return %c0_i32, %c0_i32_0 : i32, i32
  }
  func.func @transform_20(%arg0: i32) -> (i32, i32) {
    %c0_i32 = arith.constant 0 : i32
    %c0_i32_0 = arith.constant 0 : i32
    %c0_i32_1 = arith.constant 0 : i32
    return %c0_i32, %c0_i32_0 : i32, i32
  }
  func.func @transform_21(%arg0: i32) -> (i32, i32) {
    %c0_i32 = arith.constant 0 : i32
    %c0_i32_0 = arith.constant 0 : i32
    %c0_i32_1 = arith.constant 0 : i32
    return %c0_i32, %c0_i32_0 : i32, i32
  }
  func.func @transform_22(%arg0: i32) -> (i32, i32) {
    %c0_i32 = arith.constant 0 : i32
    %c0_i32_0 = arith.constant 0 : i32
    %c0_i32_1 = arith.constant 0 : i32
    return %c0_i32, %c0_i32_0 : i32, i32
  }
  func.func @transform_23(%arg0: i32) -> (i32, i32) {
    %c0_i32 = arith.constant 0 : i32
    %c0_i32_0 = arith.constant 0 : i32
    %c0_i32_1 = arith.constant 0 : i32
    return %c0_i32, %c0_i32_0 : i32, i32
  }
  func.func @transform_24(%arg0: i32) -> (i32, i32) {
    %c0_i32 = arith.constant 0 : i32
    %c0_i32_0 = arith.constant 0 : i32
    %c0_i32_1 = arith.constant 0 : i32
    return %c0_i32, %c0_i32_0 : i32, i32
  }
  func.func @transform_25(%arg0: i32) -> (i32, i32) {
    %c0_i32 = arith.constant 0 : i32
    %c0_i32_0 = arith.constant 0 : i32
    return %arg0, %c0_i32 : i32, i32
  }
}

module attributes {stable_mosaic.version = 11 : i64} {
  func.func @_ae_fused_kernel(%arg0: i32, %arg1: memref<8x256xbf16, #tpu.memory_space<vmem>>, %arg2: memref<256x1024xbf16, #tpu.memory_space<vmem>>, %arg3: memref<1x1024xf32, #tpu.memory_space<vmem>>, %arg4: memref<1024x512xbf16, #tpu.memory_space<vmem>>, %arg5: memref<1x512xf32, #tpu.memory_space<vmem>>, %arg6: memref<512x256xbf16, #tpu.memory_space<vmem>>, %arg7: memref<1x256xf32, #tpu.memory_space<vmem>>, %arg8: memref<256x128xbf16, #tpu.memory_space<vmem>>, %arg9: memref<1x128xf32, #tpu.memory_space<vmem>>, %arg10: memref<128x128xbf16, #tpu.memory_space<vmem>>, %arg11: memref<1x128xf32, #tpu.memory_space<vmem>>, %arg12: memref<128x128xbf16, #tpu.memory_space<vmem>>, %arg13: memref<1x128xf32, #tpu.memory_space<vmem>>, %arg14: memref<128x128xbf16, #tpu.memory_space<vmem>>, %arg15: memref<1x128xf32, #tpu.memory_space<vmem>>, %arg16: memref<128x128xbf16, #tpu.memory_space<vmem>>, %arg17: memref<1x128xf32, #tpu.memory_space<vmem>>, %arg18: memref<128x256xbf16, #tpu.memory_space<vmem>>, %arg19: memref<1x256xf32, #tpu.memory_space<vmem>>, %arg20: memref<256x512xbf16, #tpu.memory_space<vmem>>, %arg21: memref<1x512xf32, #tpu.memory_space<vmem>>, %arg22: memref<512x1024xbf16, #tpu.memory_space<vmem>>, %arg23: memref<1x1024xf32, #tpu.memory_space<vmem>>, %arg24: memref<1024x256xbf16, #tpu.memory_space<vmem>>, %arg25: memref<1x256xf32, #tpu.memory_space<vmem>>, %arg26: memref<8x256xf32, #tpu.memory_space<vmem>>) attributes {dimension_semantics = [#tpu.dimension_semantics<parallel>], iteration_bounds = array<i64: 1>, scalar_prefetch = 0 : i64, scratch_operands = 0 : i64, tpu.core_type = #tpu.core_type<tc>, window_params = [{transform_indices = @transform_0, window_bounds = array<i64: 8, 256>}, {pipeline_mode = #tpu.pipeline_mode<synchronous>, transform_indices = @transform_1, window_bounds = array<i64: 256, 1024>}, {pipeline_mode = #tpu.pipeline_mode<synchronous>, transform_indices = @transform_2, window_bounds = array<i64: 1, 1024>}, {pipeline_mode = #tpu.pipeline_mode<synchronous>, transform_indices = @transform_3, window_bounds = array<i64: 1024, 512>}, {pipeline_mode = #tpu.pipeline_mode<synchronous>, transform_indices = @transform_4, window_bounds = array<i64: 1, 512>}, {pipeline_mode = #tpu.pipeline_mode<synchronous>, transform_indices = @transform_5, window_bounds = array<i64: 512, 256>}, {pipeline_mode = #tpu.pipeline_mode<synchronous>, transform_indices = @transform_6, window_bounds = array<i64: 1, 256>}, {pipeline_mode = #tpu.pipeline_mode<synchronous>, transform_indices = @transform_7, window_bounds = array<i64: 256, 128>}, {pipeline_mode = #tpu.pipeline_mode<synchronous>, transform_indices = @transform_8, window_bounds = array<i64: 1, 128>}, {pipeline_mode = #tpu.pipeline_mode<synchronous>, transform_indices = @transform_9, window_bounds = array<i64: 128, 128>}, {pipeline_mode = #tpu.pipeline_mode<synchronous>, transform_indices = @transform_10, window_bounds = array<i64: 1, 128>}, {pipeline_mode = #tpu.pipeline_mode<synchronous>, transform_indices = @transform_11, window_bounds = array<i64: 128, 128>}, {pipeline_mode = #tpu.pipeline_mode<synchronous>, transform_indices = @transform_12, window_bounds = array<i64: 1, 128>}, {pipeline_mode = #tpu.pipeline_mode<synchronous>, transform_indices = @transform_13, window_bounds = array<i64: 128, 128>}, {pipeline_mode = #tpu.pipeline_mode<synchronous>, transform_indices = @transform_14, window_bounds = array<i64: 1, 128>}, {pipeline_mode = #tpu.pipeline_mode<synchronous>, transform_indices = @transform_15, window_bounds = array<i64: 128, 128>}, {pipeline_mode = #tpu.pipeline_mode<synchronous>, transform_indices = @transform_16, window_bounds = array<i64: 1, 128>}, {pipeline_mode = #tpu.pipeline_mode<synchronous>, transform_indices = @transform_17, window_bounds = array<i64: 128, 256>}, {pipeline_mode = #tpu.pipeline_mode<synchronous>, transform_indices = @transform_18, window_bounds = array<i64: 1, 256>}, {pipeline_mode = #tpu.pipeline_mode<synchronous>, transform_indices = @transform_19, window_bounds = array<i64: 256, 512>}, {pipeline_mode = #tpu.pipeline_mode<synchronous>, transform_indices = @transform_20, window_bounds = array<i64: 1, 512>}, {pipeline_mode = #tpu.pipeline_mode<synchronous>, transform_indices = @transform_21, window_bounds = array<i64: 512, 1024>}, {pipeline_mode = #tpu.pipeline_mode<synchronous>, transform_indices = @transform_22, window_bounds = array<i64: 1, 1024>}, {pipeline_mode = #tpu.pipeline_mode<synchronous>, transform_indices = @transform_23, window_bounds = array<i64: 1024, 256>}, {pipeline_mode = #tpu.pipeline_mode<synchronous>, transform_indices = @transform_24, window_bounds = array<i64: 1, 256>}, {transform_indices = @transform_25, window_bounds = array<i64: 8, 256>}]} {
    %c0 = arith.constant 0 : index
    %c0_0 = arith.constant 0 : index
    %0 = vector.load %arg1[%c0, %c0_0] : memref<8x256xbf16, #tpu.memory_space<vmem>>, vector<8x256xbf16>
    %c0_1 = arith.constant 0 : index
    %c0_2 = arith.constant 0 : index
    %1 = vector.load %arg2[%c0_1, %c0_2] : memref<256x1024xbf16, #tpu.memory_space<vmem>>, vector<256x1024xbf16>
    %cst = arith.constant dense<0.000000e+00> : vector<8x1024xf32>
    %2 = tpu.matmul %0, %1, %cst {dimension_numbers = #tpu.dot_dimension_numbers<[1], [0], [0], [1], [0, 0, 1, 1], [], []>} : vector<8x256xbf16>, vector<256x1024xbf16>, vector<8x1024xf32> -> vector<8x1024xf32>
    %c0_3 = arith.constant 0 : index
    %c0_4 = arith.constant 0 : index
    %3 = vector.load %arg3[%c0_3, %c0_4] : memref<1x1024xf32, #tpu.memory_space<vmem>>, vector<1x1024xf32>
    %4 = vector.broadcast %3 : vector<1x1024xf32> to vector<8x1024xf32>
    %5 = arith.addf %2, %4 : vector<8x1024xf32>
    %cst_5 = arith.constant 0.000000e+00 : f32
    %6 = vector.broadcast %cst_5 : f32 to vector<8x1024xf32>
    %7 = arith.maximumf %5, %6 : vector<8x1024xf32>
    %8 = arith.truncf %7 : vector<8x1024xf32> to vector<8x1024xbf16>
    %c0_6 = arith.constant 0 : index
    %c0_7 = arith.constant 0 : index
    %9 = vector.load %arg4[%c0_6, %c0_7] : memref<1024x512xbf16, #tpu.memory_space<vmem>>, vector<1024x512xbf16>
    %cst_8 = arith.constant dense<0.000000e+00> : vector<8x512xf32>
    %10 = tpu.matmul %8, %9, %cst_8 {dimension_numbers = #tpu.dot_dimension_numbers<[1], [0], [0], [1], [0, 0, 1, 1], [], []>} : vector<8x1024xbf16>, vector<1024x512xbf16>, vector<8x512xf32> -> vector<8x512xf32>
    %c0_9 = arith.constant 0 : index
    %c0_10 = arith.constant 0 : index
    %11 = vector.load %arg5[%c0_9, %c0_10] : memref<1x512xf32, #tpu.memory_space<vmem>>, vector<1x512xf32>
    %12 = vector.broadcast %11 : vector<1x512xf32> to vector<8x512xf32>
    %13 = arith.addf %10, %12 : vector<8x512xf32>
    %cst_11 = arith.constant 0.000000e+00 : f32
    %14 = vector.broadcast %cst_11 : f32 to vector<8x512xf32>
    %15 = arith.maximumf %13, %14 : vector<8x512xf32>
    %16 = arith.truncf %15 : vector<8x512xf32> to vector<8x512xbf16>
    %c0_12 = arith.constant 0 : index
    %c0_13 = arith.constant 0 : index
    %17 = vector.load %arg6[%c0_12, %c0_13] : memref<512x256xbf16, #tpu.memory_space<vmem>>, vector<512x256xbf16>
    %cst_14 = arith.constant dense<0.000000e+00> : vector<8x256xf32>
    %18 = tpu.matmul %16, %17, %cst_14 {dimension_numbers = #tpu.dot_dimension_numbers<[1], [0], [0], [1], [0, 0, 1, 1], [], []>} : vector<8x512xbf16>, vector<512x256xbf16>, vector<8x256xf32> -> vector<8x256xf32>
    %c0_15 = arith.constant 0 : index
    %c0_16 = arith.constant 0 : index
    %19 = vector.load %arg7[%c0_15, %c0_16] : memref<1x256xf32, #tpu.memory_space<vmem>>, vector<1x256xf32>
    %20 = vector.broadcast %19 : vector<1x256xf32> to vector<8x256xf32>
    %21 = arith.addf %18, %20 : vector<8x256xf32>
    %cst_17 = arith.constant 0.000000e+00 : f32
    %22 = vector.broadcast %cst_17 : f32 to vector<8x256xf32>
    %23 = arith.maximumf %21, %22 : vector<8x256xf32>
    %24 = arith.truncf %23 : vector<8x256xf32> to vector<8x256xbf16>
    %c0_18 = arith.constant 0 : index
    %c0_19 = arith.constant 0 : index
    %25 = vector.load %arg8[%c0_18, %c0_19] : memref<256x128xbf16, #tpu.memory_space<vmem>>, vector<256x128xbf16>
    %cst_20 = arith.constant dense<0.000000e+00> : vector<8x128xf32>
    %26 = tpu.matmul %24, %25, %cst_20 {dimension_numbers = #tpu.dot_dimension_numbers<[1], [0], [0], [1], [0, 0, 1, 1], [], []>} : vector<8x256xbf16>, vector<256x128xbf16>, vector<8x128xf32> -> vector<8x128xf32>
    %c0_21 = arith.constant 0 : index
    %c0_22 = arith.constant 0 : index
    %27 = vector.load %arg9[%c0_21, %c0_22] : memref<1x128xf32, #tpu.memory_space<vmem>>, vector<1x128xf32>
    %28 = vector.broadcast %27 : vector<1x128xf32> to vector<8x128xf32>
    %29 = arith.addf %26, %28 : vector<8x128xf32>
    %cst_23 = arith.constant 0.000000e+00 : f32
    %30 = vector.broadcast %cst_23 : f32 to vector<8x128xf32>
    %31 = arith.maximumf %29, %30 : vector<8x128xf32>
    %32 = arith.truncf %31 : vector<8x128xf32> to vector<8x128xbf16>
    %c0_24 = arith.constant 0 : index
    %c0_25 = arith.constant 0 : index
    %33 = vector.load %arg10[%c0_24, %c0_25] : memref<128x128xbf16, #tpu.memory_space<vmem>>, vector<128x128xbf16>
    %cst_26 = arith.constant dense<0.000000e+00> : vector<8x128xf32>
    %34 = tpu.matmul %32, %33, %cst_26 {dimension_numbers = #tpu.dot_dimension_numbers<[1], [0], [0], [1], [0, 0, 1, 1], [], []>} : vector<8x128xbf16>, vector<128x128xbf16>, vector<8x128xf32> -> vector<8x128xf32>
    %c0_27 = arith.constant 0 : index
    %c0_28 = arith.constant 0 : index
    %35 = vector.load %arg11[%c0_27, %c0_28] : memref<1x128xf32, #tpu.memory_space<vmem>>, vector<1x128xf32>
    %36 = vector.broadcast %35 : vector<1x128xf32> to vector<8x128xf32>
    %37 = arith.addf %34, %36 : vector<8x128xf32>
    %cst_29 = arith.constant 0.000000e+00 : f32
    %38 = vector.broadcast %cst_29 : f32 to vector<8x128xf32>
    %39 = arith.maximumf %37, %38 : vector<8x128xf32>
    %40 = arith.truncf %39 : vector<8x128xf32> to vector<8x128xbf16>
    %c0_30 = arith.constant 0 : index
    %c0_31 = arith.constant 0 : index
    %41 = vector.load %arg12[%c0_30, %c0_31] : memref<128x128xbf16, #tpu.memory_space<vmem>>, vector<128x128xbf16>
    %cst_32 = arith.constant dense<0.000000e+00> : vector<8x128xf32>
    %42 = tpu.matmul %40, %41, %cst_32 {dimension_numbers = #tpu.dot_dimension_numbers<[1], [0], [0], [1], [0, 0, 1, 1], [], []>} : vector<8x128xbf16>, vector<128x128xbf16>, vector<8x128xf32> -> vector<8x128xf32>
    %c0_33 = arith.constant 0 : index
    %c0_34 = arith.constant 0 : index
    %43 = vector.load %arg13[%c0_33, %c0_34] : memref<1x128xf32, #tpu.memory_space<vmem>>, vector<1x128xf32>
    %44 = vector.broadcast %43 : vector<1x128xf32> to vector<8x128xf32>
    %45 = arith.addf %42, %44 : vector<8x128xf32>
    %cst_35 = arith.constant 0.000000e+00 : f32
    %46 = vector.broadcast %cst_35 : f32 to vector<8x128xf32>
    %47 = arith.maximumf %45, %46 : vector<8x128xf32>
    %48 = arith.truncf %47 : vector<8x128xf32> to vector<8x128xbf16>
    %c0_36 = arith.constant 0 : index
    %c0_37 = arith.constant 0 : index
    %49 = vector.load %arg14[%c0_36, %c0_37] : memref<128x128xbf16, #tpu.memory_space<vmem>>, vector<128x128xbf16>
    %cst_38 = arith.constant dense<0.000000e+00> : vector<8x128xf32>
    %50 = tpu.matmul %48, %49, %cst_38 {dimension_numbers = #tpu.dot_dimension_numbers<[1], [0], [0], [1], [0, 0, 1, 1], [], []>} : vector<8x128xbf16>, vector<128x128xbf16>, vector<8x128xf32> -> vector<8x128xf32>
    %c0_39 = arith.constant 0 : index
    %c0_40 = arith.constant 0 : index
    %51 = vector.load %arg15[%c0_39, %c0_40] : memref<1x128xf32, #tpu.memory_space<vmem>>, vector<1x128xf32>
    %52 = vector.broadcast %51 : vector<1x128xf32> to vector<8x128xf32>
    %53 = arith.addf %50, %52 : vector<8x128xf32>
    %cst_41 = arith.constant 0.000000e+00 : f32
    %54 = vector.broadcast %cst_41 : f32 to vector<8x128xf32>
    %55 = arith.maximumf %53, %54 : vector<8x128xf32>
    %56 = arith.truncf %55 : vector<8x128xf32> to vector<8x128xbf16>
    %c0_42 = arith.constant 0 : index
    %c0_43 = arith.constant 0 : index
    %57 = vector.load %arg16[%c0_42, %c0_43] : memref<128x128xbf16, #tpu.memory_space<vmem>>, vector<128x128xbf16>
    %cst_44 = arith.constant dense<0.000000e+00> : vector<8x128xf32>
    %58 = tpu.matmul %56, %57, %cst_44 {dimension_numbers = #tpu.dot_dimension_numbers<[1], [0], [0], [1], [0, 0, 1, 1], [], []>} : vector<8x128xbf16>, vector<128x128xbf16>, vector<8x128xf32> -> vector<8x128xf32>
    %c0_45 = arith.constant 0 : index
    %c0_46 = arith.constant 0 : index
    %59 = vector.load %arg17[%c0_45, %c0_46] : memref<1x128xf32, #tpu.memory_space<vmem>>, vector<1x128xf32>
    %60 = vector.broadcast %59 : vector<1x128xf32> to vector<8x128xf32>
    %61 = arith.addf %58, %60 : vector<8x128xf32>
    %cst_47 = arith.constant 0.000000e+00 : f32
    %62 = vector.broadcast %cst_47 : f32 to vector<8x128xf32>
    %63 = arith.maximumf %61, %62 : vector<8x128xf32>
    %64 = arith.truncf %63 : vector<8x128xf32> to vector<8x128xbf16>
    %c0_48 = arith.constant 0 : index
    %c0_49 = arith.constant 0 : index
    %65 = vector.load %arg18[%c0_48, %c0_49] : memref<128x256xbf16, #tpu.memory_space<vmem>>, vector<128x256xbf16>
    %cst_50 = arith.constant dense<0.000000e+00> : vector<8x256xf32>
    %66 = tpu.matmul %64, %65, %cst_50 {dimension_numbers = #tpu.dot_dimension_numbers<[1], [0], [0], [1], [0, 0, 1, 1], [], []>} : vector<8x128xbf16>, vector<128x256xbf16>, vector<8x256xf32> -> vector<8x256xf32>
    %c0_51 = arith.constant 0 : index
    %c0_52 = arith.constant 0 : index
    %67 = vector.load %arg19[%c0_51, %c0_52] : memref<1x256xf32, #tpu.memory_space<vmem>>, vector<1x256xf32>
    %68 = vector.broadcast %67 : vector<1x256xf32> to vector<8x256xf32>
    %69 = arith.addf %66, %68 : vector<8x256xf32>
    %cst_53 = arith.constant 0.000000e+00 : f32
    %70 = vector.broadcast %cst_53 : f32 to vector<8x256xf32>
    %71 = arith.maximumf %69, %70 : vector<8x256xf32>
    %72 = arith.truncf %71 : vector<8x256xf32> to vector<8x256xbf16>
    %c0_54 = arith.constant 0 : index
    %c0_55 = arith.constant 0 : index
    %73 = vector.load %arg20[%c0_54, %c0_55] : memref<256x512xbf16, #tpu.memory_space<vmem>>, vector<256x512xbf16>
    %cst_56 = arith.constant dense<0.000000e+00> : vector<8x512xf32>
    %74 = tpu.matmul %72, %73, %cst_56 {dimension_numbers = #tpu.dot_dimension_numbers<[1], [0], [0], [1], [0, 0, 1, 1], [], []>} : vector<8x256xbf16>, vector<256x512xbf16>, vector<8x512xf32> -> vector<8x512xf32>
    %c0_57 = arith.constant 0 : index
    %c0_58 = arith.constant 0 : index
    %75 = vector.load %arg21[%c0_57, %c0_58] : memref<1x512xf32, #tpu.memory_space<vmem>>, vector<1x512xf32>
    %76 = vector.broadcast %75 : vector<1x512xf32> to vector<8x512xf32>
    %77 = arith.addf %74, %76 : vector<8x512xf32>
    %cst_59 = arith.constant 0.000000e+00 : f32
    %78 = vector.broadcast %cst_59 : f32 to vector<8x512xf32>
    %79 = arith.maximumf %77, %78 : vector<8x512xf32>
    %80 = arith.truncf %79 : vector<8x512xf32> to vector<8x512xbf16>
    %c0_60 = arith.constant 0 : index
    %c0_61 = arith.constant 0 : index
    %81 = vector.load %arg22[%c0_60, %c0_61] : memref<512x1024xbf16, #tpu.memory_space<vmem>>, vector<512x1024xbf16>
    %cst_62 = arith.constant dense<0.000000e+00> : vector<8x1024xf32>
    %82 = tpu.matmul %80, %81, %cst_62 {dimension_numbers = #tpu.dot_dimension_numbers<[1], [0], [0], [1], [0, 0, 1, 1], [], []>} : vector<8x512xbf16>, vector<512x1024xbf16>, vector<8x1024xf32> -> vector<8x1024xf32>
    %c0_63 = arith.constant 0 : index
    %c0_64 = arith.constant 0 : index
    %83 = vector.load %arg23[%c0_63, %c0_64] : memref<1x1024xf32, #tpu.memory_space<vmem>>, vector<1x1024xf32>
    %84 = vector.broadcast %83 : vector<1x1024xf32> to vector<8x1024xf32>
    %85 = arith.addf %82, %84 : vector<8x1024xf32>
    %cst_65 = arith.constant 0.000000e+00 : f32
    %86 = vector.broadcast %cst_65 : f32 to vector<8x1024xf32>
    %87 = arith.maximumf %85, %86 : vector<8x1024xf32>
    %88 = arith.truncf %87 : vector<8x1024xf32> to vector<8x1024xbf16>
    %c0_66 = arith.constant 0 : index
    %c0_67 = arith.constant 0 : index
    %89 = vector.load %arg24[%c0_66, %c0_67] : memref<1024x256xbf16, #tpu.memory_space<vmem>>, vector<1024x256xbf16>
    %cst_68 = arith.constant dense<0.000000e+00> : vector<8x256xf32>
    %90 = tpu.matmul %88, %89, %cst_68 {dimension_numbers = #tpu.dot_dimension_numbers<[1], [0], [0], [1], [0, 0, 1, 1], [], []>} : vector<8x1024xbf16>, vector<1024x256xbf16>, vector<8x256xf32> -> vector<8x256xf32>
    %c0_69 = arith.constant 0 : index
    %c0_70 = arith.constant 0 : index
    %91 = vector.load %arg25[%c0_69, %c0_70] : memref<1x256xf32, #tpu.memory_space<vmem>>, vector<1x256xf32>
    %92 = vector.broadcast %91 : vector<1x256xf32> to vector<8x256xf32>
    %93 = arith.addf %90, %92 : vector<8x256xf32>
    %cst_71 = arith.constant 5.000000e-01 : f32
    %94 = vector.broadcast %cst_71 : f32 to vector<8x256xf32>
    %95 = arith.mulf %94, %93 : vector<8x256xf32>
    %96 = math.tanh %95 : vector<8x256xf32>
    %cst_72 = arith.constant 5.000000e-01 : f32
    %97 = vector.broadcast %cst_72 : f32 to vector<8x256xf32>
    %98 = arith.mulf %97, %96 : vector<8x256xf32>
    %cst_73 = arith.constant 5.000000e-01 : f32
    %99 = vector.broadcast %cst_73 : f32 to vector<8x256xf32>
    %100 = arith.addf %98, %99 : vector<8x256xf32>
    %c0_74 = arith.constant 0 : index
    %c0_75 = arith.constant 0 : index
    %101 = vector.load %arg26[%c0_74, %c0_75] : memref<8x256xf32, #tpu.memory_space<vmem>>, vector<8x256xf32>
    tpu.vector_store %arg26[%c0_74, %c0_75], %100 {strides = array<i32>} : memref<8x256xf32, #tpu.memory_space<vmem>>, vector<8x256xf32>,
    return
  }
  func.func @transform_0(%arg0: i32) -> (i32, i32) {
    %c0_i32 = arith.constant 0 : i32
    %c0_i32_0 = arith.constant 0 : i32
    return %arg0, %c0_i32 : i32, i32
  }
  func.func @transform_1(%arg0: i32) -> (i32, i32) {
    %c0_i32 = arith.constant 0 : i32
    %c0_i32_0 = arith.constant 0 : i32
    %c0_i32_1 = arith.constant 0 : i32
    return %c0_i32, %c0_i32_0 : i32, i32
  }
  func.func @transform_2(%arg0: i32) -> (i32, i32) {
    %c0_i32 = arith.constant 0 : i32
    %c0_i32_0 = arith.constant 0 : i32
    %c0_i32_1 = arith.constant 0 : i32
    return %c0_i32, %c0_i32_0 : i32, i32
  }
  func.func @transform_3(%arg0: i32) -> (i32, i32) {
    %c0_i32 = arith.constant 0 : i32
    %c0_i32_0 = arith.constant 0 : i32
    %c0_i32_1 = arith.constant 0 : i32
    return %c0_i32, %c0_i32_0 : i32, i32
  }
  func.func @transform_4(%arg0: i32) -> (i32, i32) {
    %c0_i32 = arith.constant 0 : i32
    %c0_i32_0 = arith.constant 0 : i32
    %c0_i32_1 = arith.constant 0 : i32
    return %c0_i32, %c0_i32_0 : i32, i32
  }
  func.func @transform_5(%arg0: i32) -> (i32, i32) {
    %c0_i32 = arith.constant 0 : i32
    %c0_i32_0 = arith.constant 0 : i32
    %c0_i32_1 = arith.constant 0 : i32
    return %c0_i32, %c0_i32_0 : i32, i32
  }
  func.func @transform_6(%arg0: i32) -> (i32, i32) {
    %c0_i32 = arith.constant 0 : i32
    %c0_i32_0 = arith.constant 0 : i32
    %c0_i32_1 = arith.constant 0 : i32
    return %c0_i32, %c0_i32_0 : i32, i32
  }
  func.func @transform_7(%arg0: i32) -> (i32, i32) {
    %c0_i32 = arith.constant 0 : i32
    %c0_i32_0 = arith.constant 0 : i32
    %c0_i32_1 = arith.constant 0 : i32
    return %c0_i32, %c0_i32_0 : i32, i32
  }
  func.func @transform_8(%arg0: i32) -> (i32, i32) {
    %c0_i32 = arith.constant 0 : i32
    %c0_i32_0 = arith.constant 0 : i32
    %c0_i32_1 = arith.constant 0 : i32
    return %c0_i32, %c0_i32_0 : i32, i32
  }
  func.func @transform_9(%arg0: i32) -> (i32, i32) {
    %c0_i32 = arith.constant 0 : i32
    %c0_i32_0 = arith.constant 0 : i32
    %c0_i32_1 = arith.constant 0 : i32
    return %c0_i32, %c0_i32_0 : i32, i32
  }
  func.func @transform_10(%arg0: i32) -> (i32, i32) {
    %c0_i32 = arith.constant 0 : i32
    %c0_i32_0 = arith.constant 0 : i32
    %c0_i32_1 = arith.constant 0 : i32
    return %c0_i32, %c0_i32_0 : i32, i32
  }
  func.func @transform_11(%arg0: i32) -> (i32, i32) {
    %c0_i32 = arith.constant 0 : i32
    %c0_i32_0 = arith.constant 0 : i32
    %c0_i32_1 = arith.constant 0 : i32
    return %c0_i32, %c0_i32_0 : i32, i32
  }
  func.func @transform_12(%arg0: i32) -> (i32, i32) {
    %c0_i32 = arith.constant 0 : i32
    %c0_i32_0 = arith.constant 0 : i32
    %c0_i32_1 = arith.constant 0 : i32
    return %c0_i32, %c0_i32_0 : i32, i32
  }
  func.func @transform_13(%arg0: i32) -> (i32, i32) {
    %c0_i32 = arith.constant 0 : i32
    %c0_i32_0 = arith.constant 0 : i32
    %c0_i32_1 = arith.constant 0 : i32
    return %c0_i32, %c0_i32_0 : i32, i32
  }
  func.func @transform_14(%arg0: i32) -> (i32, i32) {
    %c0_i32 = arith.constant 0 : i32
    %c0_i32_0 = arith.constant 0 : i32
    %c0_i32_1 = arith.constant 0 : i32
    return %c0_i32, %c0_i32_0 : i32, i32
  }
  func.func @transform_15(%arg0: i32) -> (i32, i32) {
    %c0_i32 = arith.constant 0 : i32
    %c0_i32_0 = arith.constant 0 : i32
    %c0_i32_1 = arith.constant 0 : i32
    return %c0_i32, %c0_i32_0 : i32, i32
  }
  func.func @transform_16(%arg0: i32) -> (i32, i32) {
    %c0_i32 = arith.constant 0 : i32
    %c0_i32_0 = arith.constant 0 : i32
    %c0_i32_1 = arith.constant 0 : i32
    return %c0_i32, %c0_i32_0 : i32, i32
  }
  func.func @transform_17(%arg0: i32) -> (i32, i32) {
    %c0_i32 = arith.constant 0 : i32
    %c0_i32_0 = arith.constant 0 : i32
    %c0_i32_1 = arith.constant 0 : i32
    return %c0_i32, %c0_i32_0 : i32, i32
  }
  func.func @transform_18(%arg0: i32) -> (i32, i32) {
    %c0_i32 = arith.constant 0 : i32
    %c0_i32_0 = arith.constant 0 : i32
    %c0_i32_1 = arith.constant 0 : i32
    return %c0_i32, %c0_i32_0 : i32, i32
  }
  func.func @transform_19(%arg0: i32) -> (i32, i32) {
    %c0_i32 = arith.constant 0 : i32
    %c0_i32_0 = arith.constant 0 : i32
    %c0_i32_1 = arith.constant 0 : i32
    return %c0_i32, %c0_i32_0 : i32, i32
  }
  func.func @transform_20(%arg0: i32) -> (i32, i32) {
    %c0_i32 = arith.constant 0 : i32
    %c0_i32_0 = arith.constant 0 : i32
    %c0_i32_1 = arith.constant 0 : i32
    return %c0_i32, %c0_i32_0 : i32, i32
  }
  func.func @transform_21(%arg0: i32) -> (i32, i32) {
    %c0_i32 = arith.constant 0 : i32
    %c0_i32_0 = arith.constant 0 : i32
    %c0_i32_1 = arith.constant 0 : i32
    return %c0_i32, %c0_i32_0 : i32, i32
  }
  func.func @transform_22(%arg0: i32) -> (i32, i32) {
    %c0_i32 = arith.constant 0 : i32
    %c0_i32_0 = arith.constant 0 : i32
    %c0_i32_1 = arith.constant 0 : i32
    return %c0_i32, %c0_i32_0 : i32, i32
  }
  func.func @transform_23(%arg0: i32) -> (i32, i32) {
    %c0_i32 = arith.constant 0 : i32
    %c0_i32_0 = arith.constant 0 : i32
    %c0_i32_1 = arith.constant 0 : i32
    return %c0_i32, %c0_i32_0 : i32, i32
  }
  func.func @transform_24(%arg0: i32) -> (i32, i32) {
    %c0_i32 = arith.constant 0 : i32
    %c0_i32_0 = arith.constant 0 : i32
    %c0_i32_1 = arith.constant 0 : i32
    return %c0_i32, %c0_i32_0 : i32, i32
  }
  func.func @transform_25(%arg0: i32) -> (i32, i32) {
    %c0_i32 = arith.constant 0 : i32
    %c0_i32_0 = arith.constant 0 : i32
    return %arg0, %c0_i32 : i32, i32
  }
}

</mosaic_0001>

<bundles_post_ra>
// kernel: tpu_custom_call.1
= control target key start
LH: loop header
LB: loop body
LE: loop exit
PB: predicated region body
PF: predicated region fallthrough
CT: control target
= control target key end

     0   :  { %s10700_s0 = inlined_call_operand.hbm [shape: bf16[8,256], index: 0, kind: input, shape index: {}]   ;;  %s10701_s1 = inlined_call_operand.hbm [shape: bf16[256,1024], index: 1, kind: input, shape index: {}]   ;;  %s10702_s2 = inlined_call_operand.hbm [shape: f32[1,1024], index: 2, kind: input, shape index: {}]   ;;  %s10703_s3 = inlined_call_operand.hbm [shape: bf16[1024,512], index: 3, kind: input, shape index: {}]   ;;  %s10704_s4 = inlined_call_operand.vmem [shape: f32[1,512], index: 4, kind: input, shape index: {}]   ;;  %s10705_s5 = inlined_call_operand.hbm [shape: bf16[512,256], index: 5, kind: input, shape index: {}]   ;;  %s10706_s6 = inlined_call_operand.hbm [shape: f32[1,256], index: 6, kind: input, shape index: {}]   ;;  %s10707_s7 = inlined_call_operand.hbm [shape: bf16[256,128], index: 7, kind: input, shape index: {}]   ;;  %s10708_s8 = inlined_call_operand.hbm [shape: f32[1,128], index: 8, kind: input, shape index: {}]   ;;  %s10709_s9 = inlined_call_operand.hbm [shape: bf16[128,128], index: 9, kind: input, shape index: {}]   ;;  %s10710_s10 = inlined_call_operand.hbm [shape: f32[1,128], index: 10, kind: input, shape index: {}]   ;;  %s10711_s11 = inlined_call_operand.hbm [shape: bf16[128,128], index: 11, kind: input, shape index: {}]   ;;  %s10712_s12 = inlined_call_operand.vmem [shape: f32[1,128], index: 12, kind: input, shape index: {}]   ;;  %s10713_s13 = inlined_call_operand.hbm [shape: bf16[128,128], index: 13, kind: input, shape index: {}]   ;;  %s10714_s14 = inlined_call_operand.vmem [shape: f32[1,128], index: 14, kind: input, shape index: {}]   ;;  %s10715_s15 = inlined_call_operand.hbm [shape: bf16[128,128], index: 15, kind: input, shape index: {}]   ;;  %s10716_s16 = inlined_call_operand.vmem [shape: f32[1,128], index: 16, kind: input, shape index: {}]   ;;  %s10717_s17 = inlined_call_operand.hbm [shape: bf16[128,256], index: 17, kind: input, shape index: {}]   ;;  %s10718_s18 = inlined_call_operand.vmem [shape: f32[1,256], index: 18, kind: input, shape index: {}]   ;;  %s10719_s19 = inlined_call_operand.hbm [shape: bf16[256,512], index: 19, kind: input, shape index: {}]   ;;  %s10720_s20 = inlined_call_operand.vmem [shape: f32[1,512], index: 20, kind: input, shape index: {}]   ;;  %s10721_s21 = inlined_call_operand.hbm [shape: bf16[512,1024], index: 21, kind: input, shape index: {}]   ;;  %s10722_s22 = inlined_call_operand.vmem [shape: f32[1,1024], index: 22, kind: input, shape index: {}]   ;;  %s10723_s23 = inlined_call_operand.hbm [shape: bf16[1024,256], index: 23, kind: input, shape index: {}]   ;;  %s10724_s24 = inlined_call_operand.vmem [shape: f32[1,256], index: 24, kind: input, shape index: {}]   ;;  %s10725_s25 = inlined_call_operand.hbm [shape: f32[8,256], index: 25, kind: output, shape index: {}]  }
   0x1   :  { %10730 = sst [smem:[#allocation40_spill]] %s10700_s0 }
   0x2   :  { %10731 = sst [smem:[#allocation41_spill]] %s10701_s1 }
   0x3   :  { %10732 = sst [smem:[#allocation42_spill]] %s10702_s2 }
   0x4   :  { %10733 = sst [smem:[#allocation43_spill]] %s10703_s3 }
   0x5   :  { %10734 = sst [smem:[#allocation44_spill]] %s10704_s4 }
   0x6   :  { %10735 = sst [smem:[#allocation45_spill]] %s10705_s5 }
   0x7   :  { %10736 = sst [smem:[#allocation46_spill]] %s10706_s6 }
   0x8   :  { %10737 = sst [smem:[#allocation47_spill]] %s10707_s7 }
   0x9   :  { %10738 = sst [smem:[#allocation48_spill]] %s10708_s8 }
   0xa   :  { %10739 = sst [smem:[#allocation49_spill]] %s10709_s9 }
   0xb   :  { %30 = vsyncpa [#allocation3], 0 }
   0xc   :  { %31 = vsyncpa [#allocation6], 0 }
   0xd   :  { %32 = vsyncpa [#allocation9], 0 }
   0xe   :  { %33 = vsyncpa [#allocation12], 0 }
   0xf   :  { %34 = vsyncpa [#allocation15], 0 }
  0x10   :  { %35 = vsyncpa [#allocation18], 0 }
  0x11   :  { %36 = vsyncpa [#allocation21], 0 }
  0x12   :  { %37 = vsyncpa [#allocation24], 0 }
  0x13   :  { %38 = vsyncpa [#allocation27], 0 }
  0x14   :  { %39 = vsyncpa [#allocation4], 0  ;;  %s10213_s29 = smov [#allocation5]  }
  0x15   :  { %s55_s2 = sshll.u32 %s10213_s29, 4  ;;  %s56_s2 = int_to_ptr.vmem [resolvable:$true] %s55_s2 }
  0x16   :  { %s9841_s6 = scalar_lea.vmem %s56_s2, 16384  ;;  %p9846_p1 = scmp.lt.s32.totalorder %s56_s2, %s56_s2 }
  0x17   :  { %p9842_p0 = scmp.ne.s32.totalorder %s56_s2, %s9841_s6  ;;  %p9847_p2 = scmp.lt.s32.totalorder %s9841_s6, %s9841_s6 }
  0x19   :  { %p9848_p3 = por %p9847_p2, %p9846_p1 }
  0x1b   :  { %p9849_p4 = pnand %p9848_p3, %p9842_p0 }
  0x1d   :  { %9852 = shalt.err (!%p9849_p4)
}
  0x1e   :  { %s10726_s30 = smov 512   ;;  %s10727_s7 = smov 32  }
  0x1f   :  { %s10740_s1 = sld [smem:[#allocation41_spill]]  ;;  %s10216_s8 = smov [#allocation8]  }
  0x20   :  { %s77_s27 = sshll.u32 %s10216_s8, 4  ;;  %s78_s27 = int_to_ptr.vmem [resolvable:$true] %s77_s27 }
  0x21   :  { %s9861_s4 = scalar_lea.vmem %s78_s27, 32768  ;;  %p9866_p6 = scmp.lt.s32.totalorder %s78_s27, %s78_s27 }
  0x22   :  { %p9862_p5 = scmp.ne.s32.totalorder %s78_s27, %s9861_s4  ;;  %p9867_p7 = scmp.lt.s32.totalorder %s9861_s4, %s9861_s4 }
  0x24   :  { %p9868_p8 = por %p9867_p7, %p9866_p6 }
  0x25   :  { %61 = dma.hbm_to_vmem [thread:$0]  %s10740_s1, 16384, %s56_s2, [#allocation6], %s10726_s30, %s10726_s30, %s10727_s7  }
  0x26   :  { %p9869_p9 = pnand %p9868_p8, %p9862_p5 }
  0x28   :  { %9872 = shalt.err (!%p9869_p9)
}
  0x29   :  { %s10728_s28 = smov 256   ;;  %s10729_s9 = smov 16  }
  0x2a   :  { %s10741_s29 = sld [smem:[#allocation43_spill]]  ;;  %s10219_s2 = smov [#allocation11]  }
  0x2b   :  { %s104_s6 = sshll.u32 %s10219_s2, 4  ;;  %s10220_s3 = smov [#allocation14]   ;;  %s105_s6 = int_to_ptr.vmem [resolvable:$true] %s104_s6 }
  0x2c   :  { %s126_s26 = sshll.u32 %s10220_s3, 4  ;;  %s9881_s1 = scalar_lea.vmem %s105_s6, 32  ;;  %s127_s26 = int_to_ptr.vmem [resolvable:$true] %s126_s26 }
  0x2d   :  { %p9882_p10 = scmp.ne.s32.totalorder %s105_s6, %s9881_s1  ;;  %p9886_p11 = scmp.lt.s32.totalorder %s105_s6, %s105_s6 }
  0x2e   :  { %p9887_p12 = scmp.lt.s32.totalorder %s9881_s1, %s9881_s1 }
  0x30   :  { %83 = dma.hbm_to_vmem [thread:$0]  %s10741_s29, 32768, %s78_s27, [#allocation9], %s10728_s28, %s10728_s28, %s10729_s9  }
  0x31   :  { %p9888_p13 = por %p9887_p12, %p9886_p11 }
  0x33   :  { %p9889_p0 = pnand %p9888_p13, %p9882_p10 }
  0x35   :  { %9892 = shalt.err (!%p9889_p0)
}
  0x36   :  { %s10742_s30 = sld [smem:[#allocation46_spill]]  ;;  %s9901_s7 = scalar_lea.vmem %s127_s26, 16 }
  0x37   :  { %p9902_p1 = scmp.ne.s32.totalorder %s127_s26, %s9901_s7  ;;  %s9905_s27 = scalar_lea.vmem %s127_s26, 32 }
  0x38   :  { %p9906_p2 = scmp.lt.s32.totalorder %s127_s26, %s127_s26  ;;  %p9907_p3 = scmp.lt.s32.totalorder %s9905_s27, %s9901_s7 }
  0x3a   :  { %p9908_p4 = por %p9907_p3, %p9906_p2 }
  0x3c   :  { %107 = dma.hbm_to_vmem [thread:$0]  %s10742_s30, 32, %s105_s6, [#allocation12]  }
  0x3d   :  { %p9909_p5 = pnand %p9908_p4, %p9902_p1 }
  0x3f   :  { %9912 = shalt.err (!%p9909_p5)
}
  0x40   :  { %s10743_s29 = sld [smem:[#allocation48_spill]]  ;;  %s10221_s2 = smov [#allocation17]  }
  0x41   :  { %s148_s3 = sshll.u32 %s10221_s2, 4  ;;  %s149_s3 = int_to_ptr.vmem [resolvable:$true] %s148_s3 }
  0x42   :  { %s9921_s1 = scalar_lea.vmem %s149_s3, 16  ;;  %s9925_s28 = scalar_lea.vmem %s149_s3, 32 }
  0x43   :  { %p9922_p6 = scmp.ne.s32.totalorder %s149_s3, %s9921_s1  ;;  %p9926_p7 = scmp.lt.s32.totalorder %s149_s3, %s149_s3 }
  0x44   :  { %p9927_p8 = scmp.lt.s32.totalorder %s9925_s28, %s9921_s1 }
  0x46   :  { %129 = dma.hbm_to_vmem [thread:$0]  %s10743_s29, 16, %s127_s26, [#allocation15]  }
  0x47   :  { %p9928_p9 = por %p9927_p8, %p9926_p7 }
  0x49   :  { %p9929_p10 = pnand %p9928_p9, %p9922_p6 }
  0x4b   :  { %9932 = shalt.err (!%p9929_p10)
}
  0x4c   :  { %151 = dma.hbm_to_vmem [thread:$0]  %s10710_s10, 16, %s149_s3, [#allocation18]  }
  0x4d   :  { %s10222_s6 = smov [#allocation20]  }
  0x4e   :  { %s171_s8 = sshll.u32 %s10222_s6, 4  ;;  %s172_s8 = int_to_ptr.vmem [resolvable:$true] %s171_s8 }
  0x4f   :  { %s9941_s4 = scalar_lea.vmem %s172_s8, 1024  ;;  %p9946_p12 = scmp.lt.s32.totalorder %s172_s8, %s172_s8 }
  0x50   :  { %p9942_p11 = scmp.ne.s32.totalorder %s172_s8, %s9941_s4  ;;  %p9947_p13 = scmp.lt.s32.totalorder %s9941_s4, %s9941_s4 }
  0x52   :  { %p9948_p0 = por %p9947_p13, %p9946_p12 }
  0x54   :  { %p9949_p1 = pnand %p9948_p0, %p9942_p11 }
  0x56   :  { %9952 = shalt.err (!%p9949_p1)
}
  0x57   :  { %s10223_s26 = smov 64   ;;  %s10224_s27 = smov 4  }
  0x58   :  { %177 = dma.hbm_to_vmem [thread:$0]  %s10713_s13, 1024, %s172_s8, [#allocation21], %s10223_s26, %s10223_s26, %s10224_s27  }
  0x59   :  { %s10225_s10 = smov [#allocation23]   ;;  %s10226_s29 = smov [#allocation26]  }
  0x5a   :  { %s199_s0 = sshll.u32 %s10225_s10, 4  ;;  %s227_s2 = sshll.u32 %s10226_s29, 4  ;;  %s200_s0 = int_to_ptr.vmem [resolvable:$true] %s199_s0  ;;  %s228_s2 = int_to_ptr.vmem [resolvable:$true] %s227_s2 }
  0x5b   :  { %s9961_s3 = scalar_lea.vmem %s200_s0, 2048  ;;  %p9966_p3 = scmp.lt.s32.totalorder %s200_s0, %s200_s0 }
  0x5c   :  { %p9962_p2 = scmp.ne.s32.totalorder %s200_s0, %s9961_s3  ;;  %p9967_p4 = scmp.lt.s32.totalorder %s9961_s3, %s9961_s3 }
  0x5e   :  { %p9968_p5 = por %p9967_p4, %p9966_p3 }
  0x60   :  { %p9969_p6 = pnand %p9968_p5, %p9962_p2 }
  0x62   :  { %9972 = shalt.err (!%p9969_p6)
}
  0x63   :  { %s10227_s1 = smov 128   ;;  %s10228_s30 = smov 8  }
  0x64   :  { %205 = dma.hbm_to_vmem [thread:$0]  %s10717_s17, 2048, %s200_s0, [#allocation24], %s10227_s1, %s10227_s1, %s10228_s30  }
  0x65   :  { %s9981_s6 = scalar_lea.vmem %s228_s2, 32768  ;;  %p9986_p8 = scmp.lt.s32.totalorder %s228_s2, %s228_s2 }
  0x66   :  { %p9982_p7 = scmp.ne.s32.totalorder %s228_s2, %s9981_s6  ;;  %p9987_p9 = scmp.lt.s32.totalorder %s9981_s6, %s9981_s6 }
  0x68   :  { %p9988_p10 = por %p9987_p9, %p9986_p8 }
  0x6a   :  { %p9989_p11 = pnand %p9988_p10, %p9982_p7 }
  0x6c   :  { %9992 = shalt.err (!%p9989_p11)
}
  0x6d   :  { %s10744_s8 = smov 32   ;;  %s10745_s4 = smov 512  }
  0x6e   :  { %233 = dma.hbm_to_vmem [thread:$0]  %s10721_s21, 32768, %s228_s2, [#allocation27], %s10745_s4, %s10745_s4, %s10744_s8  }
  0x6f   :  { %s10229_s10 = smov [#allocation2]   ;;  %s10230_s3 = smov [#allocation7]  }
  0x70   :  { %s46_s29 = sshll.u32 %s10229_s10, 4  ;;  %s68_s9 = sshll.u32 %s10230_s3, 4  ;;  %s47_s29 = int_to_ptr.vmem [resolvable:$true] %s46_s29  ;;  %s69_s9 = int_to_ptr.vmem [resolvable:$true] %s68_s9 }
  0x71   :  { %s10001_s17 = scalar_lea.vmem %s47_s29, 128  ;;  %p10006_p13 = scmp.lt.s32.totalorder %s47_s29, %s47_s29 }
  0x72   :  { %p10002_p12 = scmp.ne.s32.totalorder %s47_s29, %s10001_s17  ;;  %p10007_p0 = scmp.lt.s32.totalorder %s10001_s17, %s10001_s17 }
  0x74   :  { %p10008_p1 = por %p10007_p0, %p10006_p13 }
  0x76   :  { %p10009_p2 = pnand %p10008_p1, %p10002_p12 }
  0x78   :  { %10012 = shalt.err (!%p10009_p2)
}
  0x79   :  { %s10746_s13 = sld [smem:[#allocation40_spill]]  ;;  %s10021_s6 = scalar_lea.vmem %s69_s9, 128 }
  0x7a   :  { %p10022_p3 = scmp.ne.s32.totalorder %s69_s9, %s10021_s6  ;;  %p10026_p4 = scmp.lt.s32.totalorder %s69_s9, %s69_s9 }
  0x7b   :  { %p10027_p5 = scmp.lt.s32.totalorder %s10021_s6, %s10021_s6 }
  0x7d   :  { %p10028_p6 = por %p10027_p5, %p10026_p4 }
  0x7f   :  { %49 = dma.hbm_to_vmem [thread:$0]  %s10746_s13, 128, %s47_s29, [#allocation3]  }
  0x80   :  { %p10029_p7 = pnand %p10028_p6, %p10022_p3 }
  0x82   :  { %10032 = shalt.err (!%p10029_p7)
}
  0x83   :  { %s10747_s8 = sld [smem:[#allocation42_spill]]  ;;  %s10231_s4 = smov [#allocation10]  }
  0x84   :  { %s91_s28 = sshll.u32 %s10231_s4, 4  ;;  %s10232_s5 = smov [#allocation13]   ;;  %s92_s28 = int_to_ptr.vmem [resolvable:$true] %s91_s28 }
  0x85   :  { %s113_s10 = sshll.u32 %s10232_s5, 4  ;;  %s10041_s3 = scalar_lea.vmem %s92_s28, 8192  ;;  %s114_s10 = int_to_ptr.vmem [resolvable:$true] %s113_s10 }
  0x86   :  { %p10042_p8 = scmp.ne.s32.totalorder %s92_s28, %s10041_s3  ;;  %p10046_p9 = scmp.lt.s32.totalorder %s92_s28, %s92_s28 }
  0x87   :  { %p10047_p10 = scmp.lt.s32.totalorder %s10041_s3, %s10041_s3 }
  0x89   :  { %71 = dma.hbm_to_vmem [thread:$0]  %s10747_s8, 128, %s69_s9, [#allocation6]  }
  0x8a   :  { %p10048_p11 = por %p10047_p10, %p10046_p9 }
  0x8c   :  { %p10049_p12 = pnand %p10048_p11, %p10042_p8 }
  0x8e   :  { %10052 = shalt.err (!%p10049_p12)
}
  0x8f   :  { %s10748_s0 = sld [smem:[#allocation45_spill]]  ;;  %s10061_s9 = scalar_lea.vmem %s114_s10, 2048 }
  0x90   :  { %p10062_p13 = scmp.ne.s32.totalorder %s114_s10, %s10061_s9  ;;  %p10066_p0 = scmp.lt.s32.totalorder %s114_s10, %s114_s10 }
  0x91   :  { %p10067_p1 = scmp.lt.s32.totalorder %s10061_s9, %s10061_s9 }
  0x93   :  { %p10068_p2 = por %p10067_p1, %p10066_p0 }
  0x95   :  { %97 = dma.hbm_to_vmem [thread:$0]  %s10748_s0, 8192, %s92_s28, [#allocation9], %s10227_s1, %s10227_s1, %s10228_s30  }
  0x96   :  { %p10069_p3 = pnand %p10068_p2, %p10062_p13 }
  0x98   :  { %10072 = shalt.err (!%p10069_p3)
}
  0x99   :  { %s10749_s6 = sld [smem:[#allocation47_spill]]  ;;  %s10233_s21 = smov [#allocation16]  }
  0x9a   :  { %s135_s2 = sshll.u32 %s10233_s21, 4  ;;  %s10234_s8 = smov [#allocation19]   ;;  %s136_s2 = int_to_ptr.vmem [resolvable:$true] %s135_s2 }
  0x9b   :  { %s157_s4 = sshll.u32 %s10234_s8, 4  ;;  %s10081_s28 = scalar_lea.vmem %s136_s2, 1024  ;;  %s158_s4 = int_to_ptr.vmem [resolvable:$true] %s157_s4 }
  0x9c   :  { %p10082_p4 = scmp.ne.s32.totalorder %s136_s2, %s10081_s28  ;;  %p10086_p5 = scmp.lt.s32.totalorder %s136_s2, %s136_s2 }
  0x9d   :  { %p10087_p6 = scmp.lt.s32.totalorder %s10081_s28, %s10081_s28 }
  0x9f   :  { %119 = dma.hbm_to_vmem [thread:$0]  %s10749_s6, 2048, %s114_s10, [#allocation12], %s10223_s26, %s10223_s26, %s10224_s27  }
  0xa0   :  { %p10088_p7 = por %p10087_p6, %p10086_p5 }
  0xa2   :  { %p10089_p8 = pnand %p10088_p7, %p10082_p4 }
  0xa4   :  { %10092 = shalt.err (!%p10089_p8)
}
  0xa5   :  { %s10750_s29 = sld [smem:[#allocation49_spill]]  ;;  %s10101_s10 = scalar_lea.vmem %s158_s4, 1024 }
  0xa6   :  { %p10102_p9 = scmp.ne.s32.totalorder %s158_s4, %s10101_s10  ;;  %p10106_p10 = scmp.lt.s32.totalorder %s158_s4, %s158_s4 }
  0xa7   :  { %p10107_p11 = scmp.lt.s32.totalorder %s10101_s10, %s10101_s10 }
  0xa9   :  { %p10108_p12 = por %p10107_p11, %p10106_p10 }
  0xab   :  { %141 = dma.hbm_to_vmem [thread:$0]  %s10750_s29, 1024, %s136_s2, [#allocation15], %s10223_s26, %s10223_s26, %s10224_s27  }
  0xac   :  { %p10109_p13 = pnand %p10108_p12, %p10102_p9 }
  0xae   :  { %10112 = shalt.err (!%p10109_p13)
}
  0xaf   :  { %163 = dma.hbm_to_vmem [thread:$0]  %s10711_s11, 1024, %s158_s4, [#allocation18], %s10223_s26, %s10223_s26, %s10224_s27  }
  0xb0   :  { %s10235_s9 = smov [#allocation22]   ;;  %s10236_s13 = smov [#allocation25]  }
  0xb1   :  { %s185_s7 = sshll.u32 %s10235_s9, 4  ;;  %s213_s6 = sshll.u32 %s10236_s13, 4  ;;  %s186_s7 = int_to_ptr.vmem [resolvable:$true] %s185_s7  ;;  %s214_s6 = int_to_ptr.vmem [resolvable:$true] %s213_s6 }
  0xb2   :  { %s10121_s21 = scalar_lea.vmem %s186_s7, 1024  ;;  %p10126_p1 = scmp.lt.s32.totalorder %s186_s7, %s186_s7 }
  0xb3   :  { %p10122_p0 = scmp.ne.s32.totalorder %s186_s7, %s10121_s21  ;;  %p10127_p2 = scmp.lt.s32.totalorder %s10121_s21, %s10121_s21 }
  0xb5   :  { %p10128_p3 = por %p10127_p2, %p10126_p1 }
  0xb7   :  { %p10129_p4 = pnand %p10128_p3, %p10122_p0 }
  0xb9   :  { %10132 = shalt.err (!%p10129_p4)
}
  0xba   :  { %191 = dma.hbm_to_vmem [thread:$0]  %s10715_s15, 1024, %s186_s7, [#allocation21], %s10223_s26, %s10223_s26, %s10224_s27  }
  0xbb   :  { %s10141_s11 = scalar_lea.vmem %s214_s6, 8192  ;;  %p10146_p6 = scmp.lt.s32.totalorder %s214_s6, %s214_s6 }
  0xbc   :  { %p10142_p5 = scmp.ne.s32.totalorder %s214_s6, %s10141_s11  ;;  %p10147_p7 = scmp.lt.s32.totalorder %s10141_s11, %s10141_s11 }
  0xbe   :  { %p10148_p8 = por %p10147_p7, %p10146_p6 }
  0xc0   :  { %p10149_p9 = pnand %p10148_p8, %p10142_p5 }
  0xc2   :  { %10152 = shalt.err (!%p10149_p9)
}
  0xc3   :  { %s10751_s4 = smov 16   ;;  %s10752_s28 = smov 256  }
  0xc4   :  { %219 = dma.hbm_to_vmem [thread:$0]  %s10719_s19, 8192, %s214_s6, [#allocation24], %s10752_s28, %s10752_s28, %s10751_s4  }
  0xc5   :  { %s10237_s29 = smov [#allocation28]  }
  0xc6   :  { %s241_s10 = sshll.u32 %s10237_s29, 4  ;;  %s242_s10 = int_to_ptr.vmem [resolvable:$true] %s241_s10 }
  0xc7   :  { %s10161_s17 = scalar_lea.vmem %s242_s10, 16384  ;;  %p10166_p11 = scmp.lt.s32.totalorder %s242_s10, %s242_s10 }
  0xc8   :  { %p10162_p10 = scmp.ne.s32.totalorder %s242_s10, %s10161_s17  ;;  %p10167_p12 = scmp.lt.s32.totalorder %s10161_s17, %s10161_s17 }
  0xca   :  { %p10168_p13 = por %p10167_p12, %p10166_p11 }
  0xcc   :  { %p10169_p0 = pnand %p10168_p13, %p10162_p10 }
  0xce   :  { %10172 = shalt.err (!%p10169_p0)
}
  0xcf   :  { %247 = dma.hbm_to_vmem [thread:$0]  %s10723_s23, 16384, %s242_s10, [#allocation27], %s10227_s1, %s10227_s1, %s10228_s30  }
  0xd0   :  { %10193 = dma.done.wait [#allocation3], 128  }
  0xd1   :  { %10194 = vsyncadd [#allocation3], 4294967168 }
  0xd2   :  { %10195 = dma.done.wait [#allocation6], 16512  }
  0xd3   :  { %10196 = vsyncadd [#allocation6], 4294950784 }
  0xd4   :  { %10197 = dma.done.wait [#allocation9], 40960  }
  0xd5   :  { %10198 = vsyncadd [#allocation9], 4294926336 }
  0xd6   :  { %10199 = dma.done.wait [#allocation12], 2080  }
  0xd7   :  { %10200 = vsyncadd [#allocation12], 4294965216 }
  0xd8   :  { %10201 = dma.done.wait [#allocation15], 1040  }
  0xd9   :  { %10202 = vsyncadd [#allocation15], 4294966256 }
  0xda   :  { %10203 = dma.done.wait [#allocation18], 1040  }
  0xdb   :  { %10204 = vsyncadd [#allocation18], 4294966256 }
  0xdc   :  { %10205 = dma.done.wait [#allocation21], 2048  }
  0xdd   :  { %10206 = vsyncadd [#allocation21], 4294965248 }
  0xde   :  { %10207 = dma.done.wait [#allocation24], 10240  }
  0xdf   :  { %10208 = vsyncadd [#allocation24], 4294957056 }
  0xe0   :  { %10209 = dma.done.wait [#allocation27], 49152  }
  0xe1   :  { %10210 = vsyncadd [#allocation27], 4294918144  ;;  %v359_v0 = vld [vmem:[#allocation5 + $0x1c0] sm:$0xff]  ;;  %v360_v2 = vld [vmem:[#allocation5 + $0x1c8] sm:$0xff]  ;;  %s10753_s27 = sld [smem:[#allocation44_spill]]  ;;  %vm10239_vm0 = vmmov 0  }
  0xe2   :  { %v363_v1 = vld [vmem:[#allocation5 + $0x1e0] sm:$0xff]  ;;  %v364_v4 = vld [vmem:[#allocation5 + $0x1e8] sm:$0xff]  ;;  %v10459_v53 = vld [vmem:[#allocation2] sm:$0xff] }
  0xe3   :  { %v7912_v3 = vcombine.high %v359_v0, %v363_v1  ;;  %v7911_v5 = vcombine.low %v359_v0, %v363_v1  ;;  %v351_v6 = vld [vmem:[#allocation5 + $0x180] sm:$0xff]  ;;  %v7914_v8 = vcombine.high %v360_v2, %v364_v4  ;;  %v7913_v9 = vcombine.low %v360_v2, %v364_v4  ;;  %v352_v11 = vld [vmem:[#allocation5 + $0x188] sm:$0xff] }
  0xe4   :  { %v355_v7 = vld [vmem:[#allocation5 + $0x1a0] sm:$0xff]  ;;  %v356_v12 = vld [vmem:[#allocation5 + $0x1a8] sm:$0xff]  ;;  %v10463_v57 = vcombine.high %v10459_v53, %v10459_v53 }
  0xe5   :  { %v7904_v10 = vcombine.high %v351_v6, %v355_v7  ;;  %v343_v13 = vld [vmem:[#allocation5 + $0x140] sm:$0xff]  ;;  %1120 = vmatprep.subr.bf16.mxu0 %v7912_v3  ;;  %v7906_v14 = vcombine.high %v352_v11, %v356_v12  ;;  %v344_v16 = vld [vmem:[#allocation5 + $0x148] sm:$0xff]  ;;  %1161 = vmatprep.subr.bf16.mxu1 %v7914_v8  ;;  %v7903_v18 = vcombine.low %v351_v6, %v355_v7 }
  0xe6   :  { %v347_v15 = vld [vmem:[#allocation5 + $0x160] sm:$0xff]  ;;  %v348_v17 = vld [vmem:[#allocation5 + $0x168] sm:$0xff]  ;;  %1121 = vmatpush1.bf16.msra.mxu0 %v7911_v5  ;;  %1162 = vmatpush1.bf16.msra.mxu1 %v7913_v9  ;;  %v7905_v19 = vcombine.low %v352_v11, %v356_v12 }
  0xe7   :  { %1122 = vmatprep.subr.bf16.mxu0 %v7904_v10  ;;  %v7896_v20 = vcombine.high %v343_v13, %v347_v15  ;;  %1163 = vmatprep.subr.bf16.mxu1 %v7906_v14  ;;  %v7898_v21 = vcombine.high %v344_v16, %v348_v17  ;;  %v335_v22 = vld [vmem:[#allocation5 + $0x100] sm:$0xff]  ;;  %v336_v24 = vld [vmem:[#allocation5 + $0x108] sm:$0xff]  ;;  %v7895_v26 = vcombine.low %v343_v13, %v347_v15 }
  0xe8   :  { %v339_v23 = vld [vmem:[#allocation5 + $0x120] sm:$0xff]  ;;  %v340_v25 = vld [vmem:[#allocation5 + $0x128] sm:$0xff]  ;;  %v7897_v27 = vcombine.low %v344_v16, %v348_v17  ;;  %1152 = vmatprep.mubr.bf16.mxu0 %v10463_v57  ;;  %1193 = vmatprep.mubr.bf16.mxu1 %v10463_v57 }
  0xe9   :  { %v7888_v28 = vcombine.high %v335_v22, %v339_v23  ;;  %v7890_v29 = vcombine.high %v336_v24, %v340_v25  ;;  %v327_v30 = vld [vmem:[#allocation5 + $0xc0] sm:$0xff]  ;;  %v328_v32 = vld [vmem:[#allocation5 + $0xc8] sm:$0xff]  ;;  %v7887_v34 = vcombine.low %v335_v22, %v339_v23  ;;  %v7889_v35 = vcombine.low %v336_v24, %v340_v25 }
  0xea   :  { %1123 = vmatpush1.bf16.msra.mxu0 %v7903_v18  ;;  %1164 = vmatpush1.bf16.msra.mxu1 %v7905_v19  ;;  %v331_v31 = vld [vmem:[#allocation5 + $0xe0] sm:$0xff]  ;;  %v332_v33 = vld [vmem:[#allocation5 + $0xe8] sm:$0xff] }
  0xeb   :  { %1124 = vmatprep.subr.bf16.mxu0 %v7896_v20  ;;  %1165 = vmatprep.subr.bf16.mxu1 %v7898_v21  ;;  %v7880_v36 = vcombine.high %v327_v30, %v331_v31  ;;  %v7882_v37 = vcombine.high %v328_v32, %v332_v33  ;;  %v319_v38 = vld [vmem:[#allocation5 + $0x80] sm:$0xff]  ;;  %v320_v40 = vld [vmem:[#allocation5 + $0x88] sm:$0xff]  ;;  %v7879_v42 = vcombine.low %v327_v30, %v331_v31 }
  0xec   :  { %v323_v39 = vld [vmem:[#allocation5 + $0xa0] sm:$0xff]  ;;  %v324_v41 = vld [vmem:[#allocation5 + $0xa8] sm:$0xff]  ;;  %v7881_v43 = vcombine.low %v328_v32, %v332_v33 }
  0xed   :  { %v7872_v44 = vcombine.high %v319_v38, %v323_v39  ;;  %v7874_v45 = vcombine.high %v320_v40, %v324_v41  ;;  %v311_v46 = vld [vmem:[#allocation5 + $0x40] sm:$0xff]  ;;  %v312_v48 = vld [vmem:[#allocation5 + $0x48] sm:$0xff]  ;;  %v7871_v50 = vcombine.low %v319_v38, %v323_v39  ;;  %v7873_v51 = vcombine.low %v320_v40, %v324_v41 }
  0xee   :  { %1125 = vmatpush1.bf16.msra.mxu0 %v7895_v26  ;;  %1166 = vmatpush1.bf16.msra.mxu1 %v7897_v27  ;;  %v315_v47 = vld [vmem:[#allocation5 + $0x60] sm:$0xff]  ;;  %v316_v49 = vld [vmem:[#allocation5 + $0x68] sm:$0xff] }
  0xef   :  { %1126 = vmatprep.subr.bf16.mxu0 %v7888_v28  ;;  %1167 = vmatprep.subr.bf16.mxu1 %v7890_v29  ;;  %v7864_v52 = vcombine.high %v311_v46, %v315_v47  ;;  %v7866_v54 = vcombine.high %v312_v48, %v316_v49  ;;  %v303_v55 = vld [vmem:[#allocation5] sm:$0xff]  ;;  %v304_v58 = vld [vmem:[#allocation5 + $0x8] sm:$0xff]  ;;  %v7863_v60 = vcombine.low %v311_v46, %v315_v47 }
  0xf0   :  { %v307_v56 = vld [vmem:[#allocation5 + $0x20] sm:$0xff]  ;;  %v308_v59 = vld [vmem:[#allocation5 + $0x28] sm:$0xff]  ;;  %v7865_v61 = vcombine.low %v312_v48, %v316_v49 }
  0xf1   :  { %v7856_v62 = vcombine.high %v303_v55, %v307_v56  ;;  %v7858_v63 = vcombine.high %v304_v58, %v308_v59  ;;  %v423_v0 = vld [vmem:[#allocation5 + $0x3c0] sm:$0xff]  ;;  %v424_v2 = vld [vmem:[#allocation5 + $0x3c8] sm:$0xff]  ;;  %v7855_v4 = vcombine.low %v303_v55, %v307_v56  ;;  %v7857_v5 = vcombine.low %v304_v58, %v308_v59 }
  0xf2   :  { %1127 = vmatpush1.bf16.msra.mxu0 %v7887_v34  ;;  %1168 = vmatpush1.bf16.msra.mxu1 %v7889_v35  ;;  %v427_v1 = vld [vmem:[#allocation5 + $0x3e0] sm:$0xff]  ;;  %v428_v3 = vld [vmem:[#allocation5 + $0x3e8] sm:$0xff] }
  0xf3   :  { %1128 = vmatprep.subr.bf16.mxu0 %v7880_v36  ;;  %1169 = vmatprep.subr.bf16.mxu1 %v7882_v37  ;;  %v7976_v6 = vcombine.high %v423_v0, %v427_v1  ;;  %v7978_v7 = vcombine.high %v424_v2, %v428_v3  ;;  %v415_v8 = vld [vmem:[#allocation5 + $0x380] sm:$0xff]  ;;  %v416_v10 = vld [vmem:[#allocation5 + $0x388] sm:$0xff]  ;;  %v7975_v12 = vcombine.low %v423_v0, %v427_v1  ;;  %v361_v1 = vld [vmem:[#allocation5 + $0x1d0] sm:$0xff] }
  0xf4   :  { %v419_v9 = vld [vmem:[#allocation5 + $0x3a0] sm:$0xff]  ;;  %v420_v11 = vld [vmem:[#allocation5 + $0x3a8] sm:$0xff]  ;;  %v7977_v13 = vcombine.low %v424_v2, %v428_v3  ;;  %v365_v3 = vld [vmem:[#allocation5 + $0x1f0] sm:$0xff] }
  0xf5   :  { %v7968_v14 = vcombine.high %v415_v8, %v419_v9  ;;  %v7970_v15 = vcombine.high %v416_v10, %v420_v11  ;;  %v407_v16 = vld [vmem:[#allocation5 + $0x340] sm:$0xff]  ;;  %v408_v18 = vld [vmem:[#allocation5 + $0x348] sm:$0xff]  ;;  %v7967_v20 = vcombine.low %v415_v8, %v419_v9  ;;  %v7969_v21 = vcombine.low %v416_v10, %v420_v11  ;;  %v353_v9 = vld [vmem:[#allocation5 + $0x190] sm:$0xff] }
  0xf6   :  { %1129 = vmatpush1.bf16.msra.mxu0 %v7879_v42  ;;  %1170 = vmatpush1.bf16.msra.mxu1 %v7881_v43  ;;  %v411_v17 = vld [vmem:[#allocation5 + $0x360] sm:$0xff]  ;;  %v412_v19 = vld [vmem:[#allocation5 + $0x368] sm:$0xff]  ;;  %v7916_v8 = vcombine.high %v361_v1, %v365_v3  ;;  %v357_v11 = vld [vmem:[#allocation5 + $0x1b0] sm:$0xff] }
  0xf7   :  { %1130 = vmatprep.subr.bf16.mxu0 %v7872_v44  ;;  %1171 = vmatprep.subr.bf16.mxu1 %v7874_v45  ;;  %v7960_v22 = vcombine.high %v407_v16, %v411_v17  ;;  %v7962_v23 = vcombine.high %v408_v18, %v412_v19  ;;  %v399_v24 = vld [vmem:[#allocation5 + $0x300] sm:$0xff]  ;;  %v400_v26 = vld [vmem:[#allocation5 + $0x308] sm:$0xff]  ;;  %v7959_v28 = vcombine.low %v407_v16, %v411_v17 }
  0xf8   :  { %v403_v25 = vld [vmem:[#allocation5 + $0x320] sm:$0xff]  ;;  %v404_v27 = vld [vmem:[#allocation5 + $0x328] sm:$0xff]  ;;  %v7961_v29 = vcombine.low %v408_v18, %v412_v19  ;;  %v7908_v17 = vcombine.high %v353_v9, %v357_v11  ;;  %v345_v18 = vld [vmem:[#allocation5 + $0x150] sm:$0xff] }
  0xf9   :  { %v7952_v30 = vcombine.high %v399_v24, %v403_v25  ;;  %v7954_v31 = vcombine.high %v400_v26, %v404_v27  ;;  %v391_v32 = vld [vmem:[#allocation5 + $0x2c0] sm:$0xff]  ;;  %v392_v34 = vld [vmem:[#allocation5 + $0x2c8] sm:$0xff]  ;;  %v7951_v36 = vcombine.low %v399_v24, %v403_v25  ;;  %v7953_v37 = vcombine.low %v400_v26, %v404_v27  ;;  %v337_v25 = vld [vmem:[#allocation5 + $0x110] sm:$0xff] }
  0xfa   :  { %1131 = vmatpush1.bf16.msra.mxu0 %v7871_v50  ;;  %1172 = vmatpush1.bf16.msra.mxu1 %v7873_v51  ;;  %v395_v33 = vld [vmem:[#allocation5 + $0x2e0] sm:$0xff]  ;;  %v396_v35 = vld [vmem:[#allocation5 + $0x2e8] sm:$0xff]  ;;  %v341_v27 = vld [vmem:[#allocation5 + $0x130] sm:$0xff] }
  0xfb   :  { %1132 = vmatprep.subr.bf16.mxu0 %v7864_v52  ;;  %1173 = vmatprep.subr.bf16.mxu1 %v7866_v54  ;;  %v7944_v38 = vcombine.high %v391_v32, %v395_v33  ;;  %v383_v39 = vld [vmem:[#allocation5 + $0x280] sm:$0xff]  ;;  %v7946_v40 = vcombine.high %v392_v34, %v396_v35  ;;  %v384_v42 = vld [vmem:[#allocation5 + $0x288] sm:$0xff]  ;;  %v7943_v44 = vcombine.low %v391_v32, %v395_v33  ;;  %v329_v33 = vld [vmem:[#allocation5 + $0xd0] sm:$0xff] }
  0xfc   :  { %v387_v41 = vld [vmem:[#allocation5 + $0x2a0] sm:$0xff]  ;;  %v388_v43 = vld [vmem:[#allocation5 + $0x2a8] sm:$0xff]  ;;  %v7945_v45 = vcombine.low %v392_v34, %v396_v35  ;;  %v7892_v32 = vcombine.high %v337_v25, %v341_v27  ;;  %v333_v35 = vld [vmem:[#allocation5 + $0xf0] sm:$0xff] }
  0xfd   :  { %v7936_v46 = vcombine.high %v383_v39, %v387_v41  ;;  %v375_v47 = vld [vmem:[#allocation5 + $0x240] sm:$0xff]  ;;  %v7938_v48 = vcombine.high %v384_v42, %v388_v43  ;;  %v376_v50 = vld [vmem:[#allocation5 + $0x248] sm:$0xff]  ;;  %v7935_v52 = vcombine.low %v383_v39, %v387_v41  ;;  %v7937_v54 = vcombine.low %v384_v42, %v388_v43  ;;  %v321_v41 = vld [vmem:[#allocation5 + $0x90] sm:$0xff] }
  0xfe   :  { %1133 = vmatpush1.bf16.msra.mxu0 %v7863_v60  ;;  %1174 = vmatpush1.bf16.msra.mxu1 %v7865_v61  ;;  %v379_v49 = vld [vmem:[#allocation5 + $0x260] sm:$0xff]  ;;  %v380_v51 = vld [vmem:[#allocation5 + $0x268] sm:$0xff]  ;;  %v325_v42 = vld [vmem:[#allocation5 + $0xb0] sm:$0xff] }
  0xff   :  { %1134 = vmatprep.subr.bf16.mxu0 %v7856_v62  ;;  %1175 = vmatprep.subr.bf16.mxu1 %v7858_v63  ;;  %v7928_v55 = vcombine.high %v375_v47, %v379_v49  ;;  %v367_v56 = vld [vmem:[#allocation5 + $0x200] sm:$0xff]  ;;  %v7930_v58 = vcombine.high %v376_v50, %v380_v51  ;;  %v368_v60 = vld [vmem:[#allocation5 + $0x208] sm:$0xff]  ;;  %v7927_v62 = vcombine.low %v375_v47, %v379_v49  ;;  %v322_v43 = vld [vmem:[#allocation5 + $0x98] sm:$0xff] }
 0x100   :  { %v371_v59 = vld [vmem:[#allocation5 + $0x220] sm:$0xff]  ;;  %v372_v61 = vld [vmem:[#allocation5 + $0x228] sm:$0xff]  ;;  %v7929_v63 = vcombine.low %v376_v50, %v380_v51  ;;  %v317_v47 = vld [vmem:[#allocation5 + $0x70] sm:$0xff]  ;;  %v7876_v49 = vcombine.high %v321_v41, %v325_v42 }
 0x101   :  { %v7920_v0 = vcombine.high %v367_v56, %v371_v59  ;;  %v7922_v2 = vcombine.high %v368_v60, %v372_v61  ;;  %v314_v50 = vld [vmem:[#allocation5 + $0x58] sm:$0xff] }
 0x102   :  { %1135 = vmatpush1.bf16.msra.mxu0 %v7855_v4  ;;  %1176 = vmatpush1.bf16.msra.mxu1 %v7857_v5  ;;  %v362_v4 = vld [vmem:[#allocation5 + $0x1d8] sm:$0xff] }
 0x103   :  { %1136 = vmatprep.subr.bf16.mxu0 %v7976_v6  ;;  %1177 = vmatprep.subr.bf16.mxu1 %v7978_v7  ;;  %v366_v5 = vld [vmem:[#allocation5 + $0x1f8] sm:$0xff]  ;;  %v7919_v6 = vcombine.low %v367_v56, %v371_v59  ;;  %v7921_v7 = vcombine.low %v368_v60, %v372_v61  ;;  %v309_v56 = vld [vmem:[#allocation5 + $0x30] sm:$0xff] }
 0x104   :  { %v7918_v10 = vcombine.high %v362_v4, %v366_v5  ;;  %v7917_v16 = vcombine.low %v362_v4, %v366_v5  ;;  %v318_v51 = vld [vmem:[#allocation5 + $0x78] sm:$0xff] }
 0x105   :  { %v306_v60 = vld [vmem:[#allocation5 + $0x18] sm:$0xff] }
 0x106   :  { %1137 = vmatpush2.bf16.msra.mxu0 %v7975_v12  ;;  %1178 = vmatpush2.bf16.msra.mxu1 %v7977_v13  ;;  %v354_v12 = vld [vmem:[#allocation5 + $0x198] sm:$0xff]  ;;  %v10469_v13 = vcombine.low %v10459_v53, %v10459_v53  ;;  %v7907_v53 = vcombine.low %v353_v9, %v357_v11  ;;  %v421_v9 = vld [vmem:[#allocation5 + $0x3b0] sm:$0xff] }
 0x107   :  { %1138 = vmatprep.subr.bf16.mxu0 %v7968_v14  ;;  %1179 = vmatprep.subr.bf16.mxu1 %v7970_v15  ;;  %v358_v14 = vld [vmem:[#allocation5 + $0x1b8] sm:$0xff]  ;;  %v7915_v15 = vcombine.low %v361_v1, %v365_v3  ;;  %v429_v1 = vld [vmem:[#allocation5 + $0x3f0] sm:$0xff] }
 0x108   :  { %v7910_v19 = vcombine.high %v354_v12, %v358_v14  ;;  %v310_v61 = vld [vmem:[#allocation5 + $0x38] sm:$0xff] }
 0x109   :  { %v426_v4 = vld [vmem:[#allocation5 + $0x3d8] sm:$0xff] }
 0x10a   :  { %1139 = vmatpush2.bf16.msra.mxu0 %v7967_v20  ;;  %1180 = vmatpush2.bf16.msra.mxu1 %v7969_v21  ;;  %v349_v20 = vld [vmem:[#allocation5 + $0x170] sm:$0xff]  ;;  %v346_v21 = vld [vmem:[#allocation5 + $0x158] sm:$0xff] }
 0x10b   :  { %1140 = vmatprep.subr.bf16.mxu0 %v7960_v22  ;;  %1181 = vmatprep.subr.bf16.mxu1 %v7962_v23  ;;  %v350_v22 = vld [vmem:[#allocation5 + $0x178] sm:$0xff]  ;;  %v7909_v23 = vcombine.low %v354_v12, %v358_v14  ;;  %v7900_v24 = vcombine.high %v345_v18, %v349_v20 }
 0x10c   :  { %v7902_v26 = vcombine.high %v346_v21, %v350_v22  ;;  %v430_v5 = vld [vmem:[#allocation5 + $0x3f8] sm:$0xff] }
 0x10d   :  { %v418_v12 = vld [vmem:[#allocation5 + $0x398] sm:$0xff] }
 0x10e   :  { %1141 = vmatpush2.bf16.msra.mxu0 %v7959_v28  ;;  %1182 = vmatpush2.bf16.msra.mxu1 %v7961_v29  ;;  %v338_v28 = vld [vmem:[#allocation5 + $0x118] sm:$0xff] }
 0x10f   :  { %1142 = vmatprep.subr.bf16.mxu0 %v7952_v30  ;;  %1183 = vmatprep.subr.bf16.mxu1 %v7954_v31  ;;  %v342_v29 = vld [vmem:[#allocation5 + $0x138] sm:$0xff]  ;;  %v7899_v30 = vcombine.low %v345_v18, %v349_v20  ;;  %v7901_v31 = vcombine.low %v346_v21, %v350_v22  ;;  %v413_v18 = vld [vmem:[#allocation5 + $0x370] sm:$0xff] }
 0x110   :  { %v7894_v34 = vcombine.high %v338_v28, %v342_v29  ;;  %v7893_v39 = vcombine.low %v338_v28, %v342_v29  ;;  %v422_v14 = vld [vmem:[#allocation5 + $0x3b8] sm:$0xff] }
 0x111   :  { %v410_v21 = vld [vmem:[#allocation5 + $0x358] sm:$0xff] }
 0x112   :  { %1143 = vmatpush2.bf16.msra.mxu0 %v7951_v36  ;;  %1184 = vmatpush2.bf16.msra.mxu1 %v7953_v37  ;;  %v330_v36 = vld [vmem:[#allocation5 + $0xd8] sm:$0xff] }
 0x113   :  { %1144 = vmatprep.subr.bf16.mxu0 %v7944_v38  ;;  %1185 = vmatprep.subr.bf16.mxu1 %v7946_v40  ;;  %v334_v37 = vld [vmem:[#allocation5 + $0xf8] sm:$0xff]  ;;  %v7891_v38 = vcombine.low %v337_v25, %v341_v27  ;;  %v7884_v40 = vcombine.high %v329_v33, %v333_v35  ;;  %v405_v25 = vld [vmem:[#allocation5 + $0x330] sm:$0xff] }
 0x114   :  { %v414_v22 = vld [vmem:[#allocation5 + $0x378] sm:$0xff] }
 0x115   :  { %v402_v28 = vld [vmem:[#allocation5 + $0x318] sm:$0xff] }
 0x116   :  { %1145 = vmatpush2.bf16.msra.mxu0 %v7943_v44  ;;  %1186 = vmatpush2.bf16.msra.mxu1 %v7945_v45  ;;  %v326_v44 = vld [vmem:[#allocation5 + $0xb8] sm:$0xff]  ;;  %v7883_v45 = vcombine.low %v329_v33, %v333_v35  ;;  %v397_v33 = vld [vmem:[#allocation5 + $0x2f0] sm:$0xff] }
 0x117   :  { %1146 = vmatprep.subr.bf16.mxu0 %v7936_v46  ;;  %1187 = vmatprep.subr.bf16.mxu1 %v7938_v48  ;;  %v313_v46 = vld [vmem:[#allocation5 + $0x50] sm:$0xff]  ;;  %v7885_v48 = vcombine.low %v330_v36, %v334_v37  ;;  %v406_v29 = vld [vmem:[#allocation5 + $0x338] sm:$0xff] }
 0x118   :  { %v7868_v59 = vcombine.high %v313_v46, %v317_v47 }
 0x11a   :  { %1147 = vmatpush2.bf16.msra.mxu0 %v7935_v52  ;;  %1188 = vmatpush2.bf16.msra.mxu1 %v7937_v54  ;;  %v7878_v52 = vcombine.high %v322_v43, %v326_v44  ;;  %v7875_v54 = vcombine.low %v321_v41, %v325_v42  ;;  %v389_v41 = vld [vmem:[#allocation5 + $0x2b0] sm:$0xff] }
 0x11b   :  { %1148 = vmatprep.subr.bf16.mxu0 %v7928_v55  ;;  %1189 = vmatprep.subr.bf16.mxu1 %v7930_v58  ;;  %v305_v55 = vld [vmem:[#allocation5 + $0x10] sm:$0xff]  ;;  %v7877_v58 = vcombine.low %v322_v43, %v326_v44  ;;  %v386_v43 = vld [vmem:[#allocation5 + $0x298] sm:$0xff] }
 0x11c   :  { %v7860_v3 = vcombine.high %v305_v55, %v309_v56  ;;  %v390_v44 = vld [vmem:[#allocation5 + $0x2b8] sm:$0xff] }
 0x11e   :  { %1149 = vmatpush2.bf16.msra.mxu0 %v7927_v62  ;;  %1190 = vmatpush2.bf16.msra.mxu1 %v7929_v63  ;;  %v7870_v62 = vcombine.high %v314_v50, %v318_v51  ;;  %v7867_v63 = vcombine.low %v313_v46, %v317_v47  ;;  %v377_v47 = vld [vmem:[#allocation5 + $0x250] sm:$0xff] }
 0x11f   :  { %1150 = vmatprep.subr.bf16.mxu0 %v7920_v0  ;;  %1191 = vmatprep.subr.bf16.mxu1 %v7922_v2  ;;  %v425_v0 = vld [vmem:[#allocation5 + $0x3d0] sm:$0xff]  ;;  %v7869_v2 = vcombine.low %v314_v50, %v318_v51  ;;  %v378_v51 = vld [vmem:[#allocation5 + $0x258] sm:$0xff] }
 0x120   :  { %v7980_v11 = vcombine.high %v425_v0, %v429_v1 }
 0x122   :  { %1151 = vmatpush2.bf16.msra.mxu0 %v7919_v6  ;;  %1192 = vmatpush2.bf16.msra.mxu1 %v7921_v7  ;;  %v7862_v6 = vcombine.high %v306_v60, %v310_v61  ;;  %v7859_v7 = vcombine.low %v305_v55, %v309_v56  ;;  %v369_v56 = vld [vmem:[#allocation5 + $0x210] sm:$0xff] }
 0x123   :  { %1202 = vmatprep.subr.bf16.mxu0 %v7916_v8  ;;  %1243 = vmatprep.subr.bf16.mxu1 %v7918_v10  ;;  %v417_v8 = vld [vmem:[#allocation5 + $0x390] sm:$0xff]  ;;  %v7861_v10 = vcombine.low %v306_v60, %v310_v61  ;;  %v370_v61 = vld [vmem:[#allocation5 + $0x218] sm:$0xff] }
 0x124   :  { %v7972_v20 = vcombine.high %v417_v8, %v421_v9 }
 0x125   :  { %1153 = vmatmul.mubr.bf16.vlgmr.msra.gmra.mxu0 %v10469_v13  ;;  %1194 = vmatmul.mubr.bf16.vlgmr.msra.gmra.mxu1 %v10469_v13 }
 0x126   :  { %1203 = vmatpush1.bf16.msra.mxu0 %v7915_v15  ;;  %1244 = vmatpush1.bf16.msra.mxu1 %v7917_v16  ;;  %v7982_v15 = vcombine.high %v426_v4, %v430_v5  ;;  %v7979_v16 = vcombine.low %v425_v0, %v429_v1 }
 0x127   :  { %1204 = vmatprep.subr.bf16.mxu0 %v7908_v17  ;;  %1245 = vmatprep.subr.bf16.mxu1 %v7910_v19  ;;  %v409_v17 = vld [vmem:[#allocation5 + $0x350] sm:$0xff]  ;;  %v7981_v19 = vcombine.low %v426_v4, %v430_v5  ;;  %v8991_v4 = vld [vmem:[#allocation8 + $0xe4] ss:$16 sps:$4 sm:$0xff]  }
 0x128   :  { %1234 = vmatprep.mubr.bf16.mxu0 %v10463_v57  ;;  %1275 = vmatprep.mubr.bf16.mxu1 %v10463_v57  ;;  %v7886_v57 = vcombine.high %v330_v36, %v334_v37  ;;  %v7964_v27 = vcombine.high %v409_v17, %v413_v18  ;;  %v394_v36 = vld [vmem:[#allocation5 + $0x2d8] sm:$0xff] }
 0x129   :  { %v398_v37 = vld [vmem:[#allocation5 + $0x2f8] sm:$0xff] }
 0x12a   :  { %1205 = vmatpush1.bf16.msra.mxu0 %v7907_v53  ;;  %1246 = vmatpush1.bf16.msra.mxu1 %v7909_v23  ;;  %v7974_v53 = vcombine.high %v418_v12, %v422_v14  ;;  %v7971_v23 = vcombine.low %v417_v8, %v421_v9  ;;  %v8989_v8 = vld [vmem:[#allocation8 + $0xe0] ss:$16 sps:$4 sm:$0xff]  }
 0x12b   :  { %1206 = vmatprep.subr.bf16.mxu0 %v7900_v24  ;;  %1247 = vmatprep.subr.bf16.mxu1 %v7902_v26  ;;  %v401_v24 = vld [vmem:[#allocation5 + $0x310] sm:$0xff]  ;;  %v7973_v26 = vcombine.low %v418_v12, %v422_v14  ;;  %v8992_v9 = vld [vmem:[#allocation8 + $0x2e0] ss:$16 sps:$4 sm:$0xff]  }
 0x12c   :  { %v7956_v35 = vcombine.high %v401_v24, %v405_v25  ;;  %v8995_v12 = vld [vmem:[#allocation8 + $0xc0] ss:$16 sps:$4 sm:$0xff]  }
 0x12d   :  { %v8998_v14 = vld [vmem:[#allocation8 + $0x2c0] ss:$16 sps:$4 sm:$0xff]  }
 0x12e   :  { %1207 = vmatpush1.bf16.msra.mxu0 %v7899_v30  ;;  %1248 = vmatpush1.bf16.msra.mxu1 %v7901_v31  ;;  %v7966_v30 = vcombine.high %v410_v21, %v414_v22  ;;  %v7963_v31 = vcombine.low %v409_v17, %v413_v18  ;;  %v9001_v17 = vld [vmem:[#allocation8 + $0xa0] ss:$16 sps:$4 sm:$0xff]  }
 0x12f   :  { %1208 = vmatprep.subr.bf16.mxu0 %v7892_v32  ;;  %1249 = vmatprep.subr.bf16.mxu1 %v7894_v34  ;;  %v393_v32 = vld [vmem:[#allocation5 + $0x2d0] sm:$0xff]  ;;  %v7965_v34 = vcombine.low %v410_v21, %v414_v22  ;;  %v9004_v18 = vld [vmem:[#allocation8 + $0x2a0] ss:$16 sps:$4 sm:$0xff]  }
 0x130   :  { %v7948_v42 = vcombine.high %v393_v32, %v397_v33  ;;  %v7947_v46 = vcombine.low %v393_v32, %v397_v33  ;;  %v9007_v21 = vld [vmem:[#allocation8 + $0x80] ss:$16 sps:$4 sm:$0xff]   ;;  %v9033_v33 = vld [vmem:[#allocation8 + $0x4] ss:$16 sps:$4 sm:$0xff]  }
 0x131   :  { %v9010_v22 = vld [vmem:[#allocation8 + $0x280] ss:$16 sps:$4 sm:$0xff]  }
 0x132   :  { %1209 = vmatpush1.bf16.msra.mxu0 %v7891_v38  ;;  %1250 = vmatpush1.bf16.msra.mxu1 %v7893_v39  ;;  %v7958_v38 = vcombine.high %v402_v28, %v406_v29  ;;  %v7955_v39 = vcombine.low %v401_v24, %v405_v25  ;;  %v9016_v24 = vld [vmem:[#allocation8 + $0x260] ss:$16 sps:$4 sm:$0xff]   ;;  %v9021_v25 = vld [vmem:[#allocation8 + $0x44] ss:$16 sps:$4 sm:$0xff]  }
 0x133   :  { %1210 = vmatprep.subr.bf16.mxu0 %v7884_v40  ;;  %1251 = vmatprep.subr.bf16.mxu1 %v7886_v57  ;;  %v385_v40 = vld [vmem:[#allocation5 + $0x290] sm:$0xff]  ;;  %v7957_v57 = vcombine.low %v402_v28, %v406_v29  ;;  %v9022_v28 = vld [vmem:[#allocation8 + $0x240] ss:$16 sps:$4 sm:$0xff]   ;;  %v9027_v29 = vld [vmem:[#allocation8 + $0x24] ss:$16 sps:$4 sm:$0xff]  }
 0x134   :  { %v7940_v50 = vcombine.high %v385_v40, %v389_v41  ;;  %v7939_v55 = vcombine.low %v385_v40, %v389_v41  ;;  %v9028_v32 = vld [vmem:[#allocation8 + $0x220] ss:$16 sps:$4 sm:$0xff]   ;;  %v9045_v41 = vld [vmem:[#allocation8 + $0x1c4] ss:$16 sps:$4 sm:$0xff]  }
 0x135   :  { %v9040_v40 = vld [vmem:[#allocation8 + $0x3e0] ss:$16 sps:$4 sm:$0xff]  }
 0x136   :  { %1211 = vmatpush1.bf16.msra.mxu0 %v7883_v45  ;;  %1252 = vmatpush1.bf16.msra.mxu1 %v7885_v48  ;;  %v7950_v45 = vcombine.high %v394_v36, %v398_v37  ;;  %v381_v48 = vld [vmem:[#allocation5 + $0x270] sm:$0xff] }
 0x137   :  { %1212 = vmatprep.subr.bf16.mxu0 %v7876_v49  ;;  %1253 = vmatprep.subr.bf16.mxu1 %v7878_v52  ;;  %v7949_v49 = vcombine.low %v394_v36, %v398_v37  ;;  %v382_v52 = vld [vmem:[#allocation5 + $0x278] sm:$0xff]  ;;  %v7932_v60 = vcombine.high %v377_v47, %v381_v48  ;;  %v7931_v0 = vcombine.low %v377_v47, %v381_v48 }
 0x138   :  { %v7933_v1 = vcombine.low %v378_v51, %v382_v52  ;;  %v9034_v36 = vld [vmem:[#allocation8 + $0x200] ss:$16 sps:$4 sm:$0xff]   ;;  %v9039_v37 = vld [vmem:[#allocation8 + $0x1e4] ss:$16 sps:$4 sm:$0xff]  }
 0x139   :  { %v9052_v47 = vld [vmem:[#allocation8 + $0x3a0] ss:$16 sps:$4 sm:$0xff]   ;;  %v9057_v48 = vld [vmem:[#allocation8 + $0x184] ss:$16 sps:$4 sm:$0xff]  }
 0x13a   :  { %1213 = vmatpush1.bf16.msra.mxu0 %v7875_v54  ;;  %1254 = vmatpush1.bf16.msra.mxu1 %v7877_v58  ;;  %v7942_v54 = vcombine.high %v386_v43, %v390_v44  ;;  %v373_v58 = vld [vmem:[#allocation5 + $0x230] sm:$0xff] }
 0x13b   :  { %1214 = vmatprep.subr.bf16.mxu0 %v7868_v59  ;;  %1255 = vmatprep.subr.bf16.mxu1 %v7870_v62  ;;  %v7941_v59 = vcombine.low %v386_v43, %v390_v44  ;;  %v374_v62 = vld [vmem:[#allocation5 + $0x238] sm:$0xff]  ;;  %v7923_v5 = vcombine.low %v369_v56, %v373_v58 }
 0x13c   :  { %v9046_v43 = vld [vmem:[#allocation8 + $0x3c0] ss:$16 sps:$4 sm:$0xff]   ;;  %v9051_v44 = vld [vmem:[#allocation8 + $0x1a4] ss:$16 sps:$4 sm:$0xff]  }
 0x13e   :  { %1215 = vmatpush1.bf16.msra.mxu0 %v7867_v63  ;;  %1256 = vmatpush1.bf16.msra.mxu1 %v7869_v2  ;;  %v7934_v63 = vcombine.high %v378_v51, %v382_v52  ;;  %v7924_v2 = vcombine.high %v369_v56, %v373_v58  ;;  %v9058_v51 = vld [vmem:[#allocation8 + $0x380] ss:$16 sps:$4 sm:$0xff]   ;;  %v9063_v52 = vld [vmem:[#allocation8 + $0x164] ss:$16 sps:$4 sm:$0xff]  }
 0x13f   :  { %1216 = vmatprep.subr.bf16.mxu0 %v7860_v3  ;;  %1257 = vmatprep.subr.bf16.mxu1 %v7862_v6  ;;  %v7926_v3 = vcombine.high %v370_v61, %v374_v62  ;;  %v8994_v6 = vld [vmem:[#allocation8 + $0x2e4] ss:$16 sps:$4 sm:$0xff]   ;;  %v9064_v56 = vld [vmem:[#allocation8 + $0x360] ss:$16 sps:$4 sm:$0xff]  }
 0x140   :  { %v9069_v58 = vld [vmem:[#allocation8 + $0x144] ss:$16 sps:$4 sm:$0xff]  }
 0x142   :  { %1217 = vmatpush1.bf16.msra.mxu0 %v7859_v7  ;;  %1258 = vmatpush1.bf16.msra.mxu1 %v7861_v10  ;;  %v7925_v7 = vcombine.low %v370_v61, %v374_v62  ;;  %v8997_v10 = vld [vmem:[#allocation8 + $0xc4] ss:$16 sps:$4 sm:$0xff]   ;;  %v9070_v61 = vld [vmem:[#allocation8 + $0x340] ss:$16 sps:$4 sm:$0xff]  }
 0x143   :  { %1218 = vmatprep.subr.bf16.mxu0 %v7980_v11  ;;  %1259 = vmatprep.subr.bf16.mxu1 %v7982_v15  ;;  %v9000_v11 = vld [vmem:[#allocation8 + $0x2c4] ss:$16 sps:$4 sm:$0xff]  }
 0x144   :  { %v9003_v15 = vld [vmem:[#allocation8 + $0xa4] ss:$16 sps:$4 sm:$0xff]  }
 0x145   :  { %v9075_v62 = vld [vmem:[#allocation8 + $0x124] ss:$16 sps:$4 sm:$0xff]  }
 0x146   :  { %1219 = vmatpush2.bf16.msra.mxu0 %v7979_v16  ;;  %1260 = vmatpush2.bf16.msra.mxu1 %v7981_v19  ;;  %v9006_v16 = vld [vmem:[#allocation8 + $0x2a4] ss:$16 sps:$4 sm:$0xff]  }
 0x147   :  { %1220 = vmatprep.subr.bf16.mxu0 %v7972_v20  ;;  %1261 = vmatprep.subr.bf16.mxu1 %v7974_v53  ;;  %v9009_v19 = vld [vmem:[#allocation8 + $0x84] ss:$16 sps:$4 sm:$0xff]  }
 0x148   :  { %v9012_v20 = vld [vmem:[#allocation8 + $0x284] ss:$16 sps:$4 sm:$0xff]  }
 0x149   :  { %v9015_v53 = vld [vmem:[#allocation8 + $0x64] ss:$16 sps:$4 sm:$0xff]  }
 0x14a   :  { %1221 = vmatpush2.bf16.msra.mxu0 %v7971_v23  ;;  %1262 = vmatpush2.bf16.msra.mxu1 %v7973_v26  ;;  %v9018_v23 = vld [vmem:[#allocation8 + $0x264] ss:$16 sps:$4 sm:$0xff]  }
 0x14b   :  { %1222 = vmatprep.subr.bf16.mxu0 %v7964_v27  ;;  %1263 = vmatprep.subr.bf16.mxu1 %v7966_v30  ;;  %v9024_v26 = vld [vmem:[#allocation8 + $0x244] ss:$16 sps:$4 sm:$0xff]   ;;  %v9019_v27 = vld [vmem:[#allocation8 + $0x40] ss:$16 sps:$4 sm:$0xff]  }
 0x14c   :  { %v9030_v30 = vld [vmem:[#allocation8 + $0x224] ss:$16 sps:$4 sm:$0xff]  }
 0x14e   :  { %1223 = vmatpush2.bf16.msra.mxu0 %v7963_v31  ;;  %1264 = vmatpush2.bf16.msra.mxu1 %v7965_v34  ;;  %v9025_v31 = vld [vmem:[#allocation8 + $0x20] ss:$16 sps:$4 sm:$0xff]   ;;  %v9036_v34 = vld [vmem:[#allocation8 + $0x204] ss:$16 sps:$4 sm:$0xff]  }
 0x14f   :  { %1224 = vmatprep.subr.bf16.mxu0 %v7956_v35  ;;  %1265 = vmatprep.subr.bf16.mxu1 %v7958_v38  ;;  %v9031_v35 = vld [vmem:[#allocation8] ss:$16 sps:$4 sm:$0xff]   ;;  %v9042_v38 = vld [vmem:[#allocation8 + $0x3e4] ss:$16 sps:$4 sm:$0xff]  }
 0x152   :  { %1225 = vmatpush2.bf16.msra.mxu0 %v7955_v39  ;;  %1266 = vmatpush2.bf16.msra.mxu1 %v7957_v57  ;;  %v9037_v39 = vld [vmem:[#allocation8 + $0x1e0] ss:$16 sps:$4 sm:$0xff]   ;;  %v9048_v57 = vld [vmem:[#allocation8 + $0x3c4] ss:$16 sps:$4 sm:$0xff]  }
 0x153   :  { %1226 = vmatprep.subr.bf16.mxu0 %v7948_v42  ;;  %1267 = vmatprep.subr.bf16.mxu1 %v7950_v45  ;;  %v9043_v42 = vld [vmem:[#allocation8 + $0x1c0] ss:$16 sps:$4 sm:$0xff]   ;;  %v9054_v45 = vld [vmem:[#allocation8 + $0x3a4] ss:$16 sps:$4 sm:$0xff]  }
 0x156   :  { %1227 = vmatpush2.bf16.msra.mxu0 %v7947_v46  ;;  %1268 = vmatpush2.bf16.msra.mxu1 %v7949_v49  ;;  %v9049_v46 = vld [vmem:[#allocation8 + $0x1a0] ss:$16 sps:$4 sm:$0xff]   ;;  %v9060_v49 = vld [vmem:[#allocation8 + $0x384] ss:$16 sps:$4 sm:$0xff]  }
 0x157   :  { %1228 = vmatprep.subr.bf16.mxu0 %v7940_v50  ;;  %1269 = vmatprep.subr.bf16.mxu1 %v7942_v54  ;;  %v9055_v50 = vld [vmem:[#allocation8 + $0x180] ss:$16 sps:$4 sm:$0xff]   ;;  %v9066_v54 = vld [vmem:[#allocation8 + $0x364] ss:$16 sps:$4 sm:$0xff]  }
 0x15a   :  { %1229 = vmatpush2.bf16.msra.mxu0 %v7939_v55  ;;  %1270 = vmatpush2.bf16.msra.mxu1 %v7941_v59  ;;  %v9061_v55 = vld [vmem:[#allocation8 + $0x160] ss:$16 sps:$4 sm:$0xff]   ;;  %v9072_v59 = vld [vmem:[#allocation8 + $0x344] ss:$16 sps:$4 sm:$0xff]  }
 0x15b   :  { %1230 = vmatprep.subr.bf16.mxu0 %v7932_v60  ;;  %1271 = vmatprep.subr.bf16.mxu1 %v7934_v63  ;;  %v9067_v60 = vld [vmem:[#allocation8 + $0x140] ss:$16 sps:$4 sm:$0xff]   ;;  %v9078_v63 = vld [vmem:[#allocation8 + $0x324] ss:$16 sps:$4 sm:$0xff]  }
 0x15e   :  { %1231 = vmatpush2.bf16.msra.mxu0 %v7931_v0  ;;  %1272 = vmatpush2.bf16.msra.mxu1 %v7933_v1  ;;  %v9073_v0 = vld [vmem:[#allocation8 + $0x120] ss:$16 sps:$4 sm:$0xff]  }
 0x15f   :  { %1232 = vmatprep.subr.bf16.mxu0 %v7924_v2  ;;  %1273 = vmatprep.subr.bf16.mxu1 %v7926_v3  ;;  %v9076_v1 = vld [vmem:[#allocation8 + $0x320] ss:$16 sps:$4 sm:$0xff]   ;;  %v9081_v2 = vld [vmem:[#allocation8 + $0x104] ss:$16 sps:$4 sm:$0xff]  }
 0x160   :  { %v9084_v3 = vld [vmem:[#allocation8 + $0x304] ss:$16 sps:$4 sm:$0xff]  }
 0x162   :  { %1233 = vmatpush2.bf16.msra.mxu0 %v7923_v5  ;;  %1274 = vmatpush2.bf16.msra.mxu1 %v7925_v7  ;;  %v9082_v5 = vld [vmem:[#allocation8 + $0x300] ss:$16 sps:$4 sm:$0xff]   ;;  %v9090_v7 = vld [vmem:[#allocation8 + $0x6e4] ss:$16 sps:$4 sm:$0xff]  }
 0x163   :  { %2858 = vmatprep.subr.bf16.mxu0 %v8991_v4  ;;  %2899 = vmatprep.subr.bf16.mxu1 %v8994_v6  ;;  %v9079_v4 = vld [vmem:[#allocation8 + $0x100] ss:$16 sps:$4 sm:$0xff]   ;;  %v9087_v6 = vld [vmem:[#allocation8 + $0x4e4] ss:$16 sps:$4 sm:$0xff]  }
 0x165   :  { %1235 = vmatmul.mubr.bf16.vlgmr.msra.gmra.mxu0 %v10469_v13  ;;  %1276 = vmatmul.mubr.bf16.vlgmr.msra.gmra.mxu1 %v10469_v13  ;;  %v9013_v13 = vld [vmem:[#allocation8 + $0x60] ss:$16 sps:$4 sm:$0xff]  }
 0x166   :  { %2859 = vmatpush1.bf16.msra.mxu0 %v8989_v8  ;;  %2900 = vmatpush1.bf16.msra.mxu1 %v8992_v9  ;;  %v433_v8 = vlaneseq }
 0x167   :  { %2860 = vmatprep.subr.bf16.mxu0 %v8997_v10  ;;  %2901 = vmatprep.subr.bf16.mxu1 %v9000_v11  ;;  %v10479_v10 = vld [vmem:[#allocation7] sm:$0xff] }
 0x168   :  { %v10477_v9 = vshrl.u32 %v433_v8, 7  ;;  %v9136_v8 = vld [vmem:[#allocation8 + $0x7e0] ss:$16 sps:$4 sm:$0xff]  }
 0x16a   :  { %2861 = vmatpush1.bf16.msra.mxu0 %v8995_v12  ;;  %2902 = vmatpush1.bf16.msra.mxu1 %v8998_v14  ;;  %v10482_v11 = vsub.s32 0, %v10477_v9  ;;  %v10485_v12 = vsub.s32 2, %v10477_v9  ;;  %v10488_v14 = vsub.s32 1, %v10477_v9 }
 0x16b   :  { %2862 = vmatprep.subr.bf16.mxu0 %v9003_v15  ;;  %2903 = vmatprep.subr.bf16.mxu1 %v9006_v16  ;;  %v10491_v15 = vsub.s32 3, %v10477_v9 }
 0x16c   :  { %v436_v16 = vrot.slane %v10479_v10, %v10482_v11 }
 0x16e   :  { %2863 = vmatpush1.bf16.msra.mxu0 %v9001_v17  ;;  %2904 = vmatpush1.bf16.msra.mxu1 %v9004_v18  ;;  %v444_v17 = vrot.slane %v10479_v10, %v10485_v12  ;;  %v440_v18 = vrot.slane %v10479_v10, %v10488_v14 }
 0x16f   :  { %2864 = vmatprep.subr.bf16.mxu0 %v9009_v19  ;;  %2905 = vmatprep.subr.bf16.mxu1 %v9012_v20  ;;  %v448_v20 = vrot.slane %v10479_v10, %v10491_v15 }
 0x172   :  { %2865 = vmatpush1.bf16.msra.mxu0 %v9007_v21  ;;  %2906 = vmatpush1.bf16.msra.mxu1 %v9010_v22 }
 0x173   :  { %2866 = vmatprep.subr.bf16.mxu0 %v9015_v53  ;;  %2907 = vmatprep.subr.bf16.mxu1 %v9018_v23 }
 0x176   :  { %2867 = vmatpush1.bf16.msra.mxu0 %v9013_v13  ;;  %2908 = vmatpush1.bf16.msra.mxu1 %v9016_v24 }
 0x177   :  { %2868 = vmatprep.subr.bf16.mxu0 %v9021_v25  ;;  %2909 = vmatprep.subr.bf16.mxu1 %v9024_v26 }
 0x17a   :  { %2869 = vmatpush1.bf16.msra.mxu0 %v9019_v27  ;;  %2910 = vmatpush1.bf16.msra.mxu1 %v9022_v28 }
 0x17b   :  { %2870 = vmatprep.subr.bf16.mxu0 %v9027_v29  ;;  %2911 = vmatprep.subr.bf16.mxu1 %v9030_v30 }
 0x17e   :  { %2871 = vmatpush1.bf16.msra.mxu0 %v9025_v31  ;;  %2912 = vmatpush1.bf16.msra.mxu1 %v9028_v32  ;;  %v9085_v31 = vld [vmem:[#allocation8 + $0x4e0] ss:$16 sps:$4 sm:$0xff]  }
 0x17f   :  { %2872 = vmatprep.subr.bf16.mxu0 %v9033_v33  ;;  %2913 = vmatprep.subr.bf16.mxu1 %v9036_v34  ;;  %v9088_v34 = vld [vmem:[#allocation8 + $0x6e0] ss:$16 sps:$4 sm:$0xff]  }
 0x182   :  { %2873 = vmatpush1.bf16.msra.mxu0 %v9031_v35  ;;  %2914 = vmatpush1.bf16.msra.mxu1 %v9034_v36  ;;  %v9093_v35 = vld [vmem:[#allocation8 + $0x4c4] ss:$16 sps:$4 sm:$0xff]  }
 0x183   :  { %2874 = vmatprep.subr.bf16.mxu0 %v9039_v37  ;;  %2915 = vmatprep.subr.bf16.mxu1 %v9042_v38 }
 0x186   :  { %2875 = vmatpush2.bf16.msra.mxu0 %v9037_v39  ;;  %2916 = vmatpush2.bf16.msra.mxu1 %v9040_v40 }
 0x187   :  { %2876 = vmatprep.subr.bf16.mxu0 %v9045_v41  ;;  %2917 = vmatprep.subr.bf16.mxu1 %v9048_v57  ;;  %v9091_v41 = vld [vmem:[#allocation8 + $0x4c0] ss:$16 sps:$4 sm:$0xff]   ;;  %v9096_v57 = vld [vmem:[#allocation8 + $0x6c4] ss:$16 sps:$4 sm:$0xff]  }
 0x18a   :  { %2877 = vmatpush2.bf16.msra.mxu0 %v9043_v42  ;;  %2918 = vmatpush2.bf16.msra.mxu1 %v9046_v43  ;;  %v9094_v42 = vld [vmem:[#allocation8 + $0x6c0] ss:$16 sps:$4 sm:$0xff]   ;;  %v9099_v43 = vld [vmem:[#allocation8 + $0x4a4] ss:$16 sps:$4 sm:$0xff]  }
 0x18b   :  { %2878 = vmatprep.subr.bf16.mxu0 %v9051_v44  ;;  %2919 = vmatprep.subr.bf16.mxu1 %v9054_v45  ;;  %v9102_v44 = vld [vmem:[#allocation8 + $0x6a4] ss:$16 sps:$4 sm:$0xff]   ;;  %v9097_v45 = vld [vmem:[#allocation8 + $0x4a0] ss:$16 sps:$4 sm:$0xff]  }
 0x18e   :  { %2879 = vmatpush2.bf16.msra.mxu0 %v9049_v46  ;;  %2920 = vmatpush2.bf16.msra.mxu1 %v9052_v47  ;;  %v9100_v46 = vld [vmem:[#allocation8 + $0x6a0] ss:$16 sps:$4 sm:$0xff]   ;;  %v9105_v47 = vld [vmem:[#allocation8 + $0x484] ss:$16 sps:$4 sm:$0xff]  }
 0x18f   :  { %2880 = vmatprep.subr.bf16.mxu0 %v9057_v48  ;;  %2921 = vmatprep.subr.bf16.mxu1 %v9060_v49  ;;  %v9103_v48 = vld [vmem:[#allocation8 + $0x480] ss:$16 sps:$4 sm:$0xff]   ;;  %v9108_v49 = vld [vmem:[#allocation8 + $0x684] ss:$16 sps:$4 sm:$0xff]  }
 0x192   :  { %2881 = vmatpush2.bf16.msra.mxu0 %v9055_v50  ;;  %2922 = vmatpush2.bf16.msra.mxu1 %v9058_v51  ;;  %v9106_v50 = vld [vmem:[#allocation8 + $0x680] ss:$16 sps:$4 sm:$0xff]   ;;  %v9111_v51 = vld [vmem:[#allocation8 + $0x464] ss:$16 sps:$4 sm:$0xff]  }
 0x193   :  { %2882 = vmatprep.subr.bf16.mxu0 %v9063_v52  ;;  %2923 = vmatprep.subr.bf16.mxu1 %v9066_v54  ;;  %v9109_v52 = vld [vmem:[#allocation8 + $0x460] ss:$16 sps:$4 sm:$0xff]   ;;  %v9114_v54 = vld [vmem:[#allocation8 + $0x664] ss:$16 sps:$4 sm:$0xff]  }
 0x196   :  { %2883 = vmatpush2.bf16.msra.mxu0 %v9061_v55  ;;  %2924 = vmatpush2.bf16.msra.mxu1 %v9064_v56  ;;  %v9112_v55 = vld [vmem:[#allocation8 + $0x660] ss:$16 sps:$4 sm:$0xff]   ;;  %v9117_v56 = vld [vmem:[#allocation8 + $0x444] ss:$16 sps:$4 sm:$0xff]  }
 0x197   :  { %2884 = vmatprep.subr.bf16.mxu0 %v9069_v58  ;;  %2925 = vmatprep.subr.bf16.mxu1 %v9072_v59  ;;  %v9115_v58 = vld [vmem:[#allocation8 + $0x440] ss:$16 sps:$4 sm:$0xff]   ;;  %v9120_v59 = vld [vmem:[#allocation8 + $0x644] ss:$16 sps:$4 sm:$0xff]  }
 0x19a   :  { %2885 = vmatpush2.bf16.msra.mxu0 %v9067_v60  ;;  %2926 = vmatpush2.bf16.msra.mxu1 %v9070_v61  ;;  %v9118_v60 = vld [vmem:[#allocation8 + $0x640] ss:$16 sps:$4 sm:$0xff]   ;;  %v9123_v61 = vld [vmem:[#allocation8 + $0x424] ss:$16 sps:$4 sm:$0xff]  }
 0x19b   :  { %2886 = vmatprep.subr.bf16.mxu0 %v9075_v62  ;;  %2927 = vmatprep.subr.bf16.mxu1 %v9078_v63  ;;  %v9121_v62 = vld [vmem:[#allocation8 + $0x420] ss:$16 sps:$4 sm:$0xff]   ;;  %v9126_v63 = vld [vmem:[#allocation8 + $0x624] ss:$16 sps:$4 sm:$0xff]  }
 0x19e   :  { %2887 = vmatpush2.bf16.msra.mxu0 %v9073_v0  ;;  %2928 = vmatpush2.bf16.msra.mxu1 %v9076_v1  ;;  %v9124_v0 = vld [vmem:[#allocation8 + $0x620] ss:$16 sps:$4 sm:$0xff]   ;;  %v9129_v1 = vld [vmem:[#allocation8 + $0x404] ss:$16 sps:$4 sm:$0xff]  }
 0x19f   :  { %2888 = vmatprep.subr.bf16.mxu0 %v9081_v2  ;;  %2929 = vmatprep.subr.bf16.mxu1 %v9084_v3  ;;  %v9127_v2 = vld [vmem:[#allocation8 + $0x400] ss:$16 sps:$4 sm:$0xff]   ;;  %v9132_v3 = vld [vmem:[#allocation8 + $0x604] ss:$16 sps:$4 sm:$0xff]  }
 0x1a2   :  { %2889 = vmatpush2.bf16.msra.mxu0 %v9079_v4  ;;  %2930 = vmatpush2.bf16.msra.mxu1 %v9082_v5  ;;  %v9130_v4 = vld [vmem:[#allocation8 + $0x600] ss:$16 sps:$4 sm:$0xff]   ;;  %v9135_v5 = vld [vmem:[#allocation8 + $0x5e4] ss:$16 sps:$4 sm:$0xff]  }
 0x1a3   :  { %2940 = vmatprep.subr.bf16.mxu0 %v9087_v6  ;;  %2981 = vmatprep.subr.bf16.mxu1 %v9090_v7  ;;  %v9133_v6 = vld [vmem:[#allocation8 + $0x5e0] ss:$16 sps:$4 sm:$0xff]   ;;  %v9138_v7 = vld [vmem:[#allocation8 + $0x7e4] ss:$16 sps:$4 sm:$0xff]  }
 0x1e5   :  { %v1154_v19 = vpop.f32.mrf.mxu0  ;;  %v1195_v22 = vpop.f32.mrf.mxu1 }
 0x1e6   :  { %v1155_v21 = vadd.f32 %v1154_v19, %v436_v16  ;;  %v1196_v53 = vadd.f32 %v1195_v22, %v444_v17  ;;  %v9141_v16 = vld [vmem:[#allocation8 + $0x5c4] ss:$16 sps:$4 sm:$0xff]   ;;  %v9139_v17 = vld [vmem:[#allocation8 + $0x5c0] ss:$16 sps:$4 sm:$0xff]  }
 0x1e7   :  { %v1156_v23 = vpop.f32.mrf.mxu0  ;;  %v1197_v24 = vpop.f32.mrf.mxu1  ;;  %v9142_v19 = vld [vmem:[#allocation8 + $0x7c0] ss:$16 sps:$4 sm:$0xff]   ;;  %v9150_v22 = vld [vmem:[#allocation8 + $0x7a4] ss:$16 sps:$4 sm:$0xff]  }
 0x1e8   :  { %v1157_v13 = vadd.f32 %v1156_v23, %v440_v18  ;;  %v1284_v25 = vmax.f32 %v1155_v21, 0.0  ;;  %v1286_v26 = vmax.f32 %v1196_v53, 0.0  ;;  %v1198_v27 = vadd.f32 %v1197_v24, %v448_v20  ;;  %v9144_v18 = vld [vmem:[#allocation8 + $0x7c4] ss:$16 sps:$4 sm:$0xff]   ;;  %v9145_v21 = vld [vmem:[#allocation8 + $0x5a0] ss:$16 sps:$4 sm:$0xff]  }
 0x1e9   :  { %v1158_v28 = vpop.f32.mrf.mxu0  ;;  %v1199_v30 = vpop.f32.mrf.mxu1  ;;  %v9147_v20 = vld [vmem:[#allocation8 + $0x5a4] ss:$16 sps:$4 sm:$0xff]   ;;  %v9148_v53 = vld [vmem:[#allocation8 + $0x7a0] ss:$16 sps:$4 sm:$0xff]  }
 0x1ea   :  { %v1285_v29 = vmax.f32 %v1157_v13, 0.0  ;;  %v1287_v32 = vmax.f32 %v1198_v27, 0.0  ;;  %v10501_v36 = vpack.c.bf16 %v1286_v26, %v1286_v26  ;;  %v10505_v39 = vpack.c.bf16 %v1284_v25, %v1284_v25  ;;  %v9153_v23 = vld [vmem:[#allocation8 + $0x584] ss:$16 sps:$4 sm:$0xff]   ;;  %v9151_v13 = vld [vmem:[#allocation8 + $0x580] ss:$16 sps:$4 sm:$0xff]  }
 0x1eb   :  { %v1159_v33 = vpop.f32.mrf.mxu0  ;;  %v1200_v38 = vpop.f32.mrf.mxu1  ;;  %v9156_v24 = vld [vmem:[#allocation8 + $0x784] ss:$16 sps:$4 sm:$0xff]   ;;  %v9154_v25 = vld [vmem:[#allocation8 + $0x780] ss:$16 sps:$4 sm:$0xff]  }
 0x1ec   :  { %v10503_v37 = vpack.c.bf16 %v1285_v29, %v1285_v29  ;;  %v10507_v40 = vpack.c.bf16 %v1287_v32, %v1287_v32  ;;  %v9159_v26 = vld [vmem:[#allocation8 + $0x564] ss:$16 sps:$4 sm:$0xff]   ;;  %v9157_v27 = vld [vmem:[#allocation8 + $0x560] ss:$16 sps:$4 sm:$0xff]   ;;  %v451_v33 = vsub.s32 4, %v10477_v9  ;;  %v455_v38 = vsub.s32 5, %v10477_v9 }
 0x1ed   :  { %v9162_v28 = vld [vmem:[#allocation8 + $0x764] ss:$16 sps:$4 sm:$0xff]   ;;  %v9160_v29 = vld [vmem:[#allocation8 + $0x760] ss:$16 sps:$4 sm:$0xff]  }
 0x1ee   :  { %2890 = vmatprep.mubr.bf16.mxu0 %v10503_v37  ;;  %2931 = vmatprep.mubr.bf16.mxu1 %v10507_v40  ;;  %v9165_v30 = vld [vmem:[#allocation8 + $0x544] ss:$16 sps:$4 sm:$0xff]  }
 0x1ef   :  { %2891 = vmatmul.mubr.bf16.vlgmr.msra.gmra.mxu0 %v10505_v39  ;;  %2932 = vmatmul.mubr.bf16.vlgmr.msra.gmra.mxu1 %v10501_v36  ;;  %v9168_v32 = vld [vmem:[#allocation8 + $0x744] ss:$16 sps:$4 sm:$0xff]  }
 0x1f0   :  { %2941 = vmatpush1.bf16.msra.mxu0 %v9085_v31  ;;  %2982 = vmatpush1.bf16.msra.mxu1 %v9088_v34  ;;  %v9163_v31 = vld [vmem:[#allocation8 + $0x540] ss:$16 sps:$4 sm:$0xff]  }
 0x1f1   :  { %2942 = vmatprep.subr.bf16.mxu0 %v9093_v35  ;;  %2983 = vmatprep.subr.bf16.mxu1 %v9096_v57  ;;  %v9166_v34 = vld [vmem:[#allocation8 + $0x740] ss:$16 sps:$4 sm:$0xff]   ;;  %v459_v35 = vsub.s32 6, %v10477_v9  ;;  %v9174_v57 = vld [vmem:[#allocation8 + $0x724] ss:$16 sps:$4 sm:$0xff]  }
 0x1f4   :  { %2943 = vmatpush1.bf16.msra.mxu0 %v9091_v41  ;;  %2984 = vmatpush1.bf16.msra.mxu1 %v9094_v42  ;;  %v9171_v41 = vld [vmem:[#allocation8 + $0x524] ss:$16 sps:$4 sm:$0xff]   ;;  %v463_v42 = vsub.s32 7, %v10477_v9 }
 0x1f5   :  { %2944 = vmatprep.subr.bf16.mxu0 %v9099_v43  ;;  %2985 = vmatprep.subr.bf16.mxu1 %v9102_v44  ;;  %v452_v43 = vrot.slane %v10479_v10, %v451_v33  ;;  %v9169_v44 = vld [vmem:[#allocation8 + $0x520] ss:$16 sps:$4 sm:$0xff]  }
 0x1f8   :  { %2945 = vmatpush1.bf16.msra.mxu0 %v9097_v45  ;;  %2986 = vmatpush1.bf16.msra.mxu1 %v9100_v46  ;;  %v460_v45 = vrot.slane %v10479_v10, %v459_v35  ;;  %v456_v46 = vrot.slane %v10479_v10, %v455_v38 }
 0x1f9   :  { %2946 = vmatprep.subr.bf16.mxu0 %v9105_v47  ;;  %2987 = vmatprep.subr.bf16.mxu1 %v9108_v49  ;;  %v464_v49 = vrot.slane %v10479_v10, %v463_v42 }
 0x1fc   :  { %2947 = vmatpush1.bf16.msra.mxu0 %v9103_v48  ;;  %2988 = vmatpush1.bf16.msra.mxu1 %v9106_v50  ;;  %v9172_v48 = vld [vmem:[#allocation8 + $0x720] ss:$16 sps:$4 sm:$0xff]   ;;  %v9177_v50 = vld [vmem:[#allocation8 + $0x504] ss:$16 sps:$4 sm:$0xff]  }
 0x1fd   :  { %2948 = vmatprep.subr.bf16.mxu0 %v9111_v51  ;;  %2989 = vmatprep.subr.bf16.mxu1 %v9114_v54  ;;  %v9180_v51 = vld [vmem:[#allocation8 + $0x704] ss:$16 sps:$4 sm:$0xff]  }
 0x200   :  { %2949 = vmatpush1.bf16.msra.mxu0 %v9109_v52  ;;  %2990 = vmatpush1.bf16.msra.mxu1 %v9112_v55  ;;  %v9175_v55 = vld [vmem:[#allocation8 + $0x500] ss:$16 sps:$4 sm:$0xff]  }
 0x201   :  { %2950 = vmatprep.subr.bf16.mxu0 %v9117_v56  ;;  %2991 = vmatprep.subr.bf16.mxu1 %v9120_v59  ;;  %v9178_v59 = vld [vmem:[#allocation8 + $0x700] ss:$16 sps:$4 sm:$0xff]  }
 0x204   :  { %2951 = vmatpush1.bf16.msra.mxu0 %v9115_v58  ;;  %2992 = vmatpush1.bf16.msra.mxu1 %v9118_v60 }
 0x205   :  { %2952 = vmatprep.subr.bf16.mxu0 %v9123_v61  ;;  %2993 = vmatprep.subr.bf16.mxu1 %v9126_v63 }
 0x208   :  { %2953 = vmatpush1.bf16.msra.mxu0 %v9121_v62  ;;  %2994 = vmatpush1.bf16.msra.mxu1 %v9124_v0 }
 0x209   :  { %2954 = vmatprep.subr.bf16.mxu0 %v9129_v1  ;;  %2995 = vmatprep.subr.bf16.mxu1 %v9132_v3 }
 0x20c   :  { %2955 = vmatpush1.bf16.msra.mxu0 %v9127_v2  ;;  %2996 = vmatpush1.bf16.msra.mxu1 %v9130_v4  ;;  %v9183_v2 = vld [vmem:[#allocation8 + $0xec] ss:$16 sps:$4 sm:$0xff]   ;;  %v9181_v4 = vld [vmem:[#allocation8 + $0xe8] ss:$16 sps:$4 sm:$0xff]  }
 0x20d   :  { %2956 = vmatprep.subr.bf16.mxu0 %v9135_v5  ;;  %2997 = vmatprep.subr.bf16.mxu1 %v9138_v7  ;;  %v9186_v5 = vld [vmem:[#allocation8 + $0x2ec] ss:$16 sps:$4 sm:$0xff]  }
 0x210   :  { %2957 = vmatpush2.bf16.msra.mxu0 %v9133_v6  ;;  %2998 = vmatpush2.bf16.msra.mxu1 %v9136_v8  ;;  %v9184_v8 = vld [vmem:[#allocation8 + $0x2e8] ss:$16 sps:$4 sm:$0xff]  }
 0x211   :  { %2958 = vmatprep.subr.bf16.mxu0 %v9141_v16  ;;  %2999 = vmatprep.subr.bf16.mxu1 %v9144_v18 }
 0x214   :  { %2959 = vmatpush2.bf16.msra.mxu0 %v9139_v17  ;;  %3000 = vmatpush2.bf16.msra.mxu1 %v9142_v19  ;;  %v9189_v19 = vld [vmem:[#allocation8 + $0xcc] ss:$16 sps:$4 sm:$0xff]  }
 0x215   :  { %2960 = vmatprep.subr.bf16.mxu0 %v9147_v20  ;;  %3001 = vmatprep.subr.bf16.mxu1 %v9150_v22  ;;  %v9192_v22 = vld [vmem:[#allocation8 + $0x2cc] ss:$16 sps:$4 sm:$0xff]  }
 0x218   :  { %2961 = vmatpush2.bf16.msra.mxu0 %v9145_v21  ;;  %3002 = vmatpush2.bf16.msra.mxu1 %v9148_v53  ;;  %v9187_v53 = vld [vmem:[#allocation8 + $0xc8] ss:$16 sps:$4 sm:$0xff]  }
 0x219   :  { %2962 = vmatprep.subr.bf16.mxu0 %v9153_v23  ;;  %3003 = vmatprep.subr.bf16.mxu1 %v9156_v24  ;;  %v9190_v23 = vld [vmem:[#allocation8 + $0x2c8] ss:$16 sps:$4 sm:$0xff]   ;;  %v9198_v24 = vld [vmem:[#allocation8 + $0x2ac] ss:$16 sps:$4 sm:$0xff]  }
 0x21c   :  { %2963 = vmatpush2.bf16.msra.mxu0 %v9151_v13  ;;  %3004 = vmatpush2.bf16.msra.mxu1 %v9154_v25  ;;  %v9195_v13 = vld [vmem:[#allocation8 + $0xac] ss:$16 sps:$4 sm:$0xff]   ;;  %v9193_v25 = vld [vmem:[#allocation8 + $0xa8] ss:$16 sps:$4 sm:$0xff]  }
 0x21d   :  { %2964 = vmatprep.subr.bf16.mxu0 %v9159_v26  ;;  %3005 = vmatprep.subr.bf16.mxu1 %v9162_v28  ;;  %v9196_v26 = vld [vmem:[#allocation8 + $0x2a8] ss:$16 sps:$4 sm:$0xff]   ;;  %v9204_v28 = vld [vmem:[#allocation8 + $0x28c] ss:$16 sps:$4 sm:$0xff]  }
 0x220   :  { %2965 = vmatpush2.bf16.msra.mxu0 %v9157_v27  ;;  %3006 = vmatpush2.bf16.msra.mxu1 %v9160_v29  ;;  %v9201_v27 = vld [vmem:[#allocation8 + $0x8c] ss:$16 sps:$4 sm:$0xff]   ;;  %v9199_v29 = vld [vmem:[#allocation8 + $0x88] ss:$16 sps:$4 sm:$0xff]  }
 0x221   :  { %2966 = vmatprep.subr.bf16.mxu0 %v9165_v30  ;;  %3007 = vmatprep.subr.bf16.mxu1 %v9168_v32  ;;  %v9202_v30 = vld [vmem:[#allocation8 + $0x288] ss:$16 sps:$4 sm:$0xff]  }
 0x222   :  { %v9208_v32 = vld [vmem:[#allocation8 + $0x268] ss:$16 sps:$4 sm:$0xff]  }
 0x224   :  { %2967 = vmatpush2.bf16.msra.mxu0 %v9163_v31  ;;  %3008 = vmatpush2.bf16.msra.mxu1 %v9166_v34  ;;  %v9207_v31 = vld [vmem:[#allocation8 + $0x6c] ss:$16 sps:$4 sm:$0xff]  }
 0x225   :  { %v1236_v47 = vpop.f32.mrf.mxu0  ;;  %2968 = vmatprep.subr.bf16.mxu0 %v9171_v41  ;;  %v1277_v54 = vpop.f32.mrf.mxu1  ;;  %3009 = vmatprep.subr.bf16.mxu1 %v9174_v57  ;;  %v9213_v34 = vld [vmem:[#allocation8 + $0x4c] ss:$16 sps:$4 sm:$0xff]   ;;  %v9211_v57 = vld [vmem:[#allocation8 + $0x48] ss:$16 sps:$4 sm:$0xff]  }
 0x226   :  { %v1237_v52 = vadd.f32 %v1236_v47, %v452_v43  ;;  %v1278_v56 = vadd.f32 %v1277_v54, %v460_v45  ;;  %v9216_v41 = vld [vmem:[#allocation8 + $0x24c] ss:$16 sps:$4 sm:$0xff]   ;;  %v9214_v43 = vld [vmem:[#allocation8 + $0x248] ss:$16 sps:$4 sm:$0xff]  }
 0x227   :  { %v1238_v58 = vpop.f32.mrf.mxu0  ;;  %v1279_v61 = vpop.f32.mrf.mxu1  ;;  %v9222_v45 = vld [vmem:[#allocation8 + $0x22c] ss:$16 sps:$4 sm:$0xff]   ;;  %v9220_v47 = vld [vmem:[#allocation8 + $0x228] ss:$16 sps:$4 sm:$0xff]  }
 0x228   :  { %v1239_v60 = vadd.f32 %v1238_v58, %v456_v46  ;;  %2969 = vmatpush2.bf16.msra.mxu0 %v9169_v44  ;;  %v1288_v62 = vmax.f32 %v1237_v52, 0.0  ;;  %v1290_v63 = vmax.f32 %v1278_v56, 0.0  ;;  %v1280_v0 = vadd.f32 %v1279_v61, %v464_v49  ;;  %3010 = vmatpush2.bf16.msra.mxu1 %v9172_v48  ;;  %v9219_v44 = vld [vmem:[#allocation8 + $0x2c] ss:$16 sps:$4 sm:$0xff]   ;;  %v9217_v46 = vld [vmem:[#allocation8 + $0x28] ss:$16 sps:$4 sm:$0xff]  }
 0x229   :  { %v1240_v1 = vpop.f32.mrf.mxu0  ;;  %2970 = vmatprep.subr.bf16.mxu0 %v9177_v50  ;;  %v1281_v3 = vpop.f32.mrf.mxu1  ;;  %3011 = vmatprep.subr.bf16.mxu1 %v9180_v51  ;;  %v9225_v48 = vld [vmem:[#allocation8 + $0xc] ss:$16 sps:$4 sm:$0xff]   ;;  %v9223_v50 = vld [vmem:[#allocation8 + $0x8] ss:$16 sps:$4 sm:$0xff]  }
 0x22a   :  { %v1289_v10 = vmax.f32 %v1239_v60, 0.0  ;;  %v1291_v6 = vmax.f32 %v1280_v0, 0.0  ;;  %v10529_v16 = vpack.c.bf16 %v1290_v63, %v1290_v63  ;;  %v10533_v20 = vpack.c.bf16 %v1288_v62, %v1288_v62  ;;  %v9228_v49 = vld [vmem:[#allocation8 + $0x20c] ss:$16 sps:$4 sm:$0xff]   ;;  %v9226_v51 = vld [vmem:[#allocation8 + $0x208] ss:$16 sps:$4 sm:$0xff]  }
 0x22b   :  { %v1241_v7 = vpop.f32.mrf.mxu0  ;;  %v1282_v18 = vpop.f32.mrf.mxu1  ;;  %v9231_v52 = vld [vmem:[#allocation8 + $0x1ec] ss:$16 sps:$4 sm:$0xff]   ;;  %v9232_v56 = vld [vmem:[#allocation8 + $0x3e8] ss:$16 sps:$4 sm:$0xff]  }
 0x22c   :  { %v10531_v17 = vpack.c.bf16 %v1289_v10, %v1289_v10  ;;  %2971 = vmatpush2.bf16.msra.mxu0 %v9175_v55  ;;  %v10535_v21 = vpack.c.bf16 %v1291_v6, %v1291_v6  ;;  %3012 = vmatpush2.bf16.msra.mxu1 %v9178_v59  ;;  %v9234_v54 = vld [vmem:[#allocation8 + $0x3ec] ss:$16 sps:$4 sm:$0xff]   ;;  %v9229_v55 = vld [vmem:[#allocation8 + $0x1e8] ss:$16 sps:$4 sm:$0xff]  }
 0x22d   :  { %3022 = vmatprep.subr.bf16.mxu0 %v9183_v2  ;;  %3063 = vmatprep.subr.bf16.mxu1 %v9186_v5  ;;  %v9237_v58 = vld [vmem:[#allocation8 + $0x1cc] ss:$16 sps:$4 sm:$0xff]   ;;  %v9235_v60 = vld [vmem:[#allocation8 + $0x1c8] ss:$16 sps:$4 sm:$0xff]  }
 0x22e   :  { %2972 = vmatprep.mubr.bf16.mxu0 %v10531_v17  ;;  %3013 = vmatprep.mubr.bf16.mxu1 %v10535_v21  ;;  %v9240_v59 = vld [vmem:[#allocation8 + $0x3cc] ss:$16 sps:$4 sm:$0xff]   ;;  %v9238_v61 = vld [vmem:[#allocation8 + $0x3c8] ss:$16 sps:$4 sm:$0xff]  }
 0x22f   :  { %2973 = vmatmul.mubr.bf16.vlgmr.msra.gmra.mxu0 %v10533_v20  ;;  %3014 = vmatmul.mubr.bf16.vlgmr.msra.gmra.mxu1 %v10529_v16  ;;  %v9243_v62 = vld [vmem:[#allocation8 + $0x1ac] ss:$16 sps:$4 sm:$0xff]   ;;  %v9241_v0 = vld [vmem:[#allocation8 + $0x1a8] ss:$16 sps:$4 sm:$0xff]  }
 0x230   :  { %3023 = vmatpush1.bf16.msra.mxu0 %v9181_v4  ;;  %3064 = vmatpush1.bf16.msra.mxu1 %v9184_v8  ;;  %v9246_v63 = vld [vmem:[#allocation8 + $0x3ac] ss:$16 sps:$4 sm:$0xff]   ;;  %v9244_v1 = vld [vmem:[#allocation8 + $0x3a8] ss:$16 sps:$4 sm:$0xff]  }
 0x231   :  { %3054 = vmatprep.mubr.bf16.mxu0 %v10503_v37  ;;  %3095 = vmatprep.mubr.bf16.mxu1 %v10507_v40  ;;  %v9210_v37 = vld [vmem:[#allocation8 + $0x26c] ss:$16 sps:$4 sm:$0xff]   ;;  %v9205_v40 = vld [vmem:[#allocation8 + $0x68] ss:$16 sps:$4 sm:$0xff]  }
 0x232   :  { %3024 = vmatprep.subr.bf16.mxu0 %v9189_v19  ;;  %3065 = vmatprep.subr.bf16.mxu1 %v9192_v22  ;;  %v9249_v2 = vld [vmem:[#allocation8 + $0x18c] ss:$16 sps:$4 sm:$0xff]   ;;  %v9247_v3 = vld [vmem:[#allocation8 + $0x188] ss:$16 sps:$4 sm:$0xff]  }
 0x233   :  { %v9252_v10 = vld [vmem:[#allocation8 + $0x38c] ss:$16 sps:$4 sm:$0xff]   ;;  %v9250_v4 = vld [vmem:[#allocation8 + $0x388] ss:$16 sps:$4 sm:$0xff]  }
 0x234   :  { %3025 = vmatpush1.bf16.msra.mxu0 %v9187_v53  ;;  %3066 = vmatpush1.bf16.msra.mxu1 %v9190_v23  ;;  %v9255_v5 = vld [vmem:[#allocation8 + $0x16c] ss:$16 sps:$4 sm:$0xff]   ;;  %v9253_v7 = vld [vmem:[#allocation8 + $0x168] ss:$16 sps:$4 sm:$0xff]  }
 0x235   :  { %3026 = vmatprep.subr.bf16.mxu0 %v9195_v13  ;;  %3067 = vmatprep.subr.bf16.mxu1 %v9198_v24  ;;  %v9258_v6 = vld [vmem:[#allocation8 + $0x36c] ss:$16 sps:$4 sm:$0xff]   ;;  %v9256_v8 = vld [vmem:[#allocation8 + $0x368] ss:$16 sps:$4 sm:$0xff]  }
 0x236   :  { %v9261_v18 = vld [vmem:[#allocation8 + $0x14c] ss:$16 sps:$4 sm:$0xff]   ;;  %v9259_v22 = vld [vmem:[#allocation8 + $0x148] ss:$16 sps:$4 sm:$0xff]  }
 0x237   :  { %v9264_v19 = vld [vmem:[#allocation8 + $0x34c] ss:$16 sps:$4 sm:$0xff]   ;;  %v9262_v53 = vld [vmem:[#allocation8 + $0x348] ss:$16 sps:$4 sm:$0xff]  }
 0x238   :  { %3027 = vmatpush1.bf16.msra.mxu0 %v9193_v25  ;;  %3068 = vmatpush1.bf16.msra.mxu1 %v9196_v26  ;;  %v9267_v23 = vld [vmem:[#allocation8 + $0x12c] ss:$16 sps:$4 sm:$0xff]   ;;  %v9265_v24 = vld [vmem:[#allocation8 + $0x128] ss:$16 sps:$4 sm:$0xff]  }
 0x239   :  { %3028 = vmatprep.subr.bf16.mxu0 %v9201_v27  ;;  %3069 = vmatprep.subr.bf16.mxu1 %v9204_v28  ;;  %v9270_v13 = vld [vmem:[#allocation8 + $0x32c] ss:$16 sps:$4 sm:$0xff]   ;;  %v9268_v25 = vld [vmem:[#allocation8 + $0x328] ss:$16 sps:$4 sm:$0xff]  }
 0x23a   :  { %v9273_v26 = vld [vmem:[#allocation8 + $0x10c] ss:$16 sps:$4 sm:$0xff]   ;;  %v9271_v28 = vld [vmem:[#allocation8 + $0x108] ss:$16 sps:$4 sm:$0xff]  }
 0x23b   :  { %v9276_v27 = vld [vmem:[#allocation8 + $0x30c] ss:$16 sps:$4 sm:$0xff]  }
 0x23c   :  { %3029 = vmatpush1.bf16.msra.mxu0 %v9199_v29  ;;  %3070 = vmatpush1.bf16.msra.mxu1 %v9202_v30  ;;  %v9274_v29 = vld [vmem:[#allocation8 + $0x308] ss:$16 sps:$4 sm:$0xff]   ;;  %v9279_v30 = vld [vmem:[#allocation8 + $0x4ec] ss:$16 sps:$4 sm:$0xff]  }
 0x23d   :  { %3030 = vmatprep.subr.bf16.mxu0 %v9207_v31  ;;  %3071 = vmatprep.subr.bf16.mxu1 %v9210_v37  ;;  %v9282_v31 = vld [vmem:[#allocation8 + $0x6ec] ss:$16 sps:$4 sm:$0xff]   ;;  %v9277_v37 = vld [vmem:[#allocation8 + $0x4e8] ss:$16 sps:$4 sm:$0xff]  }
 0x240   :  { %3031 = vmatpush1.bf16.msra.mxu0 %v9205_v40  ;;  %3072 = vmatpush1.bf16.msra.mxu1 %v9208_v32  ;;  %v9280_v40 = vld [vmem:[#allocation8 + $0x6e8] ss:$16 sps:$4 sm:$0xff]   ;;  %v9285_v32 = vld [vmem:[#allocation8 + $0x4cc] ss:$16 sps:$4 sm:$0xff]  }
 0x241   :  { %3032 = vmatprep.subr.bf16.mxu0 %v9213_v34  ;;  %3073 = vmatprep.subr.bf16.mxu1 %v9216_v41  ;;  %v9288_v34 = vld [vmem:[#allocation8 + $0x6cc] ss:$16 sps:$4 sm:$0xff]   ;;  %v9283_v41 = vld [vmem:[#allocation8 + $0x4c8] ss:$16 sps:$4 sm:$0xff]  }
 0x244   :  { %3033 = vmatpush1.bf16.msra.mxu0 %v9211_v57  ;;  %3074 = vmatpush1.bf16.msra.mxu1 %v9214_v43  ;;  %v9286_v57 = vld [vmem:[#allocation8 + $0x6c8] ss:$16 sps:$4 sm:$0xff]   ;;  %v9291_v43 = vld [vmem:[#allocation8 + $0x4ac] ss:$16 sps:$4 sm:$0xff]  }
 0x245   :  { %3034 = vmatprep.subr.bf16.mxu0 %v9219_v44  ;;  %3075 = vmatprep.subr.bf16.mxu1 %v9222_v45  ;;  %v9294_v44 = vld [vmem:[#allocation8 + $0x6ac] ss:$16 sps:$4 sm:$0xff]   ;;  %v9289_v45 = vld [vmem:[#allocation8 + $0x4a8] ss:$16 sps:$4 sm:$0xff]  }
 0x248   :  { %3035 = vmatpush1.bf16.msra.mxu0 %v9217_v46  ;;  %3076 = vmatpush1.bf16.msra.mxu1 %v9220_v47  ;;  %v9297_v46 = vld [vmem:[#allocation8 + $0x48c] ss:$16 sps:$4 sm:$0xff]   ;;  %v9295_v47 = vld [vmem:[#allocation8 + $0x488] ss:$16 sps:$4 sm:$0xff]  }
 0x249   :  { %3036 = vmatprep.subr.bf16.mxu0 %v9225_v48  ;;  %3077 = vmatprep.subr.bf16.mxu1 %v9228_v49  ;;  %v9303_v48 = vld [vmem:[#allocation8 + $0x46c] ss:$16 sps:$4 sm:$0xff]  }
 0x24a   :  { %v9306_v49 = vld [vmem:[#allocation8 + $0x66c] ss:$16 sps:$4 sm:$0xff]  }
 0x24c   :  { %3037 = vmatpush1.bf16.msra.mxu0 %v9223_v50  ;;  %3078 = vmatpush1.bf16.msra.mxu1 %v9226_v51  ;;  %v9304_v50 = vld [vmem:[#allocation8 + $0x668] ss:$16 sps:$4 sm:$0xff]   ;;  %v9309_v51 = vld [vmem:[#allocation8 + $0x44c] ss:$16 sps:$4 sm:$0xff]  }
 0x24d   :  { %3038 = vmatprep.subr.bf16.mxu0 %v9231_v52  ;;  %3079 = vmatprep.subr.bf16.mxu1 %v9234_v54  ;;  %v9312_v52 = vld [vmem:[#allocation8 + $0x64c] ss:$16 sps:$4 sm:$0xff]   ;;  %v9307_v54 = vld [vmem:[#allocation8 + $0x448] ss:$16 sps:$4 sm:$0xff]  }
 0x250   :  { %3039 = vmatpush2.bf16.msra.mxu0 %v9229_v55  ;;  %3080 = vmatpush2.bf16.msra.mxu1 %v9232_v56  ;;  %v9310_v55 = vld [vmem:[#allocation8 + $0x648] ss:$16 sps:$4 sm:$0xff]   ;;  %v9315_v56 = vld [vmem:[#allocation8 + $0x42c] ss:$16 sps:$4 sm:$0xff]  }
 0x251   :  { %3040 = vmatprep.subr.bf16.mxu0 %v9237_v58  ;;  %3081 = vmatprep.subr.bf16.mxu1 %v9240_v59  ;;  %v9318_v58 = vld [vmem:[#allocation8 + $0x62c] ss:$16 sps:$4 sm:$0xff]   ;;  %v9313_v59 = vld [vmem:[#allocation8 + $0x428] ss:$16 sps:$4 sm:$0xff]  }
 0x254   :  { %3041 = vmatpush2.bf16.msra.mxu0 %v9235_v60  ;;  %3082 = vmatpush2.bf16.msra.mxu1 %v9238_v61  ;;  %v9316_v60 = vld [vmem:[#allocation8 + $0x628] ss:$16 sps:$4 sm:$0xff]   ;;  %v9321_v61 = vld [vmem:[#allocation8 + $0x40c] ss:$16 sps:$4 sm:$0xff]  }
 0x255   :  { %3042 = vmatprep.subr.bf16.mxu0 %v9243_v62  ;;  %3083 = vmatprep.subr.bf16.mxu1 %v9246_v63  ;;  %v9324_v62 = vld [vmem:[#allocation8 + $0x60c] ss:$16 sps:$4 sm:$0xff]   ;;  %v9319_v63 = vld [vmem:[#allocation8 + $0x408] ss:$16 sps:$4 sm:$0xff]  }
 0x258   :  { %3043 = vmatpush2.bf16.msra.mxu0 %v9241_v0  ;;  %3084 = vmatpush2.bf16.msra.mxu1 %v9244_v1  ;;  %v9322_v0 = vld [vmem:[#allocation8 + $0x608] ss:$16 sps:$4 sm:$0xff]   ;;  %v9327_v1 = vld [vmem:[#allocation8 + $0x5ec] ss:$16 sps:$4 sm:$0xff]  }
 0x259   :  { %3044 = vmatprep.subr.bf16.mxu0 %v9249_v2  ;;  %3085 = vmatprep.subr.bf16.mxu1 %v9252_v10  ;;  %v9330_v2 = vld [vmem:[#allocation8 + $0x7ec] ss:$16 sps:$4 sm:$0xff]   ;;  %v9325_v10 = vld [vmem:[#allocation8 + $0x5e8] ss:$16 sps:$4 sm:$0xff]  }
 0x25c   :  { %3045 = vmatpush2.bf16.msra.mxu0 %v9247_v3  ;;  %3086 = vmatpush2.bf16.msra.mxu1 %v9250_v4  ;;  %v9328_v3 = vld [vmem:[#allocation8 + $0x7e8] ss:$16 sps:$4 sm:$0xff]   ;;  %v9333_v4 = vld [vmem:[#allocation8 + $0x5cc] ss:$16 sps:$4 sm:$0xff]  }
 0x25d   :  { %3046 = vmatprep.subr.bf16.mxu0 %v9255_v5  ;;  %3087 = vmatprep.subr.bf16.mxu1 %v9258_v6  ;;  %v9336_v5 = vld [vmem:[#allocation8 + $0x7cc] ss:$16 sps:$4 sm:$0xff]   ;;  %v9331_v6 = vld [vmem:[#allocation8 + $0x5c8] ss:$16 sps:$4 sm:$0xff]  }
 0x260   :  { %3047 = vmatpush2.bf16.msra.mxu0 %v9253_v7  ;;  %3088 = vmatpush2.bf16.msra.mxu1 %v9256_v8  ;;  %v9334_v7 = vld [vmem:[#allocation8 + $0x7c8] ss:$16 sps:$4 sm:$0xff]   ;;  %v9339_v8 = vld [vmem:[#allocation8 + $0x5ac] ss:$16 sps:$4 sm:$0xff]  }
 0x261   :  { %3048 = vmatprep.subr.bf16.mxu0 %v9261_v18  ;;  %3089 = vmatprep.subr.bf16.mxu1 %v9264_v19  ;;  %v9342_v18 = vld [vmem:[#allocation8 + $0x7ac] ss:$16 sps:$4 sm:$0xff]   ;;  %v9337_v19 = vld [vmem:[#allocation8 + $0x5a8] ss:$16 sps:$4 sm:$0xff]  }
 0x264   :  { %3049 = vmatpush2.bf16.msra.mxu0 %v9259_v22  ;;  %3090 = vmatpush2.bf16.msra.mxu1 %v9262_v53  ;;  %v9340_v22 = vld [vmem:[#allocation8 + $0x7a8] ss:$16 sps:$4 sm:$0xff]   ;;  %v9345_v53 = vld [vmem:[#allocation8 + $0x58c] ss:$16 sps:$4 sm:$0xff]  }
 0x265   :  { %3050 = vmatprep.subr.bf16.mxu0 %v9267_v23  ;;  %3091 = vmatprep.subr.bf16.mxu1 %v9270_v13  ;;  %v9348_v23 = vld [vmem:[#allocation8 + $0x78c] ss:$16 sps:$4 sm:$0xff]   ;;  %v9343_v13 = vld [vmem:[#allocation8 + $0x588] ss:$16 sps:$4 sm:$0xff]  }
 0x268   :  { %3051 = vmatpush2.bf16.msra.mxu0 %v9265_v24  ;;  %3092 = vmatpush2.bf16.msra.mxu1 %v9268_v25  ;;  %v9346_v24 = vld [vmem:[#allocation8 + $0x788] ss:$16 sps:$4 sm:$0xff]   ;;  %v9351_v25 = vld [vmem:[#allocation8 + $0x56c] ss:$16 sps:$4 sm:$0xff]  }
 0x269   :  { %3052 = vmatprep.subr.bf16.mxu0 %v9273_v26  ;;  %3093 = vmatprep.subr.bf16.mxu1 %v9276_v27  ;;  %v9354_v26 = vld [vmem:[#allocation8 + $0x76c] ss:$16 sps:$4 sm:$0xff]   ;;  %v9349_v27 = vld [vmem:[#allocation8 + $0x568] ss:$16 sps:$4 sm:$0xff]  }
 0x26c   :  { %3053 = vmatpush2.bf16.msra.mxu0 %v9271_v28  ;;  %3094 = vmatpush2.bf16.msra.mxu1 %v9274_v29  ;;  %v9352_v28 = vld [vmem:[#allocation8 + $0x768] ss:$16 sps:$4 sm:$0xff]   ;;  %v9357_v29 = vld [vmem:[#allocation8 + $0x54c] ss:$16 sps:$4 sm:$0xff]  }
 0x26d   :  { %3104 = vmatprep.subr.bf16.mxu0 %v9279_v30  ;;  %3145 = vmatprep.subr.bf16.mxu1 %v9282_v31  ;;  %v9360_v30 = vld [vmem:[#allocation8 + $0x74c] ss:$16 sps:$4 sm:$0xff]   ;;  %v9355_v31 = vld [vmem:[#allocation8 + $0x548] ss:$16 sps:$4 sm:$0xff]  }
 0x26f   :  { %3055 = vmatmul.mubr.bf16.vlgmr.msra.gmra.mxu0 %v10505_v39  ;;  %3096 = vmatmul.mubr.bf16.vlgmr.msra.gmra.mxu1 %v10501_v36  ;;  %v9292_v39 = vld [vmem:[#allocation8 + $0x6a8] ss:$16 sps:$4 sm:$0xff]   ;;  %v9300_v36 = vld [vmem:[#allocation8 + $0x68c] ss:$16 sps:$4 sm:$0xff]  }
 0x270   :  { %3105 = vmatpush1.bf16.msra.mxu0 %v9277_v37  ;;  %3136 = vmatprep.mubr.bf16.mxu0 %v10531_v17  ;;  %v9298_v17 = vld [vmem:[#allocation8 + $0x688] ss:$16 sps:$4 sm:$0xff]  }
 0x271   :  { %3146 = vmatpush1.bf16.msra.mxu1 %v9280_v40  ;;  %3177 = vmatprep.mubr.bf16.mxu1 %v10535_v21  ;;  %v9301_v21 = vld [vmem:[#allocation8 + $0x468] ss:$16 sps:$4 sm:$0xff]   ;;  %v9363_v40 = vld [vmem:[#allocation8 + $0x52c] ss:$16 sps:$4 sm:$0xff]  }
 0x272   :  { %3106 = vmatprep.subr.bf16.mxu0 %v9285_v32  ;;  %3147 = vmatprep.subr.bf16.mxu1 %v9288_v34  ;;  %v9358_v37 = vld [vmem:[#allocation8 + $0x748] ss:$16 sps:$4 sm:$0xff]   ;;  %v9366_v32 = vld [vmem:[#allocation8 + $0x72c] ss:$16 sps:$4 sm:$0xff]  }
 0x273   :  { %v9361_v34 = vld [vmem:[#allocation8 + $0x528] ss:$16 sps:$4 sm:$0xff]  }
 0x274   :  { %3107 = vmatpush1.bf16.msra.mxu0 %v9283_v41  ;;  %v9364_v41 = vld [vmem:[#allocation8 + $0x728] ss:$16 sps:$4 sm:$0xff]  }
 0x275   :  { %3148 = vmatpush1.bf16.msra.mxu1 %v9286_v57  ;;  %3108 = vmatprep.subr.bf16.mxu0 %v9291_v43  ;;  %v9369_v57 = vld [vmem:[#allocation8 + $0x50c] ss:$16 sps:$4 sm:$0xff]  }
 0x276   :  { %3149 = vmatprep.subr.bf16.mxu1 %v9294_v44  ;;  %v9372_v43 = vld [vmem:[#allocation8 + $0x70c] ss:$16 sps:$4 sm:$0xff]   ;;  %v9367_v44 = vld [vmem:[#allocation8 + $0x508] ss:$16 sps:$4 sm:$0xff]  }
 0x278   :  { %3109 = vmatpush1.bf16.msra.mxu0 %v9289_v45  ;;  %v9370_v45 = vld [vmem:[#allocation8 + $0x708] ss:$16 sps:$4 sm:$0xff]  }
 0x279   :  { %3150 = vmatpush1.bf16.msra.mxu1 %v9292_v39  ;;  %3110 = vmatprep.subr.bf16.mxu0 %v9297_v46  ;;  %v9375_v39 = vld [vmem:[#allocation10 + $0x74] ss:$8 sps:$4 sm:$0xff]   ;;  %v9373_v46 = vld [vmem:[#allocation10 + $0x70] ss:$8 sps:$4 sm:$0xff]  }
 0x27a   :  { %3151 = vmatprep.subr.bf16.mxu1 %v9300_v36  ;;  %v9378_v36 = vld [vmem:[#allocation10 + $0x64] ss:$8 sps:$4 sm:$0xff]  }
 0x27c   :  { %3111 = vmatpush1.bf16.msra.mxu0 %v9295_v47 }
 0x27d   :  { %3152 = vmatpush1.bf16.msra.mxu1 %v9298_v17  ;;  %3112 = vmatprep.subr.bf16.mxu0 %v9303_v48  ;;  %v9376_v48 = vld [vmem:[#allocation10 + $0x60] ss:$8 sps:$4 sm:$0xff]  }
 0x27e   :  { %3153 = vmatprep.subr.bf16.mxu1 %v9306_v49 }
 0x280   :  { %3113 = vmatpush1.bf16.msra.mxu0 %v9301_v21  ;;  %v9381_v21 = vld [vmem:[#allocation10 + $0x54] ss:$8 sps:$4 sm:$0xff]  }
 0x281   :  { %3154 = vmatpush1.bf16.msra.mxu1 %v9304_v50  ;;  %3114 = vmatprep.subr.bf16.mxu0 %v9309_v51 }
 0x282   :  { %3155 = vmatprep.subr.bf16.mxu1 %v9312_v52 }
 0x284   :  { %3115 = vmatpush1.bf16.msra.mxu0 %v9307_v54  ;;  %v9379_v54 = vld [vmem:[#allocation10 + $0x50] ss:$8 sps:$4 sm:$0xff]  }
 0x285   :  { %3156 = vmatpush1.bf16.msra.mxu1 %v9310_v55  ;;  %3116 = vmatprep.subr.bf16.mxu0 %v9315_v56 }
 0x286   :  { %3157 = vmatprep.subr.bf16.mxu1 %v9318_v58  ;;  %v9421_v58 = vld [vmem:[#allocation10 + $0x170] ss:$8 sps:$4 sm:$0xff]  }
 0x288   :  { %3117 = vmatpush1.bf16.msra.mxu0 %v9313_v59  ;;  %v9426_v59 = vld [vmem:[#allocation10 + $0x164] ss:$8 sps:$4 sm:$0xff]  }
 0x289   :  { %3158 = vmatpush1.bf16.msra.mxu1 %v9316_v60  ;;  %3118 = vmatprep.subr.bf16.mxu0 %v9321_v61  ;;  %v9382_v60 = vld [vmem:[#allocation10 + $0x40] ss:$8 sps:$4 sm:$0xff]   ;;  %v9387_v61 = vld [vmem:[#allocation10 + $0x34] ss:$8 sps:$4 sm:$0xff]  }
 0x28a   :  { %3159 = vmatprep.subr.bf16.mxu1 %v9324_v62  ;;  %v9424_v62 = vld [vmem:[#allocation10 + $0x160] ss:$8 sps:$4 sm:$0xff]  }
 0x28c   :  { %3119 = vmatpush1.bf16.msra.mxu0 %v9319_v63  ;;  %v9429_v63 = vld [vmem:[#allocation10 + $0x154] ss:$8 sps:$4 sm:$0xff]  }
 0x28d   :  { %3160 = vmatpush1.bf16.msra.mxu1 %v9322_v0  ;;  %3120 = vmatprep.subr.bf16.mxu0 %v9327_v1  ;;  %v9385_v0 = vld [vmem:[#allocation10 + $0x30] ss:$8 sps:$4 sm:$0xff]   ;;  %v9390_v1 = vld [vmem:[#allocation10 + $0x24] ss:$8 sps:$4 sm:$0xff]  }
 0x28e   :  { %3161 = vmatprep.subr.bf16.mxu1 %v9330_v2  ;;  %v9427_v2 = vld [vmem:[#allocation10 + $0x150] ss:$8 sps:$4 sm:$0xff]  }
 0x290   :  { %3121 = vmatpush2.bf16.msra.mxu0 %v9325_v10  ;;  %v9432_v10 = vld [vmem:[#allocation10 + $0x144] ss:$8 sps:$4 sm:$0xff]  }
 0x291   :  { %3162 = vmatpush2.bf16.msra.mxu1 %v9328_v3  ;;  %3122 = vmatprep.subr.bf16.mxu0 %v9333_v4  ;;  %v9388_v3 = vld [vmem:[#allocation10 + $0x20] ss:$8 sps:$4 sm:$0xff]   ;;  %v9393_v4 = vld [vmem:[#allocation10 + $0x14] ss:$8 sps:$4 sm:$0xff]  }
 0x292   :  { %3163 = vmatprep.subr.bf16.mxu1 %v9336_v5  ;;  %v9430_v5 = vld [vmem:[#allocation10 + $0x140] ss:$8 sps:$4 sm:$0xff]  }
 0x294   :  { %3123 = vmatpush2.bf16.msra.mxu0 %v9331_v6  ;;  %v9435_v6 = vld [vmem:[#allocation10 + $0x134] ss:$8 sps:$4 sm:$0xff]  }
 0x295   :  { %3164 = vmatpush2.bf16.msra.mxu1 %v9334_v7  ;;  %3124 = vmatprep.subr.bf16.mxu0 %v9339_v8  ;;  %v9391_v7 = vld [vmem:[#allocation10 + $0x10] ss:$8 sps:$4 sm:$0xff]   ;;  %v9396_v8 = vld [vmem:[#allocation10 + $0x4] ss:$8 sps:$4 sm:$0xff]  }
 0x296   :  { %3165 = vmatprep.subr.bf16.mxu1 %v9342_v18  ;;  %v9433_v18 = vld [vmem:[#allocation10 + $0x130] ss:$8 sps:$4 sm:$0xff]  }
 0x298   :  { %3125 = vmatpush2.bf16.msra.mxu0 %v9337_v19  ;;  %v9438_v19 = vld [vmem:[#allocation10 + $0x124] ss:$8 sps:$4 sm:$0xff]  }
 0x299   :  { %3166 = vmatpush2.bf16.msra.mxu1 %v9340_v22  ;;  %3126 = vmatprep.subr.bf16.mxu0 %v9345_v53  ;;  %v9394_v22 = vld [vmem:[#allocation10] ss:$8 sps:$4 sm:$0xff]   ;;  %v9399_v53 = vld [vmem:[#allocation10 + $0xf4] ss:$8 sps:$4 sm:$0xff]  }
 0x29a   :  { %3167 = vmatprep.subr.bf16.mxu1 %v9348_v23  ;;  %v9436_v23 = vld [vmem:[#allocation10 + $0x120] ss:$8 sps:$4 sm:$0xff]  }
 0x29c   :  { %3127 = vmatpush2.bf16.msra.mxu0 %v9343_v13  ;;  %v9441_v13 = vld [vmem:[#allocation10 + $0x114] ss:$8 sps:$4 sm:$0xff]  }
 0x29d   :  { %3168 = vmatpush2.bf16.msra.mxu1 %v9346_v24  ;;  %3128 = vmatprep.subr.bf16.mxu0 %v9351_v25  ;;  %v9397_v24 = vld [vmem:[#allocation10 + $0xf0] ss:$8 sps:$4 sm:$0xff]   ;;  %v9402_v25 = vld [vmem:[#allocation10 + $0xe4] ss:$8 sps:$4 sm:$0xff]  }
 0x29e   :  { %3169 = vmatprep.subr.bf16.mxu1 %v9354_v26  ;;  %v9439_v26 = vld [vmem:[#allocation10 + $0x110] ss:$8 sps:$4 sm:$0xff]  }
 0x2a0   :  { %3129 = vmatpush2.bf16.msra.mxu0 %v9349_v27  ;;  %v9444_v27 = vld [vmem:[#allocation10 + $0x104] ss:$8 sps:$4 sm:$0xff]  }
 0x2a1   :  { %3170 = vmatpush2.bf16.msra.mxu1 %v9352_v28  ;;  %3130 = vmatprep.subr.bf16.mxu0 %v9357_v29  ;;  %v9400_v28 = vld [vmem:[#allocation10 + $0xe0] ss:$8 sps:$4 sm:$0xff]   ;;  %v9405_v29 = vld [vmem:[#allocation10 + $0xd4] ss:$8 sps:$4 sm:$0xff]  }
 0x2a2   :  { %3171 = vmatprep.subr.bf16.mxu1 %v9360_v30  ;;  %v9442_v30 = vld [vmem:[#allocation10 + $0x100] ss:$8 sps:$4 sm:$0xff]  }
 0x2a4   :  { %3131 = vmatpush2.bf16.msra.mxu0 %v9355_v31  ;;  %v9447_v31 = vld [vmem:[#allocation10 + $0x1f4] ss:$8 sps:$4 sm:$0xff]  }
 0x2a5   :  { %3172 = vmatpush2.bf16.msra.mxu1 %v9358_v37  ;;  %3132 = vmatprep.subr.bf16.mxu0 %v9363_v40  ;;  %v9403_v37 = vld [vmem:[#allocation10 + $0xd0] ss:$8 sps:$4 sm:$0xff]   ;;  %v9408_v40 = vld [vmem:[#allocation10 + $0xc4] ss:$8 sps:$4 sm:$0xff]  }
 0x2a6   :  { %3173 = vmatprep.subr.bf16.mxu1 %v9366_v32  ;;  %v9445_v32 = vld [vmem:[#allocation10 + $0x1f0] ss:$8 sps:$4 sm:$0xff]  }
 0x2a8   :  { %3133 = vmatpush2.bf16.msra.mxu0 %v9361_v34  ;;  %v9450_v34 = vld [vmem:[#allocation10 + $0x1e4] ss:$8 sps:$4 sm:$0xff]  }
 0x2a9   :  { %3174 = vmatpush2.bf16.msra.mxu1 %v9364_v41  ;;  %3134 = vmatprep.subr.bf16.mxu0 %v9369_v57  ;;  %v9406_v41 = vld [vmem:[#allocation10 + $0xc0] ss:$8 sps:$4 sm:$0xff]   ;;  %v9411_v57 = vld [vmem:[#allocation10 + $0xb4] ss:$8 sps:$4 sm:$0xff]  }
 0x2aa   :  { %3175 = vmatprep.subr.bf16.mxu1 %v9372_v43  ;;  %v9448_v43 = vld [vmem:[#allocation10 + $0x1e0] ss:$8 sps:$4 sm:$0xff]  }
 0x2ac   :  { %3135 = vmatpush2.bf16.msra.mxu0 %v9367_v44  ;;  %v9453_v44 = vld [vmem:[#allocation10 + $0x1d4] ss:$8 sps:$4 sm:$0xff]  }
 0x2ad   :  { %3176 = vmatpush2.bf16.msra.mxu1 %v9370_v45  ;;  %3590 = vmatprep.subr.bf16.mxu0 %v9375_v39  ;;  %v9409_v45 = vld [vmem:[#allocation10 + $0xb0] ss:$8 sps:$4 sm:$0xff]   ;;  %v9414_v39 = vld [vmem:[#allocation10 + $0xa4] ss:$8 sps:$4 sm:$0xff]  }
 0x2af   :  { %3137 = vmatmul.mubr.bf16.vlgmr.msra.gmra.mxu0 %v10533_v20  ;;  %v10548_v47 = vpop.f32.mrf.mxu0  ;;  %v10551_v17 = vpop.f32.mrf.mxu1  ;;  %v9384_v20 = vld [vmem:[#allocation10 + $0x44] ss:$8 sps:$4 sm:$0xff]  }
 0x2b0   :  { %3178 = vmatmul.mubr.bf16.vlgmr.msra.gmra.mxu1 %v10529_v16  ;;  %3591 = vmatpush1.bf16.msra.mxu0 %v9373_v46  ;;  %v9423_v16 = vld [vmem:[#allocation10 + $0x174] ss:$8 sps:$4 sm:$0xff]   ;;  %v9451_v46 = vld [vmem:[#allocation10 + $0x1d0] ss:$8 sps:$4 sm:$0xff]  }
 0x2b1   :  { %v10553_v49 = vpop.f32.mrf.mxu0  ;;  %3592 = vmatprep.subr.bf16.mxu0 %v9378_v36  ;;  %v10555_v50 = vpop.f32.mrf.mxu1  ;;  %3631 = vmatprep.subr.bf16.mxu1 %v9423_v16  ;;  %v9456_v36 = vld [vmem:[#allocation10 + $0x1c4] ss:$8 sps:$4 sm:$0xff]  }
 0x2b2   :  { %3632 = vmatpush1.bf16.msra.mxu1 %v9421_v58 }
 0x2b3   :  { %v2896_v51 = vpop.f32.mrf.mxu0  ;;  %v2937_v52 = vpop.f32.mrf.mxu1  ;;  %3633 = vmatprep.subr.bf16.mxu1 %v9426_v59  ;;  %v9418_v59 = vld [vmem:[#allocation10 + $0x80] ss:$8 sps:$4 sm:$0xff]  }
 0x2b4   :  { %3593 = vmatpush1.bf16.msra.mxu0 %v9376_v48  ;;  %v9412_v48 = vld [vmem:[#allocation10 + $0xa0] ss:$8 sps:$4 sm:$0xff]   ;;  %v9459_v52 = vld [vmem:[#allocation10 + $0x1b4] ss:$8 sps:$4 sm:$0xff]  }
 0x2b5   :  { %v2897_v55 = vpop.f32.mrf.mxu0  ;;  %3594 = vmatprep.subr.bf16.mxu0 %v9381_v21  ;;  %v2938_v56 = vpop.f32.mrf.mxu1  ;;  %v9417_v21 = vld [vmem:[#allocation10 + $0x94] ss:$8 sps:$4 sm:$0xff]   ;;  %v9454_v51 = vld [vmem:[#allocation10 + $0x1c0] ss:$8 sps:$4 sm:$0xff]  }
 0x2b6   :  { %3634 = vmatpush1.bf16.msra.mxu1 %v9424_v62  ;;  %v9415_v55 = vld [vmem:[#allocation10 + $0x90] ss:$8 sps:$4 sm:$0xff]  }
 0x2b7   :  { %3635 = vmatprep.subr.bf16.mxu1 %v9429_v63  ;;  %v9457_v56 = vld [vmem:[#allocation10 + $0x1b0] ss:$8 sps:$4 sm:$0xff]  }
 0x2b8   :  { %3595 = vmatpush1.bf16.msra.mxu0 %v9379_v54  ;;  %v10560_v54 = vld [vmem:[%s10753_s27] sm:$0xf] }
 0x2b9   :  { %3596 = vmatprep.subr.bf16.mxu0 %v9384_v20  ;;  %v9420_v20 = vld [vmem:[#allocation10 + $0x84] ss:$8 sps:$4 sm:$0xff]   ;;  %v1561_v58 = vrot.slane %v10560_v54, %v10482_v11  ;;  %v1565_v16 = vrot.slane %v10560_v54, %v10488_v14 }
 0x2ba   :  { %3636 = vmatpush1.bf16.msra.mxu1 %v9427_v2 }
 0x2bb   :  { %3637 = vmatprep.subr.bf16.mxu1 %v9432_v10 }
 0x2bc   :  { %3597 = vmatpush1.bf16.msra.mxu0 %v9382_v60  ;;  %v2893_v60 = vadd.f32 %v10548_v47, %v1561_v58  ;;  %v9465_v47 = vld [vmem:[#allocation10 + $0x194] ss:$8 sps:$4 sm:$0xff]  }
 0x2bd   :  { %3598 = vmatprep.subr.bf16.mxu0 %v9387_v61  ;;  %v2895_v61 = vadd.f32 %v10553_v49, %v1565_v16 }
 0x2be   :  { %3638 = vmatpush1.bf16.msra.mxu1 %v9430_v5  ;;  %v2934_v62 = vadd.f32 %v10551_v17, %v2893_v60 }
 0x2bf   :  { %3639 = vmatprep.subr.bf16.mxu1 %v9435_v6 }
 0x2c0   :  { %3599 = vmatpush1.bf16.msra.mxu0 %v9385_v0  ;;  %v9462_v0 = vld [vmem:[#allocation10 + $0x1a4] ss:$8 sps:$4 sm:$0xff]  }
 0x2c1   :  { %3600 = vmatprep.subr.bf16.mxu0 %v9390_v1  ;;  %v2936_v1 = vadd.f32 %v10555_v50, %v2895_v61  ;;  %v9468_v50 = vld [vmem:[#allocation10 + $0x184] ss:$8 sps:$4 sm:$0xff]  }
 0x2c2   :  { %3640 = vmatpush1.bf16.msra.mxu1 %v9433_v18 }
 0x2c3   :  { %3641 = vmatprep.subr.bf16.mxu1 %v9438_v19  ;;  %v9463_v19 = vld [vmem:[#allocation10 + $0x190] ss:$8 sps:$4 sm:$0xff]  }
 0x2c4   :  { %3601 = vmatpush1.bf16.msra.mxu0 %v9388_v3  ;;  %v9460_v3 = vld [vmem:[#allocation10 + $0x1a0] ss:$8 sps:$4 sm:$0xff]  }
 0x2c5   :  { %3602 = vmatprep.subr.bf16.mxu0 %v9393_v4 }
 0x2c6   :  { %3642 = vmatpush1.bf16.msra.mxu1 %v9436_v23 }
 0x2c7   :  { %3643 = vmatprep.subr.bf16.mxu1 %v9441_v13 }
 0x2c8   :  { %3603 = vmatpush1.bf16.msra.mxu0 %v9391_v7 }
 0x2c9   :  { %3604 = vmatprep.subr.bf16.mxu0 %v9396_v8 }
 0x2ca   :  { %3644 = vmatpush1.bf16.msra.mxu1 %v9439_v26 }
 0x2cb   :  { %3645 = vmatprep.subr.bf16.mxu1 %v9444_v27 }
 0x2cc   :  { %3605 = vmatpush1.bf16.msra.mxu0 %v9394_v22 }
 0x2cd   :  { %3606 = vmatprep.subr.bf16.mxu0 %v9399_v53 }
 0x2ce   :  { %3646 = vmatpush1.bf16.msra.mxu1 %v9442_v30 }
 0x2cf   :  { %3647 = vmatprep.subr.bf16.mxu1 %v9447_v31 }
 0x2d0   :  { %3607 = vmatpush2.bf16.msra.mxu0 %v9397_v24  ;;  %v9466_v24 = vld [vmem:[#allocation10 + $0x180] ss:$8 sps:$4 sm:$0xff]  }
 0x2d1   :  { %3608 = vmatprep.subr.bf16.mxu0 %v9402_v25 }
 0x2d2   :  { %3648 = vmatpush2.bf16.msra.mxu1 %v9445_v32  ;;  %v9469_v32 = vld [vmem:[#allocation13 + $0x78] sm:$0xff]  }
 0x2d3   :  { %3649 = vmatprep.subr.bf16.mxu1 %v9450_v34  ;;  %v9470_v34 = vld [vmem:[#allocation13 + $0x38] sm:$0xff]  }
 0x2d4   :  { %3609 = vmatpush2.bf16.msra.mxu0 %v9400_v28 }
 0x2d5   :  { %3610 = vmatprep.subr.bf16.mxu0 %v9405_v29 }
 0x2d6   :  { %3650 = vmatpush2.bf16.msra.mxu1 %v9448_v43  ;;  %v9473_v43 = vld [vmem:[#allocation13 + $0x68] sm:$0xff]  }
 0x2d7   :  { %3651 = vmatprep.subr.bf16.mxu1 %v9453_v44  ;;  %v9474_v44 = vld [vmem:[#allocation13 + $0x28] sm:$0xff]  }
 0x2d8   :  { %3611 = vmatpush2.bf16.msra.mxu0 %v9403_v37 }
 0x2d9   :  { %3612 = vmatprep.subr.bf16.mxu0 %v9408_v40 }
 0x2da   :  { %3652 = vmatpush2.bf16.msra.mxu1 %v9451_v46  ;;  %v9477_v46 = vld [vmem:[#allocation13 + $0x58] sm:$0xff]  }
 0x2db   :  { %3653 = vmatprep.subr.bf16.mxu1 %v9456_v36  ;;  %v9478_v36 = vld [vmem:[#allocation13 + $0x18] sm:$0xff]  }
 0x2dc   :  { %3613 = vmatpush2.bf16.msra.mxu0 %v9406_v41  ;;  %v9471_v41 = vld [vmem:[#allocation13 + $0x70] sm:$0xff]  }
 0x2dd   :  { %3614 = vmatprep.subr.bf16.mxu0 %v9411_v57  ;;  %v9472_v57 = vld [vmem:[#allocation13 + $0x30] sm:$0xff]  }
 0x2de   :  { %3654 = vmatpush2.bf16.msra.mxu1 %v9454_v51  ;;  %v1569_v51 = vrot.slane %v10560_v54, %v10485_v12 }
 0x2df   :  { %3655 = vmatprep.subr.bf16.mxu1 %v9459_v52  ;;  %v1573_v52 = vrot.slane %v10560_v54, %v10491_v15 }
 0x2e0   :  { %3615 = vmatpush2.bf16.msra.mxu0 %v9409_v45  ;;  %v9475_v45 = vld [vmem:[#allocation13 + $0x60] sm:$0xff]  }
 0x2e1   :  { %3616 = vmatprep.subr.bf16.mxu0 %v9414_v39  ;;  %v9476_v39 = vld [vmem:[#allocation13 + $0x20] sm:$0xff]  }
 0x2e2   :  { %3656 = vmatpush2.bf16.msra.mxu1 %v9457_v56 }
 0x2e3   :  { %3657 = vmatprep.subr.bf16.mxu1 %v9462_v0 }
 0x2e4   :  { %3617 = vmatpush2.bf16.msra.mxu0 %v9412_v48  ;;  %v9479_v48 = vld [vmem:[#allocation13 + $0x50] sm:$0xff]  }
 0x2e5   :  { %3618 = vmatprep.subr.bf16.mxu0 %v9417_v21  ;;  %v9480_v21 = vld [vmem:[#allocation13 + $0x10] sm:$0xff]  }
 0x2e6   :  { %3658 = vmatpush2.bf16.msra.mxu1 %v9460_v3 }
 0x2e7   :  { %3659 = vmatprep.subr.bf16.mxu1 %v9465_v47 }
 0x2e8   :  { %3619 = vmatpush2.bf16.msra.mxu0 %v9415_v55 }
 0x2e9   :  { %3620 = vmatprep.subr.bf16.mxu0 %v9420_v20 }
 0x2ea   :  { %3660 = vmatpush2.bf16.msra.mxu1 %v9463_v19 }
 0x2eb   :  { %3661 = vmatprep.subr.bf16.mxu1 %v9468_v50  ;;  %v10238_v50 = vmov 0.0  }
 0x2ec   :  { %3621 = vmatpush2.bf16.msra.mxu0 %v9418_v59 }
 0x2ed   :  { %8820 = vmatprep.subr.bf16.mxu0 %v9469_v32 }
 0x2ee   :  { %3662 = vmatpush2.bf16.msra.mxu1 %v9466_v24  ;;  %v9487_v24 = vld [vmem:[#allocation16 + $0x28] sm:$0xff]  }
 0x2ef   :  { %v2974_v63 = vpop.f32.mrf.mxu0  ;;  %v3015_v10 = vpop.f32.mrf.mxu1  ;;  %8878 = vmatprep.subr.bf16.mxu1 %v10238_v50 }
 0x2f0   :  { %v2975_v2 = vadd.f32 %v2974_v63, %v2934_v62 }
 0x2f1   :  { %v2976_v4 = vpop.f32.mrf.mxu0  ;;  %v3017_v7 = vpop.f32.mrf.mxu1 }
 0x2f2   :  { %v3016_v5 = vadd.f32 %v3015_v10, %v2975_v2  ;;  %v2977_v6 = vadd.f32 %v2976_v4, %v2936_v1 }
 0x2f3   :  { %v2978_v8 = vpop.f32.mrf.mxu0  ;;  %v3019_v49 = vpop.f32.mrf.mxu1 }
 0x2f4   :  { %v3018_v18 = vadd.f32 %v3017_v7, %v2977_v6  ;;  %v3186_v22 = vmax.f32 %v3016_v5, 0.0  ;;  %v9482_v49 = vld [vmem:[#allocation13 + $0x8] sm:$0xff]  }
 0x2f5   :  { %v2979_v17 = vpop.f32.mrf.mxu0  ;;  %v3020_v23 = vpop.f32.mrf.mxu1 }
 0x2f6   :  { %v3187_v53 = vmax.f32 %v3018_v18, 0.0  ;;  %v3190_v25 = vpack.c.bf16 %v3186_v22, %v3186_v22  ;;  %v9481_v18 = vld [vmem:[#allocation13 + $0x48] sm:$0xff]   ;;  %v9483_v17 = vld [vmem:[#allocation13 + $0x40] sm:$0xff]  }
 0x2f7   :  { %v9485_v23 = vld [vmem:[#allocation16 + $0x38] sm:$0xff]  }
 0x2f8   :  { %v3191_v13 = vpack.c.bf16 %v3187_v53, %v3187_v53  ;;  %v9484_v53 = vld [vmem:[#allocation13] sm:$0xff]  }
 0x2fa   :  { %3622 = vmatprep.mubr.bf16.mxu0 %v3191_v13  ;;  %v9486_v13 = vld [vmem:[#allocation16 + $0x30] sm:$0xff]  }
 0x2fb   :  { %3623 = vmatmul.mubr.bf16.vlgmr.msra.gmra.mxu0 %v3190_v25  ;;  %v9488_v25 = vld [vmem:[#allocation16 + $0x20] sm:$0xff]  }
 0x2fc   :  { %8821 = vmatpush3.bf16.msra.mxu0 %v9470_v34 }
 0x2fd   :  { %8822 = vmatprep.subr.bf16.mxu0 %v9471_v41 }
 0x300   :  { %8823 = vmatpush3.bf16.msra.mxu0 %v9472_v57 }
 0x301   :  { %8824 = vmatprep.subr.bf16.mxu0 %v9473_v43 }
 0x304   :  { %8825 = vmatpush3.bf16.msra.mxu0 %v9474_v44 }
 0x305   :  { %8826 = vmatprep.subr.bf16.mxu0 %v9475_v45 }
 0x308   :  { %8827 = vmatpush3.bf16.msra.mxu0 %v9476_v39 }
 0x309   :  { %8828 = vmatprep.subr.bf16.mxu0 %v9477_v46  ;;  %v9490_v46 = vld [vmem:[#allocation16 + $0x10] sm:$0xff]  }
 0x30c   :  { %8829 = vmatpush3.bf16.msra.mxu0 %v9478_v36  ;;  %v9491_v36 = vld [vmem:[#allocation16 + $0x8] sm:$0xff]  }
 0x30d   :  { %8830 = vmatprep.subr.bf16.mxu0 %v9479_v48  ;;  %v9492_v48 = vld [vmem:[#allocation16] sm:$0xff]  }
 0x310   :  { %8831 = vmatpush3.bf16.msra.mxu0 %v9480_v21  ;;  %v9493_v21 = vld [vmem:[#allocation19 + $0x38] sm:$0xff]  }
 0x311   :  { %8832 = vmatprep.subr.bf16.mxu0 %v9481_v18 }
 0x314   :  { %8833 = vmatpush3.bf16.msra.mxu0 %v9482_v49 }
 0x315   :  { %8834 = vmatprep.subr.bf16.mxu0 %v9483_v17 }
 0x318   :  { %8835 = vmatpush3.bf16.msra.mxu0 %v9484_v53 }
 0x319   :  { %8898 = vmatprep.subr.bf16.mxu0 %v10238_v50 }
 0x32f   :  { %v3056_v26 = vpop.f32.mrf.mxu0  ;;  %v3097_v27 = vpop.f32.mrf.mxu1 }
 0x330   :  { %v3057_v55 = vadd.f32 %v3056_v26, %v1569_v51  ;;  %v9489_v26 = vld [vmem:[#allocation16 + $0x18] sm:$0xff]  }
 0x331   :  { %v3058_v28 = vpop.f32.mrf.mxu0  ;;  %v3099_v29 = vpop.f32.mrf.mxu1  ;;  %v9494_v51 = vld [vmem:[#allocation19 + $0x30] sm:$0xff]  }
 0x332   :  { %v3059_v20 = vadd.f32 %v3058_v28, %v1573_v52  ;;  %v3098_v56 = vadd.f32 %v3097_v27, %v3057_v55  ;;  %v3258_v27 = vld [vmem:[#allocation11] sm:$0x3]  ;;  %v9495_v52 = vld [vmem:[#allocation19 + $0x28] sm:$0xff]   ;;  %v9496_v55 = vld [vmem:[#allocation19 + $0x20] sm:$0xff]  }
 0x333   :  { %v3060_v30 = vpop.f32.mrf.mxu0  ;;  %v3101_v31 = vpop.f32.mrf.mxu1  ;;  %v3263_v28 = vrot.slane %v3258_v27, %v10482_v11 }
 0x334   :  { %v3100_v16 = vadd.f32 %v3099_v29, %v3059_v20  ;;  %v3267_v29 = vrot.slane %v3258_v27, %v10488_v14  ;;  %v9497_v20 = vld [vmem:[#allocation19 + $0x18] sm:$0xff]   ;;  %v9512_v27 = vld [vmem:[#allocation22 + $0x20] sm:$0xff]  }
 0x335   :  { %v3061_v37 = vpop.f32.mrf.mxu0  ;;  %v3102_v40 = vpop.f32.mrf.mxu1 }
 0x36f   :  { %v3138_v58 = vpop.f32.mrf.mxu0 }
 0x370   :  { %v3139_v59 = vadd.f32 %v3138_v58, %v3098_v56  ;;  %v3179_v60 = vpop.f32.mrf.mxu1  ;;  %v9498_v56 = vld [vmem:[#allocation19 + $0x10] sm:$0xff]  }
 0x371   :  { %v3140_v61 = vpop.f32.mrf.mxu0 }
 0x372   :  { %v3180_v62 = vadd.f32 %v3179_v60, %v3139_v59  ;;  %v3141_v63 = vadd.f32 %v3140_v61, %v3100_v16  ;;  %v3181_v0 = vpop.f32.mrf.mxu1  ;;  %v8303_v16 = vld [vmem:[#allocation14] ss:$0 sm:$0xff] }
 0x373   :  { %v3142_v1 = vpop.f32.mrf.mxu0 }
 0x374   :  { %v3182_v2 = vadd.f32 %v3181_v0, %v3141_v63  ;;  %v3183_v10 = vpop.f32.mrf.mxu1  ;;  %v3188_v3 = vmax.f32 %v3180_v62, 0.0 }
 0x375   :  { %v3143_v4 = vpop.f32.mrf.mxu0  ;;  %v9500_v10 = vld [vmem:[#allocation19] sm:$0xff]  }
 0x376   :  { %v3189_v5 = vmax.f32 %v3182_v2, 0.0  ;;  %v3184_v6 = vpop.f32.mrf.mxu1  ;;  %v3192_v54 = vpack.c.bf16 %v3188_v3, %v3188_v3  ;;  %v9499_v2 = vld [vmem:[#allocation19 + $0x8] sm:$0xff]   ;;  %v9501_v3 = vld [vmem:[#allocation20 + $0x38] sm:$0xff]   ;;  %v9502_v4 = vld [vmem:[#allocation20 + $0x30] sm:$0xff]  }
 0x377   :  { %v9504_v6 = vld [vmem:[#allocation20 + $0x20] sm:$0xff]  }
 0x378   :  { %v3193_v7 = vpack.c.bf16 %v3189_v5, %v3189_v5  ;;  %v9503_v5 = vld [vmem:[#allocation20 + $0x28] sm:$0xff]  }
 0x37a   :  { %3663 = vmatprep.mubr.bf16.mxu1 %v3193_v7  ;;  %v9505_v7 = vld [vmem:[#allocation20 + $0x18] sm:$0xff]  }
 0x37b   :  { %3664 = vmatmul.mubr.bf16.vlgmr.msra.gmra.mxu1 %v3192_v54  ;;  %v9506_v54 = vld [vmem:[#allocation20 + $0x10] sm:$0xff]  }
 0x37c   :  { %8879 = vmatpush3.bf16.msra.mxu1 %v9485_v23  ;;  %8894 = vmatprep.mubr.msk.bf16.mxu1 %vm10239_vm0, %v10238_v50  ;;  %v9507_v23 = vld [vmem:[#allocation20 + $0x8] sm:$0xff]  }
 0x37d   :  { %8880 = vmatprep.subr.bf16.mxu1 %v10238_v50 }
 0x380   :  { %8881 = vmatpush3.bf16.msra.mxu1 %v9486_v13  ;;  %v9508_v13 = vld [vmem:[#allocation20] sm:$0xff]  }
 0x381   :  { %8882 = vmatprep.subr.bf16.mxu1 %v10238_v50 }
 0x384   :  { %8883 = vmatpush3.bf16.msra.mxu1 %v9487_v24  ;;  %v9509_v24 = vld [vmem:[#allocation22 + $0x38] sm:$0xff]  }
 0x385   :  { %8884 = vmatprep.subr.bf16.mxu1 %v10238_v50 }
 0x388   :  { %8885 = vmatpush3.bf16.msra.mxu1 %v9488_v25  ;;  %v9510_v25 = vld [vmem:[#allocation22 + $0x30] sm:$0xff]  }
 0x389   :  { %8886 = vmatprep.subr.bf16.mxu1 %v10238_v50 }
 0x38c   :  { %8887 = vmatpush3.bf16.msra.mxu1 %v9489_v26  ;;  %v9511_v26 = vld [vmem:[#allocation22 + $0x28] sm:$0xff]  }
 0x38d   :  { %8888 = vmatprep.subr.bf16.mxu1 %v10238_v50 }
 0x390   :  { %8889 = vmatpush3.bf16.msra.mxu1 %v9490_v46  ;;  %v9522_v46 = vld [vmem:[#allocation23 + $0x64] ss:$8 sps:$4 sm:$0xff]  }
 0x391   :  { %8890 = vmatprep.subr.bf16.mxu1 %v10238_v50 }
 0x394   :  { %8891 = vmatpush3.bf16.msra.mxu1 %v9491_v36  ;;  %v9520_v36 = vld [vmem:[#allocation23 + $0x60] ss:$8 sps:$4 sm:$0xff]  }
 0x395   :  { %8892 = vmatprep.subr.bf16.mxu1 %v10238_v50 }
 0x398   :  { %8893 = vmatpush3.bf16.msra.mxu1 %v9492_v48  ;;  %v9525_v48 = vld [vmem:[#allocation23 + $0x54] ss:$8 sps:$4 sm:$0xff]  }
 0x399   :  { %8918 = vmatprep.subr.bf16.mxu1 %v10238_v50 }
 0x3bb   :  { %v3624_v8 = vpop.f32.mrf.mxu0 }
 0x3bc   :  { %v3625_v30 = vadd.f32 %v3624_v8, %v3263_v28  ;;  %v8320_v8 = vld [vmem:[#allocation17] ss:$0 sm:$0xff] }
 0x3bd   :  { %v3626_v47 = vpop.f32.mrf.mxu0  ;;  %v9513_v28 = vld [vmem:[#allocation22 + $0x18] sm:$0xff]  }
 0x3be   :  { %v3627_v37 = vadd.f32 %v3626_v47, %v3267_v29  ;;  %v9514_v29 = vld [vmem:[#allocation22 + $0x10] sm:$0xff]  }
 0x3bf   :  { %v3628_v19 = vpop.f32.mrf.mxu0 }
 0x3c1   :  { %v3629_v22 = vpop.f32.mrf.mxu0 }
 0x43b   :  { %v3665_v31 = vpop.f32.mrf.mxu1 }
 0x43c   :  { %v3666_v40 = vadd.f32 %v3665_v31, %v3625_v30  ;;  %v8329_v30 = vld [vmem:[%s10712_s12] ss:$0 sm:$0xff] }
 0x43d   :  { %v3667_v32 = vpop.f32.mrf.mxu1 }
 0x43e   :  { %v3668_v34 = vadd.f32 %v3667_v32, %v3627_v37  ;;  %v3672_v41 = vmax.f32 %v3666_v40, 0.0 }
 0x43f   :  { %v3669_v57 = vpop.f32.mrf.mxu1 }
 0x440   :  { %v3673_v43 = vmax.f32 %v3668_v34, 0.0  ;;  %v3674_v39 = vpack.c.bf16 %v3672_v41, %v3672_v41 }
 0x441   :  { %v3670_v44 = vpop.f32.mrf.mxu1 }
 0x442   :  { %v3675_v45 = vpack.c.bf16 %v3673_v43, %v3673_v43  ;;  %v9515_v43 = vld [vmem:[#allocation22 + $0x8] sm:$0xff]   ;;  %v9516_v44 = vld [vmem:[#allocation22] sm:$0xff]  }
 0x444   :  { %3843 = vmatprep.mubr.bf16.mxu0 %v3675_v45  ;;  %v9517_v45 = vld [vmem:[#allocation23 + $0x70] ss:$8 sps:$4 sm:$0xff]  }
 0x445   :  { %3844 = vmatmul.mubr.bf16.vlgmr.msra.gmra.mxu0 %v3674_v39  ;;  %v9519_v39 = vld [vmem:[#allocation23 + $0x74] ss:$8 sps:$4 sm:$0xff]  }
 0x446   :  { %8914 = vmatprep.mubr.msk.bf16.mxu0 %vm10239_vm0, %v10238_v50  ;;  %8899 = vmatpush3.bf16.msra.mxu0 %v9493_v21  ;;  %v9523_v21 = vld [vmem:[#allocation23 + $0x50] ss:$8 sps:$4 sm:$0xff]  }
 0x447   :  { %8900 = vmatprep.subr.bf16.mxu0 %v10238_v50 }
 0x44a   :  { %8901 = vmatpush3.bf16.msra.mxu0 %v9494_v51  ;;  %v9528_v51 = vld [vmem:[#allocation23 + $0x44] ss:$8 sps:$4 sm:$0xff]  }
 0x44b   :  { %8902 = vmatprep.subr.bf16.mxu0 %v10238_v50 }
 0x44e   :  { %8903 = vmatpush3.bf16.msra.mxu0 %v9495_v52  ;;  %v9526_v52 = vld [vmem:[#allocation23 + $0x40] ss:$8 sps:$4 sm:$0xff]  }
 0x44f   :  { %8904 = vmatprep.subr.bf16.mxu0 %v10238_v50 }
 0x452   :  { %8905 = vmatpush3.bf16.msra.mxu0 %v9496_v55  ;;  %v9531_v55 = vld [vmem:[#allocation23 + $0x34] ss:$8 sps:$4 sm:$0xff]  }
 0x453   :  { %8906 = vmatprep.subr.bf16.mxu0 %v10238_v50 }
 0x456   :  { %8907 = vmatpush3.bf16.msra.mxu0 %v9497_v20  ;;  %v9534_v20 = vld [vmem:[#allocation23 + $0x24] ss:$8 sps:$4 sm:$0xff]  }
 0x457   :  { %8908 = vmatprep.subr.bf16.mxu0 %v10238_v50 }
 0x45a   :  { %8909 = vmatpush3.bf16.msra.mxu0 %v9498_v56  ;;  %v9532_v56 = vld [vmem:[#allocation23 + $0x20] ss:$8 sps:$4 sm:$0xff]  }
 0x45b   :  { %8910 = vmatprep.subr.bf16.mxu0 %v10238_v50 }
 0x45e   :  { %8911 = vmatpush3.bf16.msra.mxu0 %v9499_v2 }
 0x45f   :  { %8912 = vmatprep.subr.bf16.mxu0 %v10238_v50 }
 0x462   :  { %8913 = vmatpush3.bf16.msra.mxu0 %v9500_v10  ;;  %v9540_v10 = vld [vmem:[#allocation23 + $0x4] ss:$8 sps:$4 sm:$0xff]  }
 0x463   :  { %8938 = vmatprep.subr.bf16.mxu0 %v10238_v50 }
 0x505   :  { %v8836_v58 = vpop.f32.mrf.mxu0 }
 0x507   :  { %v8837_v59 = vpop.f32.mrf.mxu0 }
 0x508   :  { %v8838_v60 = vadd.f32 %v8837_v59, %v8836_v58  ;;  %v9537_v58 = vld [vmem:[#allocation23 + $0x14] ss:$8 sps:$4 sm:$0xff]   ;;  %v8338_v59 = vld [vmem:[%s10714_s14] ss:$0 sm:$0xff] }
 0x509   :  { %v8839_v61 = vpop.f32.mrf.mxu0 }
 0x50a   :  { %v3846_v62 = vadd.f32 %v8838_v60, %v8303_v16  ;;  %v9535_v16 = vld [vmem:[#allocation23 + $0x10] ss:$8 sps:$4 sm:$0xff]  }
 0x50b   :  { %v8840_v63 = vpop.f32.mrf.mxu0 }
 0x50c   :  { %v3851_v0 = vmax.f32 %v3846_v62, 0.0 }
 0x50e   :  { %v3852_v1 = vpack.c.bf16 %v3851_v0, %v3851_v0 }
 0x510   :  { %8895 = vmatmul.mubr.bf16.vlgmr.msra.gmra.mxu1 %v3852_v1 }
 0x511   :  { %8934 = vmatprep.mubr.msk.bf16.mxu1 %vm10239_vm0, %v10238_v50  ;;  %8919 = vmatpush3.bf16.msra.mxu1 %v9501_v3  ;;  %v9538_v3 = vld [vmem:[#allocation23] ss:$8 sps:$4 sm:$0xff]  }
 0x512   :  { %8920 = vmatprep.subr.bf16.mxu1 %v10238_v50 }
 0x515   :  { %8921 = vmatpush3.bf16.msra.mxu1 %v9502_v4  ;;  %v10240_v4 = vmov 0  }
 0x516   :  { %8922 = vmatprep.subr.bf16.mxu1 %v10238_v50 }
 0x519   :  { %8923 = vmatpush3.bf16.msra.mxu1 %v9503_v5  ;;  %v9541_v5 = vld [vmem:[#allocation25 + $0xe0] ss:$16 sps:$4 sm:$0xff]  }
 0x51a   :  { %8924 = vmatprep.subr.bf16.mxu1 %v10238_v50 }
 0x51d   :  { %8925 = vmatpush3.bf16.msra.mxu1 %v9504_v6  ;;  %v9543_v6 = vld [vmem:[#allocation25 + $0xe4] ss:$16 sps:$4 sm:$0xff]  }
 0x51e   :  { %8926 = vmatprep.subr.bf16.mxu1 %v10238_v50 }
 0x521   :  { %8927 = vmatpush3.bf16.msra.mxu1 %v9505_v7  ;;  %v9546_v7 = vld [vmem:[#allocation25 + $0xec] ss:$16 sps:$4 sm:$0xff]  }
 0x522   :  { %8928 = vmatprep.subr.bf16.mxu1 %v10238_v50 }
 0x525   :  { %8929 = vmatpush3.bf16.msra.mxu1 %v9506_v54  ;;  %v9549_v54 = vld [vmem:[#allocation25 + $0xc4] ss:$16 sps:$4 sm:$0xff]  }
 0x526   :  { %8930 = vmatprep.subr.bf16.mxu1 %v10238_v50 }
 0x529   :  { %8931 = vmatpush3.bf16.msra.mxu1 %v9507_v23  ;;  %v9571_v23 = vld [vmem:[#allocation25 + $0x40] ss:$16 sps:$4 sm:$0xff]  }
 0x52a   :  { %8932 = vmatprep.subr.bf16.mxu1 %v10238_v50 }
 0x52d   :  { %8933 = vmatpush3.bf16.msra.mxu1 %v9508_v13  ;;  %v9579_v13 = vld [vmem:[#allocation25 + $0x24] ss:$16 sps:$4 sm:$0xff]  }
 0x52e   :  { %4413 = vmatprep.subr.bf16.mxu1 %v9519_v39 }
 0x5d0   :  { %v3958_v47 = vpop.f32.mrf.mxu1 }
 0x5d1   :  { %v3959_v18 = vadd.f32 %v8320_v8, %v3958_v47  ;;  %v9547_v8 = vld [vmem:[#allocation25 + $0xc0] ss:$16 sps:$4 sm:$0xff]   ;;  %v9555_v47 = vld [vmem:[#allocation25 + $0xa4] ss:$16 sps:$4 sm:$0xff]  }
 0x5d2   :  { %v8896_v49 = vpop.f32.mrf.mxu1 }
 0x5d3   :  { %v3964_v19 = vmax.f32 %v3959_v18, 0.0  ;;  %v9553_v18 = vld [vmem:[#allocation25 + $0xa0] ss:$16 sps:$4 sm:$0xff]   ;;  %v9561_v49 = vld [vmem:[#allocation25 + $0x84] ss:$16 sps:$4 sm:$0xff]  }
 0x5d4   :  { %v3961_v22 = vpop.f32.mrf.mxu1 }
 0x5d5   :  { %v3965_v17 = vpack.c.bf16 %v3964_v19, %v3964_v19  ;;  %v9559_v19 = vld [vmem:[#allocation25 + $0x80] ss:$16 sps:$4 sm:$0xff]   ;;  %v9567_v22 = vld [vmem:[#allocation25 + $0x64] ss:$16 sps:$4 sm:$0xff]  }
 0x5d6   :  { %v8897_v53 = vpop.f32.mrf.mxu1 }
 0x5d7   :  { %8915 = vmatmul.mubr.bf16.vlgmr.msra.gmra.mxu0 %v3965_v17  ;;  %v9565_v17 = vld [vmem:[#allocation25 + $0x60] ss:$16 sps:$4 sm:$0xff]   ;;  %v9573_v53 = vld [vmem:[#allocation25 + $0x44] ss:$16 sps:$4 sm:$0xff]  }
 0x5d8   :  { %8954 = vmatprep.mubr.msk.bf16.mxu0 %vm10239_vm0, %v10238_v50  ;;  %8939 = vmatpush3.bf16.msra.mxu0 %v9509_v24  ;;  %v9577_v24 = vld [vmem:[#allocation25 + $0x20] ss:$16 sps:$4 sm:$0xff]  }
 0x5d9   :  { %8940 = vmatprep.subr.bf16.mxu0 %v10238_v50 }
 0x5dc   :  { %8941 = vmatpush3.bf16.msra.mxu0 %v9510_v25  ;;  %v9585_v25 = vld [vmem:[#allocation25 + $0x4] ss:$16 sps:$4 sm:$0xff]  }
 0x5dd   :  { %8942 = vmatprep.subr.bf16.mxu0 %v10238_v50 }
 0x5e0   :  { %8943 = vmatpush3.bf16.msra.mxu0 %v9511_v26  ;;  %v9583_v26 = vld [vmem:[#allocation25] ss:$16 sps:$4 sm:$0xff]  }
 0x5e1   :  { %8944 = vmatprep.subr.bf16.mxu0 %v10238_v50 }
 0x5e4   :  { %8945 = vmatpush3.bf16.msra.mxu0 %v9512_v27  ;;  %v9591_v27 = vld [vmem:[#allocation25 + $0x1e4] ss:$16 sps:$4 sm:$0xff]  }
 0x5e5   :  { %8946 = vmatprep.subr.bf16.mxu0 %v10238_v50 }
 0x5e8   :  { %8947 = vmatpush3.bf16.msra.mxu0 %v9513_v28  ;;  %v9589_v28 = vld [vmem:[#allocation25 + $0x1e0] ss:$16 sps:$4 sm:$0xff]  }
 0x5e9   :  { %8948 = vmatprep.subr.bf16.mxu0 %v10238_v50 }
 0x5ec   :  { %8949 = vmatpush3.bf16.msra.mxu0 %v9514_v29  ;;  %v9597_v29 = vld [vmem:[#allocation25 + $0x1c4] ss:$16 sps:$4 sm:$0xff]  }
 0x5ed   :  { %8950 = vmatprep.subr.bf16.mxu0 %v10238_v50 }
 0x5f0   :  { %8951 = vmatpush3.bf16.msra.mxu0 %v9515_v43  ;;  %v9619_v43 = vld [vmem:[#allocation25 + $0x140] ss:$16 sps:$4 sm:$0xff]  }
 0x5f1   :  { %8952 = vmatprep.subr.bf16.mxu0 %v10238_v50  ;;  %v9529_v50 = vld [vmem:[#allocation23 + $0x30] ss:$8 sps:$4 sm:$0xff]  }
 0x5f4   :  { %8953 = vmatpush3.bf16.msra.mxu0 %v9516_v44  ;;  %v8347_v44 = vld [vmem:[%s10716_s16] ss:$0 sm:$0xff] }
 0x5f5   :  { %4864 = vmatprep.subr.bf16.mxu0 %v9543_v6  ;;  %v9606_v6 = vld [vmem:[#allocation25 + $0x1ac] ss:$16 sps:$4 sm:$0xff]  }
 0x697   :  { %v4071_v31 = vpop.f32.mrf.mxu0 }
 0x698   :  { %v4072_v37 = vadd.f32 %v8329_v30, %v4071_v31  ;;  %v9595_v30 = vld [vmem:[#allocation25 + $0x1c0] ss:$16 sps:$4 sm:$0xff]   ;;  %v9603_v31 = vld [vmem:[#allocation25 + $0x1a4] ss:$16 sps:$4 sm:$0xff]  }
 0x699   :  { %v8916_v40 = vpop.f32.mrf.mxu0 }
 0x69a   :  { %v4077_v32 = vmax.f32 %v4072_v37, 0.0  ;;  %v9601_v37 = vld [vmem:[#allocation25 + $0x1a0] ss:$16 sps:$4 sm:$0xff]   ;;  %v9609_v40 = vld [vmem:[#allocation25 + $0x184] ss:$16 sps:$4 sm:$0xff]  }
 0x69b   :  { %v4074_v34 = vpop.f32.mrf.mxu0 }
 0x69c   :  { %v4078_v41 = vpack.c.bf16 %v4077_v32, %v4077_v32  ;;  %v9607_v32 = vld [vmem:[#allocation25 + $0x180] ss:$16 sps:$4 sm:$0xff]   ;;  %v9615_v34 = vld [vmem:[#allocation25 + $0x164] ss:$16 sps:$4 sm:$0xff]  }
 0x69d   :  { %v8917_v57 = vpop.f32.mrf.mxu0 }
 0x69e   :  { %8935 = vmatmul.mubr.bf16.vlgmr.msra.gmra.mxu1 %v4078_v41  ;;  %v9613_v41 = vld [vmem:[#allocation25 + $0x160] ss:$16 sps:$4 sm:$0xff]   ;;  %v9621_v57 = vld [vmem:[#allocation25 + $0x144] ss:$16 sps:$4 sm:$0xff]  }
 0x69f   :  { %4414 = vmatpush1.bf16.msra.mxu1 %v9517_v45  ;;  %4445 = vmatprep.mubr.bf16.mxu1 %v10240_v4  ;;  %v9600_v4 = vld [vmem:[#allocation25 + $0x1cc] ss:$16 sps:$4 sm:$0xff]  }
 0x6a0   :  { %4415 = vmatprep.subr.bf16.mxu1 %v9522_v46 }
 0x6a3   :  { %4416 = vmatpush1.bf16.msra.mxu1 %v9520_v36 }
 0x6a4   :  { %4417 = vmatprep.subr.bf16.mxu1 %v9525_v48 }
 0x6a7   :  { %4418 = vmatpush1.bf16.msra.mxu1 %v9523_v21  ;;  %v9544_v21 = vld [vmem:[#allocation25 + $0xe8] ss:$16 sps:$4 sm:$0xff]  }
 0x6a8   :  { %4419 = vmatprep.subr.bf16.mxu1 %v9528_v51 }
 0x6ab   :  { %4420 = vmatpush1.bf16.msra.mxu1 %v9526_v52  ;;  %v9552_v52 = vld [vmem:[#allocation25 + $0xcc] ss:$16 sps:$4 sm:$0xff]  }
 0x6ac   :  { %4421 = vmatprep.subr.bf16.mxu1 %v9531_v55 }
 0x6af   :  { %4422 = vmatpush1.bf16.msra.mxu1 %v9529_v50  ;;  %v9550_v50 = vld [vmem:[#allocation25 + $0xc8] ss:$16 sps:$4 sm:$0xff]  }
 0x6b0   :  { %4423 = vmatprep.subr.bf16.mxu1 %v9534_v20  ;;  %v9558_v20 = vld [vmem:[#allocation25 + $0xac] ss:$16 sps:$4 sm:$0xff]  }
 0x6b3   :  { %4424 = vmatpush1.bf16.msra.mxu1 %v9532_v56  ;;  %v9556_v56 = vld [vmem:[#allocation25 + $0xa8] ss:$16 sps:$4 sm:$0xff]  }
 0x6b4   :  { %4425 = vmatprep.subr.bf16.mxu1 %v9537_v58  ;;  %v9564_v58 = vld [vmem:[#allocation25 + $0x8c] ss:$16 sps:$4 sm:$0xff]  }
 0x6b7   :  { %4426 = vmatpush1.bf16.msra.mxu1 %v9535_v16  ;;  %v9562_v16 = vld [vmem:[#allocation25 + $0x88] ss:$16 sps:$4 sm:$0xff]  }
 0x6b8   :  { %4427 = vmatprep.subr.bf16.mxu1 %v9540_v10  ;;  %v9594_v10 = vld [vmem:[#allocation25 + $0x1ec] ss:$16 sps:$4 sm:$0xff]  }
 0x6bb   :  { %4428 = vmatpush1.bf16.msra.mxu1 %v9538_v3  ;;  %v9592_v3 = vld [vmem:[#allocation25 + $0x1e8] ss:$16 sps:$4 sm:$0xff]  }
 0x6bc   :  { %4905 = vmatprep.subr.bf16.mxu1 %v9546_v7  ;;  %v9604_v7 = vld [vmem:[#allocation25 + $0x1a8] ss:$16 sps:$4 sm:$0xff]  }
 0x75e   :  { %v4184_v60 = vpop.f32.mrf.mxu1 }
 0x75f   :  { %v4185_v61 = vadd.f32 %v8338_v59, %v4184_v60  ;;  %v9570_v59 = vld [vmem:[#allocation25 + $0x6c] ss:$16 sps:$4 sm:$0xff]   ;;  %v9568_v60 = vld [vmem:[#allocation25 + $0x68] ss:$16 sps:$4 sm:$0xff]  }
 0x760   :  { %v8936_v62 = vpop.f32.mrf.mxu1 }
 0x761   :  { %v4190_v63 = vmax.f32 %v4185_v61, 0.0  ;;  %v9576_v61 = vld [vmem:[#allocation25 + $0x4c] ss:$16 sps:$4 sm:$0xff]   ;;  %v9574_v62 = vld [vmem:[#allocation25 + $0x48] ss:$16 sps:$4 sm:$0xff]  }
 0x762   :  { %v4187_v0 = vpop.f32.mrf.mxu1 }
 0x763   :  { %v4191_v1 = vpack.c.bf16 %v4190_v63, %v4190_v63  ;;  %v9582_v63 = vld [vmem:[#allocation25 + $0x2c] ss:$16 sps:$4 sm:$0xff]   ;;  %v9580_v0 = vld [vmem:[#allocation25 + $0x28] ss:$16 sps:$4 sm:$0xff]  }
 0x764   :  { %v8937_v2 = vpop.f32.mrf.mxu1 }
 0x765   :  { %8955 = vmatmul.mubr.bf16.vlgmr.msra.gmra.mxu0 %v4191_v1  ;;  %v9588_v1 = vld [vmem:[#allocation25 + $0xc] ss:$16 sps:$4 sm:$0xff]   ;;  %v9586_v2 = vld [vmem:[#allocation25 + $0x8] ss:$16 sps:$4 sm:$0xff]  }
 0x766   :  { %4865 = vmatpush1.bf16.msra.mxu0 %v9541_v5  ;;  %v9598_v5 = vld [vmem:[#allocation25 + $0x1c8] ss:$16 sps:$4 sm:$0xff]  }
 0x767   :  { %4866 = vmatprep.subr.bf16.mxu0 %v9549_v54  ;;  %v9612_v54 = vld [vmem:[#allocation25 + $0x18c] ss:$16 sps:$4 sm:$0xff]  }
 0x76a   :  { %4867 = vmatpush1.bf16.msra.mxu0 %v9547_v8  ;;  %v9610_v8 = vld [vmem:[#allocation25 + $0x188] ss:$16 sps:$4 sm:$0xff]  }
 0x76b   :  { %4868 = vmatprep.subr.bf16.mxu0 %v9555_v47  ;;  %v9618_v47 = vld [vmem:[#allocation25 + $0x16c] ss:$16 sps:$4 sm:$0xff]  }
 0x76e   :  { %4869 = vmatpush1.bf16.msra.mxu0 %v9553_v18  ;;  %v9616_v18 = vld [vmem:[#allocation25 + $0x168] ss:$16 sps:$4 sm:$0xff]  }
 0x76f   :  { %4870 = vmatprep.subr.bf16.mxu0 %v9561_v49  ;;  %v9624_v49 = vld [vmem:[#allocation25 + $0x14c] ss:$16 sps:$4 sm:$0xff]  }
 0x772   :  { %4871 = vmatpush1.bf16.msra.mxu0 %v9559_v19  ;;  %v9622_v19 = vld [vmem:[#allocation25 + $0x148] ss:$16 sps:$4 sm:$0xff]  }
 0x773   :  { %4872 = vmatprep.subr.bf16.mxu0 %v9567_v22  ;;  %v9627_v22 = vld [vmem:[#allocation25 + $0x124] ss:$16 sps:$4 sm:$0xff]  }
 0x776   :  { %4873 = vmatpush1.bf16.msra.mxu0 %v9565_v17  ;;  %v9630_v17 = vld [vmem:[#allocation25 + $0x12c] ss:$16 sps:$4 sm:$0xff]  }
 0x777   :  { %4874 = vmatprep.subr.bf16.mxu0 %v9573_v53  ;;  %v9625_v53 = vld [vmem:[#allocation25 + $0x120] ss:$16 sps:$4 sm:$0xff]  }
 0x77a   :  { %4875 = vmatpush1.bf16.msra.mxu0 %v9571_v23  ;;  %v9628_v23 = vld [vmem:[#allocation25 + $0x128] ss:$16 sps:$4 sm:$0xff]  }
 0x77b   :  { %4876 = vmatprep.subr.bf16.mxu0 %v9579_v13  ;;  %v9633_v13 = vld [vmem:[#allocation25 + $0x104] ss:$16 sps:$4 sm:$0xff]  }
 0x77e   :  { %4877 = vmatpush1.bf16.msra.mxu0 %v9577_v24  ;;  %v9636_v24 = vld [vmem:[#allocation25 + $0x10c] ss:$16 sps:$4 sm:$0xff]  }
 0x77f   :  { %4878 = vmatprep.subr.bf16.mxu0 %v9585_v25  ;;  %v9631_v25 = vld [vmem:[#allocation25 + $0x100] ss:$16 sps:$4 sm:$0xff]  }
 0x782   :  { %4879 = vmatpush1.bf16.msra.mxu0 %v9583_v26  ;;  %v9634_v26 = vld [vmem:[#allocation25 + $0x108] ss:$16 sps:$4 sm:$0xff]  }
 0x783   :  { %4880 = vmatprep.subr.bf16.mxu0 %v9591_v27  ;;  %v5010_v27 = vld [vmem:[#allocation26 + $0x1c0] sm:$0xff] }
 0x786   :  { %4881 = vmatpush2.bf16.msra.mxu0 %v9589_v28  ;;  %v5014_v28 = vld [vmem:[#allocation26 + $0x1e0] sm:$0xff] }
 0x787   :  { %4882 = vmatprep.subr.bf16.mxu0 %v9597_v29  ;;  %v5138_v29 = vld [vmem:[#allocation26 + $0x5c0] sm:$0xff] }
 0x78a   :  { %4883 = vmatpush2.bf16.msra.mxu0 %v9595_v30  ;;  %v8492_v30 = vcombine.low %v5010_v27, %v5014_v28 }
 0x78b   :  { %4884 = vmatprep.subr.bf16.mxu0 %v9603_v31  ;;  %v8493_v31 = vcombine.high %v5010_v27, %v5014_v28 }
 0x78e   :  { %4885 = vmatpush2.bf16.msra.mxu0 %v9601_v37  ;;  %v5142_v37 = vld [vmem:[#allocation26 + $0x5e0] sm:$0xff] }
 0x78f   :  { %4886 = vmatprep.subr.bf16.mxu0 %v9609_v40  ;;  %v8620_v40 = vcombine.low %v5138_v29, %v5142_v37 }
 0x792   :  { %4887 = vmatpush2.bf16.msra.mxu0 %v9607_v32  ;;  %v8621_v32 = vcombine.high %v5138_v29, %v5142_v37  ;;  %v4966_v37 = vld [vmem:[#allocation26 + $0x60] sm:$0xff] }
 0x793   :  { %4888 = vmatprep.subr.bf16.mxu0 %v9615_v34  ;;  %v4321_v34 = vld [vmem:[%s10718_s18] sm:$0x3] }
 0x796   :  { %4889 = vmatpush2.bf16.msra.mxu0 %v9613_v41  ;;  %v4326_v41 = vrot.slane %v4321_v34, %v10482_v11 }
 0x797   :  { %4890 = vmatprep.subr.bf16.mxu0 %v9621_v57  ;;  %v4330_v57 = vrot.slane %v4321_v34, %v10488_v14 }
 0x79a   :  { %4891 = vmatpush2.bf16.msra.mxu0 %v9619_v43 }
 0x79b   :  { %4892 = vmatprep.subr.bf16.mxu0 %v9627_v22 }
 0x79e   :  { %4893 = vmatpush2.bf16.msra.mxu0 %v9625_v53 }
 0x79f   :  { %4894 = vmatprep.subr.bf16.mxu0 %v9633_v13  ;;  %v4970_v13 = vld [vmem:[#allocation26 + $0x80] sm:$0xff] }
 0x7a2   :  { %4895 = vmatpush2.bf16.msra.mxu0 %v9631_v25  ;;  %v5098_v25 = vld [vmem:[#allocation26 + $0x480] sm:$0xff] }
 0x7a3   :  { %6532 = vmatprep.subr.bf16.mxu0 %v8493_v31  ;;  %v4962_v31 = vld [vmem:[#allocation26 + $0x40] sm:$0xff] }
 0x825   :  { %v4297_v45 = vpop.f32.mrf.mxu0 }
 0x826   :  { %v4298_v39 = vadd.f32 %v8347_v44, %v4297_v45 }
 0x827   :  { %v8956_v46 = vpop.f32.mrf.mxu0 }
 0x828   :  { %v4303_v36 = vmax.f32 %v4298_v39, 0.0 }
 0x829   :  { %v4300_v48 = vpop.f32.mrf.mxu0 }
 0x82a   :  { %v4304_v51 = vpack.c.bf16 %v4303_v36, %v4303_v36  ;;  %v5002_v48 = vld [vmem:[#allocation26 + $0x180] sm:$0xff] }
 0x82b   :  { %v8957_v55 = vpop.f32.mrf.mxu0 }
 0x82c   :  { %4446 = vmatmul.mubr.bf16.vlgmr.msra.gmra.mxu1 %v4304_v51  ;;  %v5006_v51 = vld [vmem:[#allocation26 + $0x1a0] sm:$0xff] }
 0x82d   :  { %4906 = vmatpush1.bf16.msra.mxu1 %v9544_v21  ;;  %v5134_v55 = vld [vmem:[#allocation26 + $0x5a0] sm:$0xff] }
 0x82e   :  { %4907 = vmatprep.subr.bf16.mxu1 %v9552_v52  ;;  %v5130_v52 = vld [vmem:[#allocation26 + $0x580] sm:$0xff] }
 0x831   :  { %4908 = vmatpush1.bf16.msra.mxu1 %v9550_v50 }
 0x832   :  { %4909 = vmatprep.subr.bf16.mxu1 %v9558_v20 }
 0x835   :  { %4910 = vmatpush1.bf16.msra.mxu1 %v9556_v56 }
 0x836   :  { %4911 = vmatprep.subr.bf16.mxu1 %v9564_v58  ;;  %v8485_v58 = vcombine.high %v5002_v48, %v5006_v51 }
 0x839   :  { %4912 = vmatpush1.bf16.msra.mxu1 %v9562_v16  ;;  %v8613_v16 = vcombine.high %v5130_v52, %v5134_v55 }
 0x83a   :  { %4913 = vmatprep.subr.bf16.mxu1 %v9570_v59  ;;  %v4994_v59 = vld [vmem:[#allocation26 + $0x140] sm:$0xff] }
 0x83d   :  { %4914 = vmatpush1.bf16.msra.mxu1 %v9568_v60  ;;  %v4998_v60 = vld [vmem:[#allocation26 + $0x160] sm:$0xff] }
 0x83e   :  { %4915 = vmatprep.subr.bf16.mxu1 %v9576_v61  ;;  %v5122_v61 = vld [vmem:[#allocation26 + $0x540] sm:$0xff] }
 0x841   :  { %4916 = vmatpush1.bf16.msra.mxu1 %v9574_v62  ;;  %v5126_v62 = vld [vmem:[#allocation26 + $0x560] sm:$0xff] }
 0x842   :  { %4917 = vmatprep.subr.bf16.mxu1 %v9582_v63  ;;  %v8484_v63 = vcombine.low %v5002_v48, %v5006_v51 }
 0x845   :  { %4918 = vmatpush1.bf16.msra.mxu1 %v9580_v0  ;;  %v8612_v0 = vcombine.low %v5130_v52, %v5134_v55  ;;  %v5074_v52 = vld [vmem:[#allocation26 + $0x3c0] sm:$0xff] }
 0x846   :  { %4919 = vmatprep.subr.bf16.mxu1 %v9588_v1  ;;  %v8477_v1 = vcombine.high %v4994_v59, %v4998_v60  ;;  %v5078_v55 = vld [vmem:[#allocation26 + $0x3e0] sm:$0xff] }
 0x849   :  { %4920 = vmatpush1.bf16.msra.mxu1 %v9586_v2  ;;  %v8605_v2 = vcombine.high %v5122_v61, %v5126_v62 }
 0x84a   :  { %4921 = vmatprep.subr.bf16.mxu1 %v9594_v10  ;;  %v4986_v10 = vld [vmem:[#allocation26 + $0x100] sm:$0xff] }
 0x84d   :  { %4922 = vmatpush2.bf16.msra.mxu1 %v9592_v3  ;;  %v4990_v3 = vld [vmem:[#allocation26 + $0x120] sm:$0xff] }
 0x84e   :  { %4923 = vmatprep.subr.bf16.mxu1 %v9600_v4  ;;  %v5114_v4 = vld [vmem:[#allocation26 + $0x500] sm:$0xff]  ;;  %v8468_v22 = vcombine.low %v4986_v10, %v4990_v3 }
 0x851   :  { %4924 = vmatpush2.bf16.msra.mxu1 %v9598_v5  ;;  %v5118_v5 = vld [vmem:[#allocation26 + $0x520] sm:$0xff] }
 0x852   :  { %4925 = vmatprep.subr.bf16.mxu1 %v9606_v6  ;;  %v8476_v6 = vcombine.low %v4994_v59, %v4998_v60  ;;  %v5066_v60 = vld [vmem:[#allocation26 + $0x380] sm:$0xff] }
 0x855   :  { %4926 = vmatpush2.bf16.msra.mxu1 %v9604_v7  ;;  %v8604_v7 = vcombine.low %v5122_v61, %v5126_v62  ;;  %v5070_v61 = vld [vmem:[#allocation26 + $0x3a0] sm:$0xff] }
 0x856   :  { %4927 = vmatprep.subr.bf16.mxu1 %v9612_v54  ;;  %v8469_v54 = vcombine.high %v4986_v10, %v4990_v3  ;;  %v5194_v62 = vld [vmem:[#allocation26 + $0x780] sm:$0xff] }
 0x857   :  { %v5058_v3 = vld [vmem:[#allocation26 + $0x340] sm:$0xff] }
 0x859   :  { %4928 = vmatpush2.bf16.msra.mxu1 %v9610_v8  ;;  %v8597_v8 = vcombine.high %v5114_v4, %v5118_v5 }
 0x85a   :  { %4929 = vmatprep.subr.bf16.mxu1 %v9618_v47  ;;  %v4978_v47 = vld [vmem:[#allocation26 + $0xc0] sm:$0xff] }
 0x85d   :  { %4930 = vmatpush2.bf16.msra.mxu1 %v9616_v18  ;;  %v4982_v18 = vld [vmem:[#allocation26 + $0xe0] sm:$0xff] }
 0x85e   :  { %4931 = vmatprep.subr.bf16.mxu1 %v9624_v49  ;;  %v5106_v49 = vld [vmem:[#allocation26 + $0x4c0] sm:$0xff]  ;;  %v8461_v53 = vcombine.high %v4978_v47, %v4982_v18  ;;  %v8460_v27 = vcombine.low %v4978_v47, %v4982_v18 }
 0x85f   :  { %v5050_v18 = vld [vmem:[#allocation26 + $0x300] sm:$0xff] }
 0x861   :  { %4932 = vmatpush2.bf16.msra.mxu1 %v9622_v19  ;;  %v5110_v19 = vld [vmem:[#allocation26 + $0x4e0] sm:$0xff] }
 0x862   :  { %4933 = vmatprep.subr.bf16.mxu1 %v9630_v17  ;;  %v8596_v17 = vcombine.low %v5114_v4, %v5118_v5  ;;  %v8588_v28 = vcombine.low %v5106_v49, %v5110_v19  ;;  %v5062_v4 = vld [vmem:[#allocation26 + $0x360] sm:$0xff] }
 0x863   :  { %v5186_v5 = vld [vmem:[#allocation26 + $0x740] sm:$0xff] }
 0x865   :  { %4934 = vmatpush2.bf16.msra.mxu1 %v9628_v23  ;;  %v8589_v23 = vcombine.high %v5106_v49, %v5110_v19  ;;  %v5054_v49 = vld [vmem:[#allocation26 + $0x320] sm:$0xff] }
 0x866   :  { %4935 = vmatprep.subr.bf16.mxu1 %v9636_v24  ;;  %v4974_v24 = vld [vmem:[#allocation26 + $0xa0] sm:$0xff] }
 0x867   :  { %v8453_v29 = vcombine.high %v4970_v13, %v4974_v24  ;;  %v8452_v34 = vcombine.low %v4970_v13, %v4974_v24  ;;  %v5178_v19 = vld [vmem:[#allocation26 + $0x700] sm:$0xff] }
 0x868   :  { %v5042_v24 = vld [vmem:[#allocation26 + $0x2c0] sm:$0xff] }
 0x869   :  { %4936 = vmatpush2.bf16.msra.mxu1 %v9634_v26  ;;  %v5102_v26 = vld [vmem:[#allocation26 + $0x4a0] sm:$0xff] }
 0x86a   :  { %6573 = vmatprep.subr.bf16.mxu1 %v8621_v32  ;;  %v5094_v32 = vld [vmem:[#allocation26 + $0x460] sm:$0xff] }
 0x8ec   :  { %v4447_v43 = vpop.f32.mrf.mxu1 }
 0x8ed   :  { %v4448_v44 = vadd.f32 %v4447_v43, %v4326_v41  ;;  %v8580_v41 = vcombine.low %v5098_v25, %v5102_v26 }
 0x8ee   :  { %v4449_v45 = vpop.f32.mrf.mxu1 }
 0x8ef   :  { %v4450_v39 = vadd.f32 %v4449_v45, %v4330_v57  ;;  %v4454_v46 = vmax.f32 %v4448_v44, 0.0  ;;  %v8445_v57 = vcombine.high %v4962_v31, %v4966_v37  ;;  %v4954_v44 = vld [vmem:[#allocation26] sm:$0xff] }
 0x8f0   :  { %v4451_v36 = vpop.f32.mrf.mxu1  ;;  %v4958_v45 = vld [vmem:[#allocation26 + $0x20] sm:$0xff] }
 0x8f1   :  { %v4455_v21 = vmax.f32 %v4450_v39, 0.0  ;;  %v4456_v56 = vpack.c.bf16 %v4454_v46, %v4454_v46  ;;  %v5082_v39 = vld [vmem:[#allocation26 + $0x400] sm:$0xff]  ;;  %v8444_v36 = vcombine.low %v4962_v31, %v4966_v37 }
 0x8f2   :  { %v4452_v50 = vpop.f32.mrf.mxu1  ;;  %v5086_v46 = vld [vmem:[#allocation26 + $0x420] sm:$0xff] }
 0x8f3   :  { %v4457_v20 = vpack.c.bf16 %v4455_v21, %v4455_v21  ;;  %v8437_v21 = vcombine.high %v4954_v44, %v4958_v45  ;;  %v8565_v51 = vcombine.high %v5082_v39, %v5086_v46  ;;  %v5202_v50 = vld [vmem:[#allocation26 + $0x7c0] sm:$0xff] }
 0x8f4   :  { %v5034_v37 = vld [vmem:[#allocation26 + $0x280] sm:$0xff] }
 0x8f5   :  { %4896 = vmatprep.mubr.bf16.mxu0 %v4457_v20  ;;  %4937 = vmatprep.mubr.bf16.mxu1 %v4457_v20  ;;  %v5206_v20 = vld [vmem:[#allocation26 + $0x7e0] sm:$0xff] }
 0x8f6   :  { %4897 = vmatmul.mubr.bf16.vlgmr.msra.gmra.mxu0 %v4456_v56  ;;  %4938 = vmatmul.mubr.bf16.vlgmr.msra.gmra.mxu1 %v4456_v56  ;;  %v8436_v56 = vcombine.low %v4954_v44, %v4958_v45  ;;  %v8685_v59 = vcombine.high %v5202_v50, %v5206_v20 }
 0x8f7   :  { %6533 = vmatpush1.bf16.msra.mxu0 %v8492_v30  ;;  %6574 = vmatpush1.bf16.msra.mxu1 %v8620_v40  ;;  %v8581_v30 = vcombine.high %v5098_v25, %v5102_v26  ;;  %v5090_v40 = vld [vmem:[#allocation26 + $0x440] sm:$0xff] }
 0x8f8   :  { %6534 = vmatprep.subr.bf16.mxu0 %v8485_v58  ;;  %6575 = vmatprep.subr.bf16.mxu1 %v8613_v16  ;;  %v8573_v43 = vcombine.high %v5090_v40, %v5094_v32  ;;  %v8572_v48 = vcombine.low %v5090_v40, %v5094_v32  ;;  %v8564_v58 = vcombine.low %v5082_v39, %v5086_v46  ;;  %v5046_v25 = vld [vmem:[#allocation26 + $0x2e0] sm:$0xff] }
 0x8f9   :  { %v8557_v16 = vcombine.high %v5074_v52, %v5078_v55  ;;  %v5170_v26 = vld [vmem:[#allocation26 + $0x6c0] sm:$0xff] }
 0x8fa   :  { %v5038_v40 = vld [vmem:[#allocation26 + $0x2a0] sm:$0xff] }
 0x8fb   :  { %6535 = vmatpush1.bf16.msra.mxu0 %v8484_v63  ;;  %6576 = vmatpush1.bf16.msra.mxu1 %v8612_v0  ;;  %v5198_v63 = vld [vmem:[#allocation26 + $0x7a0] sm:$0xff]  ;;  %v8556_v0 = vcombine.low %v5074_v52, %v5078_v55  ;;  %v8516_v45 = vcombine.low %v5034_v37, %v5038_v40 }
 0x8fc   :  { %6536 = vmatprep.subr.bf16.mxu0 %v8477_v1  ;;  %6577 = vmatprep.subr.bf16.mxu1 %v8605_v2  ;;  %v8684_v1 = vcombine.low %v5202_v50, %v5206_v20  ;;  %v8549_v2 = vcombine.high %v5066_v60, %v5070_v61  ;;  %v8677_v10 = vcombine.high %v5194_v62, %v5198_v63  ;;  %v5162_v32 = vld [vmem:[#allocation26 + $0x680] sm:$0xff] }
 0x8fd   :  { %v5026_v46 = vld [vmem:[#allocation26 + $0x240] sm:$0xff] }
 0x8fe   :  { %v5018_v20 = vld [vmem:[#allocation26 + $0x200] sm:$0xff] }
 0x8ff   :  { %6537 = vmatpush1.bf16.msra.mxu0 %v8476_v6  ;;  %6578 = vmatpush1.bf16.msra.mxu1 %v8604_v7  ;;  %v5190_v6 = vld [vmem:[#allocation26 + $0x760] sm:$0xff]  ;;  %v8548_v7 = vcombine.low %v5066_v60, %v5070_v61 }
 0x900   :  { %6538 = vmatprep.subr.bf16.mxu0 %v8469_v54  ;;  %6579 = vmatprep.subr.bf16.mxu1 %v8597_v8  ;;  %v8676_v54 = vcombine.low %v5194_v62, %v5198_v63  ;;  %v8541_v8 = vcombine.high %v5058_v3, %v5062_v4  ;;  %v8669_v47 = vcombine.high %v5186_v5, %v5190_v6  ;;  %v5011_v63 = vld [vmem:[#allocation26 + $0x1c8] sm:$0xff] }
 0x903   :  { %6539 = vmatpush1.bf16.msra.mxu0 %v8468_v22  ;;  %6580 = vmatpush1.bf16.msra.mxu1 %v8596_v17  ;;  %v5182_v22 = vld [vmem:[#allocation26 + $0x720] sm:$0xff]  ;;  %v8540_v17 = vcombine.low %v5058_v3, %v5062_v4  ;;  %v5143_v3 = vld [vmem:[#allocation26 + $0x5e8] sm:$0xff] }
 0x904   :  { %6540 = vmatprep.subr.bf16.mxu0 %v8461_v53  ;;  %6581 = vmatprep.subr.bf16.mxu1 %v8589_v23  ;;  %v8668_v53 = vcombine.low %v5186_v5, %v5190_v6  ;;  %v8533_v23 = vcombine.high %v5050_v18, %v5054_v49  ;;  %v8661_v13 = vcombine.high %v5178_v19, %v5182_v22  ;;  %v4522_v6 = vld [vmem:[%s10720_s20] sm:$0xf] }
 0x907   :  { %6541 = vmatpush1.bf16.msra.mxu0 %v8460_v27  ;;  %6582 = vmatpush1.bf16.msra.mxu1 %v8588_v28  ;;  %v5174_v27 = vld [vmem:[#allocation26 + $0x6e0] sm:$0xff]  ;;  %v8532_v28 = vcombine.low %v5050_v18, %v5054_v49 }
 0x908   :  { %6542 = vmatprep.subr.bf16.mxu0 %v8453_v29  ;;  %6583 = vmatprep.subr.bf16.mxu1 %v8581_v30  ;;  %v8660_v29 = vcombine.low %v5178_v19, %v5182_v22  ;;  %v8525_v30 = vcombine.high %v5042_v24, %v5046_v25  ;;  %v8653_v31 = vcombine.high %v5170_v26, %v5174_v27 }
 0x90b   :  { %6543 = vmatpush1.bf16.msra.mxu0 %v8452_v34  ;;  %6584 = vmatpush1.bf16.msra.mxu1 %v8580_v41  ;;  %v5166_v34 = vld [vmem:[#allocation26 + $0x6a0] sm:$0xff]  ;;  %v8524_v41 = vcombine.low %v5042_v24, %v5046_v25 }
 0x90c   :  { %6544 = vmatprep.subr.bf16.mxu0 %v8445_v57  ;;  %6585 = vmatprep.subr.bf16.mxu1 %v8573_v43  ;;  %v8652_v57 = vcombine.low %v5170_v26, %v5174_v27  ;;  %v8517_v43 = vcombine.high %v5034_v37, %v5038_v40  ;;  %v8645_v44 = vcombine.high %v5162_v32, %v5166_v34  ;;  %v5007_v40 = vld [vmem:[#allocation26 + $0x1a8] sm:$0xff] }
 0x90d   :  { %v8644_v39 = vcombine.low %v5162_v32, %v5166_v34  ;;  %v5131_v32 = vld [vmem:[#allocation26 + $0x588] sm:$0xff] }
 0x90e   :  { %v5135_v34 = vld [vmem:[#allocation26 + $0x5a8] sm:$0xff] }
 0x90f   :  { %6545 = vmatpush1.bf16.msra.mxu0 %v8444_v36  ;;  %6586 = vmatpush1.bf16.msra.mxu1 %v8572_v48  ;;  %v5030_v36 = vld [vmem:[#allocation26 + $0x260] sm:$0xff] }
 0x910   :  { %6546 = vmatprep.subr.bf16.mxu0 %v8437_v21  ;;  %6587 = vmatprep.subr.bf16.mxu1 %v8565_v51  ;;  %v5154_v48 = vld [vmem:[#allocation26 + $0x640] sm:$0xff]  ;;  %v8509_v21 = vcombine.high %v5026_v46, %v5030_v36  ;;  %v8508_v52 = vcombine.low %v5026_v46, %v5030_v36  ;;  %v8615_v46 = vcombine.high %v5131_v32, %v5135_v34  ;;  %v4999_v36 = vld [vmem:[#allocation26 + $0x168] sm:$0xff] }
 0x911   :  { %v5158_v51 = vld [vmem:[#allocation26 + $0x660] sm:$0xff] }
 0x912   :  { %v8636_v55 = vcombine.low %v5154_v48, %v5158_v51  ;;  %v8637_v50 = vcombine.high %v5154_v48, %v5158_v51  ;;  %v5123_v48 = vld [vmem:[#allocation26 + $0x548] sm:$0xff] }
 0x913   :  { %6547 = vmatpush1.bf16.msra.mxu0 %v8436_v56  ;;  %6588 = vmatpush1.bf16.msra.mxu1 %v8564_v58  ;;  %v5022_v56 = vld [vmem:[#allocation26 + $0x220] sm:$0xff] }
 0x914   :  { %6548 = vmatprep.subr.bf16.mxu0 %v8557_v16  ;;  %6589 = vmatprep.subr.bf16.mxu1 %v8685_v59  ;;  %v5146_v58 = vld [vmem:[#allocation26 + $0x600] sm:$0xff]  ;;  %v8501_v16 = vcombine.high %v5018_v20, %v5022_v56  ;;  %v8500_v60 = vcombine.low %v5018_v20, %v5022_v56  ;;  %v4987_v20 = vld [vmem:[#allocation26 + $0x108] sm:$0xff] }
 0x915   :  { %v5150_v59 = vld [vmem:[#allocation26 + $0x620] sm:$0xff]  ;;  %v4991_v56 = vld [vmem:[#allocation26 + $0x128] sm:$0xff] }
 0x916   :  { %v8628_v61 = vcombine.low %v5146_v58, %v5150_v59  ;;  %v8629_v62 = vcombine.high %v5146_v58, %v5150_v59  ;;  %v5115_v58 = vld [vmem:[#allocation26 + $0x508] sm:$0xff] }
 0x917   :  { %6549 = vmatpush2.bf16.msra.mxu0 %v8556_v0  ;;  %6590 = vmatpush2.bf16.msra.mxu1 %v8684_v1  ;;  %v5015_v0 = vld [vmem:[#allocation26 + $0x1e8] sm:$0xff] }
 0x918   :  { %6550 = vmatprep.subr.bf16.mxu0 %v8549_v2  ;;  %6591 = vmatprep.subr.bf16.mxu1 %v8677_v10  ;;  %v5139_v1 = vld [vmem:[#allocation26 + $0x5c8] sm:$0xff]  ;;  %v8494_v2 = vcombine.low %v5011_v63, %v5015_v0  ;;  %v8495_v10 = vcombine.high %v5011_v63, %v5015_v0 }
 0x919   :  { %v8622_v4 = vcombine.low %v5139_v1, %v5143_v3  ;;  %v8623_v5 = vcombine.high %v5139_v1, %v5143_v3  ;;  %v4979_v63 = vld [vmem:[#allocation26 + $0xc8] sm:$0xff] }
 0x91a   :  { %v4983_v0 = vld [vmem:[#allocation26 + $0xe8] sm:$0xff] }
 0x91b   :  { %6551 = vmatpush2.bf16.msra.mxu0 %v8548_v7  ;;  %6592 = vmatpush2.bf16.msra.mxu1 %v8676_v54  ;;  %v4527_v7 = vrot.slane %v4522_v6, %v10482_v11  ;;  %v4535_v54 = vrot.slane %v4522_v6, %v10485_v12  ;;  %v5107_v1 = vld [vmem:[#allocation26 + $0x4c8] sm:$0xff] }
 0x91c   :  { %6552 = vmatprep.subr.bf16.mxu0 %v8541_v8  ;;  %6593 = vmatprep.subr.bf16.mxu1 %v8669_v47  ;;  %v4531_v8 = vrot.slane %v4522_v6, %v10488_v14  ;;  %v4539_v47 = vrot.slane %v4522_v6, %v10491_v15  ;;  %v4971_v6 = vld [vmem:[#allocation26 + $0x88] sm:$0xff] }
 0x91f   :  { %6553 = vmatpush2.bf16.msra.mxu0 %v8540_v17  ;;  %6594 = vmatpush2.bf16.msra.mxu1 %v8668_v53 }
 0x920   :  { %6554 = vmatprep.subr.bf16.mxu0 %v8533_v23  ;;  %6595 = vmatprep.subr.bf16.mxu1 %v8661_v13 }
 0x923   :  { %6555 = vmatpush2.bf16.msra.mxu0 %v8532_v28  ;;  %6596 = vmatpush2.bf16.msra.mxu1 %v8660_v29 }
 0x924   :  { %6556 = vmatprep.subr.bf16.mxu0 %v8525_v30  ;;  %6597 = vmatprep.subr.bf16.mxu1 %v8653_v31  ;;  %v5003_v30 = vld [vmem:[#allocation26 + $0x188] sm:$0xff] }
 0x925   :  { %v8486_v51 = vcombine.low %v5003_v30, %v5007_v40 }
 0x927   :  { %6557 = vmatpush2.bf16.msra.mxu0 %v8524_v41  ;;  %6598 = vmatpush2.bf16.msra.mxu1 %v8652_v57 }
 0x928   :  { %6558 = vmatprep.subr.bf16.mxu0 %v8517_v43  ;;  %6599 = vmatprep.subr.bf16.mxu1 %v8645_v44 }
 0x92b   :  { %6559 = vmatpush2.bf16.msra.mxu0 %v8516_v45  ;;  %6600 = vmatpush2.bf16.msra.mxu1 %v8644_v39  ;;  %v4995_v45 = vld [vmem:[#allocation26 + $0x148] sm:$0xff]  ;;  %v8487_v39 = vcombine.high %v5003_v30, %v5007_v40 }
 0x92c   :  { %6560 = vmatprep.subr.bf16.mxu0 %v8509_v21  ;;  %6601 = vmatprep.subr.bf16.mxu1 %v8637_v50  ;;  %v5127_v21 = vld [vmem:[#allocation26 + $0x568] sm:$0xff]  ;;  %v8478_v59 = vcombine.low %v4995_v45, %v4999_v36 }
 0x92d   :  { %v8607_v50 = vcombine.high %v5123_v48, %v5127_v21  ;;  %v5087_v30 = vld [vmem:[#allocation26 + $0x428] sm:$0xff] }
 0x92f   :  { %6561 = vmatpush2.bf16.msra.mxu0 %v8508_v52  ;;  %6602 = vmatpush2.bf16.msra.mxu1 %v8636_v55  ;;  %v8614_v52 = vcombine.low %v5131_v32, %v5135_v34  ;;  %v8479_v55 = vcombine.high %v4995_v45, %v4999_v36  ;;  %v5075_v34 = vld [vmem:[#allocation26 + $0x3c8] sm:$0xff] }
 0x930   :  { %6562 = vmatprep.subr.bf16.mxu0 %v8501_v16  ;;  %6603 = vmatprep.subr.bf16.mxu1 %v8629_v62  ;;  %v5119_v16 = vld [vmem:[#allocation26 + $0x528] sm:$0xff] }
 0x931   :  { %v8599_v62 = vcombine.high %v5115_v58, %v5119_v16  ;;  %v8598_v3 = vcombine.low %v5115_v58, %v5119_v16  ;;  %v5079_v45 = vld [vmem:[#allocation26 + $0x3e8] sm:$0xff] }
 0x933   :  { %6563 = vmatpush2.bf16.msra.mxu0 %v8500_v60  ;;  %6604 = vmatpush2.bf16.msra.mxu1 %v8628_v61  ;;  %v8606_v60 = vcombine.low %v5123_v48, %v5127_v21  ;;  %v8471_v61 = vcombine.high %v4987_v20, %v4991_v56  ;;  %v8559_v21 = vcombine.high %v5075_v34, %v5079_v45 }
 0x934   :  { %6614 = vmatprep.subr.bf16.mxu0 %v8495_v10  ;;  %6655 = vmatprep.subr.bf16.mxu1 %v8623_v5  ;;  %v8470_v10 = vcombine.low %v4987_v20, %v4991_v56  ;;  %v5199_v20 = vld [vmem:[#allocation26 + $0x7a8] sm:$0xff]  ;;  %v8558_v56 = vcombine.low %v5075_v34, %v5079_v45 }
 0x935   :  { %v5159_v34 = vld [vmem:[#allocation26 + $0x668] sm:$0xff] }
 0x9b6   :  { %v4898_v18 = vpop.f32.mrf.mxu0  ;;  %v4939_v49 = vpop.f32.mrf.mxu1 }
 0x9b7   :  { %v4899_v19 = vadd.f32 %v4898_v18, %v4527_v7  ;;  %v4940_v22 = vadd.f32 %v4939_v49, %v4535_v54  ;;  %v4975_v7 = vld [vmem:[#allocation26 + $0xa8] sm:$0xff] }
 0x9b8   :  { %v4900_v17 = vpop.f32.mrf.mxu0  ;;  %v4941_v53 = vpop.f32.mrf.mxu1  ;;  %v5099_v54 = vld [vmem:[#allocation26 + $0x488] sm:$0xff]  ;;  %v8455_v49 = vcombine.high %v4971_v6, %v4975_v7 }
 0x9b9   :  { %v4901_v23 = vadd.f32 %v4900_v17, %v4531_v8  ;;  %v4942_v13 = vadd.f32 %v4941_v53, %v4539_v47  ;;  %v4946_v24 = vmax.f32 %v4899_v19, 0.0  ;;  %v4948_v25 = vmax.f32 %v4940_v22, 0.0  ;;  %v5103_v8 = vld [vmem:[#allocation26 + $0x4a8] sm:$0xff] }
 0x9ba   :  { %v4902_v26 = vpop.f32.mrf.mxu0  ;;  %v4943_v27 = vpop.f32.mrf.mxu1  ;;  %v8462_v47 = vcombine.low %v4979_v63, %v4983_v0  ;;  %v8583_v19 = vcombine.high %v5099_v54, %v5103_v8  ;;  %v4963_v22 = vld [vmem:[#allocation26 + $0x48] sm:$0xff] }
 0x9bb   :  { %v4947_v28 = vmax.f32 %v4901_v23, 0.0  ;;  %v4949_v29 = vmax.f32 %v4942_v13, 0.0  ;;  %v10641_v43 = vpack.c.bf16 %v4946_v24, %v4946_v24  ;;  %v10643_v44 = vpack.c.bf16 %v4948_v25, %v4948_v25  ;;  %v4967_v17 = vld [vmem:[#allocation26 + $0x68] sm:$0xff] }
 0x9bc   :  { %v4903_v31 = vpop.f32.mrf.mxu0  ;;  %v4944_v37 = vpop.f32.mrf.mxu1  ;;  %v5091_v53 = vld [vmem:[#allocation26 + $0x448] sm:$0xff]  ;;  %v8454_v13 = vcombine.low %v4971_v6, %v4975_v7  ;;  %v8582_v24 = vcombine.low %v5099_v54, %v5103_v8  ;;  %v8447_v25 = vcombine.high %v4963_v22, %v4967_v17 }
 0x9bd   :  { %v10637_v41 = vpack.c.bf16 %v4947_v28, %v4947_v28  ;;  %v10639_v57 = vpack.c.bf16 %v4949_v29, %v4949_v29  ;;  %v5095_v23 = vld [vmem:[#allocation26 + $0x468] sm:$0xff]  ;;  %v8446_v31 = vcombine.low %v4963_v22, %v4967_v17 }
 0x9be   :  { %v8575_v26 = vcombine.high %v5091_v53, %v5095_v23  ;;  %v4955_v27 = vld [vmem:[#allocation26 + $0x8] sm:$0xff]  ;;  %v8574_v37 = vcombine.low %v5091_v53, %v5095_v23 }
 0x9bf   :  { %6564 = vmatprep.mubr.bf16.mxu0 %v10637_v41  ;;  %6605 = vmatprep.mubr.bf16.mxu1 %v10639_v57  ;;  %v4959_v28 = vld [vmem:[#allocation26 + $0x28] sm:$0xff] }
 0x9c0   :  { %6565 = vmatmul.mubr.bf16.vlgmr.msra.gmra.mxu0 %v10641_v43  ;;  %6606 = vmatmul.mubr.bf16.vlgmr.msra.gmra.mxu1 %v10643_v44  ;;  %v5083_v29 = vld [vmem:[#allocation26 + $0x408] sm:$0xff]  ;;  %v8439_v40 = vcombine.high %v4955_v27, %v4959_v28  ;;  %v8438_v36 = vcombine.low %v4955_v27, %v4959_v28 }
 0x9c1   :  { %6615 = vmatpush1.bf16.msra.mxu0 %v8494_v2  ;;  %6656 = vmatpush1.bf16.msra.mxu1 %v8622_v4  ;;  %v5111_v2 = vld [vmem:[#allocation26 + $0x4e8] sm:$0xff]  ;;  %v8463_v4 = vcombine.high %v4979_v63, %v4983_v0  ;;  %v8567_v32 = vcombine.high %v5083_v29, %v5087_v30  ;;  %v8566_v48 = vcombine.low %v5083_v29, %v5087_v30 }
 0x9c2   :  { %6646 = vmatprep.mubr.bf16.mxu0 %v10637_v41  ;;  %6687 = vmatprep.mubr.bf16.mxu1 %v10639_v57  ;;  %v8591_v5 = vcombine.high %v5107_v1, %v5111_v2  ;;  %v8590_v18 = vcombine.low %v5107_v1, %v5111_v2  ;;  %v5191_v63 = vld [vmem:[#allocation26 + $0x768] sm:$0xff] }
 0x9c3   :  { %6616 = vmatprep.subr.bf16.mxu0 %v8487_v39  ;;  %6657 = vmatprep.subr.bf16.mxu1 %v8615_v46  ;;  %v5203_v39 = vld [vmem:[#allocation26 + $0x7c8] sm:$0xff] }
 0x9c4   :  { %v5207_v46 = vld [vmem:[#allocation26 + $0x7e8] sm:$0xff] }
 0x9c5   :  { %6617 = vmatpush1.bf16.msra.mxu0 %v8486_v51  ;;  %6658 = vmatpush1.bf16.msra.mxu1 %v8614_v52  ;;  %v8687_v51 = vcombine.high %v5203_v39, %v5207_v46  ;;  %v5067_v52 = vld [vmem:[#allocation26 + $0x388] sm:$0xff]  ;;  %v8686_v58 = vcombine.low %v5203_v39, %v5207_v46 }
 0x9c6   :  { %6618 = vmatprep.subr.bf16.mxu0 %v8479_v55  ;;  %6659 = vmatprep.subr.bf16.mxu1 %v8607_v50  ;;  %v5071_v55 = vld [vmem:[#allocation26 + $0x3a8] sm:$0xff] }
 0x9c7   :  { %v5195_v50 = vld [vmem:[#allocation26 + $0x788] sm:$0xff]  ;;  %v8551_v16 = vcombine.high %v5067_v52, %v5071_v55  ;;  %v8550_v0 = vcombine.low %v5067_v52, %v5071_v55 }
 0x9c8   :  { %v8678_v1 = vcombine.low %v5195_v50, %v5199_v20  ;;  %v5183_v6 = vld [vmem:[#allocation26 + $0x728] sm:$0xff] }
 0x9c9   :  { %6619 = vmatpush1.bf16.msra.mxu0 %v8478_v59  ;;  %6660 = vmatpush1.bf16.msra.mxu1 %v8606_v60  ;;  %v8679_v59 = vcombine.high %v5195_v50, %v5199_v20  ;;  %v5059_v60 = vld [vmem:[#allocation26 + $0x348] sm:$0xff] }
 0x9ca   :  { %6620 = vmatprep.subr.bf16.mxu0 %v8471_v61  ;;  %6661 = vmatprep.subr.bf16.mxu1 %v8599_v62  ;;  %v5063_v61 = vld [vmem:[#allocation26 + $0x368] sm:$0xff] }
 0x9cb   :  { %v5187_v62 = vld [vmem:[#allocation26 + $0x748] sm:$0xff]  ;;  %v8543_v2 = vcombine.high %v5059_v60, %v5063_v61  ;;  %v8542_v7 = vcombine.low %v5059_v60, %v5063_v61  ;;  %v5144_v60 = vld [vmem:[#allocation26 + $0x5f0] sm:$0xff] }
 0x9cc   :  { %v8670_v54 = vcombine.low %v5187_v62, %v5191_v63  ;;  %v5175_v22 = vld [vmem:[#allocation26 + $0x6e8] sm:$0xff] }
 0x9cd   :  { %6621 = vmatpush1.bf16.msra.mxu0 %v8470_v10  ;;  %6662 = vmatpush1.bf16.msra.mxu1 %v8598_v3  ;;  %v8671_v10 = vcombine.high %v5187_v62, %v5191_v63  ;;  %v5051_v3 = vld [vmem:[#allocation26 + $0x308] sm:$0xff] }
 0x9ce   :  { %6622 = vmatprep.subr.bf16.mxu0 %v8463_v4  ;;  %6663 = vmatprep.subr.bf16.mxu1 %v8591_v5  ;;  %v5055_v4 = vld [vmem:[#allocation26 + $0x328] sm:$0xff] }
 0x9cf   :  { %v5179_v5 = vld [vmem:[#allocation26 + $0x708] sm:$0xff]  ;;  %v8535_v8 = vcombine.high %v5051_v3, %v5055_v4  ;;  %v8534_v17 = vcombine.low %v5051_v3, %v5055_v4  ;;  %v5136_v3 = vld [vmem:[#allocation26 + $0x5b0] sm:$0xff] }
 0x9d0   :  { %v8662_v53 = vcombine.low %v5179_v5, %v5183_v6  ;;  %v5167_v27 = vld [vmem:[#allocation26 + $0x6a8] sm:$0xff] }
 0x9d1   :  { %6623 = vmatpush1.bf16.msra.mxu0 %v8462_v47  ;;  %6664 = vmatpush1.bf16.msra.mxu1 %v8590_v18  ;;  %v8663_v47 = vcombine.high %v5179_v5, %v5183_v6  ;;  %v5043_v18 = vld [vmem:[#allocation26 + $0x2c8] sm:$0xff] }
 0x9d2   :  { %6624 = vmatprep.subr.bf16.mxu0 %v8455_v49  ;;  %6665 = vmatprep.subr.bf16.mxu1 %v8583_v19  ;;  %v5047_v49 = vld [vmem:[#allocation26 + $0x2e8] sm:$0xff] }
 0x9d3   :  { %v5171_v19 = vld [vmem:[#allocation26 + $0x6c8] sm:$0xff]  ;;  %v8527_v23 = vcombine.high %v5043_v18, %v5047_v49  ;;  %v8526_v28 = vcombine.low %v5043_v18, %v5047_v49  ;;  %v5128_v18 = vld [vmem:[#allocation26 + $0x570] sm:$0xff] }
 0x9d4   :  { %v8654_v29 = vcombine.low %v5171_v19, %v5175_v22  ;;  %v5151_v52 = vld [vmem:[#allocation26 + $0x628] sm:$0xff] }
 0x9d5   :  { %6625 = vmatpush1.bf16.msra.mxu0 %v8454_v13  ;;  %6666 = vmatpush1.bf16.msra.mxu1 %v8582_v24  ;;  %v8655_v13 = vcombine.high %v5171_v19, %v5175_v22  ;;  %v5035_v24 = vld [vmem:[#allocation26 + $0x288] sm:$0xff] }
 0x9d6   :  { %6626 = vmatprep.subr.bf16.mxu0 %v8447_v25  ;;  %6667 = vmatprep.subr.bf16.mxu1 %v8575_v26  ;;  %v5039_v25 = vld [vmem:[#allocation26 + $0x2a8] sm:$0xff] }
 0x9d7   :  { %v5163_v26 = vld [vmem:[#allocation26 + $0x688] sm:$0xff]  ;;  %v8519_v30 = vcombine.high %v5035_v24, %v5039_v25  ;;  %v8518_v45 = vcombine.low %v5035_v24, %v5039_v25  ;;  %v5120_v24 = vld [vmem:[#allocation26 + $0x530] sm:$0xff] }
 0x9d8   :  { %v8646_v39 = vcombine.low %v5163_v26, %v5167_v27 }
 0x9d9   :  { %6627 = vmatpush1.bf16.msra.mxu0 %v8446_v31  ;;  %6668 = vmatpush1.bf16.msra.mxu1 %v8574_v37  ;;  %v8647_v31 = vcombine.high %v5163_v26, %v5167_v27  ;;  %v5027_v37 = vld [vmem:[#allocation26 + $0x248] sm:$0xff] }
 0x9da   :  { %6628 = vmatprep.subr.bf16.mxu0 %v8439_v40  ;;  %6669 = vmatprep.subr.bf16.mxu1 %v8567_v32  ;;  %v5031_v40 = vld [vmem:[#allocation26 + $0x268] sm:$0xff] }
 0x9db   :  { %v5155_v32 = vld [vmem:[#allocation26 + $0x648] sm:$0xff]  ;;  %v8511_v46 = vcombine.high %v5027_v37, %v5031_v40  ;;  %v8510_v55 = vcombine.low %v5027_v37, %v5031_v40  ;;  %v5112_v37 = vld [vmem:[#allocation26 + $0x4f0] sm:$0xff] }
 0x9dc   :  { %v8638_v50 = vcombine.low %v5155_v32, %v5159_v34 }
 0x9dd   :  { %6629 = vmatpush1.bf16.msra.mxu0 %v8438_v36  ;;  %6670 = vmatpush1.bf16.msra.mxu1 %v8566_v48  ;;  %v8639_v36 = vcombine.high %v5155_v32, %v5159_v34  ;;  %v5019_v48 = vld [vmem:[#allocation26 + $0x208] sm:$0xff] }
 0x9de   :  { %6630 = vmatprep.subr.bf16.mxu0 %v8559_v21  ;;  %6671 = vmatprep.subr.bf16.mxu1 %v8687_v51  ;;  %v5023_v21 = vld [vmem:[#allocation26 + $0x228] sm:$0xff] }
 0x9df   :  { %v5147_v51 = vld [vmem:[#allocation26 + $0x608] sm:$0xff]  ;;  %v8503_v20 = vcombine.high %v5019_v48, %v5023_v21  ;;  %v8502_v61 = vcombine.low %v5019_v48, %v5023_v21  ;;  %v5104_v48 = vld [vmem:[#allocation26 + $0x4b0] sm:$0xff] }
 0x9e0   :  { %v8630_v62 = vcombine.low %v5147_v51, %v5151_v52 }
 0x9e1   :  { %6631 = vmatpush2.bf16.msra.mxu0 %v8558_v56  ;;  %6672 = vmatpush2.bf16.msra.mxu1 %v8686_v58  ;;  %v8631_v56 = vcombine.high %v5147_v51, %v5151_v52  ;;  %v5012_v58 = vld [vmem:[#allocation26 + $0x1d0] sm:$0xff] }
 0x9e2   :  { %6632 = vmatprep.subr.bf16.mxu0 %v8551_v16  ;;  %6673 = vmatprep.subr.bf16.mxu1 %v8679_v59  ;;  %v5016_v16 = vld [vmem:[#allocation26 + $0x1f0] sm:$0xff] }
 0x9e3   :  { %v5140_v59 = vld [vmem:[#allocation26 + $0x5d0] sm:$0xff]  ;;  %v8497_v63 = vcombine.high %v5012_v58, %v5016_v16  ;;  %v8496_v4 = vcombine.low %v5012_v58, %v5016_v16 }
 0x9e4   :  { %v8624_v5 = vcombine.low %v5140_v59, %v5144_v60  ;;  %v5096_v58 = vld [vmem:[#allocation26 + $0x470] sm:$0xff] }
 0x9e5   :  { %6633 = vmatpush2.bf16.msra.mxu0 %v8550_v0  ;;  %6674 = vmatpush2.bf16.msra.mxu1 %v8678_v1  ;;  %v8625_v0 = vcombine.high %v5140_v59, %v5144_v60  ;;  %v5004_v1 = vld [vmem:[#allocation26 + $0x190] sm:$0xff] }
 0x9e6   :  { %6634 = vmatprep.subr.bf16.mxu0 %v8543_v2  ;;  %6675 = vmatprep.subr.bf16.mxu1 %v8671_v10  ;;  %v5008_v2 = vld [vmem:[#allocation26 + $0x1b0] sm:$0xff] }
 0x9e7   :  { %v5132_v10 = vld [vmem:[#allocation26 + $0x590] sm:$0xff]  ;;  %v8489_v6 = vcombine.high %v5004_v1, %v5008_v2  ;;  %v8488_v49 = vcombine.low %v5004_v1, %v5008_v2 }
 0x9e8   :  { %v8616_v19 = vcombine.low %v5132_v10, %v5136_v3  ;;  %v5088_v1 = vld [vmem:[#allocation26 + $0x430] sm:$0xff] }
 0x9e9   :  { %6635 = vmatpush2.bf16.msra.mxu0 %v8542_v7  ;;  %6676 = vmatpush2.bf16.msra.mxu1 %v8670_v54  ;;  %v8617_v7 = vcombine.high %v5132_v10, %v5136_v3  ;;  %v4996_v54 = vld [vmem:[#allocation26 + $0x150] sm:$0xff] }
 0x9ea   :  { %6636 = vmatprep.subr.bf16.mxu0 %v8535_v8  ;;  %6677 = vmatprep.subr.bf16.mxu1 %v8663_v47  ;;  %v5000_v8 = vld [vmem:[#allocation26 + $0x170] sm:$0xff] }
 0x9eb   :  { %v5124_v47 = vld [vmem:[#allocation26 + $0x550] sm:$0xff]  ;;  %v8481_v22 = vcombine.high %v4996_v54, %v5000_v8  ;;  %v8480_v25 = vcombine.low %v4996_v54, %v5000_v8 }
 0x9ec   :  { %v8608_v26 = vcombine.low %v5124_v47, %v5128_v18  ;;  %v5208_v54 = vld [vmem:[#allocation26 + $0x7f0] sm:$0xff] }
 0x9ed   :  { %6637 = vmatpush2.bf16.msra.mxu0 %v8534_v17  ;;  %6678 = vmatpush2.bf16.msra.mxu1 %v8662_v53  ;;  %v8609_v17 = vcombine.high %v5124_v47, %v5128_v18  ;;  %v4988_v53 = vld [vmem:[#allocation26 + $0x110] sm:$0xff] }
 0x9ee   :  { %6638 = vmatprep.subr.bf16.mxu0 %v8527_v23  ;;  %6679 = vmatprep.subr.bf16.mxu1 %v8655_v13  ;;  %v4992_v23 = vld [vmem:[#allocation26 + $0x130] sm:$0xff] }
 0x9ef   :  { %v5116_v13 = vld [vmem:[#allocation26 + $0x510] sm:$0xff]  ;;  %v8473_v27 = vcombine.high %v4988_v53, %v4992_v23  ;;  %v8472_v40 = vcombine.low %v4988_v53, %v4992_v23 }
 0x9f0   :  { %v8600_v32 = vcombine.low %v5116_v13, %v5120_v24  ;;  %v5200_v53 = vld [vmem:[#allocation26 + $0x7b0] sm:$0xff] }
 0x9f1   :  { %6639 = vmatpush2.bf16.msra.mxu0 %v8526_v28  ;;  %6680 = vmatpush2.bf16.msra.mxu1 %v8654_v29  ;;  %v8601_v28 = vcombine.high %v5116_v13, %v5120_v24  ;;  %v4980_v29 = vld [vmem:[#allocation26 + $0xd0] sm:$0xff] }
 0x9f2   :  { %6640 = vmatprep.subr.bf16.mxu0 %v8519_v30  ;;  %6681 = vmatprep.subr.bf16.mxu1 %v8647_v31  ;;  %v4984_v30 = vld [vmem:[#allocation26 + $0xf0] sm:$0xff] }
 0x9f3   :  { %v5108_v31 = vld [vmem:[#allocation26 + $0x4d0] sm:$0xff]  ;;  %v8465_v34 = vcombine.high %v4980_v29, %v4984_v30  ;;  %v8464_v21 = vcombine.low %v4980_v29, %v4984_v30 }
 0x9f4   :  { %v8592_v51 = vcombine.low %v5108_v31, %v5112_v37  ;;  %v5192_v29 = vld [vmem:[#allocation26 + $0x770] sm:$0xff] }
 0x9f5   :  { %6641 = vmatpush2.bf16.msra.mxu0 %v8518_v45  ;;  %6682 = vmatpush2.bf16.msra.mxu1 %v8646_v39  ;;  %v8593_v45 = vcombine.high %v5108_v31, %v5112_v37  ;;  %v4972_v39 = vld [vmem:[#allocation26 + $0x90] sm:$0xff] }
 0x9f6   :  { %6642 = vmatprep.subr.bf16.mxu0 %v8511_v46  ;;  %6683 = vmatprep.subr.bf16.mxu1 %v8639_v36  ;;  %v4976_v46 = vld [vmem:[#allocation26 + $0xb0] sm:$0xff] }
 0x9f7   :  { %v5100_v36 = vld [vmem:[#allocation26 + $0x490] sm:$0xff]  ;;  %v8457_v52 = vcombine.high %v4972_v39, %v4976_v46  ;;  %v8456_v16 = vcombine.low %v4972_v39, %v4976_v46 }
 0x9f8   :  { %v8584_v59 = vcombine.low %v5100_v36, %v5104_v48  ;;  %v5184_v39 = vld [vmem:[#allocation26 + $0x730] sm:$0xff] }
 0x9f9   :  { %6643 = vmatpush2.bf16.msra.mxu0 %v8510_v55  ;;  %6684 = vmatpush2.bf16.msra.mxu1 %v8638_v50  ;;  %v8585_v55 = vcombine.high %v5100_v36, %v5104_v48  ;;  %v4964_v50 = vld [vmem:[#allocation26 + $0x50] sm:$0xff] }
 0x9fa   :  { %6644 = vmatprep.subr.bf16.mxu0 %v8503_v20  ;;  %6685 = vmatprep.subr.bf16.mxu1 %v8631_v56  ;;  %v4968_v20 = vld [vmem:[#allocation26 + $0x70] sm:$0xff] }
 0x9fb   :  { %v5092_v56 = vld [vmem:[#allocation26 + $0x450] sm:$0xff]  ;;  %v8449_v60 = vcombine.high %v4964_v50, %v4968_v20  ;;  %v8448_v2 = vcombine.low %v4964_v50, %v4968_v20 }
 0x9fc   :  { %v8576_v10 = vcombine.low %v5092_v56, %v5096_v58  ;;  %v5176_v50 = vld [vmem:[#allocation26 + $0x6f0] sm:$0xff] }
 0x9fd   :  { %6645 = vmatpush2.bf16.msra.mxu0 %v8502_v61  ;;  %6686 = vmatpush2.bf16.msra.mxu1 %v8630_v62  ;;  %v8577_v61 = vcombine.high %v5092_v56, %v5096_v58  ;;  %v4956_v62 = vld [vmem:[#allocation26 + $0x10] sm:$0xff] }
 0x9fe   :  { %6696 = vmatprep.subr.bf16.mxu0 %v8497_v63  ;;  %6737 = vmatprep.subr.bf16.mxu1 %v8625_v0  ;;  %v4960_v63 = vld [vmem:[#allocation26 + $0x30] sm:$0xff] }
 0x9ff   :  { %v5084_v0 = vld [vmem:[#allocation26 + $0x410] sm:$0xff]  ;;  %v8441_v3 = vcombine.high %v4956_v62, %v4960_v63  ;;  %v8440_v8 = vcombine.low %v4956_v62, %v4960_v63 }
 0xa00   :  { %6647 = vmatmul.mubr.bf16.vlgmr.msra.gmra.mxu0 %v10641_v43  ;;  %6688 = vmatmul.mubr.bf16.vlgmr.msra.gmra.mxu1 %v10643_v44  ;;  %v8568_v47 = vcombine.low %v5084_v0, %v5088_v1  ;;  %v5168_v62 = vld [vmem:[#allocation26 + $0x6b0] sm:$0xff] }
 0xa01   :  { %6697 = vmatpush1.bf16.msra.mxu0 %v8496_v4  ;;  %6728 = vmatprep.mubr.bf16.mxu0 %v10637_v41  ;;  %v8569_v4 = vcombine.high %v5084_v0, %v5088_v1 }
 0xa02   :  { %6738 = vmatpush1.bf16.msra.mxu1 %v8624_v5  ;;  %6769 = vmatprep.mubr.bf16.mxu1 %v10639_v57  ;;  %v5076_v5 = vld [vmem:[#allocation26 + $0x3d0] sm:$0xff] }
 0xa03   :  { %6698 = vmatprep.subr.bf16.mxu0 %v8489_v6  ;;  %6739 = vmatprep.subr.bf16.mxu1 %v8617_v7  ;;  %v5080_v6 = vld [vmem:[#allocation26 + $0x3f0] sm:$0xff] }
 0xa04   :  { %v5204_v7 = vld [vmem:[#allocation26 + $0x7d0] sm:$0xff]  ;;  %v8561_v18 = vcombine.high %v5076_v5, %v5080_v6  ;;  %v8560_v23 = vcombine.low %v5076_v5, %v5080_v6 }
 0xa05   :  { %6699 = vmatpush1.bf16.msra.mxu0 %v8488_v49  ;;  %v8689_v49 = vcombine.high %v5204_v7, %v5208_v54  ;;  %v8688_v13 = vcombine.low %v5204_v7, %v5208_v54  ;;  %v5160_v5 = vld [vmem:[#allocation26 + $0x670] sm:$0xff] }
 0xa06   :  { %6740 = vmatpush1.bf16.msra.mxu1 %v8616_v19  ;;  %6700 = vmatprep.subr.bf16.mxu0 %v8481_v22  ;;  %v5068_v19 = vld [vmem:[#allocation26 + $0x390] sm:$0xff] }
 0xa07   :  { %6741 = vmatprep.subr.bf16.mxu1 %v8609_v17  ;;  %v5072_v22 = vld [vmem:[#allocation26 + $0x3b0] sm:$0xff] }
 0xa08   :  { %v5196_v17 = vld [vmem:[#allocation26 + $0x790] sm:$0xff]  ;;  %v8553_v24 = vcombine.high %v5068_v19, %v5072_v22  ;;  %v8552_v30 = vcombine.low %v5068_v19, %v5072_v22 }
 0xa09   :  { %6701 = vmatpush1.bf16.msra.mxu0 %v8480_v25  ;;  %v8681_v25 = vcombine.high %v5196_v17, %v5200_v53  ;;  %v8680_v31 = vcombine.low %v5196_v17, %v5200_v53  ;;  %v5152_v19 = vld [vmem:[#allocation26 + $0x630] sm:$0xff] }
 0xa0a   :  { %6742 = vmatpush1.bf16.msra.mxu1 %v8608_v26  ;;  %6702 = vmatprep.subr.bf16.mxu0 %v8473_v27  ;;  %v5060_v26 = vld [vmem:[#allocation26 + $0x350] sm:$0xff] }
 0xa0b   :  { %6743 = vmatprep.subr.bf16.mxu1 %v8601_v28  ;;  %v5064_v27 = vld [vmem:[#allocation26 + $0x370] sm:$0xff] }
 0xa0c   :  { %v5188_v28 = vld [vmem:[#allocation26 + $0x750] sm:$0xff]  ;;  %v8545_v37 = vcombine.high %v5060_v26, %v5064_v27  ;;  %v8544_v46 = vcombine.low %v5060_v26, %v5064_v27  ;;  %v5145_v26 = vld [vmem:[#allocation26 + $0x5f8] sm:$0xff] }
 0xa0d   :  { %6703 = vmatpush1.bf16.msra.mxu0 %v8472_v40  ;;  %v8673_v40 = vcombine.high %v5188_v28, %v5192_v29  ;;  %v8672_v36 = vcombine.low %v5188_v28, %v5192_v29 }
 0xa0e   :  { %6744 = vmatpush1.bf16.msra.mxu1 %v8600_v32  ;;  %6704 = vmatprep.subr.bf16.mxu0 %v8465_v34  ;;  %v5052_v32 = vld [vmem:[#allocation26 + $0x310] sm:$0xff] }
 0xa0f   :  { %6745 = vmatprep.subr.bf16.mxu1 %v8593_v45  ;;  %v5056_v34 = vld [vmem:[#allocation26 + $0x330] sm:$0xff] }
 0xa10   :  { %v5180_v45 = vld [vmem:[#allocation26 + $0x710] sm:$0xff]  ;;  %v8537_v48 = vcombine.high %v5052_v32, %v5056_v34  ;;  %v8536_v20 = vcombine.low %v5052_v32, %v5056_v34  ;;  %v5133_v32 = vld [vmem:[#allocation26 + $0x598] sm:$0xff] }
 0xa11   :  { %6705 = vmatpush1.bf16.msra.mxu0 %v8464_v21  ;;  %v8665_v21 = vcombine.high %v5180_v45, %v5184_v39  ;;  %v8664_v56 = vcombine.low %v5180_v45, %v5184_v39  ;;  %v5137_v34 = vld [vmem:[#allocation26 + $0x5b8] sm:$0xff] }
 0xa12   :  { %6746 = vmatpush1.bf16.msra.mxu1 %v8592_v51  ;;  %6706 = vmatprep.subr.bf16.mxu0 %v8457_v52  ;;  %v5044_v51 = vld [vmem:[#allocation26 + $0x2d0] sm:$0xff] }
 0xa13   :  { %6747 = vmatprep.subr.bf16.mxu1 %v8585_v55  ;;  %v5048_v52 = vld [vmem:[#allocation26 + $0x2f0] sm:$0xff] }
 0xa14   :  { %v5172_v55 = vld [vmem:[#allocation26 + $0x6d0] sm:$0xff]  ;;  %v8529_v58 = vcombine.high %v5044_v51, %v5048_v52  ;;  %v8528_v63 = vcombine.low %v5044_v51, %v5048_v52  ;;  %v5129_v51 = vld [vmem:[#allocation26 + $0x578] sm:$0xff] }
 0xa15   :  { %6707 = vmatpush1.bf16.msra.mxu0 %v8456_v16  ;;  %v8657_v16 = vcombine.high %v5172_v55, %v5176_v50  ;;  %v8656_v0 = vcombine.low %v5172_v55, %v5176_v50  ;;  %v8618_v55 = vcombine.low %v5133_v32, %v5137_v34 }
 0xa16   :  { %6748 = vmatpush1.bf16.msra.mxu1 %v8584_v59  ;;  %6708 = vmatprep.subr.bf16.mxu0 %v8449_v60  ;;  %v5036_v59 = vld [vmem:[#allocation26 + $0x290] sm:$0xff] }
 0xa17   :  { %6749 = vmatprep.subr.bf16.mxu1 %v8577_v61  ;;  %v5040_v60 = vld [vmem:[#allocation26 + $0x2b0] sm:$0xff] }
 0xa18   :  { %v5164_v61 = vld [vmem:[#allocation26 + $0x690] sm:$0xff]  ;;  %v8521_v1 = vcombine.high %v5036_v59, %v5040_v60  ;;  %v8520_v6 = vcombine.low %v5036_v59, %v5040_v60  ;;  %v5121_v59 = vld [vmem:[#allocation26 + $0x538] sm:$0xff] }
 0xa19   :  { %6709 = vmatpush1.bf16.msra.mxu0 %v8448_v2  ;;  %v8649_v2 = vcombine.high %v5164_v61, %v5168_v62  ;;  %v8648_v7 = vcombine.low %v5164_v61, %v5168_v62 }
 0xa1a   :  { %6750 = vmatpush1.bf16.msra.mxu1 %v8576_v10  ;;  %6710 = vmatprep.subr.bf16.mxu0 %v8441_v3  ;;  %v5028_v10 = vld [vmem:[#allocation26 + $0x250] sm:$0xff] }
 0xa1b   :  { %6751 = vmatprep.subr.bf16.mxu1 %v8569_v4  ;;  %v5032_v3 = vld [vmem:[#allocation26 + $0x270] sm:$0xff] }
 0xa1c   :  { %v5156_v4 = vld [vmem:[#allocation26 + $0x650] sm:$0xff]  ;;  %v8513_v54 = vcombine.high %v5028_v10, %v5032_v3  ;;  %v8512_v22 = vcombine.low %v5028_v10, %v5032_v3 }
 0xa1d   :  { %6711 = vmatpush1.bf16.msra.mxu0 %v8440_v8  ;;  %v8641_v8 = vcombine.high %v5156_v4, %v5160_v5  ;;  %v8640_v17 = vcombine.low %v5156_v4, %v5160_v5  ;;  %v4973_v5 = vld [vmem:[#allocation26 + $0x98] sm:$0xff] }
 0xa1e   :  { %6752 = vmatpush1.bf16.msra.mxu1 %v8568_v47  ;;  %6712 = vmatprep.subr.bf16.mxu0 %v8561_v18  ;;  %v5020_v47 = vld [vmem:[#allocation26 + $0x210] sm:$0xff] }
 0xa1f   :  { %6753 = vmatprep.subr.bf16.mxu1 %v8689_v49  ;;  %v5024_v18 = vld [vmem:[#allocation26 + $0x230] sm:$0xff] }
 0xa20   :  { %v5148_v49 = vld [vmem:[#allocation26 + $0x610] sm:$0xff]  ;;  %v8505_v53 = vcombine.high %v5020_v47, %v5024_v18  ;;  %v8504_v27 = vcombine.low %v5020_v47, %v5024_v18 }
 0xa21   :  { %6713 = vmatpush2.bf16.msra.mxu0 %v8560_v23  ;;  %v8633_v23 = vcombine.high %v5148_v49, %v5152_v19  ;;  %v8632_v28 = vcombine.low %v5148_v49, %v5152_v19  ;;  %v4965_v19 = vld [vmem:[#allocation26 + $0x58] sm:$0xff] }
 0xa22   :  { %6754 = vmatpush2.bf16.msra.mxu1 %v8688_v13  ;;  %6714 = vmatprep.subr.bf16.mxu0 %v8553_v24  ;;  %v5013_v13 = vld [vmem:[#allocation26 + $0x1d8] sm:$0xff] }
 0xa23   :  { %6755 = vmatprep.subr.bf16.mxu1 %v8681_v25  ;;  %v5017_v24 = vld [vmem:[#allocation26 + $0x1f8] sm:$0xff] }
 0xa24   :  { %v5141_v25 = vld [vmem:[#allocation26 + $0x5d8] sm:$0xff]  ;;  %v8499_v29 = vcombine.high %v5013_v13, %v5017_v24 }
 0xa25   :  { %6715 = vmatpush2.bf16.msra.mxu0 %v8552_v30  ;;  %v8627_v30 = vcombine.high %v5141_v25, %v5145_v26  ;;  %v8626_v45 = vcombine.low %v5141_v25, %v5145_v26  ;;  %v4957_v26 = vld [vmem:[#allocation26 + $0x18] sm:$0xff] }
 0xa26   :  { %6756 = vmatpush2.bf16.msra.mxu1 %v8680_v31  ;;  %6716 = vmatprep.subr.bf16.mxu0 %v8545_v37  ;;  %v5005_v31 = vld [vmem:[#allocation26 + $0x198] sm:$0xff] }
 0xa27   :  { %6757 = vmatprep.subr.bf16.mxu1 %v8673_v40  ;;  %v5009_v37 = vld [vmem:[#allocation26 + $0x1b8] sm:$0xff]  ;;  %v8498_v40 = vcombine.low %v5013_v13, %v5017_v24 }
 0xa28   :  { %v8491_v39 = vcombine.high %v5005_v31, %v5009_v37  ;;  %v8490_v52 = vcombine.low %v5005_v31, %v5009_v37 }
 0xa29   :  { %6717 = vmatpush2.bf16.msra.mxu0 %v8544_v46  ;;  %v4997_v46 = vld [vmem:[#allocation26 + $0x158] sm:$0xff] }
 0xa2a   :  { %6758 = vmatpush2.bf16.msra.mxu1 %v8672_v36  ;;  %6718 = vmatprep.subr.bf16.mxu0 %v8537_v48  ;;  %v5001_v36 = vld [vmem:[#allocation26 + $0x178] sm:$0xff]  ;;  %v8619_v48 = vcombine.high %v5133_v32, %v5137_v34 }
 0xa2b   :  { %6759 = vmatprep.subr.bf16.mxu1 %v8665_v21  ;;  %v5125_v21 = vld [vmem:[#allocation26 + $0x558] sm:$0xff]  ;;  %v8483_v50 = vcombine.high %v4997_v46, %v5001_v36  ;;  %v8482_v60 = vcombine.low %v4997_v46, %v5001_v36 }
 0xa2c   :  { %v8610_v61 = vcombine.low %v5125_v21, %v5129_v51  ;;  %v5077_v32 = vld [vmem:[#allocation26 + $0x3d8] sm:$0xff] }
 0xa2d   :  { %6719 = vmatpush2.bf16.msra.mxu0 %v8536_v20  ;;  %v8611_v20 = vcombine.high %v5125_v21, %v5129_v51  ;;  %v5081_v34 = vld [vmem:[#allocation26 + $0x3f8] sm:$0xff] }
 0xa2e   :  { %6760 = vmatpush2.bf16.msra.mxu1 %v8664_v56  ;;  %6720 = vmatprep.subr.bf16.mxu0 %v8529_v58  ;;  %v4989_v56 = vld [vmem:[#allocation26 + $0x118] sm:$0xff] }
 0xa2f   :  { %6761 = vmatprep.subr.bf16.mxu1 %v8657_v16  ;;  %v4993_v58 = vld [vmem:[#allocation26 + $0x138] sm:$0xff] }
 0xa30   :  { %v5117_v16 = vld [vmem:[#allocation26 + $0x518] sm:$0xff]  ;;  %v8475_v62 = vcombine.high %v4989_v56, %v4993_v58 }
 0xa31   :  { %6721 = vmatpush2.bf16.msra.mxu0 %v8528_v63  ;;  %v4981_v63 = vld [vmem:[#allocation26 + $0xd8] sm:$0xff]  ;;  %v8602_v10 = vcombine.low %v5117_v16, %v5121_v59 }
 0xa32   :  { %6762 = vmatpush2.bf16.msra.mxu1 %v8656_v0  ;;  %6722 = vmatprep.subr.bf16.mxu0 %v8521_v1  ;;  %v4985_v0 = vld [vmem:[#allocation26 + $0xf8] sm:$0xff] }
 0xa33   :  { %6763 = vmatprep.subr.bf16.mxu1 %v8649_v2  ;;  %v5109_v1 = vld [vmem:[#allocation26 + $0x4d8] sm:$0xff]  ;;  %v8467_v3 = vcombine.high %v4981_v63, %v4985_v0 }
 0xa34   :  { %v5113_v2 = vld [vmem:[#allocation26 + $0x4f8] sm:$0xff] }
 0xa35   :  { %6723 = vmatpush2.bf16.msra.mxu0 %v8520_v6  ;;  %v8595_v4 = vcombine.high %v5109_v1, %v5113_v2  ;;  %v4977_v6 = vld [vmem:[#allocation26 + $0xb8] sm:$0xff]  ;;  %v8594_v47 = vcombine.low %v5109_v1, %v5113_v2 }
 0xa36   :  { %6764 = vmatpush2.bf16.msra.mxu1 %v8648_v7  ;;  %6724 = vmatprep.subr.bf16.mxu0 %v8513_v54  ;;  %v5101_v7 = vld [vmem:[#allocation26 + $0x498] sm:$0xff]  ;;  %v8459_v18 = vcombine.high %v4973_v5, %v4977_v6 }
 0xa37   :  { %6765 = vmatprep.subr.bf16.mxu1 %v8641_v8  ;;  %v5105_v54 = vld [vmem:[#allocation26 + $0x4b8] sm:$0xff]  ;;  %v8466_v8 = vcombine.low %v4981_v63, %v4985_v0 }
 0xa38   :  { %v8587_v49 = vcombine.high %v5101_v7, %v5105_v54  ;;  %v8586_v13 = vcombine.low %v5101_v7, %v5105_v54  ;;  %v5069_v51 = vld [vmem:[#allocation26 + $0x398] sm:$0xff] }
 0xa39   :  { %6725 = vmatpush2.bf16.msra.mxu0 %v8512_v22  ;;  %v4969_v22 = vld [vmem:[#allocation26 + $0x78] sm:$0xff] }
 0xa3a   :  { %6766 = vmatpush2.bf16.msra.mxu1 %v8640_v17  ;;  %6726 = vmatprep.subr.bf16.mxu0 %v8505_v53  ;;  %v5093_v17 = vld [vmem:[#allocation26 + $0x458] sm:$0xff]  ;;  %v8451_v24 = vcombine.high %v4965_v19, %v4969_v22 }
 0xa3b   :  { %6767 = vmatprep.subr.bf16.mxu1 %v8633_v23  ;;  %v5097_v53 = vld [vmem:[#allocation26 + $0x478] sm:$0xff]  ;;  %v8458_v23 = vcombine.low %v4973_v5, %v4977_v6 }
 0xa3c   :  { %v8579_v25 = vcombine.high %v5093_v17, %v5097_v53  ;;  %v8578_v31 = vcombine.low %v5093_v17, %v5097_v53  ;;  %v5053_v2 = vld [vmem:[#allocation26 + $0x318] sm:$0xff] }
 0xa3d   :  { %6727 = vmatpush2.bf16.msra.mxu0 %v8504_v27  ;;  %v4961_v27 = vld [vmem:[#allocation26 + $0x38] sm:$0xff] }
 0xa3e   :  { %6768 = vmatpush2.bf16.msra.mxu1 %v8632_v28  ;;  %6778 = vmatprep.subr.bf16.mxu0 %v8499_v29  ;;  %v5085_v28 = vld [vmem:[#allocation26 + $0x418] sm:$0xff]  ;;  %v8443_v37 = vcombine.high %v4957_v26, %v4961_v27  ;;  %v8442_v46 = vcombine.low %v4957_v26, %v4961_v27 }
 0xa3f   :  { %6819 = vmatprep.subr.bf16.mxu1 %v8627_v30  ;;  %v5089_v29 = vld [vmem:[#allocation26 + $0x438] sm:$0xff]  ;;  %v8450_v30 = vcombine.low %v4965_v19, %v4969_v22 }
 0xa40   :  { %6729 = vmatmul.mubr.bf16.vlgmr.msra.gmra.mxu0 %v10641_v43  ;;  %v8570_v36 = vcombine.low %v5085_v28, %v5089_v29  ;;  %v5045_v54 = vld [vmem:[#allocation26 + $0x2d8] sm:$0xff] }
 0xa41   :  { %6770 = vmatmul.mubr.bf16.vlgmr.msra.gmra.mxu1 %v10643_v44  ;;  %6779 = vmatpush1.bf16.msra.mxu0 %v8498_v40  ;;  %v8571_v40 = vcombine.high %v5085_v28, %v5089_v29  ;;  %v5037_v53 = vld [vmem:[#allocation26 + $0x298] sm:$0xff] }
 0xa42   :  { %6810 = vmatprep.mubr.bf16.mxu0 %v10637_v41  ;;  %6820 = vmatpush1.bf16.msra.mxu1 %v8626_v45  ;;  %v8603_v41 = vcombine.high %v5117_v16, %v5121_v59  ;;  %v5205_v45 = vld [vmem:[#allocation26 + $0x7d8] sm:$0xff] }
 0xa43   :  { %6851 = vmatprep.mubr.bf16.mxu1 %v10639_v57  ;;  %6780 = vmatprep.subr.bf16.mxu0 %v8491_v39  ;;  %v8474_v57 = vcombine.low %v4989_v56, %v4993_v58  ;;  %v5209_v39 = vld [vmem:[#allocation26 + $0x7f8] sm:$0xff] }
 0xa44   :  { %6821 = vmatprep.subr.bf16.mxu1 %v8619_v48  ;;  %v8563_v48 = vcombine.high %v5077_v32, %v5081_v34  ;;  %v8691_v21 = vcombine.high %v5205_v45, %v5209_v39  ;;  %v8690_v56 = vcombine.low %v5205_v45, %v5209_v39  ;;  %v5061_v59 = vld [vmem:[#allocation26 + $0x358] sm:$0xff] }
 0xa45   :  { %6781 = vmatpush1.bf16.msra.mxu0 %v8490_v52  ;;  %v5073_v52 = vld [vmem:[#allocation26 + $0x3b8] sm:$0xff] }
 0xa46   :  { %6822 = vmatpush1.bf16.msra.mxu1 %v8618_v55  ;;  %6782 = vmatprep.subr.bf16.mxu0 %v8483_v50  ;;  %v5197_v55 = vld [vmem:[#allocation26 + $0x798] sm:$0xff]  ;;  %v8555_v58 = vcombine.high %v5069_v51, %v5073_v52 }
 0xa47   :  { %6823 = vmatprep.subr.bf16.mxu1 %v8611_v20  ;;  %v5201_v50 = vld [vmem:[#allocation26 + $0x7b8] sm:$0xff]  ;;  %v8562_v20 = vcombine.low %v5077_v32, %v5081_v34 }
 0xa48   :  { %v8683_v16 = vcombine.high %v5197_v55, %v5201_v50  ;;  %v8682_v63 = vcombine.low %v5197_v55, %v5201_v50  ;;  %v5029_v29 = vld [vmem:[#allocation26 + $0x258] sm:$0xff] }
 0xa49   :  { %6783 = vmatpush1.bf16.msra.mxu0 %v8482_v60  ;;  %v5065_v60 = vld [vmem:[#allocation26 + $0x378] sm:$0xff] }
 0xa4a   :  { %6824 = vmatpush1.bf16.msra.mxu1 %v8610_v61  ;;  %6784 = vmatprep.subr.bf16.mxu0 %v8475_v62  ;;  %v5189_v61 = vld [vmem:[#allocation26 + $0x758] sm:$0xff]  ;;  %v8547_v0 = vcombine.high %v5061_v59, %v5065_v60 }
 0xa4b   :  { %6825 = vmatprep.subr.bf16.mxu1 %v8603_v41  ;;  %v5193_v62 = vld [vmem:[#allocation26 + $0x778] sm:$0xff]  ;;  %v8554_v41 = vcombine.low %v5069_v51, %v5073_v52 }
 0xa4c   :  { %v8675_v1 = vcombine.high %v5189_v61, %v5193_v62  ;;  %v8674_v5 = vcombine.low %v5189_v61, %v5193_v62  ;;  %v5021_v39 = vld [vmem:[#allocation26 + $0x218] sm:$0xff] }
 0xa4d   :  { %6785 = vmatpush1.bf16.msra.mxu0 %v8474_v57  ;;  %v5057_v57 = vld [vmem:[#allocation26 + $0x338] sm:$0xff] }
 0xa4e   :  { %6826 = vmatpush1.bf16.msra.mxu1 %v8602_v10  ;;  %6786 = vmatprep.subr.bf16.mxu0 %v8467_v3  ;;  %v5181_v10 = vld [vmem:[#allocation26 + $0x718] sm:$0xff]  ;;  %v8539_v6 = vcombine.high %v5053_v2, %v5057_v57 }
 0xa4f   :  { %6827 = vmatprep.subr.bf16.mxu1 %v8595_v4  ;;  %v5185_v3 = vld [vmem:[#allocation26 + $0x738] sm:$0xff]  ;;  %v8546_v4 = vcombine.low %v5061_v59, %v5065_v60  ;;  %v10662_v59 = vld [vmem:[%s10722_s22] sm:$0xff] }
 0xa50   :  { %v8667_v7 = vcombine.high %v5181_v10, %v5185_v3  ;;  %v8666_v19 = vcombine.low %v5181_v10, %v5185_v3  ;;  %v9642_v60 = vld [vmem:[#allocation28 + $0x64] ss:$8 sps:$4 sm:$0xff]   ;;  %v9649_v61 = vld [vmem:[#allocation28 + $0x170] ss:$8 sps:$4 sm:$0xff]   ;;  %v5219_v62 = vrot.slane %v10662_v59, %v10488_v14  ;;  %v9645_v10 = vld [vmem:[#allocation28 + $0x54] ss:$8 sps:$4 sm:$0xff]  }
 0xa51   :  { %6787 = vmatpush1.bf16.msra.mxu0 %v8466_v8  ;;  %v5049_v8 = vld [vmem:[#allocation26 + $0x2f8] sm:$0xff]  ;;  %v9655_v3 = vld [vmem:[#allocation28 + $0x160] ss:$8 sps:$4 sm:$0xff]  }
 0xa52   :  { %6828 = vmatpush1.bf16.msra.mxu1 %v8594_v47  ;;  %6788 = vmatprep.subr.bf16.mxu0 %v8459_v18  ;;  %v5173_v47 = vld [vmem:[#allocation26 + $0x6d8] sm:$0xff]  ;;  %v8531_v22 = vcombine.high %v5045_v54, %v5049_v8 }
 0xa53   :  { %6829 = vmatprep.subr.bf16.mxu1 %v8587_v49  ;;  %v5177_v18 = vld [vmem:[#allocation26 + $0x6f8] sm:$0xff]  ;;  %v8538_v49 = vcombine.low %v5053_v2, %v5057_v57 }
 0xa54   :  { %v8659_v17 = vcombine.high %v5173_v47, %v5177_v18  ;;  %v8658_v26 = vcombine.low %v5173_v47, %v5177_v18  ;;  %v9661_v18 = vld [vmem:[#allocation28 + $0x150] ss:$8 sps:$4 sm:$0xff]  }
 0xa55   :  { %6789 = vmatpush1.bf16.msra.mxu0 %v8458_v23  ;;  %v5041_v23 = vld [vmem:[#allocation26 + $0x2b8] sm:$0xff] }
 0xa56   :  { %6830 = vmatpush1.bf16.msra.mxu1 %v8586_v13  ;;  %6790 = vmatprep.subr.bf16.mxu0 %v8451_v24  ;;  %v5165_v13 = vld [vmem:[#allocation26 + $0x698] sm:$0xff]  ;;  %v8523_v27 = vcombine.high %v5037_v53, %v5041_v23 }
 0xa57   :  { %6831 = vmatprep.subr.bf16.mxu1 %v8579_v25  ;;  %v5169_v24 = vld [vmem:[#allocation26 + $0x6b8] sm:$0xff]  ;;  %v8530_v25 = vcombine.low %v5045_v54, %v5049_v8 }
 0xa58   :  { %v8651_v28 = vcombine.high %v5165_v13, %v5169_v24  ;;  %v8650_v32 = vcombine.low %v5165_v13, %v5169_v24  ;;  %v9643_v54 = vld [vmem:[#allocation28 + $0x50] ss:$8 sps:$4 sm:$0xff]   ;;  %v9675_v13 = vld [vmem:[#allocation28 + $0x134] ss:$8 sps:$4 sm:$0xff]  }
 0xa59   :  { %6791 = vmatpush1.bf16.msra.mxu0 %v8450_v30  ;;  %v5033_v30 = vld [vmem:[#allocation26 + $0x278] sm:$0xff] }
 0xa5a   :  { %6832 = vmatpush1.bf16.msra.mxu1 %v8578_v31  ;;  %6792 = vmatprep.subr.bf16.mxu0 %v8443_v37  ;;  %v5157_v31 = vld [vmem:[#allocation26 + $0x658] sm:$0xff]  ;;  %v8515_v34 = vcombine.high %v5029_v29, %v5033_v30 }
 0xa5b   :  { %6833 = vmatprep.subr.bf16.mxu1 %v8571_v40  ;;  %v5161_v37 = vld [vmem:[#allocation26 + $0x678] sm:$0xff]  ;;  %v8522_v40 = vcombine.low %v5037_v53, %v5041_v23  ;;  %v9667_v23 = vld [vmem:[#allocation28 + $0x140] ss:$8 sps:$4 sm:$0xff]  }
 0xa5c   :  { %v8643_v45 = vcombine.high %v5157_v31, %v5161_v37  ;;  %v8642_v51 = vcombine.low %v5157_v31, %v5161_v37  ;;  %v9654_v53 = vld [vmem:[#allocation28 + $0x34] ss:$8 sps:$4 sm:$0xff]   ;;  %v9652_v24 = vld [vmem:[#allocation28 + $0x30] ss:$8 sps:$4 sm:$0xff]  }
 0xa5d   :  { %6793 = vmatpush1.bf16.msra.mxu0 %v8442_v46  ;;  %v5025_v46 = vld [vmem:[#allocation26 + $0x238] sm:$0xff] }
 0xa5e   :  { %6834 = vmatpush1.bf16.msra.mxu1 %v8570_v36  ;;  %6794 = vmatprep.subr.bf16.mxu0 %v8563_v48  ;;  %v5149_v36 = vld [vmem:[#allocation26 + $0x618] sm:$0xff]  ;;  %v8507_v52 = vcombine.high %v5021_v39, %v5025_v46  ;;  %v8506_v50 = vcombine.low %v5021_v39, %v5025_v46  ;;  %v9691_v46 = vld [vmem:[#allocation28 + $0x100] ss:$8 sps:$4 sm:$0xff]  }
 0xa5f   :  { %6835 = vmatprep.subr.bf16.mxu1 %v8691_v21  ;;  %v5153_v48 = vld [vmem:[#allocation26 + $0x638] sm:$0xff]  ;;  %v8514_v21 = vcombine.low %v5029_v29, %v5033_v30  ;;  %v9679_v30 = vld [vmem:[#allocation28 + $0x120] ss:$8 sps:$4 sm:$0xff]  }
 0xa60   :  { %v8635_v55 = vcombine.high %v5149_v36, %v5153_v48  ;;  %v9666_v29 = vld [vmem:[#allocation28 + $0x14] ss:$8 sps:$4 sm:$0xff]   ;;  %v9664_v37 = vld [vmem:[#allocation28 + $0x10] ss:$8 sps:$4 sm:$0xff]  }
 0xa61   :  { %6795 = vmatpush2.bf16.msra.mxu0 %v8562_v20  ;;  %v8634_v20 = vcombine.low %v5149_v36, %v5153_v48  ;;  %v9687_v31 = vld [vmem:[#allocation28 + $0x114] ss:$8 sps:$4 sm:$0xff]   ;;  %v9676_v48 = vld [vmem:[#allocation28 + $0xf0] ss:$8 sps:$4 sm:$0xff]  }
 0xa62   :  { %6836 = vmatpush2.bf16.msra.mxu1 %v8690_v56  ;;  %6796 = vmatprep.subr.bf16.mxu0 %v8555_v58  ;;  %v9639_v56 = vld [vmem:[#allocation28 + $0x74] ss:$8 sps:$4 sm:$0xff]  }
 0xa63   :  { %6837 = vmatprep.subr.bf16.mxu1 %v8683_v16  ;;  %v9651_v58 = vld [vmem:[#allocation28 + $0x174] ss:$8 sps:$4 sm:$0xff]   ;;  %v9637_v16 = vld [vmem:[#allocation28 + $0x70] ss:$8 sps:$4 sm:$0xff]  }
 0xa64   :  { %v9678_v39 = vld [vmem:[#allocation28 + $0xf4] ss:$8 sps:$4 sm:$0xff]  }
 0xa65   :  { %6797 = vmatpush2.bf16.msra.mxu0 %v8554_v41  ;;  %v9657_v41 = vld [vmem:[#allocation28 + $0x164] ss:$8 sps:$4 sm:$0xff]   ;;  %v9699_v36 = vld [vmem:[#allocation28 + $0x1f4] ss:$8 sps:$4 sm:$0xff]  }
 0xa66   :  { %6838 = vmatpush2.bf16.msra.mxu1 %v8682_v63  ;;  %6798 = vmatprep.subr.bf16.mxu0 %v8547_v0 }
 0xa67   :  { %6839 = vmatprep.subr.bf16.mxu1 %v8675_v1  ;;  %v9640_v1 = vld [vmem:[#allocation28 + $0x60] ss:$8 sps:$4 sm:$0xff]  }
 0xa69   :  { %6799 = vmatpush2.bf16.msra.mxu0 %v8546_v4 }
 0xa6a   :  { %6840 = vmatpush2.bf16.msra.mxu1 %v8674_v5  ;;  %6800 = vmatprep.subr.bf16.mxu0 %v8539_v6  ;;  %v9663_v5 = vld [vmem:[#allocation28 + $0x154] ss:$8 sps:$4 sm:$0xff]  }
 0xa6b   :  { %6841 = vmatprep.subr.bf16.mxu1 %v8667_v7 }
 0xa6d   :  { %6801 = vmatpush2.bf16.msra.mxu0 %v8538_v49 }
 0xa6e   :  { %6842 = vmatpush2.bf16.msra.mxu1 %v8666_v19  ;;  %6802 = vmatprep.subr.bf16.mxu0 %v8531_v22  ;;  %v9669_v19 = vld [vmem:[#allocation28 + $0x144] ss:$8 sps:$4 sm:$0xff]  }
 0xa6f   :  { %6843 = vmatprep.subr.bf16.mxu1 %v8659_v17  ;;  %v9646_v17 = vld [vmem:[#allocation28 + $0x40] ss:$8 sps:$4 sm:$0xff]  }
 0xa71   :  { %6803 = vmatpush2.bf16.msra.mxu0 %v8530_v25  ;;  %v9660_v25 = vld [vmem:[#allocation28 + $0x24] ss:$8 sps:$4 sm:$0xff]  }
 0xa72   :  { %6844 = vmatpush2.bf16.msra.mxu1 %v8658_v26  ;;  %6804 = vmatprep.subr.bf16.mxu0 %v8523_v27  ;;  %v9673_v26 = vld [vmem:[#allocation28 + $0x130] ss:$8 sps:$4 sm:$0xff]   ;;  %v9681_v27 = vld [vmem:[#allocation28 + $0x124] ss:$8 sps:$4 sm:$0xff]  }
 0xa73   :  { %6845 = vmatprep.subr.bf16.mxu1 %v8651_v28  ;;  %v9658_v28 = vld [vmem:[#allocation28 + $0x20] ss:$8 sps:$4 sm:$0xff]  }
 0xa75   :  { %6805 = vmatpush2.bf16.msra.mxu0 %v8522_v40  ;;  %v9672_v40 = vld [vmem:[#allocation28 + $0x4] ss:$8 sps:$4 sm:$0xff]  }
 0xa76   :  { %6846 = vmatpush2.bf16.msra.mxu1 %v8650_v32  ;;  %6806 = vmatprep.subr.bf16.mxu0 %v8515_v34  ;;  %v9685_v32 = vld [vmem:[#allocation28 + $0x110] ss:$8 sps:$4 sm:$0xff]   ;;  %v9693_v34 = vld [vmem:[#allocation28 + $0x104] ss:$8 sps:$4 sm:$0xff]  }
 0xa77   :  { %6847 = vmatprep.subr.bf16.mxu1 %v8643_v45  ;;  %v9670_v45 = vld [vmem:[#allocation28] ss:$8 sps:$4 sm:$0xff]  }
 0xa79   :  { %6807 = vmatpush2.bf16.msra.mxu0 %v8514_v21  ;;  %v9684_v21 = vld [vmem:[#allocation28 + $0xe4] ss:$8 sps:$4 sm:$0xff]  }
 0xa7a   :  { %6848 = vmatpush2.bf16.msra.mxu1 %v8642_v51  ;;  %6808 = vmatprep.subr.bf16.mxu0 %v8507_v52  ;;  %v9697_v51 = vld [vmem:[#allocation28 + $0x1f0] ss:$8 sps:$4 sm:$0xff]   ;;  %v9705_v52 = vld [vmem:[#allocation28 + $0x1e4] ss:$8 sps:$4 sm:$0xff]  }
 0xa7b   :  { %6849 = vmatprep.subr.bf16.mxu1 %v8635_v55  ;;  %v9682_v55 = vld [vmem:[#allocation28 + $0xe0] ss:$8 sps:$4 sm:$0xff]  }
 0xa7d   :  { %6809 = vmatpush2.bf16.msra.mxu0 %v8506_v50  ;;  %v9690_v50 = vld [vmem:[#allocation28 + $0xd4] ss:$8 sps:$4 sm:$0xff]  }
 0xa7e   :  { %6850 = vmatpush2.bf16.msra.mxu1 %v8634_v20  ;;  %7656 = vmatprep.subr.bf16.mxu0 %v9639_v56  ;;  %v9703_v20 = vld [vmem:[#allocation28 + $0x1e0] ss:$8 sps:$4 sm:$0xff]   ;;  %v9711_v56 = vld [vmem:[#allocation28 + $0x1d4] ss:$8 sps:$4 sm:$0xff]  }
 0xa7f   :  { %7697 = vmatprep.subr.bf16.mxu1 %v9651_v58  ;;  %v9688_v58 = vld [vmem:[#allocation28 + $0xd0] ss:$8 sps:$4 sm:$0xff]  }
 0xa80   :  { %6811 = vmatmul.mubr.bf16.vlgmr.msra.gmra.mxu0 %v10641_v43  ;;  %v10667_v63 = vpop.f32.mrf.mxu0  ;;  %v10669_v0 = vpop.f32.mrf.mxu1 }
 0xa81   :  { %6852 = vmatmul.mubr.bf16.vlgmr.msra.gmra.mxu1 %v10643_v44  ;;  %7657 = vmatpush1.bf16.msra.mxu0 %v9637_v16  ;;  %v9648_v44 = vld [vmem:[#allocation28 + $0x44] ss:$8 sps:$4 sm:$0xff]  }
 0xa82   :  { %v6568_v2 = vpop.f32.mrf.mxu0  ;;  %v6609_v57 = vpop.f32.mrf.mxu1  ;;  %7658 = vmatprep.subr.bf16.mxu0 %v9642_v60  ;;  %7698 = vmatpush1.bf16.msra.mxu1 %v9649_v61  ;;  %v9696_v16 = vld [vmem:[#allocation28 + $0xc4] ss:$8 sps:$4 sm:$0xff]   ;;  %v9709_v60 = vld [vmem:[#allocation28 + $0x1d0] ss:$8 sps:$4 sm:$0xff]  }
 0xa83   :  { %v6569_v4 = vadd.f32 %v6568_v2, %v5219_v62  ;;  %7699 = vmatprep.subr.bf16.mxu1 %v9657_v41  ;;  %v9717_v61 = vld [vmem:[#allocation28 + $0x1c4] ss:$8 sps:$4 sm:$0xff]   ;;  %v9694_v62 = vld [vmem:[#allocation28 + $0xc0] ss:$8 sps:$4 sm:$0xff]   ;;  %v9702_v41 = vld [vmem:[#allocation28 + $0xb4] ss:$8 sps:$4 sm:$0xff]  }
 0xa84   :  { %v6570_v6 = vpop.f32.mrf.mxu0  ;;  %v6611_v7 = vpop.f32.mrf.mxu1  ;;  %v9723_v2 = vld [vmem:[#allocation28 + $0x1b4] ss:$8 sps:$4 sm:$0xff]  }
 0xa85   :  { %v6610_v43 = vadd.f32 %v6609_v57, %v6569_v4  ;;  %7659 = vmatpush1.bf16.msra.mxu0 %v9640_v1  ;;  %v9715_v1 = vld [vmem:[#allocation28 + $0x1c0] ss:$8 sps:$4 sm:$0xff]   ;;  %v9700_v57 = vld [vmem:[#allocation28 + $0xb0] ss:$8 sps:$4 sm:$0xff]  }
 0xa86   :  { %v6571_v8 = vpop.f32.mrf.mxu0  ;;  %v6612_v47 = vpop.f32.mrf.mxu1  ;;  %7660 = vmatprep.subr.bf16.mxu0 %v9645_v10  ;;  %7700 = vmatpush1.bf16.msra.mxu1 %v9655_v3  ;;  %v5215_v10 = vrot.slane %v10662_v59, %v10482_v11  ;;  %v9708_v3 = vld [vmem:[#allocation28 + $0xa4] ss:$8 sps:$4 sm:$0xff]   ;;  %v9721_v4 = vld [vmem:[#allocation28 + $0x1b0] ss:$8 sps:$4 sm:$0xff]   ;;  %v9706_v6 = vld [vmem:[#allocation28 + $0xa0] ss:$8 sps:$4 sm:$0xff]  }
 0xa87   :  { %v6861_v49 = vmax.f32 %v6610_v43, 0.0  ;;  %7701 = vmatprep.subr.bf16.mxu1 %v9663_v5  ;;  %v9726_v5 = vld [vmem:[#allocation28 + $0x1a4] ss:$8 sps:$4 sm:$0xff]   ;;  %v9714_v43 = vld [vmem:[#allocation28 + $0x94] ss:$8 sps:$4 sm:$0xff]  }
 0xa88   :  { %v6567_v7 = vadd.f32 %v10667_v63, %v5215_v10  ;;  %v9729_v8 = vld [vmem:[#allocation28 + $0x194] ss:$8 sps:$4 sm:$0xff]   ;;  %v9712_v47 = vld [vmem:[#allocation28 + $0x90] ss:$8 sps:$4 sm:$0xff]   ;;  %v9730_v63 = vld [vmem:[#allocation28 + $0x180] ss:$8 sps:$4 sm:$0xff]  }
 0xa89   :  { %v6869_v22 = vpack.c.bf16 %v6861_v49, %v6861_v49  ;;  %7661 = vmatpush1.bf16.msra.mxu0 %v9643_v54  ;;  %v9724_v54 = vld [vmem:[#allocation28 + $0x1a0] ss:$8 sps:$4 sm:$0xff]   ;;  %v9727_v49 = vld [vmem:[#allocation28 + $0x190] ss:$8 sps:$4 sm:$0xff]  }
 0xa8a   :  { %7662 = vmatprep.subr.bf16.mxu0 %v9648_v44  ;;  %7702 = vmatpush1.bf16.msra.mxu1 %v9661_v18  ;;  %v6608_v44 = vadd.f32 %v10669_v0, %v6567_v7  ;;  %v9720_v18 = vld [vmem:[#allocation28 + $0x84] ss:$8 sps:$4 sm:$0xff]   ;;  %v9733_v0 = vld [vmem:[#allocation28 + $0x270] ss:$8 sps:$4 sm:$0xff]  }
 0xa8b   :  { %7688 = vmatprep.mubr.bf16.mxu0 %v6869_v22  ;;  %7703 = vmatprep.subr.bf16.mxu1 %v9669_v19  ;;  %v9732_v19 = vld [vmem:[#allocation28 + $0x184] ss:$8 sps:$4 sm:$0xff]   ;;  %v9718_v22 = vld [vmem:[#allocation28 + $0x80] ss:$8 sps:$4 sm:$0xff]   ;;  %v9751_v10 = vld [vmem:[#allocation28 + $0x210] ss:$8 sps:$4 sm:$0xff]  }
 0xa8c   :  { %v9793_v7 = vld [vmem:[#allocation28 + $0x330] ss:$8 sps:$4 sm:$0xff]  }
 0xa8d   :  { %7663 = vmatpush1.bf16.msra.mxu0 %v9646_v17  ;;  %v6860_v17 = vmax.f32 %v6608_v44, 0.0  ;;  %v9762_v44 = vld [vmem:[#allocation28 + $0x2e4] ss:$8 sps:$4 sm:$0xff]  }
 0xa8e   :  { %7664 = vmatprep.subr.bf16.mxu0 %v9654_v53  ;;  %7704 = vmatpush1.bf16.msra.mxu1 %v9667_v23  ;;  %v9735_v53 = vld [vmem:[#allocation28 + $0x274] ss:$8 sps:$4 sm:$0xff]  }
 0xa8f   :  { %7705 = vmatprep.subr.bf16.mxu1 %v9675_v13  ;;  %v9783_v23 = vld [vmem:[#allocation28 + $0x374] ss:$8 sps:$4 sm:$0xff]   ;;  %v5223_v13 = vrot.slane %v10662_v59, %v10485_v12 }
 0xa91   :  { %7665 = vmatpush1.bf16.msra.mxu0 %v9652_v24  ;;  %v6868_v24 = vpack.c.bf16 %v6860_v17, %v6860_v17  ;;  %v9804_v17 = vld [vmem:[#allocation28 + $0x304] ss:$8 sps:$4 sm:$0xff]  }
 0xa92   :  { %7666 = vmatprep.subr.bf16.mxu0 %v9660_v25  ;;  %7706 = vmatpush1.bf16.msra.mxu1 %v9673_v26  ;;  %v9738_v25 = vld [vmem:[#allocation28 + $0x264] ss:$8 sps:$4 sm:$0xff]   ;;  %v5227_v26 = vrot.slane %v10662_v59, %v10491_v15 }
 0xa93   :  { %7707 = vmatprep.subr.bf16.mxu1 %v9681_v27 }
 0xa95   :  { %7667 = vmatpush1.bf16.msra.mxu0 %v9658_v28 }
 0xa96   :  { %7668 = vmatprep.subr.bf16.mxu0 %v9666_v29  ;;  %7708 = vmatpush1.bf16.msra.mxu1 %v9679_v30  ;;  %v9736_v30 = vld [vmem:[#allocation28 + $0x260] ss:$8 sps:$4 sm:$0xff]  }
 0xa97   :  { %7709 = vmatprep.subr.bf16.mxu1 %v9687_v31 }
 0xa99   :  { %7669 = vmatpush1.bf16.msra.mxu0 %v9664_v37 }
 0xa9a   :  { %7670 = vmatprep.subr.bf16.mxu0 %v9672_v40  ;;  %7710 = vmatpush1.bf16.msra.mxu1 %v9685_v32  ;;  %v9741_v40 = vld [vmem:[#allocation28 + $0x254] ss:$8 sps:$4 sm:$0xff]  }
 0xa9b   :  { %7711 = vmatprep.subr.bf16.mxu1 %v9693_v34 }
 0xa9d   :  { %7671 = vmatpush1.bf16.msra.mxu0 %v9670_v45 }
 0xa9e   :  { %7672 = vmatprep.subr.bf16.mxu0 %v9678_v39  ;;  %7712 = vmatpush1.bf16.msra.mxu1 %v9691_v46  ;;  %v9739_v46 = vld [vmem:[#allocation28 + $0x250] ss:$8 sps:$4 sm:$0xff]  }
 0xa9f   :  { %7713 = vmatprep.subr.bf16.mxu1 %v9699_v36 }
 0xaa1   :  { %7673 = vmatpush2.bf16.msra.mxu0 %v9676_v48 }
 0xaa2   :  { %7674 = vmatprep.subr.bf16.mxu0 %v9684_v21  ;;  %7714 = vmatpush2.bf16.msra.mxu1 %v9697_v51  ;;  %v9744_v21 = vld [vmem:[#allocation28 + $0x244] ss:$8 sps:$4 sm:$0xff]  }
 0xaa3   :  { %7715 = vmatprep.subr.bf16.mxu1 %v9705_v52 }
 0xaa5   :  { %7675 = vmatpush2.bf16.msra.mxu0 %v9682_v55  ;;  %v9742_v55 = vld [vmem:[#allocation28 + $0x240] ss:$8 sps:$4 sm:$0xff]  }
 0xaa6   :  { %7676 = vmatprep.subr.bf16.mxu0 %v9690_v50  ;;  %7716 = vmatpush2.bf16.msra.mxu1 %v9703_v20  ;;  %v9781_v50 = vld [vmem:[#allocation28 + $0x370] ss:$8 sps:$4 sm:$0xff]  }
 0xaa7   :  { %7717 = vmatprep.subr.bf16.mxu1 %v9711_v56  ;;  %v9747_v56 = vld [vmem:[#allocation28 + $0x234] ss:$8 sps:$4 sm:$0xff]  }
 0xaa9   :  { %7677 = vmatpush2.bf16.msra.mxu0 %v9688_v58  ;;  %v9786_v58 = vld [vmem:[#allocation28 + $0x364] ss:$8 sps:$4 sm:$0xff]  }
 0xaaa   :  { %7678 = vmatprep.subr.bf16.mxu0 %v9696_v16  ;;  %7718 = vmatpush2.bf16.msra.mxu1 %v9709_v60  ;;  %v9745_v16 = vld [vmem:[#allocation28 + $0x230] ss:$8 sps:$4 sm:$0xff]   ;;  %v9784_v60 = vld [vmem:[#allocation28 + $0x360] ss:$8 sps:$4 sm:$0xff]  }
 0xaab   :  { %7719 = vmatprep.subr.bf16.mxu1 %v9717_v61  ;;  %v9750_v61 = vld [vmem:[#allocation28 + $0x224] ss:$8 sps:$4 sm:$0xff]  }
 0xaad   :  { %7679 = vmatpush2.bf16.msra.mxu0 %v9694_v62  ;;  %v9789_v62 = vld [vmem:[#allocation28 + $0x354] ss:$8 sps:$4 sm:$0xff]  }
 0xaae   :  { %7680 = vmatprep.subr.bf16.mxu0 %v9702_v41  ;;  %7720 = vmatpush2.bf16.msra.mxu1 %v9715_v1  ;;  %v9748_v41 = vld [vmem:[#allocation28 + $0x220] ss:$8 sps:$4 sm:$0xff]   ;;  %v9787_v1 = vld [vmem:[#allocation28 + $0x350] ss:$8 sps:$4 sm:$0xff]  }
 0xaaf   :  { %7721 = vmatprep.subr.bf16.mxu1 %v9723_v2  ;;  %v9753_v2 = vld [vmem:[#allocation28 + $0x214] ss:$8 sps:$4 sm:$0xff]  }
 0xab1   :  { %7681 = vmatpush2.bf16.msra.mxu0 %v9700_v57  ;;  %v9792_v57 = vld [vmem:[#allocation28 + $0x344] ss:$8 sps:$4 sm:$0xff]  }
 0xab2   :  { %7682 = vmatprep.subr.bf16.mxu0 %v9708_v3  ;;  %7722 = vmatpush2.bf16.msra.mxu1 %v9721_v4  ;;  %v9790_v3 = vld [vmem:[#allocation28 + $0x340] ss:$8 sps:$4 sm:$0xff]   ;;  %v9756_v4 = vld [vmem:[#allocation28 + $0x204] ss:$8 sps:$4 sm:$0xff]  }
 0xab3   :  { %7723 = vmatprep.subr.bf16.mxu1 %v9726_v5  ;;  %v9795_v5 = vld [vmem:[#allocation28 + $0x334] ss:$8 sps:$4 sm:$0xff]  }
 0xab5   :  { %7683 = vmatpush2.bf16.msra.mxu0 %v9706_v6  ;;  %v9754_v6 = vld [vmem:[#allocation28 + $0x200] ss:$8 sps:$4 sm:$0xff]  }
 0xab6   :  { %7684 = vmatprep.subr.bf16.mxu0 %v9714_v43  ;;  %7724 = vmatpush2.bf16.msra.mxu1 %v9724_v54  ;;  %v9759_v43 = vld [vmem:[#allocation28 + $0x2f4] ss:$8 sps:$4 sm:$0xff]   ;;  %v9798_v54 = vld [vmem:[#allocation28 + $0x324] ss:$8 sps:$4 sm:$0xff]  }
 0xab7   :  { %7725 = vmatprep.subr.bf16.mxu1 %v9729_v8  ;;  %v9757_v8 = vld [vmem:[#allocation28 + $0x2f0] ss:$8 sps:$4 sm:$0xff]  }
 0xab9   :  { %7685 = vmatpush2.bf16.msra.mxu0 %v9712_v47  ;;  %v9796_v47 = vld [vmem:[#allocation28 + $0x320] ss:$8 sps:$4 sm:$0xff]  }
 0xaba   :  { %7686 = vmatprep.subr.bf16.mxu0 %v9720_v18  ;;  %7726 = vmatpush2.bf16.msra.mxu1 %v9727_v49  ;;  %v9801_v18 = vld [vmem:[#allocation28 + $0x314] ss:$8 sps:$4 sm:$0xff]   ;;  %v9760_v49 = vld [vmem:[#allocation28 + $0x2e0] ss:$8 sps:$4 sm:$0xff]  }
 0xabb   :  { %7727 = vmatprep.subr.bf16.mxu1 %v9732_v19  ;;  %v9799_v19 = vld [vmem:[#allocation28 + $0x310] ss:$8 sps:$4 sm:$0xff]  }
 0xabd   :  { %7687 = vmatpush2.bf16.msra.mxu0 %v9718_v22  ;;  %v9765_v22 = vld [vmem:[#allocation28 + $0x2d4] ss:$8 sps:$4 sm:$0xff]  }
 0xabe   :  { %7728 = vmatpush2.bf16.msra.mxu1 %v9730_v63  ;;  %7738 = vmatprep.subr.bf16.mxu0 %v9735_v53  ;;  %v9763_v63 = vld [vmem:[#allocation28 + $0x2d0] ss:$8 sps:$4 sm:$0xff]   ;;  %v9802_v53 = vld [vmem:[#allocation28 + $0x300] ss:$8 sps:$4 sm:$0xff]  }
 0xabf   :  { %7779 = vmatprep.subr.bf16.mxu1 %v9783_v23  ;;  %v9768_v23 = vld [vmem:[#allocation28 + $0x2c4] ss:$8 sps:$4 sm:$0xff]  }
 0xac0   :  { %v6648_v27 = vpop.f32.mrf.mxu0  ;;  %v6689_v28 = vpop.f32.mrf.mxu1  ;;  %7689 = vmatmul.mubr.bf16.vlgmr.msra.gmra.mxu0 %v6868_v24  ;;  %v9805_v24 = vld [vmem:[#allocation28 + $0x3f0] ss:$8 sps:$4 sm:$0xff]  }
 0xac1   :  { %v6649_v29 = vadd.f32 %v6648_v27, %v5223_v13  ;;  %7739 = vmatpush1.bf16.msra.mxu0 %v9733_v0  ;;  %v9807_v13 = vld [vmem:[#allocation28 + $0x3f4] ss:$8 sps:$4 sm:$0xff]   ;;  %v9766_v0 = vld [vmem:[#allocation28 + $0x2c0] ss:$8 sps:$4 sm:$0xff]   ;;  %v9769_v27 = vld [vmem:[#allocation28 + $0x2b0] ss:$8 sps:$4 sm:$0xff]  }
 0xac2   :  { %v6650_v31 = vpop.f32.mrf.mxu0  ;;  %v6691_v37 = vpop.f32.mrf.mxu1  ;;  %7740 = vmatprep.subr.bf16.mxu0 %v9738_v25  ;;  %v9771_v25 = vld [vmem:[#allocation28 + $0x2b4] ss:$8 sps:$4 sm:$0xff]  }
 0xac3   :  { %v6690_v12 = vadd.f32 %v6689_v28, %v6649_v29  ;;  %v6651_v32 = vadd.f32 %v6650_v31, %v5227_v26  ;;  %v9810_v26 = vld [vmem:[#allocation28 + $0x3e4] ss:$8 sps:$4 sm:$0xff]   ;;  %v9808_v28 = vld [vmem:[#allocation28 + $0x3e0] ss:$8 sps:$4 sm:$0xff]  }
 0xac4   :  { %v6652_v34 = vpop.f32.mrf.mxu0  ;;  %v6693_v45 = vpop.f32.mrf.mxu1  ;;  %v9774_v29 = vld [vmem:[#allocation28 + $0x2a4] ss:$8 sps:$4 sm:$0xff]   ;;  %v9772_v31 = vld [vmem:[#allocation28 + $0x2a0] ss:$8 sps:$4 sm:$0xff]  }
 0xac5   :  { %v6692_v39 = vadd.f32 %v6691_v37, %v6651_v32  ;;  %7741 = vmatpush1.bf16.msra.mxu0 %v9736_v30  ;;  %v6862_v36 = vmax.f32 %v6690_v12, 0.0  ;;  %v9813_v30 = vld [vmem:[#allocation28 + $0x3d4] ss:$8 sps:$4 sm:$0xff]   ;;  %v9811_v37 = vld [vmem:[#allocation28 + $0x3d0] ss:$8 sps:$4 sm:$0xff]  }
 0xac6   :  { %v6653_v15 = vpop.f32.mrf.mxu0  ;;  %v6694_v48 = vpop.f32.mrf.mxu1  ;;  %7742 = vmatprep.subr.bf16.mxu0 %v9741_v40  ;;  %v9777_v40 = vld [vmem:[#allocation28 + $0x294] ss:$8 sps:$4 sm:$0xff]   ;;  %v9816_v12 = vld [vmem:[#allocation28 + $0x3c4] ss:$8 sps:$4 sm:$0xff]   ;;  %v9775_v32 = vld [vmem:[#allocation28 + $0x290] ss:$8 sps:$4 sm:$0xff]  }
 0xac7   :  { %v6863_v51 = vmax.f32 %v6692_v39, 0.0  ;;  %v6870_v20 = vpack.c.bf16 %v6862_v36, %v6862_v36  ;;  %v9814_v34 = vld [vmem:[#allocation28 + $0x3c0] ss:$8 sps:$4 sm:$0xff]   ;;  %v9780_v45 = vld [vmem:[#allocation28 + $0x284] ss:$8 sps:$4 sm:$0xff]   ;;  %v5231_v48 = vrot.slane %v10662_v59, %v451_v33 }
 0xac8   :  { %v9819_v39 = vld [vmem:[#allocation28 + $0x3b4] ss:$8 sps:$4 sm:$0xff]   ;;  %v9817_v36 = vld [vmem:[#allocation28 + $0x3b0] ss:$8 sps:$4 sm:$0xff]   ;;  %v9822_v15 = vld [vmem:[#allocation28 + $0x3a4] ss:$8 sps:$4 sm:$0xff]  }
 0xac9   :  { %v6871_v52 = vpack.c.bf16 %v6863_v51, %v6863_v51  ;;  %7743 = vmatpush1.bf16.msra.mxu0 %v9739_v46  ;;  %v9778_v46 = vld [vmem:[#allocation28 + $0x280] ss:$8 sps:$4 sm:$0xff]   ;;  %v9825_v51 = vld [vmem:[#allocation28 + $0x394] ss:$8 sps:$4 sm:$0xff]  }
 0xaca   :  { %7744 = vmatprep.subr.bf16.mxu0 %v9744_v21  ;;  %v9820_v21 = vld [vmem:[#allocation28 + $0x3a0] ss:$8 sps:$4 sm:$0xff]  }
 0xacb   :  { %7729 = vmatprep.mubr.bf16.mxu1 %v6871_v52  ;;  %v5235_v52 = vrot.slane %v10662_v59, %v455_v38 }
 0xacc   :  { %7730 = vmatmul.mubr.bf16.vlgmr.msra.gmra.mxu1 %v6870_v20 }
 0xacd   :  { %7745 = vmatpush1.bf16.msra.mxu0 %v9742_v55  ;;  %7780 = vmatpush1.bf16.msra.mxu1 %v9781_v50 }
 0xace   :  { %7746 = vmatprep.subr.bf16.mxu0 %v9747_v56  ;;  %7781 = vmatprep.subr.bf16.mxu1 %v9786_v58  ;;  %v9823_v56 = vld [vmem:[#allocation28 + $0x390] ss:$8 sps:$4 sm:$0xff]  }
 0xad1   :  { %7747 = vmatpush1.bf16.msra.mxu0 %v9745_v16  ;;  %7782 = vmatpush1.bf16.msra.mxu1 %v9784_v60  ;;  %v9828_v16 = vld [vmem:[#allocation28 + $0x384] ss:$8 sps:$4 sm:$0xff]  }
 0xad2   :  { %7748 = vmatprep.subr.bf16.mxu0 %v9750_v61  ;;  %7783 = vmatprep.subr.bf16.mxu1 %v9789_v62 }
 0xad5   :  { %7749 = vmatpush1.bf16.msra.mxu0 %v9748_v41  ;;  %7784 = vmatpush1.bf16.msra.mxu1 %v9787_v1 }
 0xad6   :  { %7750 = vmatprep.subr.bf16.mxu0 %v9753_v2  ;;  %7785 = vmatprep.subr.bf16.mxu1 %v9792_v57  ;;  %v9826_v2 = vld [vmem:[#allocation28 + $0x380] ss:$8 sps:$4 sm:$0xff]  }
 0xad9   :  { %7751 = vmatpush1.bf16.msra.mxu0 %v9751_v10  ;;  %7786 = vmatpush1.bf16.msra.mxu1 %v9790_v3 }
 0xada   :  { %7752 = vmatprep.subr.bf16.mxu0 %v9756_v4  ;;  %7787 = vmatprep.subr.bf16.mxu1 %v9795_v5 }
 0xadd   :  { %7753 = vmatpush1.bf16.msra.mxu0 %v9754_v6  ;;  %7788 = vmatpush1.bf16.msra.mxu1 %v9793_v7  ;;  %v5239_v6 = vrot.slane %v10662_v59, %v459_v35  ;;  %v5243_v7 = vrot.slane %v10662_v59, %v463_v42  ;;  %v7004_v59 = vld [vmem:[%s10724_s24] sm:$0x3]  ;;  %s10241_s24 = smov [#allocation29]  }
 0xade   :  { %7754 = vmatprep.subr.bf16.mxu0 %v9759_v43  ;;  %7789 = vmatprep.subr.bf16.mxu1 %v9798_v54  ;;  %s7836_s2 = sshll.u32 %s10241_s24, 4  ;;  %s7837_s2 = int_to_ptr.vmem [resolvable:$true] %s7836_s2 }
 0xadf   :  { %s10173_s8 = scalar_lea.vmem %s7837_s2, 256  ;;  %p10178_p2 = scmp.lt.s32.totalorder %s7837_s2, %s7837_s2 }
 0xae0   :  { %p10174_p1 = scmp.ne.s32.totalorder %s7837_s2, %s10173_s8  ;;  %p10179_p3 = scmp.lt.s32.totalorder %s10173_s8, %s10173_s8 }
 0xae1   :  { %7755 = vmatpush2.bf16.msra.mxu0 %v9757_v8  ;;  %7790 = vmatpush1.bf16.msra.mxu1 %v9796_v47 }
 0xae2   :  { %7756 = vmatprep.subr.bf16.mxu0 %v9762_v44  ;;  %7791 = vmatprep.subr.bf16.mxu1 %v9801_v18  ;;  %p10180_p4 = por %p10179_p3, %p10178_p2 }
 0xae4   :  { %p10181_p5 = pnand %p10180_p4, %p10174_p1 }
 0xae5   :  { %7757 = vmatpush2.bf16.msra.mxu0 %v9760_v49  ;;  %7792 = vmatpush1.bf16.msra.mxu1 %v9799_v19 }
 0xae6   :  { %7758 = vmatprep.subr.bf16.mxu0 %v9765_v22  ;;  %7793 = vmatprep.subr.bf16.mxu1 %v9804_v17 }
 0xae9   :  { %7759 = vmatpush2.bf16.msra.mxu0 %v9763_v63  ;;  %7794 = vmatpush1.bf16.msra.mxu1 %v9802_v53 }
 0xaea   :  { %7760 = vmatprep.subr.bf16.mxu0 %v9768_v23  ;;  %7795 = vmatprep.subr.bf16.mxu1 %v9807_v13 }
 0xaed   :  { %7761 = vmatpush2.bf16.msra.mxu0 %v9766_v0  ;;  %7796 = vmatpush2.bf16.msra.mxu1 %v9805_v24 }
 0xaee   :  { %7762 = vmatprep.subr.bf16.mxu0 %v9771_v25  ;;  %7797 = vmatprep.subr.bf16.mxu1 %v9810_v26  ;;  %v7009_v26 = vrot.slane %v7004_v59, %v10482_v11 }
 0xaf1   :  { %7763 = vmatpush2.bf16.msra.mxu0 %v9769_v27  ;;  %7798 = vmatpush2.bf16.msra.mxu1 %v9808_v28  ;;  %v7013_v27 = vrot.slane %v7004_v59, %v10488_v14 }
 0xaf2   :  { %7764 = vmatprep.subr.bf16.mxu0 %v9774_v29  ;;  %7799 = vmatprep.subr.bf16.mxu1 %v9813_v30 }
 0xaf5   :  { %7765 = vmatpush2.bf16.msra.mxu0 %v9772_v31  ;;  %7800 = vmatpush2.bf16.msra.mxu1 %v9811_v37 }
 0xaf6   :  { %7766 = vmatprep.subr.bf16.mxu0 %v9777_v40  ;;  %7801 = vmatprep.subr.bf16.mxu1 %v9816_v12 }
 0xaf9   :  { %7767 = vmatpush2.bf16.msra.mxu0 %v9775_v32  ;;  %7802 = vmatpush2.bf16.msra.mxu1 %v9814_v34 }
 0xafa   :  { %7768 = vmatprep.subr.bf16.mxu0 %v9780_v45  ;;  %7803 = vmatprep.subr.bf16.mxu1 %v9819_v39 }
 0xafd   :  { %7769 = vmatpush2.bf16.msra.mxu0 %v9778_v46  ;;  %7804 = vmatpush2.bf16.msra.mxu1 %v9817_v36 }
 0xafe   :  { %7805 = vmatprep.subr.bf16.mxu1 %v9822_v15 }
 0xb00   :  { %v6730_v55 = vpop.f32.mrf.mxu0 }
 0xb01   :  { %v6731_v50 = vadd.f32 %v6730_v55, %v5231_v48  ;;  %v6771_v20 = vpop.f32.mrf.mxu1  ;;  %7806 = vmatpush2.bf16.msra.mxu1 %v9820_v21 }
 0xb02   :  { %v6732_v58 = vpop.f32.mrf.mxu0  ;;  %7807 = vmatprep.subr.bf16.mxu1 %v9825_v51 }
 0xb03   :  { %v6772_v60 = vadd.f32 %v6771_v20, %v6731_v50  ;;  %v6733_v61 = vadd.f32 %v6732_v58, %v5235_v52  ;;  %v6773_v33 = vpop.f32.mrf.mxu1 }
 0xb04   :  { %v6734_v62 = vpop.f32.mrf.mxu0 }
 0xb05   :  { %v6774_v41 = vadd.f32 %v6773_v33, %v6733_v61  ;;  %v6775_v1 = vpop.f32.mrf.mxu1  ;;  %7808 = vmatpush2.bf16.msra.mxu1 %v9823_v56  ;;  %v6864_v57 = vmax.f32 %v6772_v60, 0.0 }
 0xb06   :  { %v6735_v10 = vpop.f32.mrf.mxu0  ;;  %7809 = vmatprep.subr.bf16.mxu1 %v9828_v16 }
 0xb07   :  { %v6865_v38 = vmax.f32 %v6774_v41, 0.0  ;;  %v6776_v3 = vpop.f32.mrf.mxu1  ;;  %v6872_v5 = vpack.c.bf16 %v6864_v57, %v6864_v57 }
 0xb09   :  { %v6873_v4 = vpack.c.bf16 %v6865_v38, %v6865_v38  ;;  %7810 = vmatpush2.bf16.msra.mxu1 %v9826_v2 }
 0xb0b   :  { %7770 = vmatprep.mubr.bf16.mxu0 %v6873_v4 }
 0xb0c   :  { %7771 = vmatmul.mubr.bf16.vlgmr.msra.gmra.mxu0 %v6872_v5 }
 0xb40   :  { %v6812_v43 = vpop.f32.mrf.mxu0 }
 0xb41   :  { %v6813_v54 = vadd.f32 %v6812_v43, %v5239_v6  ;;  %v6853_v8 = vpop.f32.mrf.mxu1 }
 0xb42   :  { %v6814_v47 = vpop.f32.mrf.mxu0 }
 0xb43   :  { %v6854_v44 = vadd.f32 %v6853_v8, %v6813_v54  ;;  %v6815_v18 = vadd.f32 %v6814_v47, %v5243_v7  ;;  %v6855_v49 = vpop.f32.mrf.mxu1 }
 0xb44   :  { %v6816_v19 = vpop.f32.mrf.mxu0 }
 0xb45   :  { %v6856_v22 = vadd.f32 %v6855_v49, %v6815_v18  ;;  %v6857_v17 = vpop.f32.mrf.mxu1  ;;  %v6866_v63 = vmax.f32 %v6854_v44, 0.0 }
 0xb46   :  { %v6817_v53 = vpop.f32.mrf.mxu0 }
 0xb47   :  { %v6867_v23 = vmax.f32 %v6856_v22, 0.0  ;;  %v6858_v13 = vpop.f32.mrf.mxu1  ;;  %v6874_v35 = vpack.c.bf16 %v6866_v63, %v6866_v63 }
 0xb49   :  { %v6875_v0 = vpack.c.bf16 %v6867_v23, %v6867_v23 }
 0xb4b   :  { %7811 = vmatprep.mubr.bf16.mxu1 %v6875_v0 }
 0xb4c   :  { %7812 = vmatmul.mubr.bf16.vlgmr.msra.gmra.mxu1 %v6874_v35 }
 0xb80   :  { %v7690_v9 = vpop.f32.mrf.mxu0 }
 0xb81   :  { %v7691_v28 = vadd.f32 %v7690_v9, %v7009_v26 }
 0xb82   :  { %v7692_v42 = vpop.f32.mrf.mxu0 }
 0xb83   :  { %v7693_v30 = vadd.f32 %v7692_v42, %v7013_v27 }
 0xb84   :  { %v7694_v24 = vpop.f32.mrf.mxu0 }
 0xb86   :  { %v7695_v25 = vpop.f32.mrf.mxu0 }
 0xb8c   :  { %v7731_v29 = vpop.f32.mrf.mxu1 }
 0xb8d   :  { %v7732_v31 = vadd.f32 %v7731_v29, %v7691_v28 }
 0xb8e   :  { %v7733_v37 = vpop.f32.mrf.mxu1 }
 0xb8f   :  { %v7734_v40 = vadd.f32 %v7733_v37, %v7693_v30 }
 0xb90   :  { %v7735_v12 = vpop.f32.mrf.mxu1 }
 0xb92   :  { %v7736_v32 = vpop.f32.mrf.mxu1 }
 0xbcc   :  { %v7772_v34 = vpop.f32.mrf.mxu0 }
 0xbcd   :  { %v7773_v36 = vadd.f32 %v7772_v34, %v7732_v31 }
 0xbce   :  { %v7774_v45 = vpop.f32.mrf.mxu0 }
 0xbcf   :  { %v7775_v48 = vadd.f32 %v7774_v45, %v7734_v40 }
 0xbd0   :  { %v7776_v39 = vpop.f32.mrf.mxu0 }
 0xbd2   :  { %v7777_v46 = vpop.f32.mrf.mxu0 }
 0xc0c   :  { %v7813_v15 = vpop.f32.mrf.mxu1 }
 0xc0d   :  { %v7814_v21 = vadd.f32 %v7813_v15, %v7773_v36 }
 0xc0e   :  { %v7815_v51 = vpop.f32.mrf.mxu1 }
 0xc0f   :  { %v7820_v11 = vmul.f32 0.5, %v7814_v21  ;;  %v7816_v52 = vadd.f32 %v7815_v51, %v7775_v48 }
 0xc10   :  { %v7817_v14 = vpop.f32.mrf.mxu1 }
 0xc11   :  { %9829 = vtanh.f32 %v7820_v11  ;;  %v7821_v55 = vmul.f32 0.5, %v7816_v52 }
 0xc12   :  { %v7818_v50 = vpop.f32.mrf.mxu1 }
 0xc13   :  { %9831 = vtanh.f32 %v7821_v55 }
 0xc1e   :  { %v9830_v20 = vpop.eup %9829 }
 0xc1f   :  { %v7824_v56 = vmul.f32 0.5, %v9830_v20 }
 0xc20   :  { %v9832_v58 = vpop.eup %9831 }
 0xc21   :  { %v7825_v16 = vmul.f32 0.5, %v9832_v58  ;;  %v7826_v60 = vadd.f32 0.5, %v7824_v56 }
 0xc23   :  { %v7827_v61 = vadd.f32 0.5, %v7825_v16  ;;  %7828 = vst [vmem:[#allocation29] sm:$0xff] %v7826_v60 }
 0xc25   :  { %7829 = vst [vmem:[#allocation29 + $0x8] sm:$0xff] %v7827_v61 }
 0xc26   :  { %10184 = shalt.err (!%p10181_p5)
}
 0xc27   :  { %7839 = dma.vmem_to_hbm [thread:$0]  %s7837_s2, 256, %s10725_s25, [#allocation4]  }
 0xc28   :  { %10211 = dma.done.wait [#allocation4], 256  }
 0xc29   :  { %10212 = vsyncadd [#allocation4], 4294967040 }
 0xc2a   :  { %7843 = vsyncpa [#allocation3], 1 }
 0xc2b   :  { %7844 = vsyncpa [#allocation6], 1 }
 0xc2c   :  { %7845 = vsyncpa [#allocation9], 1 }
 0xc2d   :  { %7846 = vsyncpa [#allocation12], 1 }
 0xc2e   :  { %7847 = vsyncpa [#allocation15], 1 }
 0xc2f   :  { %7848 = vsyncpa [#allocation18], 1 }
 0xc30   :  { %7849 = vsyncpa [#allocation21], 1 }
 0xc31   :  { %7850 = vsyncpa [#allocation24], 1 }
 0xc32   :  { %7851 = vsyncpa [#allocation27], 1 }
 0xc33   :  { %7852 = vsyncpa [#allocation4], 1 }

// kernel: tpu_custom_call.1
= control target key start
LH: loop header
LB: loop body
LE: loop exit
PB: predicated region body
PF: predicated region fallthrough
CT: control target
= control target key end

     0   :  { %s10700_s0 = inlined_call_operand.hbm [shape: bf16[8,256], index: 0, kind: input, shape index: {}]   ;;  %s10701_s1 = inlined_call_operand.hbm [shape: bf16[256,1024], index: 1, kind: input, shape index: {}]   ;;  %s10702_s2 = inlined_call_operand.hbm [shape: f32[1,1024], index: 2, kind: input, shape index: {}]   ;;  %s10703_s3 = inlined_call_operand.hbm [shape: bf16[1024,512], index: 3, kind: input, shape index: {}]   ;;  %s10704_s4 = inlined_call_operand.vmem [shape: f32[1,512], index: 4, kind: input, shape index: {}]   ;;  %s10705_s5 = inlined_call_operand.hbm [shape: bf16[512,256], index: 5, kind: input, shape index: {}]   ;;  %s10706_s6 = inlined_call_operand.hbm [shape: f32[1,256], index: 6, kind: input, shape index: {}]   ;;  %s10707_s7 = inlined_call_operand.hbm [shape: bf16[256,128], index: 7, kind: input, shape index: {}]   ;;  %s10708_s8 = inlined_call_operand.hbm [shape: f32[1,128], index: 8, kind: input, shape index: {}]   ;;  %s10709_s9 = inlined_call_operand.hbm [shape: bf16[128,128], index: 9, kind: input, shape index: {}]   ;;  %s10710_s10 = inlined_call_operand.hbm [shape: f32[1,128], index: 10, kind: input, shape index: {}]   ;;  %s10711_s11 = inlined_call_operand.hbm [shape: bf16[128,128], index: 11, kind: input, shape index: {}]   ;;  %s10712_s12 = inlined_call_operand.vmem [shape: f32[1,128], index: 12, kind: input, shape index: {}]   ;;  %s10713_s13 = inlined_call_operand.hbm [shape: bf16[128,128], index: 13, kind: input, shape index: {}]   ;;  %s10714_s14 = inlined_call_operand.vmem [shape: f32[1,128], index: 14, kind: input, shape index: {}]   ;;  %s10715_s15 = inlined_call_operand.hbm [shape: bf16[128,128], index: 15, kind: input, shape index: {}]   ;;  %s10716_s16 = inlined_call_operand.vmem [shape: f32[1,128], index: 16, kind: input, shape index: {}]   ;;  %s10717_s17 = inlined_call_operand.hbm [shape: bf16[128,256], index: 17, kind: input, shape index: {}]   ;;  %s10718_s18 = inlined_call_operand.vmem [shape: f32[1,256], index: 18, kind: input, shape index: {}]   ;;  %s10719_s19 = inlined_call_operand.hbm [shape: bf16[256,512], index: 19, kind: input, shape index: {}]   ;;  %s10720_s20 = inlined_call_operand.vmem [shape: f32[1,512], index: 20, kind: input, shape index: {}]   ;;  %s10721_s21 = inlined_call_operand.hbm [shape: bf16[512,1024], index: 21, kind: input, shape index: {}]   ;;  %s10722_s22 = inlined_call_operand.vmem [shape: f32[1,1024], index: 22, kind: input, shape index: {}]   ;;  %s10723_s23 = inlined_call_operand.hbm [shape: bf16[1024,256], index: 23, kind: input, shape index: {}]   ;;  %s10724_s24 = inlined_call_operand.vmem [shape: f32[1,256], index: 24, kind: input, shape index: {}]   ;;  %s10725_s25 = inlined_call_operand.hbm [shape: f32[8,256], index: 25, kind: output, shape index: {}]  }
   0x1   :  { %10730 = sst [smem:[#allocation40_spill]] %s10700_s0 }
   0x2   :  { %10731 = sst [smem:[#allocation41_spill]] %s10701_s1 }
   0x3   :  { %10732 = sst [smem:[#allocation42_spill]] %s10702_s2 }
   0x4   :  { %10733 = sst [smem:[#allocation43_spill]] %s10703_s3 }
   0x5   :  { %10734 = sst [smem:[#allocation44_spill]] %s10704_s4 }
   0x6   :  { %10735 = sst [smem:[#allocation45_spill]] %s10705_s5 }
   0x7   :  { %10736 = sst [smem:[#allocation46_spill]] %s10706_s6 }
   0x8   :  { %10737 = sst [smem:[#allocation47_spill]] %s10707_s7 }
   0x9   :  { %10738 = sst [smem:[#allocation48_spill]] %s10708_s8 }
   0xa   :  { %10739 = sst [smem:[#allocation49_spill]] %s10709_s9 }
   0xb   :  { %30 = vsyncpa [#allocation3], 0 }
   0xc   :  { %31 = vsyncpa [#allocation6], 0 }
   0xd   :  { %32 = vsyncpa [#allocation9], 0 }
   0xe   :  { %33 = vsyncpa [#allocation12], 0 }
   0xf   :  { %34 = vsyncpa [#allocation15], 0 }
  0x10   :  { %35 = vsyncpa [#allocation18], 0 }
  0x11   :  { %36 = vsyncpa [#allocation21], 0 }
  0x12   :  { %37 = vsyncpa [#allocation24], 0 }
  0x13   :  { %38 = vsyncpa [#allocation27], 0 }
  0x14   :  { %39 = vsyncpa [#allocation4], 0  ;;  %s10213_s29 = smov [#allocation5]  }
  0x15   :  { %s55_s2 = sshll.u32 %s10213_s29, 4  ;;  %s56_s2 = int_to_ptr.vmem [resolvable:$true] %s55_s2 }
  0x16   :  { %s9841_s6 = scalar_lea.vmem %s56_s2, 16384  ;;  %p9846_p1 = scmp.lt.s32.totalorder %s56_s2, %s56_s2 }
  0x17   :  { %p9842_p0 = scmp.ne.s32.totalorder %s56_s2, %s9841_s6  ;;  %p9847_p2 = scmp.lt.s32.totalorder %s9841_s6, %s9841_s6 }
  0x19   :  { %p9848_p3 = por %p9847_p2, %p9846_p1 }
  0x1b   :  { %p9849_p4 = pnand %p9848_p3, %p9842_p0 }
  0x1d   :  { %9852 = shalt.err (!%p9849_p4)
}
  0x1e   :  { %s10726_s30 = smov 512   ;;  %s10727_s7 = smov 32  }
  0x1f   :  { %s10740_s1 = sld [smem:[#allocation41_spill]]  ;;  %s10216_s8 = smov [#allocation8]  }
  0x20   :  { %s77_s27 = sshll.u32 %s10216_s8, 4  ;;  %s78_s27 = int_to_ptr.vmem [resolvable:$true] %s77_s27 }
  0x21   :  { %s9861_s4 = scalar_lea.vmem %s78_s27, 32768  ;;  %p9866_p6 = scmp.lt.s32.totalorder %s78_s27, %s78_s27 }
  0x22   :  { %p9862_p5 = scmp.ne.s32.totalorder %s78_s27, %s9861_s4  ;;  %p9867_p7 = scmp.lt.s32.totalorder %s9861_s4, %s9861_s4 }
  0x24   :  { %p9868_p8 = por %p9867_p7, %p9866_p6 }
  0x25   :  { %61 = dma.hbm_to_vmem [thread:$0]  %s10740_s1, 16384, %s56_s2, [#allocation6], %s10726_s30, %s10726_s30, %s10727_s7  }
  0x26   :  { %p9869_p9 = pnand %p9868_p8, %p9862_p5 }
  0x28   :  { %9872 = shalt.err (!%p9869_p9)
}
  0x29   :  { %s10728_s28 = smov 256   ;;  %s10729_s9 = smov 16  }
  0x2a   :  { %s10741_s29 = sld [smem:[#allocation43_spill]]  ;;  %s10219_s2 = smov [#allocation11]  }
  0x2b   :  { %s104_s6 = sshll.u32 %s10219_s2, 4  ;;  %s10220_s3 = smov [#allocation14]   ;;  %s105_s6 = int_to_ptr.vmem [resolvable:$true] %s104_s6 }
  0x2c   :  { %s126_s26 = sshll.u32 %s10220_s3, 4  ;;  %s9881_s1 = scalar_lea.vmem %s105_s6, 32  ;;  %s127_s26 = int_to_ptr.vmem [resolvable:$true] %s126_s26 }
  0x2d   :  { %p9882_p10 = scmp.ne.s32.totalorder %s105_s6, %s9881_s1  ;;  %p9886_p11 = scmp.lt.s32.totalorder %s105_s6, %s105_s6 }
  0x2e   :  { %p9887_p12 = scmp.lt.s32.totalorder %s9881_s1, %s9881_s1 }
  0x30   :  { %83 = dma.hbm_to_vmem [thread:$0]  %s10741_s29, 32768, %s78_s27, [#allocation9], %s10728_s28, %s10728_s28, %s10729_s9  }
  0x31   :  { %p9888_p13 = por %p9887_p12, %p9886_p11 }
  0x33   :  { %p9889_p0 = pnand %p9888_p13, %p9882_p10 }
  0x35   :  { %9892 = shalt.err (!%p9889_p0)
}
  0x36   :  { %s10742_s30 = sld [smem:[#allocation46_spill]]  ;;  %s9901_s7 = scalar_lea.vmem %s127_s26, 16 }
  0x37   :  { %p9902_p1 = scmp.ne.s32.totalorder %s127_s26, %s9901_s7  ;;  %s9905_s27 = scalar_lea.vmem %s127_s26, 32 }
  0x38   :  { %p9906_p2 = scmp.lt.s32.totalorder %s127_s26, %s127_s26  ;;  %p9907_p3 = scmp.lt.s32.totalorder %s9905_s27, %s9901_s7 }
  0x3a   :  { %p9908_p4 = por %p9907_p3, %p9906_p2 }
  0x3c   :  { %107 = dma.hbm_to_vmem [thread:$0]  %s10742_s30, 32, %s105_s6, [#allocation12]  }
  0x3d   :  { %p9909_p5 = pnand %p9908_p4, %p9902_p1 }
  0x3f   :  { %9912 = shalt.err (!%p9909_p5)
}
  0x40   :  { %s10743_s29 = sld [smem:[#allocation48_spill]]  ;;  %s10221_s2 = smov [#allocation17]  }
  0x41   :  { %s148_s3 = sshll.u32 %s10221_s2, 4  ;;  %s149_s3 = int_to_ptr.vmem [resolvable:$true] %s148_s3 }
  0x42   :  { %s9921_s1 = scalar_lea.vmem %s149_s3, 16  ;;  %s9925_s28 = scalar_lea.vmem %s149_s3, 32 }
  0x43   :  { %p9922_p6 = scmp.ne.s32.totalorder %s149_s3, %s9921_s1  ;;  %p9926_p7 = scmp.lt.s32.totalorder %s149_s3, %s149_s3 }
  0x44   :  { %p9927_p8 = scmp.lt.s32.totalorder %s9925_s28, %s9921_s1 }
  0x46   :  { %129 = dma.hbm_to_vmem [thread:$0]  %s10743_s29, 16, %s127_s26, [#allocation15]  }
  0x47   :  { %p9928_p9 = por %p9927_p8, %p9926_p7 }
  0x49   :  { %p9929_p10 = pnand %p9928_p9, %p9922_p6 }
  0x4b   :  { %9932 = shalt.err (!%p9929_p10)
}
  0x4c   :  { %151 = dma.hbm_to_vmem [thread:$0]  %s10710_s10, 16, %s149_s3, [#allocation18]  }
  0x4d   :  { %s10222_s6 = smov [#allocation20]  }
  0x4e   :  { %s171_s8 = sshll.u32 %s10222_s6, 4  ;;  %s172_s8 = int_to_ptr.vmem [resolvable:$true] %s171_s8 }
  0x4f   :  { %s9941_s4 = scalar_lea.vmem %s172_s8, 1024  ;;  %p9946_p12 = scmp.lt.s32.totalorder %s172_s8, %s172_s8 }
  0x50   :  { %p9942_p11 = scmp.ne.s32.totalorder %s172_s8, %s9941_s4  ;;  %p9947_p13 = scmp.lt.s32.totalorder %s9941_s4, %s9941_s4 }
  0x52   :  { %p9948_p0 = por %p9947_p13, %p9946_p12 }
  0x54   :  { %p9949_p1 = pnand %p9948_p0, %p9942_p11 }
  0x56   :  { %9952 = shalt.err (!%p9949_p1)
}
  0x57   :  { %s10223_s26 = smov 64   ;;  %s10224_s27 = smov 4  }
  0x58   :  { %177 = dma.hbm_to_vmem [thread:$0]  %s10713_s13, 1024, %s172_s8, [#allocation21], %s10223_s26, %s10223_s26, %s10224_s27  }
  0x59   :  { %s10225_s10 = smov [#allocation23]   ;;  %s10226_s29 = smov [#allocation26]  }
  0x5a   :  { %s199_s0 = sshll.u32 %s10225_s10, 4  ;;  %s227_s2 = sshll.u32 %s10226_s29, 4  ;;  %s200_s0 = int_to_ptr.vmem [resolvable:$true] %s199_s0  ;;  %s228_s2 = int_to_ptr.vmem [resolvable:$true] %s227_s2 }
  0x5b   :  { %s9961_s3 = scalar_lea.vmem %s200_s0, 2048  ;;  %p9966_p3 = scmp.lt.s32.totalorder %s200_s0, %s200_s0 }
  0x5c   :  { %p9962_p2 = scmp.ne.s32.totalorder %s200_s0, %s9961_s3  ;;  %p9967_p4 = scmp.lt.s32.totalorder %s9961_s3, %s9961_s3 }
  0x5e   :  { %p9968_p5 = por %p9967_p4, %p9966_p3 }
  0x60   :  { %p9969_p6 = pnand %p9968_p5, %p9962_p2 }
  0x62   :  { %9972 = shalt.err (!%p9969_p6)
}
  0x63   :  { %s10227_s1 = smov 128   ;;  %s10228_s30 = smov 8  }
  0x64   :  { %205 = dma.hbm_to_vmem [thread:$0]  %s10717_s17, 2048, %s200_s0, [#allocation24], %s10227_s1, %s10227_s1, %s10228_s30  }
  0x65   :  { %s9981_s6 = scalar_lea.vmem %s228_s2, 32768  ;;  %p9986_p8 = scmp.lt.s32.totalorder %s228_s2, %s228_s2 }
  0x66   :  { %p9982_p7 = scmp.ne.s32.totalorder %s228_s2, %s9981_s6  ;;  %p9987_p9 = scmp.lt.s32.totalorder %s9981_s6, %s9981_s6 }
  0x68   :  { %p9988_p10 = por %p9987_p9, %p9986_p8 }
  0x6a   :  { %p9989_p11 = pnand %p9988_p10, %p9982_p7 }
  0x6c   :  { %9992 = shalt.err (!%p9989_p11)
}
  0x6d   :  { %s10744_s8 = smov 32   ;;  %s10745_s4 = smov 512  }
  0x6e   :  { %233 = dma.hbm_to_vmem [thread:$0]  %s10721_s21, 32768, %s228_s2, [#allocation27], %s10745_s4, %s10745_s4, %s10744_s8  }
  0x6f   :  { %s10229_s10 = smov [#allocation2]   ;;  %s10230_s3 = smov [#allocation7]  }
  0x70   :  { %s46_s29 = sshll.u32 %s10229_s10, 4  ;;  %s68_s9 = sshll.u32 %s10230_s3, 4  ;;  %s47_s29 = int_to_ptr.vmem [resolvable:$true] %s46_s29  ;;  %s69_s9 = int_to_ptr.vmem [resolvable:$true] %s68_s9 }
  0x71   :  { %s10001_s17 = scalar_lea.vmem %s47_s29, 128  ;;  %p10006_p13 = scmp.lt.s32.totalorder %s47_s29, %s47_s29 }
  0x72   :  { %p10002_p12 = scmp.ne.s32.totalorder %s47_s29, %s10001_s17  ;;  %p10007_p0 = scmp.lt.s32.totalorder %s10001_s17, %s10001_s17 }
  0x74   :  { %p10008_p1 = por %p10007_p0, %p10006_p13 }
  0x76   :  { %p10009_p2 = pnand %p10008_p1, %p10002_p12 }
  0x78   :  { %10012 = shalt.err (!%p10009_p2)
}
  0x79   :  { %s10746_s13 = sld [smem:[#allocation40_spill]]  ;;  %s10021_s6 = scalar_lea.vmem %s69_s9, 128 }
  0x7a   :  { %p10022_p3 = scmp.ne.s32.totalorder %s69_s9, %s10021_s6  ;;  %p10026_p4 = scmp.lt.s32.totalorder %s69_s9, %s69_s9 }
  0x7b   :  { %p10027_p5 = scmp.lt.s32.totalorder %s10021_s6, %s10021_s6 }
  0x7d   :  { %p10028_p6 = por %p10027_p5, %p10026_p4 }
  0x7f   :  { %49 = dma.hbm_to_vmem [thread:$0]  %s10746_s13, 128, %s47_s29, [#allocation3]  }
  0x80   :  { %p10029_p7 = pnand %p10028_p6, %p10022_p3 }
  0x82   :  { %10032 = shalt.err (!%p10029_p7)
}
  0x83   :  { %s10747_s8 = sld [smem:[#allocation42_spill]]  ;;  %s10231_s4 = smov [#allocation10]  }
  0x84   :  { %s91_s28 = sshll.u32 %s10231_s4, 4  ;;  %s10232_s5 = smov [#allocation13]   ;;  %s92_s28 = int_to_ptr.vmem [resolvable:$true] %s91_s28 }
  0x85   :  { %s113_s10 = sshll.u32 %s10232_s5, 4  ;;  %s10041_s3 = scalar_lea.vmem %s92_s28, 8192  ;;  %s114_s10 = int_to_ptr.vmem [resolvable:$true] %s113_s10 }
  0x86   :  { %p10042_p8 = scmp.ne.s32.totalorder %s92_s28, %s10041_s3  ;;  %p10046_p9 = scmp.lt.s32.totalorder %s92_s28, %s92_s28 }
  0x87   :  { %p10047_p10 = scmp.lt.s32.totalorder %s10041_s3, %s10041_s3 }
  0x89   :  { %71 = dma.hbm_to_vmem [thread:$0]  %s10747_s8, 128, %s69_s9, [#allocation6]  }
  0x8a   :  { %p10048_p11 = por %p10047_p10, %p10046_p9 }
  0x8c   :  { %p10049_p12 = pnand %p10048_p11, %p10042_p8 }
  0x8e   :  { %10052 = shalt.err (!%p10049_p12)
}
  0x8f   :  { %s10748_s0 = sld [smem:[#allocation45_spill]]  ;;  %s10061_s9 = scalar_lea.vmem %s114_s10, 2048 }
  0x90   :  { %p10062_p13 = scmp.ne.s32.totalorder %s114_s10, %s10061_s9  ;;  %p10066_p0 = scmp.lt.s32.totalorder %s114_s10, %s114_s10 }
  0x91   :  { %p10067_p1 = scmp.lt.s32.totalorder %s10061_s9, %s10061_s9 }
  0x93   :  { %p10068_p2 = por %p10067_p1, %p10066_p0 }
  0x95   :  { %97 = dma.hbm_to_vmem [thread:$0]  %s10748_s0, 8192, %s92_s28, [#allocation9], %s10227_s1, %s10227_s1, %s10228_s30  }
  0x96   :  { %p10069_p3 = pnand %p10068_p2, %p10062_p13 }
  0x98   :  { %10072 = shalt.err (!%p10069_p3)
}
  0x99   :  { %s10749_s6 = sld [smem:[#allocation47_spill]]  ;;  %s10233_s21 = smov [#allocation16]  }
  0x9a   :  { %s135_s2 = sshll.u32 %s10233_s21, 4  ;;  %s10234_s8 = smov [#allocation19]   ;;  %s136_s2 = int_to_ptr.vmem [resolvable:$true] %s135_s2 }
  0x9b   :  { %s157_s4 = sshll.u32 %s10234_s8, 4  ;;  %s10081_s28 = scalar_lea.vmem %s136_s2, 1024  ;;  %s158_s4 = int_to_ptr.vmem [resolvable:$true] %s157_s4 }
  0x9c   :  { %p10082_p4 = scmp.ne.s32.totalorder %s136_s2, %s10081_s28  ;;  %p10086_p5 = scmp.lt.s32.totalorder %s136_s2, %s136_s2 }
  0x9d   :  { %p10087_p6 = scmp.lt.s32.totalorder %s10081_s28, %s10081_s28 }
  0x9f   :  { %119 = dma.hbm_to_vmem [thread:$0]  %s10749_s6, 2048, %s114_s10, [#allocation12], %s10223_s26, %s10223_s26, %s10224_s27  }
  0xa0   :  { %p10088_p7 = por %p10087_p6, %p10086_p5 }
  0xa2   :  { %p10089_p8 = pnand %p10088_p7, %p10082_p4 }
  0xa4   :  { %10092 = shalt.err (!%p10089_p8)
}
  0xa5   :  { %s10750_s29 = sld [smem:[#allocation49_spill]]  ;;  %s10101_s10 = scalar_lea.vmem %s158_s4, 1024 }
  0xa6   :  { %p10102_p9 = scmp.ne.s32.totalorder %s158_s4, %s10101_s10  ;;  %p10106_p10 = scmp.lt.s32.totalorder %s158_s4, %s158_s4 }
  0xa7   :  { %p10107_p11 = scmp.lt.s32.totalorder %s10101_s10, %s10101_s10 }
  0xa9   :  { %p10108_p12 = por %p10107_p11, %p10106_p10 }
  0xab   :  { %141 = dma.hbm_to_vmem [thread:$0]  %s10750_s29, 1024, %s136_s2, [#allocation15], %s10223_s26, %s10223_s26, %s10224_s27  }
  0xac   :  { %p10109_p13 = pnand %p10108_p12, %p10102_p9 }
  0xae   :  { %10112 = shalt.err (!%p10109_p13)
}
  0xaf   :  { %163 = dma.hbm_to_vmem [thread:$0]  %s10711_s11, 1024, %s158_s4, [#allocation18], %s10223_s26, %s10223_s26, %s10224_s27  }
  0xb0   :  { %s10235_s9 = smov [#allocation22]   ;;  %s10236_s13 = smov [#allocation25]  }
  0xb1   :  { %s185_s7 = sshll.u32 %s10235_s9, 4  ;;  %s213_s6 = sshll.u32 %s10236_s13, 4  ;;  %s186_s7 = int_to_ptr.vmem [resolvable:$true] %s185_s7  ;;  %s214_s6 = int_to_ptr.vmem [resolvable:$true] %s213_s6 }
  0xb2   :  { %s10121_s21 = scalar_lea.vmem %s186_s7, 1024  ;;  %p10126_p1 = scmp.lt.s32.totalorder %s186_s7, %s186_s7 }
  0xb3   :  { %p10122_p0 = scmp.ne.s32.totalorder %s186_s7, %s10121_s21  ;;  %p10127_p2 = scmp.lt.s32.totalorder %s10121_s21, %s10121_s21 }
  0xb5   :  { %p10128_p3 = por %p10127_p2, %p10126_p1 }
  0xb7   :  { %p10129_p4 = pnand %p10128_p3, %p10122_p0 }
  0xb9   :  { %10132 = shalt.err (!%p10129_p4)
}
  0xba   :  { %191 = dma.hbm_to_vmem [thread:$0]  %s10715_s15, 1024, %s186_s7, [#allocation21], %s10223_s26, %s10223_s26, %s10224_s27  }
  0xbb   :  { %s10141_s11 = scalar_lea.vmem %s214_s6, 8192  ;;  %p10146_p6 = scmp.lt.s32.totalorder %s214_s6, %s214_s6 }
  0xbc   :  { %p10142_p5 = scmp.ne.s32.totalorder %s214_s6, %s10141_s11  ;;  %p10147_p7 = scmp.lt.s32.totalorder %s10141_s11, %s10141_s11 }
  0xbe   :  { %p10148_p8 = por %p10147_p7, %p10146_p6 }
  0xc0   :  { %p10149_p9 = pnand %p10148_p8, %p10142_p5 }
  0xc2   :  { %10152 = shalt.err (!%p10149_p9)
}
  0xc3   :  { %s10751_s4 = smov 16   ;;  %s10752_s28 = smov 256  }
  0xc4   :  { %219 = dma.hbm_to_vmem [thread:$0]  %s10719_s19, 8192, %s214_s6, [#allocation24], %s10752_s28, %s10752_s28, %s10751_s4  }
  0xc5   :  { %s10237_s29 = smov [#allocation28]  }
  0xc6   :  { %s241_s10 = sshll.u32 %s10237_s29, 4  ;;  %s242_s10 = int_to_ptr.vmem [resolvable:$true] %s241_s10 }
  0xc7   :  { %s10161_s17 = scalar_lea.vmem %s242_s10, 16384  ;;  %p10166_p11 = scmp.lt.s32.totalorder %s242_s10, %s242_s10 }
  0xc8   :  { %p10162_p10 = scmp.ne.s32.totalorder %s242_s10, %s10161_s17  ;;  %p10167_p12 = scmp.lt.s32.totalorder %s10161_s17, %s10161_s17 }
  0xca   :  { %p10168_p13 = por %p10167_p12, %p10166_p11 }
  0xcc   :  { %p10169_p0 = pnand %p10168_p13, %p10162_p10 }
  0xce   :  { %10172 = shalt.err (!%p10169_p0)
}
  0xcf   :  { %247 = dma.hbm_to_vmem [thread:$0]  %s10723_s23, 16384, %s242_s10, [#allocation27], %s10227_s1, %s10227_s1, %s10228_s30  }
  0xd0   :  { %10193 = dma.done.wait [#allocation3], 128  }
  0xd1   :  { %10194 = vsyncadd [#allocation3], 4294967168 }
  0xd2   :  { %10195 = dma.done.wait [#allocation6], 16512  }
  0xd3   :  { %10196 = vsyncadd [#allocation6], 4294950784 }
  0xd4   :  { %10197 = dma.done.wait [#allocation9], 40960  }
  0xd5   :  { %10198 = vsyncadd [#allocation9], 4294926336 }
  0xd6   :  { %10199 = dma.done.wait [#allocation12], 2080  }
  0xd7   :  { %10200 = vsyncadd [#allocation12], 4294965216 }
  0xd8   :  { %10201 = dma.done.wait [#allocation15], 1040  }
  0xd9   :  { %10202 = vsyncadd [#allocation15], 4294966256 }
  0xda   :  { %10203 = dma.done.wait [#allocation18], 1040  }
  0xdb   :  { %10204 = vsyncadd [#allocation18], 4294966256 }
  0xdc   :  { %10205 = dma.done.wait [#allocation21], 2048  }
  0xdd   :  { %10206 = vsyncadd [#allocation21], 4294965248 }
  0xde   :  { %10207 = dma.done.wait [#allocation24], 10240  }
  0xdf   :  { %10208 = vsyncadd [#allocation24], 4294957056 }
  0xe0   :  { %10209 = dma.done.wait [#allocation27], 49152  }
  0xe1   :  { %10210 = vsyncadd [#allocation27], 4294918144  ;;  %v359_v0 = vld [vmem:[#allocation5 + $0x1c0] sm:$0xff]  ;;  %v360_v2 = vld [vmem:[#allocation5 + $0x1c8] sm:$0xff]  ;;  %s10753_s27 = sld [smem:[#allocation44_spill]]  ;;  %vm10239_vm0 = vmmov 0  }
  0xe2   :  { %v363_v1 = vld [vmem:[#allocation5 + $0x1e0] sm:$0xff]  ;;  %v364_v4 = vld [vmem:[#allocation5 + $0x1e8] sm:$0xff]  ;;  %v10459_v53 = vld [vmem:[#allocation2] sm:$0xff] }
  0xe3   :  { %v7912_v3 = vcombine.high %v359_v0, %v363_v1  ;;  %v7911_v5 = vcombine.low %v359_v0, %v363_v1  ;;  %v351_v6 = vld [vmem:[#allocation5 + $0x180] sm:$0xff]  ;;  %v7914_v8 = vcombine.high %v360_v2, %v364_v4  ;;  %v7913_v9 = vcombine.low %v360_v2, %v364_v4  ;;  %v352_v11 = vld [vmem:[#allocation5 + $0x188] sm:$0xff] }
  0xe4   :  { %v355_v7 = vld [vmem:[#allocation5 + $0x1a0] sm:$0xff]  ;;  %v356_v12 = vld [vmem:[#allocation5 + $0x1a8] sm:$0xff]  ;;  %v10463_v57 = vcombine.high %v10459_v53, %v10459_v53 }
  0xe5   :  { %v7904_v10 = vcombine.high %v351_v6, %v355_v7  ;;  %v343_v13 = vld [vmem:[#allocation5 + $0x140] sm:$0xff]  ;;  %1120 = vmatprep.subr.bf16.mxu0 %v7912_v3  ;;  %v7906_v14 = vcombine.high %v352_v11, %v356_v12  ;;  %v344_v16 = vld [vmem:[#allocation5 + $0x148] sm:$0xff]  ;;  %1161 = vmatprep.subr.bf16.mxu1 %v7914_v8  ;;  %v7903_v18 = vcombine.low %v351_v6, %v355_v7 }
  0xe6   :  { %v347_v15 = vld [vmem:[#allocation5 + $0x160] sm:$0xff]  ;;  %v348_v17 = vld [vmem:[#allocation5 + $0x168] sm:$0xff]  ;;  %1121 = vmatpush1.bf16.msra.mxu0 %v7911_v5  ;;  %1162 = vmatpush1.bf16.msra.mxu1 %v7913_v9  ;;  %v7905_v19 = vcombine.low %v352_v11, %v356_v12 }
  0xe7   :  { %1122 = vmatprep.subr.bf16.mxu0 %v7904_v10  ;;  %v7896_v20 = vcombine.high %v343_v13, %v347_v15  ;;  %1163 = vmatprep.subr.bf16.mxu1 %v7906_v14  ;;  %v7898_v21 = vcombine.high %v344_v16, %v348_v17  ;;  %v335_v22 = vld [vmem:[#allocation5 + $0x100] sm:$0xff]  ;;  %v336_v24 = vld [vmem:[#allocation5 + $0x108] sm:$0xff]  ;;  %v7895_v26 = vcombine.low %v343_v13, %v347_v15 }
  0xe8   :  { %v339_v23 = vld [vmem:[#allocation5 + $0x120] sm:$0xff]  ;;  %v340_v25 = vld [vmem:[#allocation5 + $0x128] sm:$0xff]  ;;  %v7897_v27 = vcombine.low %v344_v16, %v348_v17  ;;  %1152 = vmatprep.mubr.bf16.mxu0 %v10463_v57  ;;  %1193 = vmatprep.mubr.bf16.mxu1 %v10463_v57 }
  0xe9   :  { %v7888_v28 = vcombine.high %v335_v22, %v339_v23  ;;  %v7890_v29 = vcombine.high %v336_v24, %v340_v25  ;;  %v327_v30 = vld [vmem:[#allocation5 + $0xc0] sm:$0xff]  ;;  %v328_v32 = vld [vmem:[#allocation5 + $0xc8] sm:$0xff]  ;;  %v7887_v34 = vcombine.low %v335_v22, %v339_v23  ;;  %v7889_v35 = vcombine.low %v336_v24, %v340_v25 }
  0xea   :  { %1123 = vmatpush1.bf16.msra.mxu0 %v7903_v18  ;;  %1164 = vmatpush1.bf16.msra.mxu1 %v7905_v19  ;;  %v331_v31 = vld [vmem:[#allocation5 + $0xe0] sm:$0xff]  ;;  %v332_v33 = vld [vmem:[#allocation5 + $0xe8] sm:$0xff] }
  0xeb   :  { %1124 = vmatprep.subr.bf16.mxu0 %v7896_v20  ;;  %1165 = vmatprep.subr.bf16.mxu1 %v7898_v21  ;;  %v7880_v36 = vcombine.high %v327_v30, %v331_v31  ;;  %v7882_v37 = vcombine.high %v328_v32, %v332_v33  ;;  %v319_v38 = vld [vmem:[#allocation5 + $0x80] sm:$0xff]  ;;  %v320_v40 = vld [vmem:[#allocation5 + $0x88] sm:$0xff]  ;;  %v7879_v42 = vcombine.low %v327_v30, %v331_v31 }
  0xec   :  { %v323_v39 = vld [vmem:[#allocation5 + $0xa0] sm:$0xff]  ;;  %v324_v41 = vld [vmem:[#allocation5 + $0xa8] sm:$0xff]  ;;  %v7881_v43 = vcombine.low %v328_v32, %v332_v33 }
  0xed   :  { %v7872_v44 = vcombine.high %v319_v38, %v323_v39  ;;  %v7874_v45 = vcombine.high %v320_v40, %v324_v41  ;;  %v311_v46 = vld [vmem:[#allocation5 + $0x40] sm:$0xff]  ;;  %v312_v48 = vld [vmem:[#allocation5 + $0x48] sm:$0xff]  ;;  %v7871_v50 = vcombine.low %v319_v38, %v323_v39  ;;  %v7873_v51 = vcombine.low %v320_v40, %v324_v41 }
  0xee   :  { %1125 = vmatpush1.bf16.msra.mxu0 %v7895_v26  ;;  %1166 = vmatpush1.bf16.msra.mxu1 %v7897_v27  ;;  %v315_v47 = vld [vmem:[#allocation5 + $0x60] sm:$0xff]  ;;  %v316_v49 = vld [vmem:[#allocation5 + $0x68] sm:$0xff] }
  0xef   :  { %1126 = vmatprep.subr.bf16.mxu0 %v7888_v28  ;;  %1167 = vmatprep.subr.bf16.mxu1 %v7890_v29  ;;  %v7864_v52 = vcombine.high %v311_v46, %v315_v47  ;;  %v7866_v54 = vcombine.high %v312_v48, %v316_v49  ;;  %v303_v55 = vld [vmem:[#allocation5] sm:$0xff]  ;;  %v304_v58 = vld [vmem:[#allocation5 + $0x8] sm:$0xff]  ;;  %v7863_v60 = vcombine.low %v311_v46, %v315_v47 }
  0xf0   :  { %v307_v56 = vld [vmem:[#allocation5 + $0x20] sm:$0xff]  ;;  %v308_v59 = vld [vmem:[#allocation5 + $0x28] sm:$0xff]  ;;  %v7865_v61 = vcombine.low %v312_v48, %v316_v49 }
  0xf1   :  { %v7856_v62 = vcombine.high %v303_v55, %v307_v56  ;;  %v7858_v63 = vcombine.high %v304_v58, %v308_v59  ;;  %v423_v0 = vld [vmem:[#allocation5 + $0x3c0] sm:$0xff]  ;;  %v424_v2 = vld [vmem:[#allocation5 + $0x3c8] sm:$0xff]  ;;  %v7855_v4 = vcombine.low %v303_v55, %v307_v56  ;;  %v7857_v5 = vcombine.low %v304_v58, %v308_v59 }
  0xf2   :  { %1127 = vmatpush1.bf16.msra.mxu0 %v7887_v34  ;;  %1168 = vmatpush1.bf16.msra.mxu1 %v7889_v35  ;;  %v427_v1 = vld [vmem:[#allocation5 + $0x3e0] sm:$0xff]  ;;  %v428_v3 = vld [vmem:[#allocation5 + $0x3e8] sm:$0xff] }
  0xf3   :  { %1128 = vmatprep.subr.bf16.mxu0 %v7880_v36  ;;  %1169 = vmatprep.subr.bf16.mxu1 %v7882_v37  ;;  %v7976_v6 = vcombine.high %v423_v0, %v427_v1  ;;  %v7978_v7 = vcombine.high %v424_v2, %v428_v3  ;;  %v415_v8 = vld [vmem:[#allocation5 + $0x380] sm:$0xff]  ;;  %v416_v10 = vld [vmem:[#allocation5 + $0x388] sm:$0xff]  ;;  %v7975_v12 = vcombine.low %v423_v0, %v427_v1  ;;  %v361_v1 = vld [vmem:[#allocation5 + $0x1d0] sm:$0xff] }
  0xf4   :  { %v419_v9 = vld [vmem:[#allocation5 + $0x3a0] sm:$0xff]  ;;  %v420_v11 = vld [vmem:[#allocation5 + $0x3a8] sm:$0xff]  ;;  %v7977_v13 = vcombine.low %v424_v2, %v428_v3  ;;  %v365_v3 = vld [vmem:[#allocation5 + $0x1f0] sm:$0xff] }
  0xf5   :  { %v7968_v14 = vcombine.high %v415_v8, %v419_v9  ;;  %v7970_v15 = vcombine.high %v416_v10, %v420_v11  ;;  %v407_v16 = vld [vmem:[#allocation5 + $0x340] sm:$0xff]  ;;  %v408_v18 = vld [vmem:[#allocation5 + $0x348] sm:$0xff]  ;;  %v7967_v20 = vcombine.low %v415_v8, %v419_v9  ;;  %v7969_v21 = vcombine.low %v416_v10, %v420_v11  ;;  %v353_v9 = vld [vmem:[#allocation5 + $0x190] sm:$0xff] }
  0xf6   :  { %1129 = vmatpush1.bf16.msra.mxu0 %v7879_v42  ;;  %1170 = vmatpush1.bf16.msra.mxu1 %v7881_v43  ;;  %v411_v17 = vld [vmem:[#allocation5 + $0x360] sm:$0xff]  ;;  %v412_v19 = vld [vmem:[#allocation5 + $0x368] sm:$0xff]  ;;  %v7916_v8 = vcombine.high %v361_v1, %v365_v3  ;;  %v357_v11 = vld [vmem:[#allocation5 + $0x1b0] sm:$0xff] }
  0xf7   :  { %1130 = vmatprep.subr.bf16.mxu0 %v7872_v44  ;;  %1171 = vmatprep.subr.bf16.mxu1 %v7874_v45  ;;  %v7960_v22 = vcombine.high %v407_v16, %v411_v17  ;;  %v7962_v23 = vcombine.high %v408_v18, %v412_v19  ;;  %v399_v24 = vld [vmem:[#allocation5 + $0x300] sm:$0xff]  ;;  %v400_v26 = vld [vmem:[#allocation5 + $0x308] sm:$0xff]  ;;  %v7959_v28 = vcombine.low %v407_v16, %v411_v17 }
  0xf8   :  { %v403_v25 = vld [vmem:[#allocation5 + $0x320] sm:$0xff]  ;;  %v404_v27 = vld [vmem:[#allocation5 + $0x328] sm:$0xff]  ;;  %v7961_v29 = vcombine.low %v408_v18, %v412_v19  ;;  %v7908_v17 = vcombine.high %v353_v9, %v357_v11  ;;  %v345_v18 = vld [vmem:[#allocation5 + $0x150] sm:$0xff] }
  0xf9   :  { %v7952_v30 = vcombine.high %v399_v24, %v403_v25  ;;  %v7954_v31 = vcombine.high %v400_v26, %v404_v27  ;;  %v391_v32 = vld [vmem:[#allocation5 + $0x2c0] sm:$0xff]  ;;  %v392_v34 = vld [vmem:[#allocation5 + $0x2c8] sm:$0xff]  ;;  %v7951_v36 = vcombine.low %v399_v24, %v403_v25  ;;  %v7953_v37 = vcombine.low %v400_v26, %v404_v27  ;;  %v337_v25 = vld [vmem:[#allocation5 + $0x110] sm:$0xff] }
  0xfa   :  { %1131 = vmatpush1.bf16.msra.mxu0 %v7871_v50  ;;  %1172 = vmatpush1.bf16.msra.mxu1 %v7873_v51  ;;  %v395_v33 = vld [vmem:[#allocation5 + $0x2e0] sm:$0xff]  ;;  %v396_v35 = vld [vmem:[#allocation5 + $0x2e8] sm:$0xff]  ;;  %v341_v27 = vld [vmem:[#allocation5 + $0x130] sm:$0xff] }
  0xfb   :  { %1132 = vmatprep.subr.bf16.mxu0 %v7864_v52  ;;  %1173 = vmatprep.subr.bf16.mxu1 %v7866_v54  ;;  %v7944_v38 = vcombine.high %v391_v32, %v395_v33  ;;  %v383_v39 = vld [vmem:[#allocation5 + $0x280] sm:$0xff]  ;;  %v7946_v40 = vcombine.high %v392_v34, %v396_v35  ;;  %v384_v42 = vld [vmem:[#allocation5 + $0x288] sm:$0xff]  ;;  %v7943_v44 = vcombine.low %v391_v32, %v395_v33  ;;  %v329_v33 = vld [vmem:[#allocation5 + $0xd0] sm:$0xff] }
  0xfc   :  { %v387_v41 = vld [vmem:[#allocation5 + $0x2a0] sm:$0xff]  ;;  %v388_v43 = vld [vmem:[#allocation5 + $0x2a8] sm:$0xff]  ;;  %v7945_v45 = vcombine.low %v392_v34, %v396_v35  ;;  %v7892_v32 = vcombine.high %v337_v25, %v341_v27  ;;  %v333_v35 = vld [vmem:[#allocation5 + $0xf0] sm:$0xff] }
  0xfd   :  { %v7936_v46 = vcombine.high %v383_v39, %v387_v41  ;;  %v375_v47 = vld [vmem:[#allocation5 + $0x240] sm:$0xff]  ;;  %v7938_v48 = vcombine.high %v384_v42, %v388_v43  ;;  %v376_v50 = vld [vmem:[#allocation5 + $0x248] sm:$0xff]  ;;  %v7935_v52 = vcombine.low %v383_v39, %v387_v41  ;;  %v7937_v54 = vcombine.low %v384_v42, %v388_v43  ;;  %v321_v41 = vld [vmem:[#allocation5 + $0x90] sm:$0xff] }
  0xfe   :  { %1133 = vmatpush1.bf16.msra.mxu0 %v7863_v60  ;;  %1174 = vmatpush1.bf16.msra.mxu1 %v7865_v61  ;;  %v379_v49 = vld [vmem:[#allocation5 + $0x260] sm:$0xff]  ;;  %v380_v51 = vld [vmem:[#allocation5 + $0x268] sm:$0xff]  ;;  %v325_v42 = vld [vmem:[#allocation5 + $0xb0] sm:$0xff] }
  0xff   :  { %1134 = vmatprep.subr.bf16.mxu0 %v7856_v62  ;;  %1175 = vmatprep.subr.bf16.mxu1 %v7858_v63  ;;  %v7928_v55 = vcombine.high %v375_v47, %v379_v49  ;;  %v367_v56 = vld [vmem:[#allocation5 + $0x200] sm:$0xff]  ;;  %v7930_v58 = vcombine.high %v376_v50, %v380_v51  ;;  %v368_v60 = vld [vmem:[#allocation5 + $0x208] sm:$0xff]  ;;  %v7927_v62 = vcombine.low %v375_v47, %v379_v49  ;;  %v322_v43 = vld [vmem:[#allocation5 + $0x98] sm:$0xff] }
 0x100   :  { %v371_v59 = vld [vmem:[#allocation5 + $0x220] sm:$0xff]  ;;  %v372_v61 = vld [vmem:[#allocation5 + $0x228] sm:$0xff]  ;;  %v7929_v63 = vcombine.low %v376_v50, %v380_v51  ;;  %v317_v47 = vld [vmem:[#allocation5 + $0x70] sm:$0xff]  ;;  %v7876_v49 = vcombine.high %v321_v41, %v325_v42 }
 0x101   :  { %v7920_v0 = vcombine.high %v367_v56, %v371_v59  ;;  %v7922_v2 = vcombine.high %v368_v60, %v372_v61  ;;  %v314_v50 = vld [vmem:[#allocation5 + $0x58] sm:$0xff] }
 0x102   :  { %1135 = vmatpush1.bf16.msra.mxu0 %v7855_v4  ;;  %1176 = vmatpush1.bf16.msra.mxu1 %v7857_v5  ;;  %v362_v4 = vld [vmem:[#allocation5 + $0x1d8] sm:$0xff] }
 0x103   :  { %1136 = vmatprep.subr.bf16.mxu0 %v7976_v6  ;;  %1177 = vmatprep.subr.bf16.mxu1 %v7978_v7  ;;  %v366_v5 = vld [vmem:[#allocation5 + $0x1f8] sm:$0xff]  ;;  %v7919_v6 = vcombine.low %v367_v56, %v371_v59  ;;  %v7921_v7 = vcombine.low %v368_v60, %v372_v61  ;;  %v309_v56 = vld [vmem:[#allocation5 + $0x30] sm:$0xff] }
 0x104   :  { %v7918_v10 = vcombine.high %v362_v4, %v366_v5  ;;  %v7917_v16 = vcombine.low %v362_v4, %v366_v5  ;;  %v318_v51 = vld [vmem:[#allocation5 + $0x78] sm:$0xff] }
 0x105   :  { %v306_v60 = vld [vmem:[#allocation5 + $0x18] sm:$0xff] }
 0x106   :  { %1137 = vmatpush2.bf16.msra.mxu0 %v7975_v12  ;;  %1178 = vmatpush2.bf16.msra.mxu1 %v7977_v13  ;;  %v354_v12 = vld [vmem:[#allocation5 + $0x198] sm:$0xff]  ;;  %v10469_v13 = vcombine.low %v10459_v53, %v10459_v53  ;;  %v7907_v53 = vcombine.low %v353_v9, %v357_v11  ;;  %v421_v9 = vld [vmem:[#allocation5 + $0x3b0] sm:$0xff] }
 0x107   :  { %1138 = vmatprep.subr.bf16.mxu0 %v7968_v14  ;;  %1179 = vmatprep.subr.bf16.mxu1 %v7970_v15  ;;  %v358_v14 = vld [vmem:[#allocation5 + $0x1b8] sm:$0xff]  ;;  %v7915_v15 = vcombine.low %v361_v1, %v365_v3  ;;  %v429_v1 = vld [vmem:[#allocation5 + $0x3f0] sm:$0xff] }
 0x108   :  { %v7910_v19 = vcombine.high %v354_v12, %v358_v14  ;;  %v310_v61 = vld [vmem:[#allocation5 + $0x38] sm:$0xff] }
 0x109   :  { %v426_v4 = vld [vmem:[#allocation5 + $0x3d8] sm:$0xff] }
 0x10a   :  { %1139 = vmatpush2.bf16.msra.mxu0 %v7967_v20  ;;  %1180 = vmatpush2.bf16.msra.mxu1 %v7969_v21  ;;  %v349_v20 = vld [vmem:[#allocation5 + $0x170] sm:$0xff]  ;;  %v346_v21 = vld [vmem:[#allocation5 + $0x158] sm:$0xff] }
 0x10b   :  { %1140 = vmatprep.subr.bf16.mxu0 %v7960_v22  ;;  %1181 = vmatprep.subr.bf16.mxu1 %v7962_v23  ;;  %v350_v22 = vld [vmem:[#allocation5 + $0x178] sm:$0xff]  ;;  %v7909_v23 = vcombine.low %v354_v12, %v358_v14  ;;  %v7900_v24 = vcombine.high %v345_v18, %v349_v20 }
 0x10c   :  { %v7902_v26 = vcombine.high %v346_v21, %v350_v22  ;;  %v430_v5 = vld [vmem:[#allocation5 + $0x3f8] sm:$0xff] }
 0x10d   :  { %v418_v12 = vld [vmem:[#allocation5 + $0x398] sm:$0xff] }
 0x10e   :  { %1141 = vmatpush2.bf16.msra.mxu0 %v7959_v28  ;;  %1182 = vmatpush2.bf16.msra.mxu1 %v7961_v29  ;;  %v338_v28 = vld [vmem:[#allocation5 + $0x118] sm:$0xff] }
 0x10f   :  { %1142 = vmatprep.subr.bf16.mxu0 %v7952_v30  ;;  %1183 = vmatprep.subr.bf16.mxu1 %v7954_v31  ;;  %v342_v29 = vld [vmem:[#allocation5 + $0x138] sm:$0xff]  ;;  %v7899_v30 = vcombine.low %v345_v18, %v349_v20  ;;  %v7901_v31 = vcombine.low %v346_v21, %v350_v22  ;;  %v413_v18 = vld [vmem:[#allocation5 + $0x370] sm:$0xff] }
 0x110   :  { %v7894_v34 = vcombine.high %v338_v28, %v342_v29  ;;  %v7893_v39 = vcombine.low %v338_v28, %v342_v29  ;;  %v422_v14 = vld [vmem:[#allocation5 + $0x3b8] sm:$0xff] }
 0x111   :  { %v410_v21 = vld [vmem:[#allocation5 + $0x358] sm:$0xff] }
 0x112   :  { %1143 = vmatpush2.bf16.msra.mxu0 %v7951_v36  ;;  %1184 = vmatpush2.bf16.msra.mxu1 %v7953_v37  ;;  %v330_v36 = vld [vmem:[#allocation5 + $0xd8] sm:$0xff] }
 0x113   :  { %1144 = vmatprep.subr.bf16.mxu0 %v7944_v38  ;;  %1185 = vmatprep.subr.bf16.mxu1 %v7946_v40  ;;  %v334_v37 = vld [vmem:[#allocation5 + $0xf8] sm:$0xff]  ;;  %v7891_v38 = vcombine.low %v337_v25, %v341_v27  ;;  %v7884_v40 = vcombine.high %v329_v33, %v333_v35  ;;  %v405_v25 = vld [vmem:[#allocation5 + $0x330] sm:$0xff] }
 0x114   :  { %v414_v22 = vld [vmem:[#allocation5 + $0x378] sm:$0xff] }
 0x115   :  { %v402_v28 = vld [vmem:[#allocation5 + $0x318] sm:$0xff] }
 0x116   :  { %1145 = vmatpush2.bf16.msra.mxu0 %v7943_v44  ;;  %1186 = vmatpush2.bf16.msra.mxu1 %v7945_v45  ;;  %v326_v44 = vld [vmem:[#allocation5 + $0xb8] sm:$0xff]  ;;  %v7883_v45 = vcombine.low %v329_v33, %v333_v35  ;;  %v397_v33 = vld [vmem:[#allocation5 + $0x2f0] sm:$0xff] }
 0x117   :  { %1146 = vmatprep.subr.bf16.mxu0 %v7936_v46  ;;  %1187 = vmatprep.subr.bf16.mxu1 %v7938_v48  ;;  %v313_v46 = vld [vmem:[#allocation5 + $0x50] sm:$0xff]  ;;  %v7885_v48 = vcombine.low %v330_v36, %v334_v37  ;;  %v406_v29 = vld [vmem:[#allocation5 + $0x338] sm:$0xff] }
 0x118   :  { %v7868_v59 = vcombine.high %v313_v46, %v317_v47 }
 0x11a   :  { %1147 = vmatpush2.bf16.msra.mxu0 %v7935_v52  ;;  %1188 = vmatpush2.bf16.msra.mxu1 %v7937_v54  ;;  %v7878_v52 = vcombine.high %v322_v43, %v326_v44  ;;  %v7875_v54 = vcombine.low %v321_v41, %v325_v42  ;;  %v389_v41 = vld [vmem:[#allocation5 + $0x2b0] sm:$0xff] }
 0x11b   :  { %1148 = vmatprep.subr.bf16.mxu0 %v7928_v55  ;;  %1189 = vmatprep.subr.bf16.mxu1 %v7930_v58  ;;  %v305_v55 = vld [vmem:[#allocation5 + $0x10] sm:$0xff]  ;;  %v7877_v58 = vcombine.low %v322_v43, %v326_v44  ;;  %v386_v43 = vld [vmem:[#allocation5 + $0x298] sm:$0xff] }
 0x11c   :  { %v7860_v3 = vcombine.high %v305_v55, %v309_v56  ;;  %v390_v44 = vld [vmem:[#allocation5 + $0x2b8] sm:$0xff] }
 0x11e   :  { %1149 = vmatpush2.bf16.msra.mxu0 %v7927_v62  ;;  %1190 = vmatpush2.bf16.msra.mxu1 %v7929_v63  ;;  %v7870_v62 = vcombine.high %v314_v50, %v318_v51  ;;  %v7867_v63 = vcombine.low %v313_v46, %v317_v47  ;;  %v377_v47 = vld [vmem:[#allocation5 + $0x250] sm:$0xff] }
 0x11f   :  { %1150 = vmatprep.subr.bf16.mxu0 %v7920_v0  ;;  %1191 = vmatprep.subr.bf16.mxu1 %v7922_v2  ;;  %v425_v0 = vld [vmem:[#allocation5 + $0x3d0] sm:$0xff]  ;;  %v7869_v2 = vcombine.low %v314_v50, %v318_v51  ;;  %v378_v51 = vld [vmem:[#allocation5 + $0x258] sm:$0xff] }
 0x120   :  { %v7980_v11 = vcombine.high %v425_v0, %v429_v1 }
 0x122   :  { %1151 = vmatpush2.bf16.msra.mxu0 %v7919_v6  ;;  %1192 = vmatpush2.bf16.msra.mxu1 %v7921_v7  ;;  %v7862_v6 = vcombine.high %v306_v60, %v310_v61  ;;  %v7859_v7 = vcombine.low %v305_v55, %v309_v56  ;;  %v369_v56 = vld [vmem:[#allocation5 + $0x210] sm:$0xff] }
 0x123   :  { %1202 = vmatprep.subr.bf16.mxu0 %v7916_v8  ;;  %1243 = vmatprep.subr.bf16.mxu1 %v7918_v10  ;;  %v417_v8 = vld [vmem:[#allocation5 + $0x390] sm:$0xff]  ;;  %v7861_v10 = vcombine.low %v306_v60, %v310_v61  ;;  %v370_v61 = vld [vmem:[#allocation5 + $0x218] sm:$0xff] }
 0x124   :  { %v7972_v20 = vcombine.high %v417_v8, %v421_v9 }
 0x125   :  { %1153 = vmatmul.mubr.bf16.vlgmr.msra.gmra.mxu0 %v10469_v13  ;;  %1194 = vmatmul.mubr.bf16.vlgmr.msra.gmra.mxu1 %v10469_v13 }
 0x126   :  { %1203 = vmatpush1.bf16.msra.mxu0 %v7915_v15  ;;  %1244 = vmatpush1.bf16.msra.mxu1 %v7917_v16  ;;  %v7982_v15 = vcombine.high %v426_v4, %v430_v5  ;;  %v7979_v16 = vcombine.low %v425_v0, %v429_v1 }
 0x127   :  { %1204 = vmatprep.subr.bf16.mxu0 %v7908_v17  ;;  %1245 = vmatprep.subr.bf16.mxu1 %v7910_v19  ;;  %v409_v17 = vld [vmem:[#allocation5 + $0x350] sm:$0xff]  ;;  %v7981_v19 = vcombine.low %v426_v4, %v430_v5  ;;  %v8991_v4 = vld [vmem:[#allocation8 + $0xe4] ss:$16 sps:$4 sm:$0xff]  }
 0x128   :  { %1234 = vmatprep.mubr.bf16.mxu0 %v10463_v57  ;;  %1275 = vmatprep.mubr.bf16.mxu1 %v10463_v57  ;;  %v7886_v57 = vcombine.high %v330_v36, %v334_v37  ;;  %v7964_v27 = vcombine.high %v409_v17, %v413_v18  ;;  %v394_v36 = vld [vmem:[#allocation5 + $0x2d8] sm:$0xff] }
 0x129   :  { %v398_v37 = vld [vmem:[#allocation5 + $0x2f8] sm:$0xff] }
 0x12a   :  { %1205 = vmatpush1.bf16.msra.mxu0 %v7907_v53  ;;  %1246 = vmatpush1.bf16.msra.mxu1 %v7909_v23  ;;  %v7974_v53 = vcombine.high %v418_v12, %v422_v14  ;;  %v7971_v23 = vcombine.low %v417_v8, %v421_v9  ;;  %v8989_v8 = vld [vmem:[#allocation8 + $0xe0] ss:$16 sps:$4 sm:$0xff]  }
 0x12b   :  { %1206 = vmatprep.subr.bf16.mxu0 %v7900_v24  ;;  %1247 = vmatprep.subr.bf16.mxu1 %v7902_v26  ;;  %v401_v24 = vld [vmem:[#allocation5 + $0x310] sm:$0xff]  ;;  %v7973_v26 = vcombine.low %v418_v12, %v422_v14  ;;  %v8992_v9 = vld [vmem:[#allocation8 + $0x2e0] ss:$16 sps:$4 sm:$0xff]  }
 0x12c   :  { %v7956_v35 = vcombine.high %v401_v24, %v405_v25  ;;  %v8995_v12 = vld [vmem:[#allocation8 + $0xc0] ss:$16 sps:$4 sm:$0xff]  }
 0x12d   :  { %v8998_v14 = vld [vmem:[#allocation8 + $0x2c0] ss:$16 sps:$4 sm:$0xff]  }
 0x12e   :  { %1207 = vmatpush1.bf16.msra.mxu0 %v7899_v30  ;;  %1248 = vmatpush1.bf16.msra.mxu1 %v7901_v31  ;;  %v7966_v30 = vcombine.high %v410_v21, %v414_v22  ;;  %v7963_v31 = vcombine.low %v409_v17, %v413_v18  ;;  %v9001_v17 = vld [vmem:[#allocation8 + $0xa0] ss:$16 sps:$4 sm:$0xff]  }
 0x12f   :  { %1208 = vmatprep.subr.bf16.mxu0 %v7892_v32  ;;  %1249 = vmatprep.subr.bf16.mxu1 %v7894_v34  ;;  %v393_v32 = vld [vmem:[#allocation5 + $0x2d0] sm:$0xff]  ;;  %v7965_v34 = vcombine.low %v410_v21, %v414_v22  ;;  %v9004_v18 = vld [vmem:[#allocation8 + $0x2a0] ss:$16 sps:$4 sm:$0xff]  }
 0x130   :  { %v7948_v42 = vcombine.high %v393_v32, %v397_v33  ;;  %v7947_v46 = vcombine.low %v393_v32, %v397_v33  ;;  %v9007_v21 = vld [vmem:[#allocation8 + $0x80] ss:$16 sps:$4 sm:$0xff]   ;;  %v9033_v33 = vld [vmem:[#allocation8 + $0x4] ss:$16 sps:$4 sm:$0xff]  }
 0x131   :  { %v9010_v22 = vld [vmem:[#allocation8 + $0x280] ss:$16 sps:$4 sm:$0xff]  }
 0x132   :  { %1209 = vmatpush1.bf16.msra.mxu0 %v7891_v38  ;;  %1250 = vmatpush1.bf16.msra.mxu1 %v7893_v39  ;;  %v7958_v38 = vcombine.high %v402_v28, %v406_v29  ;;  %v7955_v39 = vcombine.low %v401_v24, %v405_v25  ;;  %v9016_v24 = vld [vmem:[#allocation8 + $0x260] ss:$16 sps:$4 sm:$0xff]   ;;  %v9021_v25 = vld [vmem:[#allocation8 + $0x44] ss:$16 sps:$4 sm:$0xff]  }
 0x133   :  { %1210 = vmatprep.subr.bf16.mxu0 %v7884_v40  ;;  %1251 = vmatprep.subr.bf16.mxu1 %v7886_v57  ;;  %v385_v40 = vld [vmem:[#allocation5 + $0x290] sm:$0xff]  ;;  %v7957_v57 = vcombine.low %v402_v28, %v406_v29  ;;  %v9022_v28 = vld [vmem:[#allocation8 + $0x240] ss:$16 sps:$4 sm:$0xff]   ;;  %v9027_v29 = vld [vmem:[#allocation8 + $0x24] ss:$16 sps:$4 sm:$0xff]  }
 0x134   :  { %v7940_v50 = vcombine.high %v385_v40, %v389_v41  ;;  %v7939_v55 = vcombine.low %v385_v40, %v389_v41  ;;  %v9028_v32 = vld [vmem:[#allocation8 + $0x220] ss:$16 sps:$4 sm:$0xff]   ;;  %v9045_v41 = vld [vmem:[#allocation8 + $0x1c4] ss:$16 sps:$4 sm:$0xff]  }
 0x135   :  { %v9040_v40 = vld [vmem:[#allocation8 + $0x3e0] ss:$16 sps:$4 sm:$0xff]  }
 0x136   :  { %1211 = vmatpush1.bf16.msra.mxu0 %v7883_v45  ;;  %1252 = vmatpush1.bf16.msra.mxu1 %v7885_v48  ;;  %v7950_v45 = vcombine.high %v394_v36, %v398_v37  ;;  %v381_v48 = vld [vmem:[#allocation5 + $0x270] sm:$0xff] }
 0x137   :  { %1212 = vmatprep.subr.bf16.mxu0 %v7876_v49  ;;  %1253 = vmatprep.subr.bf16.mxu1 %v7878_v52  ;;  %v7949_v49 = vcombine.low %v394_v36, %v398_v37  ;;  %v382_v52 = vld [vmem:[#allocation5 + $0x278] sm:$0xff]  ;;  %v7932_v60 = vcombine.high %v377_v47, %v381_v48  ;;  %v7931_v0 = vcombine.low %v377_v47, %v381_v48 }
 0x138   :  { %v7933_v1 = vcombine.low %v378_v51, %v382_v52  ;;  %v9034_v36 = vld [vmem:[#allocation8 + $0x200] ss:$16 sps:$4 sm:$0xff]   ;;  %v9039_v37 = vld [vmem:[#allocation8 + $0x1e4] ss:$16 sps:$4 sm:$0xff]  }
 0x139   :  { %v9052_v47 = vld [vmem:[#allocation8 + $0x3a0] ss:$16 sps:$4 sm:$0xff]   ;;  %v9057_v48 = vld [vmem:[#allocation8 + $0x184] ss:$16 sps:$4 sm:$0xff]  }
 0x13a   :  { %1213 = vmatpush1.bf16.msra.mxu0 %v7875_v54  ;;  %1254 = vmatpush1.bf16.msra.mxu1 %v7877_v58  ;;  %v7942_v54 = vcombine.high %v386_v43, %v390_v44  ;;  %v373_v58 = vld [vmem:[#allocation5 + $0x230] sm:$0xff] }
 0x13b   :  { %1214 = vmatprep.subr.bf16.mxu0 %v7868_v59  ;;  %1255 = vmatprep.subr.bf16.mxu1 %v7870_v62  ;;  %v7941_v59 = vcombine.low %v386_v43, %v390_v44  ;;  %v374_v62 = vld [vmem:[#allocation5 + $0x238] sm:$0xff]  ;;  %v7923_v5 = vcombine.low %v369_v56, %v373_v58 }
 0x13c   :  { %v9046_v43 = vld [vmem:[#allocation8 + $0x3c0] ss:$16 sps:$4 sm:$0xff]   ;;  %v9051_v44 = vld [vmem:[#allocation8 + $0x1a4] ss:$16 sps:$4 sm:$0xff]  }
 0x13e   :  { %1215 = vmatpush1.bf16.msra.mxu0 %v7867_v63  ;;  %1256 = vmatpush1.bf16.msra.mxu1 %v7869_v2  ;;  %v7934_v63 = vcombine.high %v378_v51, %v382_v52  ;;  %v7924_v2 = vcombine.high %v369_v56, %v373_v58  ;;  %v9058_v51 = vld [vmem:[#allocation8 + $0x380] ss:$16 sps:$4 sm:$0xff]   ;;  %v9063_v52 = vld [vmem:[#allocation8 + $0x164] ss:$16 sps:$4 sm:$0xff]  }
 0x13f   :  { %1216 = vmatprep.subr.bf16.mxu0 %v7860_v3  ;;  %1257 = vmatprep.subr.bf16.mxu1 %v7862_v6  ;;  %v7926_v3 = vcombine.high %v370_v61, %v374_v62  ;;  %v8994_v6 = vld [vmem:[#allocation8 + $0x2e4] ss:$16 sps:$4 sm:$0xff]   ;;  %v9064_v56 = vld [vmem:[#allocation8 + $0x360] ss:$16 sps:$4 sm:$0xff]  }
 0x140   :  { %v9069_v58 = vld [vmem:[#allocation8 + $0x144] ss:$16 sps:$4 sm:$0xff]  }
 0x142   :  { %1217 = vmatpush1.bf16.msra.mxu0 %v7859_v7  ;;  %1258 = vmatpush1.bf16.msra.mxu1 %v7861_v10  ;;  %v7925_v7 = vcombine.low %v370_v61, %v374_v62  ;;  %v8997_v10 = vld [vmem:[#allocation8 + $0xc4] ss:$16 sps:$4 sm:$0xff]   ;;  %v9070_v61 = vld [vmem:[#allocation8 + $0x340] ss:$16 sps:$4 sm:$0xff]  }
 0x143   :  { %1218 = vmatprep.subr.bf16.mxu0 %v7980_v11  ;;  %1259 = vmatprep.subr.bf16.mxu1 %v7982_v15  ;;  %v9000_v11 = vld [vmem:[#allocation8 + $0x2c4] ss:$16 sps:$4 sm:$0xff]  }
 0x144   :  { %v9003_v15 = vld [vmem:[#allocation8 + $0xa4] ss:$16 sps:$4 sm:$0xff]  }
 0x145   :  { %v9075_v62 = vld [vmem:[#allocation8 + $0x124] ss:$16 sps:$4 sm:$0xff]  }
 0x146   :  { %1219 = vmatpush2.bf16.msra.mxu0 %v7979_v16  ;;  %1260 = vmatpush2.bf16.msra.mxu1 %v7981_v19  ;;  %v9006_v16 = vld [vmem:[#allocation8 + $0x2a4] ss:$16 sps:$4 sm:$0xff]  }
 0x147   :  { %1220 = vmatprep.subr.bf16.mxu0 %v7972_v20  ;;  %1261 = vmatprep.subr.bf16.mxu1 %v7974_v53  ;;  %v9009_v19 = vld [vmem:[#allocation8 + $0x84] ss:$16 sps:$4 sm:$0xff]  }
 0x148   :  { %v9012_v20 = vld [vmem:[#allocation8 + $0x284] ss:$16 sps:$4 sm:$0xff]  }
 0x149   :  { %v9015_v53 = vld [vmem:[#allocation8 + $0x64] ss:$16 sps:$4 sm:$0xff]  }
 0x14a   :  { %1221 = vmatpush2.bf16.msra.mxu0 %v7971_v23  ;;  %1262 = vmatpush2.bf16.msra.mxu1 %v7973_v26  ;;  %v9018_v23 = vld [vmem:[#allocation8 + $0x264] ss:$16 sps:$4 sm:$0xff]  }
 0x14b   :  { %1222 = vmatprep.subr.bf16.mxu0 %v7964_v27  ;;  %1263 = vmatprep.subr.bf16.mxu1 %v7966_v30  ;;  %v9024_v26 = vld [vmem:[#allocation8 + $0x244] ss:$16 sps:$4 sm:$0xff]   ;;  %v9019_v27 = vld [vmem:[#allocation8 + $0x40] ss:$16 sps:$4 sm:$0xff]  }
 0x14c   :  { %v9030_v30 = vld [vmem:[#allocation8 + $0x224] ss:$16 sps:$4 sm:$0xff]  }
 0x14e   :  { %1223 = vmatpush2.bf16.msra.mxu0 %v7963_v31  ;;  %1264 = vmatpush2.bf16.msra.mxu1 %v7965_v34  ;;  %v9025_v31 = vld [vmem:[#allocation8 + $0x20] ss:$16 sps:$4 sm:$0xff]   ;;  %v9036_v34 = vld [vmem:[#allocation8 + $0x204] ss:$16 sps:$4 sm:$0xff]  }
 0x14f   :  { %1224 = vmatprep.subr.bf16.mxu0 %v7956_v35  ;;  %1265 = vmatprep.subr.bf16.mxu1 %v7958_v38  ;;  %v9031_v35 = vld [vmem:[#allocation8] ss:$16 sps:$4 sm:$0xff]   ;;  %v9042_v38 = vld [vmem:[#allocation8 + $0x3e4] ss:$16 sps:$4 sm:$0xff]  }
 0x152   :  { %1225 = vmatpush2.bf16.msra.mxu0 %v7955_v39  ;;  %1266 = vmatpush2.bf16.msra.mxu1 %v7957_v57  ;;  %v9037_v39 = vld [vmem:[#allocation8 + $0x1e0] ss:$16 sps:$4 sm:$0xff]   ;;  %v9048_v57 = vld [vmem:[#allocation8 + $0x3c4] ss:$16 sps:$4 sm:$0xff]  }
 0x153   :  { %1226 = vmatprep.subr.bf16.mxu0 %v7948_v42  ;;  %1267 = vmatprep.subr.bf16.mxu1 %v7950_v45  ;;  %v9043_v42 = vld [vmem:[#allocation8 + $0x1c0] ss:$16 sps:$4 sm:$0xff]   ;;  %v9054_v45 = vld [vmem:[#allocation8 + $0x3a4] ss:$16 sps:$4 sm:$0xff]  }
 0x156   :  { %1227 = vmatpush2.bf16.msra.mxu0 %v7947_v46  ;;  %1268 = vmatpush2.bf16.msra.mxu1 %v7949_v49  ;;  %v9049_v46 = vld [vmem:[#allocation8 + $0x1a0] ss:$16 sps:$4 sm:$0xff]   ;;  %v9060_v49 = vld [vmem:[#allocation8 + $0x384] ss:$16 sps:$4 sm:$0xff]  }
 0x157   :  { %1228 = vmatprep.subr.bf16.mxu0 %v7940_v50  ;;  %1269 = vmatprep.subr.bf16.mxu1 %v7942_v54  ;;  %v9055_v50 = vld [vmem:[#allocation8 + $0x180] ss:$16 sps:$4 sm:$0xff]   ;;  %v9066_v54 = vld [vmem:[#allocation8 + $0x364] ss:$16 sps:$4 sm:$0xff]  }
 0x15a   :  { %1229 = vmatpush2.bf16.msra.mxu0 %v7939_v55  ;;  %1270 = vmatpush2.bf16.msra.mxu1 %v7941_v59  ;;  %v9061_v55 = vld [vmem:[#allocation8 + $0x160] ss:$16 sps:$4 sm:$0xff]   ;;  %v9072_v59 = vld [vmem:[#allocation8 + $0x344] ss:$16 sps:$4 sm:$0xff]  }
 0x15b   :  { %1230 = vmatprep.subr.bf16.mxu0 %v7932_v60  ;;  %1271 = vmatprep.subr.bf16.mxu1 %v7934_v63  ;;  %v9067_v60 = vld [vmem:[#allocation8 + $0x140] ss:$16 sps:$4 sm:$0xff]   ;;  %v9078_v63 = vld [vmem:[#allocation8 + $0x324] ss:$16 sps:$4 sm:$0xff]  }
 0x15e   :  { %1231 = vmatpush2.bf16.msra.mxu0 %v7931_v0  ;;  %1272 = vmatpush2.bf16.msra.mxu1 %v7933_v1  ;;  %v9073_v0 = vld [vmem:[#allocation8 + $0x120] ss:$16 sps:$4 sm:$0xff]  }
 0x15f   :  { %1232 = vmatprep.subr.bf16.mxu0 %v7924_v2  ;;  %1273 = vmatprep.subr.bf16.mxu1 %v7926_v3  ;;  %v9076_v1 = vld [vmem:[#allocation8 + $0x320] ss:$16 sps:$4 sm:$0xff]   ;;  %v9081_v2 = vld [vmem:[#allocation8 + $0x104] ss:$16 sps:$4 sm:$0xff]  }
 0x160   :  { %v9084_v3 = vld [vmem:[#allocation8 + $0x304] ss:$16 sps:$4 sm:$0xff]  }
 0x162   :  { %1233 = vmatpush2.bf16.msra.mxu0 %v7923_v5  ;;  %1274 = vmatpush2.bf16.msra.mxu1 %v7925_v7  ;;  %v9082_v5 = vld [vmem:[#allocation8 + $0x300] ss:$16 sps:$4 sm:$0xff]   ;;  %v9090_v7 = vld [vmem:[#allocation8 + $0x6e4] ss:$16 sps:$4 sm:$0xff]  }
 0x163   :  { %2858 = vmatprep.subr.bf16.mxu0 %v8991_v4  ;;  %2899 = vmatprep.subr.bf16.mxu1 %v8994_v6  ;;  %v9079_v4 = vld [vmem:[#allocation8 + $0x100] ss:$16 sps:$4 sm:$0xff]   ;;  %v9087_v6 = vld [vmem:[#allocation8 + $0x4e4] ss:$16 sps:$4 sm:$0xff]  }
 0x165   :  { %1235 = vmatmul.mubr.bf16.vlgmr.msra.gmra.mxu0 %v10469_v13  ;;  %1276 = vmatmul.mubr.bf16.vlgmr.msra.gmra.mxu1 %v10469_v13  ;;  %v9013_v13 = vld [vmem:[#allocation8 + $0x60] ss:$16 sps:$4 sm:$0xff]  }
 0x166   :  { %2859 = vmatpush1.bf16.msra.mxu0 %v8989_v8  ;;  %2900 = vmatpush1.bf16.msra.mxu1 %v8992_v9  ;;  %v433_v8 = vlaneseq }
 0x167   :  { %2860 = vmatprep.subr.bf16.mxu0 %v8997_v10  ;;  %2901 = vmatprep.subr.bf16.mxu1 %v9000_v11  ;;  %v10479_v10 = vld [vmem:[#allocation7] sm:$0xff] }
 0x168   :  { %v10477_v9 = vshrl.u32 %v433_v8, 7  ;;  %v9136_v8 = vld [vmem:[#allocation8 + $0x7e0] ss:$16 sps:$4 sm:$0xff]  }
 0x16a   :  { %2861 = vmatpush1.bf16.msra.mxu0 %v8995_v12  ;;  %2902 = vmatpush1.bf16.msra.mxu1 %v8998_v14  ;;  %v10482_v11 = vsub.s32 0, %v10477_v9  ;;  %v10485_v12 = vsub.s32 2, %v10477_v9  ;;  %v10488_v14 = vsub.s32 1, %v10477_v9 }
 0x16b   :  { %2862 = vmatprep.subr.bf16.mxu0 %v9003_v15  ;;  %2903 = vmatprep.subr.bf16.mxu1 %v9006_v16  ;;  %v10491_v15 = vsub.s32 3, %v10477_v9 }
 0x16c   :  { %v436_v16 = vrot.slane %v10479_v10, %v10482_v11 }
 0x16e   :  { %2863 = vmatpush1.bf16.msra.mxu0 %v9001_v17  ;;  %2904 = vmatpush1.bf16.msra.mxu1 %v9004_v18  ;;  %v444_v17 = vrot.slane %v10479_v10, %v10485_v12  ;;  %v440_v18 = vrot.slane %v10479_v10, %v10488_v14 }
 0x16f   :  { %2864 = vmatprep.subr.bf16.mxu0 %v9009_v19  ;;  %2905 = vmatprep.subr.bf16.mxu1 %v9012_v20  ;;  %v448_v20 = vrot.slane %v10479_v10, %v10491_v15 }
 0x172   :  { %2865 = vmatpush1.bf16.msra.mxu0 %v9007_v21  ;;  %2906 = vmatpush1.bf16.msra.mxu1 %v9010_v22 }
 0x173   :  { %2866 = vmatprep.subr.bf16.mxu0 %v9015_v53  ;;  %2907 = vmatprep.subr.bf16.mxu1 %v9018_v23 }
 0x176   :  { %2867 = vmatpush1.bf16.msra.mxu0 %v9013_v13  ;;  %2908 = vmatpush1.bf16.msra.mxu1 %v9016_v24 }
 0x177   :  { %2868 = vmatprep.subr.bf16.mxu0 %v9021_v25  ;;  %2909 = vmatprep.subr.bf16.mxu1 %v9024_v26 }
 0x17a   :  { %2869 = vmatpush1.bf16.msra.mxu0 %v9019_v27  ;;  %2910 = vmatpush1.bf16.msra.mxu1 %v9022_v28 }
 0x17b   :  { %2870 = vmatprep.subr.bf16.mxu0 %v9027_v29  ;;  %2911 = vmatprep.subr.bf16.mxu1 %v9030_v30 }
 0x17e   :  { %2871 = vmatpush1.bf16.msra.mxu0 %v9025_v31  ;;  %2912 = vmatpush1.bf16.msra.mxu1 %v9028_v32  ;;  %v9085_v31 = vld [vmem:[#allocation8 + $0x4e0] ss:$16 sps:$4 sm:$0xff]  }
 0x17f   :  { %2872 = vmatprep.subr.bf16.mxu0 %v9033_v33  ;;  %2913 = vmatprep.subr.bf16.mxu1 %v9036_v34  ;;  %v9088_v34 = vld [vmem:[#allocation8 + $0x6e0] ss:$16 sps:$4 sm:$0xff]  }
 0x182   :  { %2873 = vmatpush1.bf16.msra.mxu0 %v9031_v35  ;;  %2914 = vmatpush1.bf16.msra.mxu1 %v9034_v36  ;;  %v9093_v35 = vld [vmem:[#allocation8 + $0x4c4] ss:$16 sps:$4 sm:$0xff]  }
 0x183   :  { %2874 = vmatprep.subr.bf16.mxu0 %v9039_v37  ;;  %2915 = vmatprep.subr.bf16.mxu1 %v9042_v38 }
 0x186   :  { %2875 = vmatpush2.bf16.msra.mxu0 %v9037_v39  ;;  %2916 = vmatpush2.bf16.msra.mxu1 %v9040_v40 }
 0x187   :  { %2876 = vmatprep.subr.bf16.mxu0 %v9045_v41  ;;  %2917 = vmatprep.subr.bf16.mxu1 %v9048_v57  ;;  %v9091_v41 = vld [vmem:[#allocation8 + $0x4c0] ss:$16 sps:$4 sm:$0xff]   ;;  %v9096_v57 = vld [vmem:[#allocation8 + $0x6c4] ss:$16 sps:$4 sm:$0xff]  }
 0x18a   :  { %2877 = vmatpush2.bf16.msra.mxu0 %v9043_v42  ;;  %2918 = vmatpush2.bf16.msra.mxu1 %v9046_v43  ;;  %v9094_v42 = vld [vmem:[#allocation8 + $0x6c0] ss:$16 sps:$4 sm:$0xff]   ;;  %v9099_v43 = vld [vmem:[#allocation8 + $0x4a4] ss:$16 sps:$4 sm:$0xff]  }
 0x18b   :  { %2878 = vmatprep.subr.bf16.mxu0 %v9051_v44  ;;  %2919 = vmatprep.subr.bf16.mxu1 %v9054_v45  ;;  %v9102_v44 = vld [vmem:[#allocation8 + $0x6a4] ss:$16 sps:$4 sm:$0xff]   ;;  %v9097_v45 = vld [vmem:[#allocation8 + $0x4a0] ss:$16 sps:$4 sm:$0xff]  }
 0x18e   :  { %2879 = vmatpush2.bf16.msra.mxu0 %v9049_v46  ;;  %2920 = vmatpush2.bf16.msra.mxu1 %v9052_v47  ;;  %v9100_v46 = vld [vmem:[#allocation8 + $0x6a0] ss:$16 sps:$4 sm:$0xff]   ;;  %v9105_v47 = vld [vmem:[#allocation8 + $0x484] ss:$16 sps:$4 sm:$0xff]  }
 0x18f   :  { %2880 = vmatprep.subr.bf16.mxu0 %v9057_v48  ;;  %2921 = vmatprep.subr.bf16.mxu1 %v9060_v49  ;;  %v9103_v48 = vld [vmem:[#allocation8 + $0x480] ss:$16 sps:$4 sm:$0xff]   ;;  %v9108_v49 = vld [vmem:[#allocation8 + $0x684] ss:$16 sps:$4 sm:$0xff]  }
 0x192   :  { %2881 = vmatpush2.bf16.msra.mxu0 %v9055_v50  ;;  %2922 = vmatpush2.bf16.msra.mxu1 %v9058_v51  ;;  %v9106_v50 = vld [vmem:[#allocation8 + $0x680] ss:$16 sps:$4 sm:$0xff]   ;;  %v9111_v51 = vld [vmem:[#allocation8 + $0x464] ss:$16 sps:$4 sm:$0xff]  }
 0x193   :  { %2882 = vmatprep.subr.bf16.mxu0 %v9063_v52  ;;  %2923 = vmatprep.subr.bf16.mxu1 %v9066_v54  ;;  %v9109_v52 = vld [vmem:[#allocation8 + $0x460] ss:$16 sps:$4 sm:$0xff]   ;;  %v9114_v54 = vld [vmem:[#allocation8 + $0x664] ss:$16 sps:$4 sm:$0xff]  }
 0x196   :  { %2883 = vmatpush2.bf16.msra.mxu0 %v9061_v55  ;;  %2924 = vmatpush2.bf16.msra.mxu1 %v9064_v56  ;;  %v9112_v55 = vld [vmem:[#allocation8 + $0x660] ss:$16 sps:$4 sm:$0xff]   ;;  %v9117_v56 = vld [vmem:[#allocation8 + $0x444] ss:$16 sps:$4 sm:$0xff]  }
 0x197   :  { %2884 = vmatprep.subr.bf16.mxu0 %v9069_v58  ;;  %2925 = vmatprep.subr.bf16.mxu1 %v9072_v59  ;;  %v9115_v58 = vld [vmem:[#allocation8 + $0x440] ss:$16 sps:$4 sm:$0xff]   ;;  %v9120_v59 = vld [vmem:[#allocation8 + $0x644] ss:$16 sps:$4 sm:$0xff]  }
 0x19a   :  { %2885 = vmatpush2.bf16.msra.mxu0 %v9067_v60  ;;  %2926 = vmatpush2.bf16.msra.mxu1 %v9070_v61  ;;  %v9118_v60 = vld [vmem:[#allocation8 + $0x640] ss:$16 sps:$4 sm:$0xff]   ;;  %v9123_v61 = vld [vmem:[#allocation8 + $0x424] ss:$16 sps:$4 sm:$0xff]  }
 0x19b   :  { %2886 = vmatprep.subr.bf16.mxu0 %v9075_v62  ;;  %2927 = vmatprep.subr.bf16.mxu1 %v9078_v63  ;;  %v9121_v62 = vld [vmem:[#allocation8 + $0x420] ss:$16 sps:$4 sm:$0xff]   ;;  %v9126_v63 = vld [vmem:[#allocation8 + $0x624] ss:$16 sps:$4 sm:$0xff]  }
 0x19e   :  { %2887 = vmatpush2.bf16.msra.mxu0 %v9073_v0  ;;  %2928 = vmatpush2.bf16.msra.mxu1 %v9076_v1  ;;  %v9124_v0 = vld [vmem:[#allocation8 + $0x620] ss:$16 sps:$4 sm:$0xff]   ;;  %v9129_v1 = vld [vmem:[#allocation8 + $0x404] ss:$16 sps:$4 sm:$0xff]  }
 0x19f   :  { %2888 = vmatprep.subr.bf16.mxu0 %v9081_v2  ;;  %2929 = vmatprep.subr.bf16.mxu1 %v9084_v3  ;;  %v9127_v2 = vld [vmem:[#allocation8 + $0x400] ss:$16 sps:$4 sm:$0xff]   ;;  %v9132_v3 = vld [vmem:[#allocation8 + $0x604] ss:$16 sps:$4 sm:$0xff]  }
 0x1a2   :  { %2889 = vmatpush2.bf16.msra.mxu0 %v9079_v4  ;;  %2930 = vmatpush2.bf16.msra.mxu1 %v9082_v5  ;;  %v9130_v4 = vld [vmem:[#allocation8 + $0x600] ss:$16 sps:$4 sm:$0xff]   ;;  %v9135_v5 = vld [vmem:[#allocation8 + $0x5e4] ss:$16 sps:$4 sm:$0xff]  }
 0x1a3   :  { %2940 = vmatprep.subr.bf16.mxu0 %v9087_v6  ;;  %2981 = vmatprep.subr.bf16.mxu1 %v9090_v7  ;;  %v9133_v6 = vld [vmem:[#allocation8 + $0x5e0] ss:$16 sps:$4 sm:$0xff]   ;;  %v9138_v7 = vld [vmem:[#allocation8 + $0x7e4] ss:$16 sps:$4 sm:$0xff]  }
 0x1e5   :  { %v1154_v19 = vpop.f32.mrf.mxu0  ;;  %v1195_v22 = vpop.f32.mrf.mxu1 }
 0x1e6   :  { %v1155_v21 = vadd.f32 %v1154_v19, %v436_v16  ;;  %v1196_v53 = vadd.f32 %v1195_v22, %v444_v17  ;;  %v9141_v16 = vld [vmem:[#allocation8 + $0x5c4] ss:$16 sps:$4 sm:$0xff]   ;;  %v9139_v17 = vld [vmem:[#allocation8 + $0x5c0] ss:$16 sps:$4 sm:$0xff]  }
 0x1e7   :  { %v1156_v23 = vpop.f32.mrf.mxu0  ;;  %v1197_v24 = vpop.f32.mrf.mxu1  ;;  %v9142_v19 = vld [vmem:[#allocation8 + $0x7c0] ss:$16 sps:$4 sm:$0xff]   ;;  %v9150_v22 = vld [vmem:[#allocation8 + $0x7a4] ss:$16 sps:$4 sm:$0xff]  }
 0x1e8   :  { %v1157_v13 = vadd.f32 %v1156_v23, %v440_v18  ;;  %v1284_v25 = vmax.f32 %v1155_v21, 0.0  ;;  %v1286_v26 = vmax.f32 %v1196_v53, 0.0  ;;  %v1198_v27 = vadd.f32 %v1197_v24, %v448_v20  ;;  %v9144_v18 = vld [vmem:[#allocation8 + $0x7c4] ss:$16 sps:$4 sm:$0xff]   ;;  %v9145_v21 = vld [vmem:[#allocation8 + $0x5a0] ss:$16 sps:$4 sm:$0xff]  }
 0x1e9   :  { %v1158_v28 = vpop.f32.mrf.mxu0  ;;  %v1199_v30 = vpop.f32.mrf.mxu1  ;;  %v9147_v20 = vld [vmem:[#allocation8 + $0x5a4] ss:$16 sps:$4 sm:$0xff]   ;;  %v9148_v53 = vld [vmem:[#allocation8 + $0x7a0] ss:$16 sps:$4 sm:$0xff]  }
 0x1ea   :  { %v1285_v29 = vmax.f32 %v1157_v13, 0.0  ;;  %v1287_v32 = vmax.f32 %v1198_v27, 0.0  ;;  %v10501_v36 = vpack.c.bf16 %v1286_v26, %v1286_v26  ;;  %v10505_v39 = vpack.c.bf16 %v1284_v25, %v1284_v25  ;;  %v9153_v23 = vld [vmem:[#allocation8 + $0x584] ss:$16 sps:$4 sm:$0xff]   ;;  %v9151_v13 = vld [vmem:[#allocation8 + $0x580] ss:$16 sps:$4 sm:$0xff]  }
 0x1eb   :  { %v1159_v33 = vpop.f32.mrf.mxu0  ;;  %v1200_v38 = vpop.f32.mrf.mxu1  ;;  %v9156_v24 = vld [vmem:[#allocation8 + $0x784] ss:$16 sps:$4 sm:$0xff]   ;;  %v9154_v25 = vld [vmem:[#allocation8 + $0x780] ss:$16 sps:$4 sm:$0xff]  }
 0x1ec   :  { %v10503_v37 = vpack.c.bf16 %v1285_v29, %v1285_v29  ;;  %v10507_v40 = vpack.c.bf16 %v1287_v32, %v1287_v32  ;;  %v9159_v26 = vld [vmem:[#allocation8 + $0x564] ss:$16 sps:$4 sm:$0xff]   ;;  %v9157_v27 = vld [vmem:[#allocation8 + $0x560] ss:$16 sps:$4 sm:$0xff]   ;;  %v451_v33 = vsub.s32 4, %v10477_v9  ;;  %v455_v38 = vsub.s32 5, %v10477_v9 }
 0x1ed   :  { %v9162_v28 = vld [vmem:[#allocation8 + $0x764] ss:$16 sps:$4 sm:$0xff]   ;;  %v9160_v29 = vld [vmem:[#allocation8 + $0x760] ss:$16 sps:$4 sm:$0xff]  }
 0x1ee   :  { %2890 = vmatprep.mubr.bf16.mxu0 %v10503_v37  ;;  %2931 = vmatprep.mubr.bf16.mxu1 %v10507_v40  ;;  %v9165_v30 = vld [vmem:[#allocation8 + $0x544] ss:$16 sps:$4 sm:$0xff]  }
 0x1ef   :  { %2891 = vmatmul.mubr.bf16.vlgmr.msra.gmra.mxu0 %v10505_v39  ;;  %2932 = vmatmul.mubr.bf16.vlgmr.msra.gmra.mxu1 %v10501_v36  ;;  %v9168_v32 = vld [vmem:[#allocation8 + $0x744] ss:$16 sps:$4 sm:$0xff]  }
 0x1f0   :  { %2941 = vmatpush1.bf16.msra.mxu0 %v9085_v31  ;;  %2982 = vmatpush1.bf16.msra.mxu1 %v9088_v34  ;;  %v9163_v31 = vld [vmem:[#allocation8 + $0x540] ss:$16 sps:$4 sm:$0xff]  }
 0x1f1   :  { %2942 = vmatprep.subr.bf16.mxu0 %v9093_v35  ;;  %2983 = vmatprep.subr.bf16.mxu1 %v9096_v57  ;;  %v9166_v34 = vld [vmem:[#allocation8 + $0x740] ss:$16 sps:$4 sm:$0xff]   ;;  %v459_v35 = vsub.s32 6, %v10477_v9  ;;  %v9174_v57 = vld [vmem:[#allocation8 + $0x724] ss:$16 sps:$4 sm:$0xff]  }
 0x1f4   :  { %2943 = vmatpush1.bf16.msra.mxu0 %v9091_v41  ;;  %2984 = vmatpush1.bf16.msra.mxu1 %v9094_v42  ;;  %v9171_v41 = vld [vmem:[#allocation8 + $0x524] ss:$16 sps:$4 sm:$0xff]   ;;  %v463_v42 = vsub.s32 7, %v10477_v9 }
 0x1f5   :  { %2944 = vmatprep.subr.bf16.mxu0 %v9099_v43  ;;  %2985 = vmatprep.subr.bf16.mxu1 %v9102_v44  ;;  %v452_v43 = vrot.slane %v10479_v10, %v451_v33  ;;  %v9169_v44 = vld [vmem:[#allocation8 + $0x520] ss:$16 sps:$4 sm:$0xff]  }
 0x1f8   :  { %2945 = vmatpush1.bf16.msra.mxu0 %v9097_v45  ;;  %2986 = vmatpush1.bf16.msra.mxu1 %v9100_v46  ;;  %v460_v45 = vrot.slane %v10479_v10, %v459_v35  ;;  %v456_v46 = vrot.slane %v10479_v10, %v455_v38 }
 0x1f9   :  { %2946 = vmatprep.subr.bf16.mxu0 %v9105_v47  ;;  %2987 = vmatprep.subr.bf16.mxu1 %v9108_v49  ;;  %v464_v49 = vrot.slane %v10479_v10, %v463_v42 }
 0x1fc   :  { %2947 = vmatpush1.bf16.msra.mxu0 %v9103_v48  ;;  %2988 = vmatpush1.bf16.msra.mxu1 %v9106_v50  ;;  %v9172_v48 = vld [vmem:[#allocation8 + $0x720] ss:$16 sps:$4 sm:$0xff]   ;;  %v9177_v50 = vld [vmem:[#allocation8 + $0x504] ss:$16 sps:$4 sm:$0xff]  }
 0x1fd   :  { %2948 = vmatprep.subr.bf16.mxu0 %v9111_v51  ;;  %2989 = vmatprep.subr.bf16.mxu1 %v9114_v54  ;;  %v9180_v51 = vld [vmem:[#allocation8 + $0x704] ss:$16 sps:$4 sm:$0xff]  }
 0x200   :  { %2949 = vmatpush1.bf16.msra.mxu0 %v9109_v52  ;;  %2990 = vmatpush1.bf16.msra.mxu1 %v9112_v55  ;;  %v9175_v55 = vld [vmem:[#allocation8 + $0x500] ss:$16 sps:$4 sm:$0xff]  }
 0x201   :  { %2950 = vmatprep.subr.bf16.mxu0 %v9117_v56  ;;  %2991 = vmatprep.subr.bf16.mxu1 %v9120_v59  ;;  %v9178_v59 = vld [vmem:[#allocation8 + $0x700] ss:$16 sps:$4 sm:$0xff]  }
 0x204   :  { %2951 = vmatpush1.bf16.msra.mxu0 %v9115_v58  ;;  %2992 = vmatpush1.bf16.msra.mxu1 %v9118_v60 }
 0x205   :  { %2952 = vmatprep.subr.bf16.mxu0 %v9123_v61  ;;  %2993 = vmatprep.subr.bf16.mxu1 %v9126_v63 }
 0x208   :  { %2953 = vmatpush1.bf16.msra.mxu0 %v9121_v62  ;;  %2994 = vmatpush1.bf16.msra.mxu1 %v9124_v0 }
 0x209   :  { %2954 = vmatprep.subr.bf16.mxu0 %v9129_v1  ;;  %2995 = vmatprep.subr.bf16.mxu1 %v9132_v3 }
 0x20c   :  { %2955 = vmatpush1.bf16.msra.mxu0 %v9127_v2  ;;  %2996 = vmatpush1.bf16.msra.mxu1 %v9130_v4  ;;  %v9183_v2 = vld [vmem:[#allocation8 + $0xec] ss:$16 sps:$4 sm:$0xff]   ;;  %v9181_v4 = vld [vmem:[#allocation8 + $0xe8] ss:$16 sps:$4 sm:$0xff]  }
 0x20d   :  { %2956 = vmatprep.subr.bf16.mxu0 %v9135_v5  ;;  %2997 = vmatprep.subr.bf16.mxu1 %v9138_v7  ;;  %v9186_v5 = vld [vmem:[#allocation8 + $0x2ec] ss:$16 sps:$4 sm:$0xff]  }
 0x210   :  { %2957 = vmatpush2.bf16.msra.mxu0 %v9133_v6  ;;  %2998 = vmatpush2.bf16.msra.mxu1 %v9136_v8  ;;  %v9184_v8 = vld [vmem:[#allocation8 + $0x2e8] ss:$16 sps:$4 sm:$0xff]  }
 0x211   :  { %2958 = vmatprep.subr.bf16.mxu0 %v9141_v16  ;;  %2999 = vmatprep.subr.bf16.mxu1 %v9144_v18 }
 0x214   :  { %2959 = vmatpush2.bf16.msra.mxu0 %v9139_v17  ;;  %3000 = vmatpush2.bf16.msra.mxu1 %v9142_v19  ;;  %v9189_v19 = vld [vmem:[#allocation8 + $0xcc] ss:$16 sps:$4 sm:$0xff]  }
 0x215   :  { %2960 = vmatprep.subr.bf16.mxu0 %v9147_v20  ;;  %3001 = vmatprep.subr.bf16.mxu1 %v9150_v22  ;;  %v9192_v22 = vld [vmem:[#allocation8 + $0x2cc] ss:$16 sps:$4 sm:$0xff]  }
 0x218   :  { %2961 = vmatpush2.bf16.msra.mxu0 %v9145_v21  ;;  %3002 = vmatpush2.bf16.msra.mxu1 %v9148_v53  ;;  %v9187_v53 = vld [vmem:[#allocation8 + $0xc8] ss:$16 sps:$4 sm:$0xff]  }
 0x219   :  { %2962 = vmatprep.subr.bf16.mxu0 %v9153_v23  ;;  %3003 = vmatprep.subr.bf16.mxu1 %v9156_v24  ;;  %v9190_v23 = vld [vmem:[#allocation8 + $0x2c8] ss:$16 sps:$4 sm:$0xff]   ;;  %v9198_v24 = vld [vmem:[#allocation8 + $0x2ac] ss:$16 sps:$4 sm:$0xff]  }
 0x21c   :  { %2963 = vmatpush2.bf16.msra.mxu0 %v9151_v13  ;;  %3004 = vmatpush2.bf16.msra.mxu1 %v9154_v25  ;;  %v9195_v13 = vld [vmem:[#allocation8 + $0xac] ss:$16 sps:$4 sm:$0xff]   ;;  %v9193_v25 = vld [vmem:[#allocation8 + $0xa8] ss:$16 sps:$4 sm:$0xff]  }
 0x21d   :  { %2964 = vmatprep.subr.bf16.mxu0 %v9159_v26  ;;  %3005 = vmatprep.subr.bf16.mxu1 %v9162_v28  ;;  %v9196_v26 = vld [vmem:[#allocation8 + $0x2a8] ss:$16 sps:$4 sm:$0xff]   ;;  %v9204_v28 = vld [vmem:[#allocation8 + $0x28c] ss:$16 sps:$4 sm:$0xff]  }
 0x220   :  { %2965 = vmatpush2.bf16.msra.mxu0 %v9157_v27  ;;  %3006 = vmatpush2.bf16.msra.mxu1 %v9160_v29  ;;  %v9201_v27 = vld [vmem:[#allocation8 + $0x8c] ss:$16 sps:$4 sm:$0xff]   ;;  %v9199_v29 = vld [vmem:[#allocation8 + $0x88] ss:$16 sps:$4 sm:$0xff]  }
 0x221   :  { %2966 = vmatprep.subr.bf16.mxu0 %v9165_v30  ;;  %3007 = vmatprep.subr.bf16.mxu1 %v9168_v32  ;;  %v9202_v30 = vld [vmem:[#allocation8 + $0x288] ss:$16 sps:$4 sm:$0xff]  }
 0x222   :  { %v9208_v32 = vld [vmem:[#allocation8 + $0x268] ss:$16 sps:$4 sm:$0xff]  }
 0x224   :  { %2967 = vmatpush2.bf16.msra.mxu0 %v9163_v31  ;;  %3008 = vmatpush2.bf16.msra.mxu1 %v9166_v34  ;;  %v9207_v31 = vld [vmem:[#allocation8 + $0x6c] ss:$16 sps:$4 sm:$0xff]  }
 0x225   :  { %v1236_v47 = vpop.f32.mrf.mxu0  ;;  %2968 = vmatprep.subr.bf16.mxu0 %v9171_v41  ;;  %v1277_v54 = vpop.f32.mrf.mxu1  ;;  %3009 = vmatprep.subr.bf16.mxu1 %v9174_v57  ;;  %v9213_v34 = vld [vmem:[#allocation8 + $0x4c] ss:$16 sps:$4 sm:$0xff]   ;;  %v9211_v57 = vld [vmem:[#allocation8 + $0x48] ss:$16 sps:$4 sm:$0xff]  }
 0x226   :  { %v1237_v52 = vadd.f32 %v1236_v47, %v452_v43  ;;  %v1278_v56 = vadd.f32 %v1277_v54, %v460_v45  ;;  %v9216_v41 = vld [vmem:[#allocation8 + $0x24c] ss:$16 sps:$4 sm:$0xff]   ;;  %v9214_v43 = vld [vmem:[#allocation8 + $0x248] ss:$16 sps:$4 sm:$0xff]  }
 0x227   :  { %v1238_v58 = vpop.f32.mrf.mxu0  ;;  %v1279_v61 = vpop.f32.mrf.mxu1  ;;  %v9222_v45 = vld [vmem:[#allocation8 + $0x22c] ss:$16 sps:$4 sm:$0xff]   ;;  %v9220_v47 = vld [vmem:[#allocation8 + $0x228] ss:$16 sps:$4 sm:$0xff]  }
 0x228   :  { %v1239_v60 = vadd.f32 %v1238_v58, %v456_v46  ;;  %2969 = vmatpush2.bf16.msra.mxu0 %v9169_v44  ;;  %v1288_v62 = vmax.f32 %v1237_v52, 0.0  ;;  %v1290_v63 = vmax.f32 %v1278_v56, 0.0  ;;  %v1280_v0 = vadd.f32 %v1279_v61, %v464_v49  ;;  %3010 = vmatpush2.bf16.msra.mxu1 %v9172_v48  ;;  %v9219_v44 = vld [vmem:[#allocation8 + $0x2c] ss:$16 sps:$4 sm:$0xff]   ;;  %v9217_v46 = vld [vmem:[#allocation8 + $0x28] ss:$16 sps:$4 sm:$0xff]  }
 0x229   :  { %v1240_v1 = vpop.f32.mrf.mxu0  ;;  %2970 = vmatprep.subr.bf16.mxu0 %v9177_v50  ;;  %v1281_v3 = vpop.f32.mrf.mxu1  ;;  %3011 = vmatprep.subr.bf16.mxu1 %v9180_v51  ;;  %v9225_v48 = vld [vmem:[#allocation8 + $0xc] ss:$16 sps:$4 sm:$0xff]   ;;  %v9223_v50 = vld [vmem:[#allocation8 + $0x8] ss:$16 sps:$4 sm:$0xff]  }
 0x22a   :  { %v1289_v10 = vmax.f32 %v1239_v60, 0.0  ;;  %v1291_v6 = vmax.f32 %v1280_v0, 0.0  ;;  %v10529_v16 = vpack.c.bf16 %v1290_v63, %v1290_v63  ;;  %v10533_v20 = vpack.c.bf16 %v1288_v62, %v1288_v62  ;;  %v9228_v49 = vld [vmem:[#allocation8 + $0x20c] ss:$16 sps:$4 sm:$0xff]   ;;  %v9226_v51 = vld [vmem:[#allocation8 + $0x208] ss:$16 sps:$4 sm:$0xff]  }
 0x22b   :  { %v1241_v7 = vpop.f32.mrf.mxu0  ;;  %v1282_v18 = vpop.f32.mrf.mxu1  ;;  %v9231_v52 = vld [vmem:[#allocation8 + $0x1ec] ss:$16 sps:$4 sm:$0xff]   ;;  %v9232_v56 = vld [vmem:[#allocation8 + $0x3e8] ss:$16 sps:$4 sm:$0xff]  }
 0x22c   :  { %v10531_v17 = vpack.c.bf16 %v1289_v10, %v1289_v10  ;;  %2971 = vmatpush2.bf16.msra.mxu0 %v9175_v55  ;;  %v10535_v21 = vpack.c.bf16 %v1291_v6, %v1291_v6  ;;  %3012 = vmatpush2.bf16.msra.mxu1 %v9178_v59  ;;  %v9234_v54 = vld [vmem:[#allocation8 + $0x3ec] ss:$16 sps:$4 sm:$0xff]   ;;  %v9229_v55 = vld [vmem:[#allocation8 + $0x1e8] ss:$16 sps:$4 sm:$0xff]  }
 0x22d   :  { %3022 = vmatprep.subr.bf16.mxu0 %v9183_v2  ;;  %3063 = vmatprep.subr.bf16.mxu1 %v9186_v5  ;;  %v9237_v58 = vld [vmem:[#allocation8 + $0x1cc] ss:$16 sps:$4 sm:$0xff]   ;;  %v9235_v60 = vld [vmem:[#allocation8 + $0x1c8] ss:$16 sps:$4 sm:$0xff]  }
 0x22e   :  { %2972 = vmatprep.mubr.bf16.mxu0 %v10531_v17  ;;  %3013 = vmatprep.mubr.bf16.mxu1 %v10535_v21  ;;  %v9240_v59 = vld [vmem:[#allocation8 + $0x3cc] ss:$16 sps:$4 sm:$0xff]   ;;  %v9238_v61 = vld [vmem:[#allocation8 + $0x3c8] ss:$16 sps:$4 sm:$0xff]  }
 0x22f   :  { %2973 = vmatmul.mubr.bf16.vlgmr.msra.gmra.mxu0 %v10533_v20  ;;  %3014 = vmatmul.mubr.bf16.vlgmr.msra.gmra.mxu1 %v10529_v16  ;;  %v9243_v62 = vld [vmem:[#allocation8 + $0x1ac] ss:$16 sps:$4 sm:$0xff]   ;;  %v9241_v0 = vld [vmem:[#allocation8 + $0x1a8] ss:$16 sps:$4 sm:$0xff]  }
 0x230   :  { %3023 = vmatpush1.bf16.msra.mxu0 %v9181_v4  ;;  %3064 = vmatpush1.bf16.msra.mxu1 %v9184_v8  ;;  %v9246_v63 = vld [vmem:[#allocation8 + $0x3ac] ss:$16 sps:$4 sm:$0xff]   ;;  %v9244_v1 = vld [vmem:[#allocation8 + $0x3a8] ss:$16 sps:$4 sm:$0xff]  }
 0x231   :  { %3054 = vmatprep.mubr.bf16.mxu0 %v10503_v37  ;;  %3095 = vmatprep.mubr.bf16.mxu1 %v10507_v40  ;;  %v9210_v37 = vld [vmem:[#allocation8 + $0x26c] ss:$16 sps:$4 sm:$0xff]   ;;  %v9205_v40 = vld [vmem:[#allocation8 + $0x68] ss:$16 sps:$4 sm:$0xff]  }
 0x232   :  { %3024 = vmatprep.subr.bf16.mxu0 %v9189_v19  ;;  %3065 = vmatprep.subr.bf16.mxu1 %v9192_v22  ;;  %v9249_v2 = vld [vmem:[#allocation8 + $0x18c] ss:$16 sps:$4 sm:$0xff]   ;;  %v9247_v3 = vld [vmem:[#allocation8 + $0x188] ss:$16 sps:$4 sm:$0xff]  }
 0x233   :  { %v9252_v10 = vld [vmem:[#allocation8 + $0x38c] ss:$16 sps:$4 sm:$0xff]   ;;  %v9250_v4 = vld [vmem:[#allocation8 + $0x388] ss:$16 sps:$4 sm:$0xff]  }
 0x234   :  { %3025 = vmatpush1.bf16.msra.mxu0 %v9187_v53  ;;  %3066 = vmatpush1.bf16.msra.mxu1 %v9190_v23  ;;  %v9255_v5 = vld [vmem:[#allocation8 + $0x16c] ss:$16 sps:$4 sm:$0xff]   ;;  %v9253_v7 = vld [vmem:[#allocation8 + $0x168] ss:$16 sps:$4 sm:$0xff]  }
 0x235   :  { %3026 = vmatprep.subr.bf16.mxu0 %v9195_v13  ;;  %3067 = vmatprep.subr.bf16.mxu1 %v9198_v24  ;;  %v9258_v6 = vld [vmem:[#allocation8 + $0x36c] ss:$16 sps:$4 sm:$0xff]   ;;  %v9256_v8 = vld [vmem:[#allocation8 + $0x368] ss:$16 sps:$4 sm:$0xff]  }
 0x236   :  { %v9261_v18 = vld [vmem:[#allocation8 + $0x14c] ss:$16 sps:$4 sm:$0xff]   ;;  %v9259_v22 = vld [vmem:[#allocation8 + $0x148] ss:$16 sps:$4 sm:$0xff]  }
 0x237   :  { %v9264_v19 = vld [vmem:[#allocation8 + $0x34c] ss:$16 sps:$4 sm:$0xff]   ;;  %v9262_v53 = vld [vmem:[#allocation8 + $0x348] ss:$16 sps:$4 sm:$0xff]  }
 0x238   :  { %3027 = vmatpush1.bf16.msra.mxu0 %v9193_v25  ;;  %3068 = vmatpush1.bf16.msra.mxu1 %v9196_v26  ;;  %v9267_v23 = vld [vmem:[#allocation8 + $0x12c] ss:$16 sps:$4 sm:$0xff]   ;;  %v9265_v24 = vld [vmem:[#allocation8 + $0x128] ss:$16 sps:$4 sm:$0xff]  }
 0x239   :  { %3028 = vmatprep.subr.bf16.mxu0 %v9201_v27  ;;  %3069 = vmatprep.subr.bf16.mxu1 %v9204_v28  ;;  %v9270_v13 = vld [vmem:[#allocation8 + $0x32c] ss:$16 sps:$4 sm:$0xff]   ;;  %v9268_v25 = vld [vmem:[#allocation8 + $0x328] ss:$16 sps:$4 sm:$0xff]  }
 0x23a   :  { %v9273_v26 = vld [vmem:[#allocation8 + $0x10c] ss:$16 sps:$4 sm:$0xff]   ;;  %v9271_v28 = vld [vmem:[#allocation8 + $0x108] ss:$16 sps:$4 sm:$0xff]  }
 0x23b   :  { %v9276_v27 = vld [vmem:[#allocation8 + $0x30c] ss:$16 sps:$4 sm:$0xff]  }
 0x23c   :  { %3029 = vmatpush1.bf16.msra.mxu0 %v9199_v29  ;;  %3070 = vmatpush1.bf16.msra.mxu1 %v9202_v30  ;;  %v9274_v29 = vld [vmem:[#allocation8 + $0x308] ss:$16 sps:$4 sm:$0xff]   ;;  %v9279_v30 = vld [vmem:[#allocation8 + $0x4ec] ss:$16 sps:$4 sm:$0xff]  }
 0x23d   :  { %3030 = vmatprep.subr.bf16.mxu0 %v9207_v31  ;;  %3071 = vmatprep.subr.bf16.mxu1 %v9210_v37  ;;  %v9282_v31 = vld [vmem:[#allocation8 + $0x6ec] ss:$16 sps:$4 sm:$0xff]   ;;  %v9277_v37 = vld [vmem:[#allocation8 + $0x4e8] ss:$16 sps:$4 sm:$0xff]  }
 0x240   :  { %3031 = vmatpush1.bf16.msra.mxu0 %v9205_v40  ;;  %3072 = vmatpush1.bf16.msra.mxu1 %v9208_v32  ;;  %v9280_v40 = vld [vmem:[#allocation8 + $0x6e8] ss:$16 sps:$4 sm:$0xff]   ;;  %v9285_v32 = vld [vmem:[#allocation8 + $0x4cc] ss:$16 sps:$4 sm:$0xff]  }
 0x241   :  { %3032 = vmatprep.subr.bf16.mxu0 %v9213_v34  ;;  %3073 = vmatprep.subr.bf16.mxu1 %v9216_v41  ;;  %v9288_v34 = vld [vmem:[#allocation8 + $0x6cc] ss:$16 sps:$4 sm:$0xff]   ;;  %v9283_v41 = vld [vmem:[#allocation8 + $0x4c8] ss:$16 sps:$4 sm:$0xff]  }
 0x244   :  { %3033 = vmatpush1.bf16.msra.mxu0 %v9211_v57  ;;  %3074 = vmatpush1.bf16.msra.mxu1 %v9214_v43  ;;  %v9286_v57 = vld [vmem:[#allocation8 + $0x6c8] ss:$16 sps:$4 sm:$0xff]   ;;  %v9291_v43 = vld [vmem:[#allocation8 + $0x4ac] ss:$16 sps:$4 sm:$0xff]  }
 0x245   :  { %3034 = vmatprep.subr.bf16.mxu0 %v9219_v44  ;;  %3075 = vmatprep.subr.bf16.mxu1 %v9222_v45  ;;  %v9294_v44 = vld [vmem:[#allocation8 + $0x6ac] ss:$16 sps:$4 sm:$0xff]   ;;  %v9289_v45 = vld [vmem:[#allocation8 + $0x4a8] ss:$16 sps:$4 sm:$0xff]  }
 0x248   :  { %3035 = vmatpush1.bf16.msra.mxu0 %v9217_v46  ;;  %3076 = vmatpush1.bf16.msra.mxu1 %v9220_v47  ;;  %v9297_v46 = vld [vmem:[#allocation8 + $0x48c] ss:$16 sps:$4 sm:$0xff]   ;;  %v9295_v47 = vld [vmem:[#allocation8 + $0x488] ss:$16 sps:$4 sm:$0xff]  }
 0x249   :  { %3036 = vmatprep.subr.bf16.mxu0 %v9225_v48  ;;  %3077 = vmatprep.subr.bf16.mxu1 %v9228_v49  ;;  %v9303_v48 = vld [vmem:[#allocation8 + $0x46c] ss:$16 sps:$4 sm:$0xff]  }
 0x24a   :  { %v9306_v49 = vld [vmem:[#allocation8 + $0x66c] ss:$16 sps:$4 sm:$0xff]  }
 0x24c   :  { %3037 = vmatpush1.bf16.msra.mxu0 %v9223_v50  ;;  %3078 = vmatpush1.bf16.msra.mxu1 %v9226_v51  ;;  %v9304_v50 = vld [vmem:[#allocation8 + $0x668] ss:$16 sps:$4 sm:$0xff]   ;;  %v9309_v51 = vld [vmem:[#allocation8 + $0x44c] ss:$16 sps:$4 sm:$0xff]  }
 0x24d   :  { %3038 = vmatprep.subr.bf16.mxu0 %v9231_v52  ;;  %3079 = vmatprep.subr.bf16.mxu1 %v9234_v54  ;;  %v9312_v52 = vld [vmem:[#allocation8 + $0x64c] ss:$16 sps:$4 sm:$0xff]   ;;  %v9307_v54 = vld [vmem:[#allocation8 + $0x448] ss:$16 sps:$4 sm:$0xff]  }
 0x250   :  { %3039 = vmatpush2.bf16.msra.mxu0 %v9229_v55  ;;  %3080 = vmatpush2.bf16.msra.mxu1 %v9232_v56  ;;  %v9310_v55 = vld [vmem:[#allocation8 + $0x648] ss:$16 sps:$4 sm:$0xff]   ;;  %v9315_v56 = vld [vmem:[#allocation8 + $0x42c] ss:$16 sps:$4 sm:$0xff]  }
 0x251   :  { %3040 = vmatprep.subr.bf16.mxu0 %v9237_v58  ;;  %3081 = vmatprep.subr.bf16.mxu1 %v9240_v59  ;;  %v9318_v58 = vld [vmem:[#allocation8 + $0x62c] ss:$16 sps:$4 sm:$0xff]   ;;  %v9313_v59 = vld [vmem:[#allocation8 + $0x428] ss:$16 sps:$4 sm:$0xff]  }
 0x254   :  { %3041 = vmatpush2.bf16.msra.mxu0 %v9235_v60  ;;  %3082 = vmatpush2.bf16.msra.mxu1 %v9238_v61  ;;  %v9316_v60 = vld [vmem:[#allocation8 + $0x628] ss:$16 sps:$4 sm:$0xff]   ;;  %v9321_v61 = vld [vmem:[#allocation8 + $0x40c] ss:$16 sps:$4 sm:$0xff]  }
 0x255   :  { %3042 = vmatprep.subr.bf16.mxu0 %v9243_v62  ;;  %3083 = vmatprep.subr.bf16.mxu1 %v9246_v63  ;;  %v9324_v62 = vld [vmem:[#allocation8 + $0x60c] ss:$16 sps:$4 sm:$0xff]   ;;  %v9319_v63 = vld [vmem:[#allocation8 + $0x408] ss:$16 sps:$4 sm:$0xff]  }
 0x258   :  { %3043 = vmatpush2.bf16.msra.mxu0 %v9241_v0  ;;  %3084 = vmatpush2.bf16.msra.mxu1 %v9244_v1  ;;  %v9322_v0 = vld [vmem:[#allocation8 + $0x608] ss:$16 sps:$4 sm:$0xff]   ;;  %v9327_v1 = vld [vmem:[#allocation8 + $0x5ec] ss:$16 sps:$4 sm:$0xff]  }
 0x259   :  { %3044 = vmatprep.subr.bf16.mxu0 %v9249_v2  ;;  %3085 = vmatprep.subr.bf16.mxu1 %v9252_v10  ;;  %v9330_v2 = vld [vmem:[#allocation8 + $0x7ec] ss:$16 sps:$4 sm:$0xff]   ;;  %v9325_v10 = vld [vmem:[#allocation8 + $0x5e8] ss:$16 sps:$4 sm:$0xff]  }
 0x25c   :  { %3045 = vmatpush2.bf16.msra.mxu0 %v9247_v3  ;;  %3086 = vmatpush2.bf16.msra.mxu1 %v9250_v4  ;;  %v9328_v3 = vld [vmem:[#allocation8 + $0x7e8] ss:$16 sps:$4 sm:$0xff]   ;;  %v9333_v4 = vld [vmem:[#allocation8 + $0x5cc] ss:$16 sps:$4 sm:$0xff]  }
 0x25d   :  { %3046 = vmatprep.subr.bf16.mxu0 %v9255_v5  ;;  %3087 = vmatprep.subr.bf16.mxu1 %v9258_v6  ;;  %v9336_v5 = vld [vmem:[#allocation8 + $0x7cc] ss:$16 sps:$4 sm:$0xff]   ;;  %v9331_v6 = vld [vmem:[#allocation8 + $0x5c8] ss:$16 sps:$4 sm:$0xff]  }
 0x260   :  { %3047 = vmatpush2.bf16.msra.mxu0 %v9253_v7  ;;  %3088 = vmatpush2.bf16.msra.mxu1 %v9256_v8  ;;  %v9334_v7 = vld [vmem:[#allocation8 + $0x7c8] ss:$16 sps:$4 sm:$0xff]   ;;  %v9339_v8 = vld [vmem:[#allocation8 + $0x5ac] ss:$16 sps:$4 sm:$0xff]  }
 0x261   :  { %3048 = vmatprep.subr.bf16.mxu0 %v9261_v18  ;;  %3089 = vmatprep.subr.bf16.mxu1 %v9264_v19  ;;  %v9342_v18 = vld [vmem:[#allocation8 + $0x7ac] ss:$16 sps:$4 sm:$0xff]   ;;  %v9337_v19 = vld [vmem:[#allocation8 + $0x5a8] ss:$16 sps:$4 sm:$0xff]  }
 0x264   :  { %3049 = vmatpush2.bf16.msra.mxu0 %v9259_v22  ;;  %3090 = vmatpush2.bf16.msra.mxu1 %v9262_v53  ;;  %v9340_v22 = vld [vmem:[#allocation8 + $0x7a8] ss:$16 sps:$4 sm:$0xff]   ;;  %v9345_v53 = vld [vmem:[#allocation8 + $0x58c] ss:$16 sps:$4 sm:$0xff]  }
 0x265   :  { %3050 = vmatprep.subr.bf16.mxu0 %v9267_v23  ;;  %3091 = vmatprep.subr.bf16.mxu1 %v9270_v13  ;;  %v9348_v23 = vld [vmem:[#allocation8 + $0x78c] ss:$16 sps:$4 sm:$0xff]   ;;  %v9343_v13 = vld [vmem:[#allocation8 + $0x588] ss:$16 sps:$4 sm:$0xff]  }
 0x268   :  { %3051 = vmatpush2.bf16.msra.mxu0 %v9265_v24  ;;  %3092 = vmatpush2.bf16.msra.mxu1 %v9268_v25  ;;  %v9346_v24 = vld [vmem:[#allocation8 + $0x788] ss:$16 sps:$4 sm:$0xff]   ;;  %v9351_v25 = vld [vmem:[#allocation8 + $0x56c] ss:$16 sps:$4 sm:$0xff]  }
 0x269   :  { %3052 = vmatprep.subr.bf16.mxu0 %v9273_v26  ;;  %3093 = vmatprep.subr.bf16.mxu1 %v9276_v27  ;;  %v9354_v26 = vld [vmem:[#allocation8 + $0x76c] ss:$16 sps:$4 sm:$0xff]   ;;  %v9349_v27 = vld [vmem:[#allocation8 + $0x568] ss:$16 sps:$4 sm:$0xff]  }
 0x26c   :  { %3053 = vmatpush2.bf16.msra.mxu0 %v9271_v28  ;;  %3094 = vmatpush2.bf16.msra.mxu1 %v9274_v29  ;;  %v9352_v28 = vld [vmem:[#allocation8 + $0x768] ss:$16 sps:$4 sm:$0xff]   ;;  %v9357_v29 = vld [vmem:[#allocation8 + $0x54c] ss:$16 sps:$4 sm:$0xff]  }
 0x26d   :  { %3104 = vmatprep.subr.bf16.mxu0 %v9279_v30  ;;  %3145 = vmatprep.subr.bf16.mxu1 %v9282_v31  ;;  %v9360_v30 = vld [vmem:[#allocation8 + $0x74c] ss:$16 sps:$4 sm:$0xff]   ;;  %v9355_v31 = vld [vmem:[#allocation8 + $0x548] ss:$16 sps:$4 sm:$0xff]  }
 0x26f   :  { %3055 = vmatmul.mubr.bf16.vlgmr.msra.gmra.mxu0 %v10505_v39  ;;  %3096 = vmatmul.mubr.bf16.vlgmr.msra.gmra.mxu1 %v10501_v36  ;;  %v9292_v39 = vld [vmem:[#allocation8 + $0x6a8] ss:$16 sps:$4 sm:$0xff]   ;;  %v9300_v36 = vld [vmem:[#allocation8 + $0x68c] ss:$16 sps:$4 sm:$0xff]  }
 0x270   :  { %3105 = vmatpush1.bf16.msra.mxu0 %v9277_v37  ;;  %3136 = vmatprep.mubr.bf16.mxu0 %v10531_v17  ;;  %v9298_v17 = vld [vmem:[#allocation8 + $0x688] ss:$16 sps:$4 sm:$0xff]  }
 0x271   :  { %3146 = vmatpush1.bf16.msra.mxu1 %v9280_v40  ;;  %3177 = vmatprep.mubr.bf16.mxu1 %v10535_v21  ;;  %v9301_v21 = vld [vmem:[#allocation8 + $0x468] ss:$16 sps:$4 sm:$0xff]   ;;  %v9363_v40 = vld [vmem:[#allocation8 + $0x52c] ss:$16 sps:$4 sm:$0xff]  }
 0x272   :  { %3106 = vmatprep.subr.bf16.mxu0 %v9285_v32  ;;  %3147 = vmatprep.subr.bf16.mxu1 %v9288_v34  ;;  %v9358_v37 = vld [vmem:[#allocation8 + $0x748] ss:$16 sps:$4 sm:$0xff]   ;;  %v9366_v32 = vld [vmem:[#allocation8 + $0x72c] ss:$16 sps:$4 sm:$0xff]  }
 0x273   :  { %v9361_v34 = vld [vmem:[#allocation8 + $0x528] ss:$16 sps:$4 sm:$0xff]  }
 0x274   :  { %3107 = vmatpush1.bf16.msra.mxu0 %v9283_v41  ;;  %v9364_v41 = vld [vmem:[#allocation8 + $0x728] ss:$16 sps:$4 sm:$0xff]  }
 0x275   :  { %3148 = vmatpush1.bf16.msra.mxu1 %v9286_v57  ;;  %3108 = vmatprep.subr.bf16.mxu0 %v9291_v43  ;;  %v9369_v57 = vld [vmem:[#allocation8 + $0x50c] ss:$16 sps:$4 sm:$0xff]  }
 0x276   :  { %3149 = vmatprep.subr.bf16.mxu1 %v9294_v44  ;;  %v9372_v43 = vld [vmem:[#allocation8 + $0x70c] ss:$16 sps:$4 sm:$0xff]   ;;  %v9367_v44 = vld [vmem:[#allocation8 + $0x508] ss:$16 sps:$4 sm:$0xff]  }
 0x278   :  { %3109 = vmatpush1.bf16.msra.mxu0 %v9289_v45  ;;  %v9370_v45 = vld [vmem:[#allocation8 + $0x708] ss:$16 sps:$4 sm:$0xff]  }
 0x279   :  { %3150 = vmatpush1.bf16.msra.mxu1 %v9292_v39  ;;  %3110 = vmatprep.subr.bf16.mxu0 %v9297_v46  ;;  %v9375_v39 = vld [vmem:[#allocation10 + $0x74] ss:$8 sps:$4 sm:$0xff]   ;;  %v9373_v46 = vld [vmem:[#allocation10 + $0x70] ss:$8 sps:$4 sm:$0xff]  }
 0x27a   :  { %3151 = vmatprep.subr.bf16.mxu1 %v9300_v36  ;;  %v9378_v36 = vld [vmem:[#allocation10 + $0x64] ss:$8 sps:$4 sm:$0xff]  }
 0x27c   :  { %3111 = vmatpush1.bf16.msra.mxu0 %v9295_v47 }
 0x27d   :  { %3152 = vmatpush1.bf16.msra.mxu1 %v9298_v17  ;;  %3112 = vmatprep.subr.bf16.mxu0 %v9303_v48  ;;  %v9376_v48 = vld [vmem:[#allocation10 + $0x60] ss:$8 sps:$4 sm:$0xff]  }
 0x27e   :  { %3153 = vmatprep.subr.bf16.mxu1 %v9306_v49 }
 0x280   :  { %3113 = vmatpush1.bf16.msra.mxu0 %v9301_v21  ;;  %v9381_v21 = vld [vmem:[#allocation10 + $0x54] ss:$8 sps:$4 sm:$0xff]  }
 0x281   :  { %3154 = vmatpush1.bf16.msra.mxu1 %v9304_v50  ;;  %3114 = vmatprep.subr.bf16.mxu0 %v9309_v51 }
 0x282   :  { %3155 = vmatprep.subr.bf16.mxu1 %v9312_v52 }
 0x284   :  { %3115 = vmatpush1.bf16.msra.mxu0 %v9307_v54  ;;  %v9379_v54 = vld [vmem:[#allocation10 + $0x50] ss:$8 sps:$4 sm:$0xff]  }
 0x285   :  { %3156 = vmatpush1.bf16.msra.mxu1 %v9310_v55  ;;  %3116 = vmatprep.subr.bf16.mxu0 %v9315_v56 }
 0x286   :  { %3157 = vmatprep.subr.bf16.mxu1 %v9318_v58  ;;  %v9421_v58 = vld [vmem:[#allocation10 + $0x170] ss:$8 sps:$4 sm:$0xff]  }
 0x288   :  { %3117 = vmatpush1.bf16.msra.mxu0 %v9313_v59  ;;  %v9426_v59 = vld [vmem:[#allocation10 + $0x164] ss:$8 sps:$4 sm:$0xff]  }
 0x289   :  { %3158 = vmatpush1.bf16.msra.mxu1 %v9316_v60  ;;  %3118 = vmatprep.subr.bf16.mxu0 %v9321_v61  ;;  %v9382_v60 = vld [vmem:[#allocation10 + $0x40] ss:$8 sps:$4 sm:$0xff]   ;;  %v9387_v61 = vld [vmem:[#allocation10 + $0x34] ss:$8 sps:$4 sm:$0xff]  }
 0x28a   :  { %3159 = vmatprep.subr.bf16.mxu1 %v9324_v62  ;;  %v9424_v62 = vld [vmem:[#allocation10 + $0x160] ss:$8 sps:$4 sm:$0xff]  }
 0x28c   :  { %3119 = vmatpush1.bf16.msra.mxu0 %v9319_v63  ;;  %v9429_v63 = vld [vmem:[#allocation10 + $0x154] ss:$8 sps:$4 sm:$0xff]  }
 0x28d   :  { %3160 = vmatpush1.bf16.msra.mxu1 %v9322_v0  ;;  %3120 = vmatprep.subr.bf16.mxu0 %v9327_v1  ;;  %v9385_v0 = vld [vmem:[#allocation10 + $0x30] ss:$8 sps:$4 sm:$0xff]   ;;  %v9390_v1 = vld [vmem:[#allocation10 + $0x24] ss:$8 sps:$4 sm:$0xff]  }
 0x28e   :  { %3161 = vmatprep.subr.bf16.mxu1 %v9330_v2  ;;  %v9427_v2 = vld [vmem:[#allocation10 + $0x150] ss:$8 sps:$4 sm:$0xff]  }
 0x290   :  { %3121 = vmatpush2.bf16.msra.mxu0 %v9325_v10  ;;  %v9432_v10 = vld [vmem:[#allocation10 + $0x144] ss:$8 sps:$4 sm:$0xff]  }
 0x291   :  { %3162 = vmatpush2.bf16.msra.mxu1 %v9328_v3  ;;  %3122 = vmatprep.subr.bf16.mxu0 %v9333_v4  ;;  %v9388_v3 = vld [vmem:[#allocation10 + $0x20] ss:$8 sps:$4 sm:$0xff]   ;;  %v9393_v4 = vld [vmem:[#allocation10 + $0x14] ss:$8 sps:$4 sm:$0xff]  }
 0x292   :  { %3163 = vmatprep.subr.bf16.mxu1 %v9336_v5  ;;  %v9430_v5 = vld [vmem:[#allocation10 + $0x140] ss:$8 sps:$4 sm:$0xff]  }
 0x294   :  { %3123 = vmatpush2.bf16.msra.mxu0 %v9331_v6  ;;  %v9435_v6 = vld [vmem:[#allocation10 + $0x134] ss:$8 sps:$4 sm:$0xff]  }
 0x295   :  { %3164 = vmatpush2.bf16.msra.mxu1 %v9334_v7  ;;  %3124 = vmatprep.subr.bf16.mxu0 %v9339_v8  ;;  %v9391_v7 = vld [vmem:[#allocation10 + $0x10] ss:$8 sps:$4 sm:$0xff]   ;;  %v9396_v8 = vld [vmem:[#allocation10 + $0x4] ss:$8 sps:$4 sm:$0xff]  }
 0x296   :  { %3165 = vmatprep.subr.bf16.mxu1 %v9342_v18  ;;  %v9433_v18 = vld [vmem:[#allocation10 + $0x130] ss:$8 sps:$4 sm:$0xff]  }
 0x298   :  { %3125 = vmatpush2.bf16.msra.mxu0 %v9337_v19  ;;  %v9438_v19 = vld [vmem:[#allocation10 + $0x124] ss:$8 sps:$4 sm:$0xff]  }
 0x299   :  { %3166 = vmatpush2.bf16.msra.mxu1 %v9340_v22  ;;  %3126 = vmatprep.subr.bf16.mxu0 %v9345_v53  ;;  %v9394_v22 = vld [vmem:[#allocation10] ss:$8 sps:$4 sm:$0xff]   ;;  %v9399_v53 = vld [vmem:[#allocation10 + $0xf4] ss:$8 sps:$4 sm:$0xff]  }
 0x29a   :  { %3167 = vmatprep.subr.bf16.mxu1 %v9348_v23  ;;  %v9436_v23 = vld [vmem:[#allocation10 + $0x120] ss:$8 sps:$4 sm:$0xff]  }
 0x29c   :  { %3127 = vmatpush2.bf16.msra.mxu0 %v9343_v13  ;;  %v9441_v13 = vld [vmem:[#allocation10 + $0x114] ss:$8 sps:$4 sm:$0xff]  }
 0x29d   :  { %3168 = vmatpush2.bf16.msra.mxu1 %v9346_v24  ;;  %3128 = vmatprep.subr.bf16.mxu0 %v9351_v25  ;;  %v9397_v24 = vld [vmem:[#allocation10 + $0xf0] ss:$8 sps:$4 sm:$0xff]   ;;  %v9402_v25 = vld [vmem:[#allocation10 + $0xe4] ss:$8 sps:$4 sm:$0xff]  }
 0x29e   :  { %3169 = vmatprep.subr.bf16.mxu1 %v9354_v26  ;;  %v9439_v26 = vld [vmem:[#allocation10 + $0x110] ss:$8 sps:$4 sm:$0xff]  }
 0x2a0   :  { %3129 = vmatpush2.bf16.msra.mxu0 %v9349_v27  ;;  %v9444_v27 = vld [vmem:[#allocation10 + $0x104] ss:$8 sps:$4 sm:$0xff]  }
 0x2a1   :  { %3170 = vmatpush2.bf16.msra.mxu1 %v9352_v28  ;;  %3130 = vmatprep.subr.bf16.mxu0 %v9357_v29  ;;  %v9400_v28 = vld [vmem:[#allocation10 + $0xe0] ss:$8 sps:$4 sm:$0xff]   ;;  %v9405_v29 = vld [vmem:[#allocation10 + $0xd4] ss:$8 sps:$4 sm:$0xff]  }
 0x2a2   :  { %3171 = vmatprep.subr.bf16.mxu1 %v9360_v30  ;;  %v9442_v30 = vld [vmem:[#allocation10 + $0x100] ss:$8 sps:$4 sm:$0xff]  }
 0x2a4   :  { %3131 = vmatpush2.bf16.msra.mxu0 %v9355_v31  ;;  %v9447_v31 = vld [vmem:[#allocation10 + $0x1f4] ss:$8 sps:$4 sm:$0xff]  }
 0x2a5   :  { %3172 = vmatpush2.bf16.msra.mxu1 %v9358_v37  ;;  %3132 = vmatprep.subr.bf16.mxu0 %v9363_v40  ;;  %v9403_v37 = vld [vmem:[#allocation10 + $0xd0] ss:$8 sps:$4 sm:$0xff]   ;;  %v9408_v40 = vld [vmem:[#allocation10 + $0xc4] ss:$8 sps:$4 sm:$0xff]  }
 0x2a6   :  { %3173 = vmatprep.subr.bf16.mxu1 %v9366_v32  ;;  %v9445_v32 = vld [vmem:[#allocation10 + $0x1f0] ss:$8 sps:$4 sm:$0xff]  }
 0x2a8   :  { %3133 = vmatpush2.bf16.msra.mxu0 %v9361_v34  ;;  %v9450_v34 = vld [vmem:[#allocation10 + $0x1e4] ss:$8 sps:$4 sm:$0xff]  }
 0x2a9   :  { %3174 = vmatpush2.bf16.msra.mxu1 %v9364_v41  ;;  %3134 = vmatprep.subr.bf16.mxu0 %v9369_v57  ;;  %v9406_v41 = vld [vmem:[#allocation10 + $0xc0] ss:$8 sps:$4 sm:$0xff]   ;;  %v9411_v57 = vld [vmem:[#allocation10 + $0xb4] ss:$8 sps:$4 sm:$0xff]  }
 0x2aa   :  { %3175 = vmatprep.subr.bf16.mxu1 %v9372_v43  ;;  %v9448_v43 = vld [vmem:[#allocation10 + $0x1e0] ss:$8 sps:$4 sm:$0xff]  }
 0x2ac   :  { %3135 = vmatpush2.bf16.msra.mxu0 %v9367_v44  ;;  %v9453_v44 = vld [vmem:[#allocation10 + $0x1d4] ss:$8 sps:$4 sm:$0xff]  }
 0x2ad   :  { %3176 = vmatpush2.bf16.msra.mxu1 %v9370_v45  ;;  %3590 = vmatprep.subr.bf16.mxu0 %v9375_v39  ;;  %v9409_v45 = vld [vmem:[#allocation10 + $0xb0] ss:$8 sps:$4 sm:$0xff]   ;;  %v9414_v39 = vld [vmem:[#allocation10 + $0xa4] ss:$8 sps:$4 sm:$0xff]  }
 0x2af   :  { %3137 = vmatmul.mubr.bf16.vlgmr.msra.gmra.mxu0 %v10533_v20  ;;  %v10548_v47 = vpop.f32.mrf.mxu0  ;;  %v10551_v17 = vpop.f32.mrf.mxu1  ;;  %v9384_v20 = vld [vmem:[#allocation10 + $0x44] ss:$8 sps:$4 sm:$0xff]  }
 0x2b0   :  { %3178 = vmatmul.mubr.bf16.vlgmr.msra.gmra.mxu1 %v10529_v16  ;;  %3591 = vmatpush1.bf16.msra.mxu0 %v9373_v46  ;;  %v9423_v16 = vld [vmem:[#allocation10 + $0x174] ss:$8 sps:$4 sm:$0xff]   ;;  %v9451_v46 = vld [vmem:[#allocation10 + $0x1d0] ss:$8 sps:$4 sm:$0xff]  }
 0x2b1   :  { %v10553_v49 = vpop.f32.mrf.mxu0  ;;  %3592 = vmatprep.subr.bf16.mxu0 %v9378_v36  ;;  %v10555_v50 = vpop.f32.mrf.mxu1  ;;  %3631 = vmatprep.subr.bf16.mxu1 %v9423_v16  ;;  %v9456_v36 = vld [vmem:[#allocation10 + $0x1c4] ss:$8 sps:$4 sm:$0xff]  }
 0x2b2   :  { %3632 = vmatpush1.bf16.msra.mxu1 %v9421_v58 }
 0x2b3   :  { %v2896_v51 = vpop.f32.mrf.mxu0  ;;  %v2937_v52 = vpop.f32.mrf.mxu1  ;;  %3633 = vmatprep.subr.bf16.mxu1 %v9426_v59  ;;  %v9418_v59 = vld [vmem:[#allocation10 + $0x80] ss:$8 sps:$4 sm:$0xff]  }
 0x2b4   :  { %3593 = vmatpush1.bf16.msra.mxu0 %v9376_v48  ;;  %v9412_v48 = vld [vmem:[#allocation10 + $0xa0] ss:$8 sps:$4 sm:$0xff]   ;;  %v9459_v52 = vld [vmem:[#allocation10 + $0x1b4] ss:$8 sps:$4 sm:$0xff]  }
 0x2b5   :  { %v2897_v55 = vpop.f32.mrf.mxu0  ;;  %3594 = vmatprep.subr.bf16.mxu0 %v9381_v21  ;;  %v2938_v56 = vpop.f32.mrf.mxu1  ;;  %v9417_v21 = vld [vmem:[#allocation10 + $0x94] ss:$8 sps:$4 sm:$0xff]   ;;  %v9454_v51 = vld [vmem:[#allocation10 + $0x1c0] ss:$8 sps:$4 sm:$0xff]  }
 0x2b6   :  { %3634 = vmatpush1.bf16.msra.mxu1 %v9424_v62  ;;  %v9415_v55 = vld [vmem:[#allocation10 + $0x90] ss:$8 sps:$4 sm:$0xff]  }
 0x2b7   :  { %3635 = vmatprep.subr.bf16.mxu1 %v9429_v63  ;;  %v9457_v56 = vld [vmem:[#allocation10 + $0x1b0] ss:$8 sps:$4 sm:$0xff]  }
 0x2b8   :  { %3595 = vmatpush1.bf16.msra.mxu0 %v9379_v54  ;;  %v10560_v54 = vld [vmem:[%s10753_s27] sm:$0xf] }
 0x2b9   :  { %3596 = vmatprep.subr.bf16.mxu0 %v9384_v20  ;;  %v9420_v20 = vld [vmem:[#allocation10 + $0x84] ss:$8 sps:$4 sm:$0xff]   ;;  %v1561_v58 = vrot.slane %v10560_v54, %v10482_v11  ;;  %v1565_v16 = vrot.slane %v10560_v54, %v10488_v14 }
 0x2ba   :  { %3636 = vmatpush1.bf16.msra.mxu1 %v9427_v2 }
 0x2bb   :  { %3637 = vmatprep.subr.bf16.mxu1 %v9432_v10 }
 0x2bc   :  { %3597 = vmatpush1.bf16.msra.mxu0 %v9382_v60  ;;  %v2893_v60 = vadd.f32 %v10548_v47, %v1561_v58  ;;  %v9465_v47 = vld [vmem:[#allocation10 + $0x194] ss:$8 sps:$4 sm:$0xff]  }
 0x2bd   :  { %3598 = vmatprep.subr.bf16.mxu0 %v9387_v61  ;;  %v2895_v61 = vadd.f32 %v10553_v49, %v1565_v16 }
 0x2be   :  { %3638 = vmatpush1.bf16.msra.mxu1 %v9430_v5  ;;  %v2934_v62 = vadd.f32 %v10551_v17, %v2893_v60 }
 0x2bf   :  { %3639 = vmatprep.subr.bf16.mxu1 %v9435_v6 }
 0x2c0   :  { %3599 = vmatpush1.bf16.msra.mxu0 %v9385_v0  ;;  %v9462_v0 = vld [vmem:[#allocation10 + $0x1a4] ss:$8 sps:$4 sm:$0xff]  }
 0x2c1   :  { %3600 = vmatprep.subr.bf16.mxu0 %v9390_v1  ;;  %v2936_v1 = vadd.f32 %v10555_v50, %v2895_v61  ;;  %v9468_v50 = vld [vmem:[#allocation10 + $0x184] ss:$8 sps:$4 sm:$0xff]  }
 0x2c2   :  { %3640 = vmatpush1.bf16.msra.mxu1 %v9433_v18 }
 0x2c3   :  { %3641 = vmatprep.subr.bf16.mxu1 %v9438_v19  ;;  %v9463_v19 = vld [vmem:[#allocation10 + $0x190] ss:$8 sps:$4 sm:$0xff]  }
 0x2c4   :  { %3601 = vmatpush1.bf16.msra.mxu0 %v9388_v3  ;;  %v9460_v3 = vld [vmem:[#allocation10 + $0x1a0] ss:$8 sps:$4 sm:$0xff]  }
 0x2c5   :  { %3602 = vmatprep.subr.bf16.mxu0 %v9393_v4 }
 0x2c6   :  { %3642 = vmatpush1.bf16.msra.mxu1 %v9436_v23 }
 0x2c7   :  { %3643 = vmatprep.subr.bf16.mxu1 %v9441_v13 }
 0x2c8   :  { %3603 = vmatpush1.bf16.msra.mxu0 %v9391_v7 }
 0x2c9   :  { %3604 = vmatprep.subr.bf16.mxu0 %v9396_v8 }
 0x2ca   :  { %3644 = vmatpush1.bf16.msra.mxu1 %v9439_v26 }
 0x2cb   :  { %3645 = vmatprep.subr.bf16.mxu1 %v9444_v27 }
 0x2cc   :  { %3605 = vmatpush1.bf16.msra.mxu0 %v9394_v22 }
 0x2cd   :  { %3606 = vmatprep.subr.bf16.mxu0 %v9399_v53 }
 0x2ce   :  { %3646 = vmatpush1.bf16.msra.mxu1 %v9442_v30 }
 0x2cf   :  { %3647 = vmatprep.subr.bf16.mxu1 %v9447_v31 }
 0x2d0   :  { %3607 = vmatpush2.bf16.msra.mxu0 %v9397_v24  ;;  %v9466_v24 = vld [vmem:[#allocation10 + $0x180] ss:$8 sps:$4 sm:$0xff]  }
 0x2d1   :  { %3608 = vmatprep.subr.bf16.mxu0 %v9402_v25 }
 0x2d2   :  { %3648 = vmatpush2.bf16.msra.mxu1 %v9445_v32  ;;  %v9469_v32 = vld [vmem:[#allocation13 + $0x78] sm:$0xff]  }
 0x2d3   :  { %3649 = vmatprep.subr.bf16.mxu1 %v9450_v34  ;;  %v9470_v34 = vld [vmem:[#allocation13 + $0x38] sm:$0xff]  }
 0x2d4   :  { %3609 = vmatpush2.bf16.msra.mxu0 %v9400_v28 }
 0x2d5   :  { %3610 = vmatprep.subr.bf16.mxu0 %v9405_v29 }
 0x2d6   :  { %3650 = vmatpush2.bf16.msra.mxu1 %v9448_v43  ;;  %v9473_v43 = vld [vmem:[#allocation13 + $0x68] sm:$0xff]  }
 0x2d7   :  { %3651 = vmatprep.subr.bf16.mxu1 %v9453_v44  ;;  %v9474_v44 = vld [vmem:[#allocation13 + $0x28] sm:$0xff]  }
 0x2d8   :  { %3611 = vmatpush2.bf16.msra.mxu0 %v9403_v37 }
 0x2d9   :  { %3612 = vmatprep.subr.bf16.mxu0 %v9408_v40 }
 0x2da   :  { %3652 = vmatpush2.bf16.msra.mxu1 %v9451_v46  ;;  %v9477_v46 = vld [vmem:[#allocation13 + $0x58] sm:$0xff]  }
 0x2db   :  { %3653 = vmatprep.subr.bf16.mxu1 %v9456_v36  ;;  %v9478_v36 = vld [vmem:[#allocation13 + $0x18] sm:$0xff]  }
 0x2dc   :  { %3613 = vmatpush2.bf16.msra.mxu0 %v9406_v41  ;;  %v9471_v41 = vld [vmem:[#allocation13 + $0x70] sm:$0xff]  }
 0x2dd   :  { %3614 = vmatprep.subr.bf16.mxu0 %v9411_v57  ;;  %v9472_v57 = vld [vmem:[#allocation13 + $0x30] sm:$0xff]  }
 0x2de   :  { %3654 = vmatpush2.bf16.msra.mxu1 %v9454_v51  ;;  %v1569_v51 = vrot.slane %v10560_v54, %v10485_v12 }
 0x2df   :  { %3655 = vmatprep.subr.bf16.mxu1 %v9459_v52  ;;  %v1573_v52 = vrot.slane %v10560_v54, %v10491_v15 }
 0x2e0   :  { %3615 = vmatpush2.bf16.msra.mxu0 %v9409_v45  ;;  %v9475_v45 = vld [vmem:[#allocation13 + $0x60] sm:$0xff]  }
 0x2e1   :  { %3616 = vmatprep.subr.bf16.mxu0 %v9414_v39  ;;  %v9476_v39 = vld [vmem:[#allocation13 + $0x20] sm:$0xff]  }
 0x2e2   :  { %3656 = vmatpush2.bf16.msra.mxu1 %v9457_v56 }
 0x2e3   :  { %3657 = vmatprep.subr.bf16.mxu1 %v9462_v0 }
 0x2e4   :  { %3617 = vmatpush2.bf16.msra.mxu0 %v9412_v48  ;;  %v9479_v48 = vld [vmem:[#allocation13 + $0x50] sm:$0xff]  }
 0x2e5   :  { %3618 = vmatprep.subr.bf16.mxu0 %v9417_v21  ;;  %v9480_v21 = vld [vmem:[#allocation13 + $0x10] sm:$0xff]  }
 0x2e6   :  { %3658 = vmatpush2.bf16.msra.mxu1 %v9460_v3 }
 0x2e7   :  { %3659 = vmatprep.subr.bf16.mxu1 %v9465_v47 }
 0x2e8   :  { %3619 = vmatpush2.bf16.msra.mxu0 %v9415_v55 }
 0x2e9   :  { %3620 = vmatprep.subr.bf16.mxu0 %v9420_v20 }
 0x2ea   :  { %3660 = vmatpush2.bf16.msra.mxu1 %v9463_v19 }
 0x2eb   :  { %3661 = vmatprep.subr.bf16.mxu1 %v9468_v50  ;;  %v10238_v50 = vmov 0.0  }
 0x2ec   :  { %3621 = vmatpush2.bf16.msra.mxu0 %v9418_v59 }
 0x2ed   :  { %8820 = vmatprep.subr.bf16.mxu0 %v9469_v32 }
 0x2ee   :  { %3662 = vmatpush2.bf16.msra.mxu1 %v9466_v24  ;;  %v9487_v24 = vld [vmem:[#allocation16 + $0x28] sm:$0xff]  }
 0x2ef   :  { %v2974_v63 = vpop.f32.mrf.mxu0  ;;  %v3015_v10 = vpop.f32.mrf.mxu1  ;;  %8878 = vmatprep.subr.bf16.mxu1 %v10238_v50 }
 0x2f0   :  { %v2975_v2 = vadd.f32 %v2974_v63, %v2934_v62 }
 0x2f1   :  { %v2976_v4 = vpop.f32.mrf.mxu0  ;;  %v3017_v7 = vpop.f32.mrf.mxu1 }
 0x2f2   :  { %v3016_v5 = vadd.f32 %v3015_v10, %v2975_v2  ;;  %v2977_v6 = vadd.f32 %v2976_v4, %v2936_v1 }
 0x2f3   :  { %v2978_v8 = vpop.f32.mrf.mxu0  ;;  %v3019_v49 = vpop.f32.mrf.mxu1 }
 0x2f4   :  { %v3018_v18 = vadd.f32 %v3017_v7, %v2977_v6  ;;  %v3186_v22 = vmax.f32 %v3016_v5, 0.0  ;;  %v9482_v49 = vld [vmem:[#allocation13 + $0x8] sm:$0xff]  }
 0x2f5   :  { %v2979_v17 = vpop.f32.mrf.mxu0  ;;  %v3020_v23 = vpop.f32.mrf.mxu1 }
 0x2f6   :  { %v3187_v53 = vmax.f32 %v3018_v18, 0.0  ;;  %v3190_v25 = vpack.c.bf16 %v3186_v22, %v3186_v22  ;;  %v9481_v18 = vld [vmem:[#allocation13 + $0x48] sm:$0xff]   ;;  %v9483_v17 = vld [vmem:[#allocation13 + $0x40] sm:$0xff]  }
 0x2f7   :  { %v9485_v23 = vld [vmem:[#allocation16 + $0x38] sm:$0xff]  }
 0x2f8   :  { %v3191_v13 = vpack.c.bf16 %v3187_v53, %v3187_v53  ;;  %v9484_v53 = vld [vmem:[#allocation13] sm:$0xff]  }
 0x2fa   :  { %3622 = vmatprep.mubr.bf16.mxu0 %v3191_v13  ;;  %v9486_v13 = vld [vmem:[#allocation16 + $0x30] sm:$0xff]  }
 0x2fb   :  { %3623 = vmatmul.mubr.bf16.vlgmr.msra.gmra.mxu0 %v3190_v25  ;;  %v9488_v25 = vld [vmem:[#allocation16 + $0x20] sm:$0xff]  }
 0x2fc   :  { %8821 = vmatpush3.bf16.msra.mxu0 %v9470_v34 }
 0x2fd   :  { %8822 = vmatprep.subr.bf16.mxu0 %v9471_v41 }
 0x300   :  { %8823 = vmatpush3.bf16.msra.mxu0 %v9472_v57 }
 0x301   :  { %8824 = vmatprep.subr.bf16.mxu0 %v9473_v43 }
 0x304   :  { %8825 = vmatpush3.bf16.msra.mxu0 %v9474_v44 }
 0x305   :  { %8826 = vmatprep.subr.bf16.mxu0 %v9475_v45 }
 0x308   :  { %8827 = vmatpush3.bf16.msra.mxu0 %v9476_v39 }
 0x309   :  { %8828 = vmatprep.subr.bf16.mxu0 %v9477_v46  ;;  %v9490_v46 = vld [vmem:[#allocation16 + $0x10] sm:$0xff]  }
 0x30c   :  { %8829 = vmatpush3.bf16.msra.mxu0 %v9478_v36  ;;  %v9491_v36 = vld [vmem:[#allocation16 + $0x8] sm:$0xff]  }
 0x30d   :  { %8830 = vmatprep.subr.bf16.mxu0 %v9479_v48  ;;  %v9492_v48 = vld [vmem:[#allocation16] sm:$0xff]  }
 0x310   :  { %8831 = vmatpush3.bf16.msra.mxu0 %v9480_v21  ;;  %v9493_v21 = vld [vmem:[#allocation19 + $0x38] sm:$0xff]  }
 0x311   :  { %8832 = vmatprep.subr.bf16.mxu0 %v9481_v18 }
 0x314   :  { %8833 = vmatpush3.bf16.msra.mxu0 %v9482_v49 }
 0x315   :  { %8834 = vmatprep.subr.bf16.mxu0 %v9483_v17 }
 0x318   :  { %8835 = vmatpush3.bf16.msra.mxu0 %v9484_v53 }
 0x319   :  { %8898 = vmatprep.subr.bf16.mxu0 %v10238_v50 }
 0x32f   :  { %v3056_v26 = vpop.f32.mrf.mxu0  ;;  %v3097_v27 = vpop.f32.mrf.mxu1 }
 0x330   :  { %v3057_v55 = vadd.f32 %v3056_v26, %v1569_v51  ;;  %v9489_v26 = vld [vmem:[#allocation16 + $0x18] sm:$0xff]  }
 0x331   :  { %v3058_v28 = vpop.f32.mrf.mxu0  ;;  %v3099_v29 = vpop.f32.mrf.mxu1  ;;  %v9494_v51 = vld [vmem:[#allocation19 + $0x30] sm:$0xff]  }
 0x332   :  { %v3059_v20 = vadd.f32 %v3058_v28, %v1573_v52  ;;  %v3098_v56 = vadd.f32 %v3097_v27, %v3057_v55  ;;  %v3258_v27 = vld [vmem:[#allocation11] sm:$0x3]  ;;  %v9495_v52 = vld [vmem:[#allocation19 + $0x28] sm:$0xff]   ;;  %v9496_v55 = vld [vmem:[#allocation19 + $0x20] sm:$0xff]  }
 0x333   :  { %v3060_v30 = vpop.f32.mrf.mxu0  ;;  %v3101_v31 = vpop.f32.mrf.mxu1  ;;  %v3263_v28 = vrot.slane %v3258_v27, %v10482_v11 }
 0x334   :  { %v3100_v16 = vadd.f32 %v3099_v29, %v3059_v20  ;;  %v3267_v29 = vrot.slane %v3258_v27, %v10488_v14  ;;  %v9497_v20 = vld [vmem:[#allocation19 + $0x18] sm:$0xff]   ;;  %v9512_v27 = vld [vmem:[#allocation22 + $0x20] sm:$0xff]  }
 0x335   :  { %v3061_v37 = vpop.f32.mrf.mxu0  ;;  %v3102_v40 = vpop.f32.mrf.mxu1 }
 0x36f   :  { %v3138_v58 = vpop.f32.mrf.mxu0 }
 0x370   :  { %v3139_v59 = vadd.f32 %v3138_v58, %v3098_v56  ;;  %v3179_v60 = vpop.f32.mrf.mxu1  ;;  %v9498_v56 = vld [vmem:[#allocation19 + $0x10] sm:$0xff]  }
 0x371   :  { %v3140_v61 = vpop.f32.mrf.mxu0 }
 0x372   :  { %v3180_v62 = vadd.f32 %v3179_v60, %v3139_v59  ;;  %v3141_v63 = vadd.f32 %v3140_v61, %v3100_v16  ;;  %v3181_v0 = vpop.f32.mrf.mxu1  ;;  %v8303_v16 = vld [vmem:[#allocation14] ss:$0 sm:$0xff] }
 0x373   :  { %v3142_v1 = vpop.f32.mrf.mxu0 }
 0x374   :  { %v3182_v2 = vadd.f32 %v3181_v0, %v3141_v63  ;;  %v3183_v10 = vpop.f32.mrf.mxu1  ;;  %v3188_v3 = vmax.f32 %v3180_v62, 0.0 }
 0x375   :  { %v3143_v4 = vpop.f32.mrf.mxu0  ;;  %v9500_v10 = vld [vmem:[#allocation19] sm:$0xff]  }
 0x376   :  { %v3189_v5 = vmax.f32 %v3182_v2, 0.0  ;;  %v3184_v6 = vpop.f32.mrf.mxu1  ;;  %v3192_v54 = vpack.c.bf16 %v3188_v3, %v3188_v3  ;;  %v9499_v2 = vld [vmem:[#allocation19 + $0x8] sm:$0xff]   ;;  %v9501_v3 = vld [vmem:[#allocation20 + $0x38] sm:$0xff]   ;;  %v9502_v4 = vld [vmem:[#allocation20 + $0x30] sm:$0xff]  }
 0x377   :  { %v9504_v6 = vld [vmem:[#allocation20 + $0x20] sm:$0xff]  }
 0x378   :  { %v3193_v7 = vpack.c.bf16 %v3189_v5, %v3189_v5  ;;  %v9503_v5 = vld [vmem:[#allocation20 + $0x28] sm:$0xff]  }
 0x37a   :  { %3663 = vmatprep.mubr.bf16.mxu1 %v3193_v7  ;;  %v9505_v7 = vld [vmem:[#allocation20 + $0x18] sm:$0xff]  }
 0x37b   :  { %3664 = vmatmul.mubr.bf16.vlgmr.msra.gmra.mxu1 %v3192_v54  ;;  %v9506_v54 = vld [vmem:[#allocation20 + $0x10] sm:$0xff]  }
 0x37c   :  { %8879 = vmatpush3.bf16.msra.mxu1 %v9485_v23  ;;  %8894 = vmatprep.mubr.msk.bf16.mxu1 %vm10239_vm0, %v10238_v50  ;;  %v9507_v23 = vld [vmem:[#allocation20 + $0x8] sm:$0xff]  }
 0x37d   :  { %8880 = vmatprep.subr.bf16.mxu1 %v10238_v50 }
 0x380   :  { %8881 = vmatpush3.bf16.msra.mxu1 %v9486_v13  ;;  %v9508_v13 = vld [vmem:[#allocation20] sm:$0xff]  }
 0x381   :  { %8882 = vmatprep.subr.bf16.mxu1 %v10238_v50 }
 0x384   :  { %8883 = vmatpush3.bf16.msra.mxu1 %v9487_v24  ;;  %v9509_v24 = vld [vmem:[#allocation22 + $0x38] sm:$0xff]  }
 0x385   :  { %8884 = vmatprep.subr.bf16.mxu1 %v10238_v50 }
 0x388   :  { %8885 = vmatpush3.bf16.msra.mxu1 %v9488_v25  ;;  %v9510_v25 = vld [vmem:[#allocation22 + $0x30] sm:$0xff]  }
 0x389   :  { %8886 = vmatprep.subr.bf16.mxu1 %v10238_v50 }
 0x38c   :  { %8887 = vmatpush3.bf16.msra.mxu1 %v9489_v26  ;;  %v9511_v26 = vld [vmem:[#allocation22 + $0x28] sm:$0xff]  }
 0x38d   :  { %8888 = vmatprep.subr.bf16.mxu1 %v10238_v50 }
 0x390   :  { %8889 = vmatpush3.bf16.msra.mxu1 %v9490_v46  ;;  %v9522_v46 = vld [vmem:[#allocation23 + $0x64] ss:$8 sps:$4 sm:$0xff]  }
 0x391   :  { %8890 = vmatprep.subr.bf16.mxu1 %v10238_v50 }
 0x394   :  { %8891 = vmatpush3.bf16.msra.mxu1 %v9491_v36  ;;  %v9520_v36 = vld [vmem:[#allocation23 + $0x60] ss:$8 sps:$4 sm:$0xff]  }
 0x395   :  { %8892 = vmatprep.subr.bf16.mxu1 %v10238_v50 }
 0x398   :  { %8893 = vmatpush3.bf16.msra.mxu1 %v9492_v48  ;;  %v9525_v48 = vld [vmem:[#allocation23 + $0x54] ss:$8 sps:$4 sm:$0xff]  }
 0x399   :  { %8918 = vmatprep.subr.bf16.mxu1 %v10238_v50 }
 0x3bb   :  { %v3624_v8 = vpop.f32.mrf.mxu0 }
 0x3bc   :  { %v3625_v30 = vadd.f32 %v3624_v8, %v3263_v28  ;;  %v8320_v8 = vld [vmem:[#allocation17] ss:$0 sm:$0xff] }
 0x3bd   :  { %v3626_v47 = vpop.f32.mrf.mxu0  ;;  %v9513_v28 = vld [vmem:[#allocation22 + $0x18] sm:$0xff]  }
 0x3be   :  { %v3627_v37 = vadd.f32 %v3626_v47, %v3267_v29  ;;  %v9514_v29 = vld [vmem:[#allocation22 + $0x10] sm:$0xff]  }
 0x3bf   :  { %v3628_v19 = vpop.f32.mrf.mxu0 }
 0x3c1   :  { %v3629_v22 = vpop.f32.mrf.mxu0 }
 0x43b   :  { %v3665_v31 = vpop.f32.mrf.mxu1 }
 0x43c   :  { %v3666_v40 = vadd.f32 %v3665_v31, %v3625_v30  ;;  %v8329_v30 = vld [vmem:[%s10712_s12] ss:$0 sm:$0xff] }
 0x43d   :  { %v3667_v32 = vpop.f32.mrf.mxu1 }
 0x43e   :  { %v3668_v34 = vadd.f32 %v3667_v32, %v3627_v37  ;;  %v3672_v41 = vmax.f32 %v3666_v40, 0.0 }
 0x43f   :  { %v3669_v57 = vpop.f32.mrf.mxu1 }
 0x440   :  { %v3673_v43 = vmax.f32 %v3668_v34, 0.0  ;;  %v3674_v39 = vpack.c.bf16 %v3672_v41, %v3672_v41 }
 0x441   :  { %v3670_v44 = vpop.f32.mrf.mxu1 }
 0x442   :  { %v3675_v45 = vpack.c.bf16 %v3673_v43, %v3673_v43  ;;  %v9515_v43 = vld [vmem:[#allocation22 + $0x8] sm:$0xff]   ;;  %v9516_v44 = vld [vmem:[#allocation22] sm:$0xff]  }
 0x444   :  { %3843 = vmatprep.mubr.bf16.mxu0 %v3675_v45  ;;  %v9517_v45 = vld [vmem:[#allocation23 + $0x70] ss:$8 sps:$4 sm:$0xff]  }
 0x445   :  { %3844 = vmatmul.mubr.bf16.vlgmr.msra.gmra.mxu0 %v3674_v39  ;;  %v9519_v39 = vld [vmem:[#allocation23 + $0x74] ss:$8 sps:$4 sm:$0xff]  }
 0x446   :  { %8914 = vmatprep.mubr.msk.bf16.mxu0 %vm10239_vm0, %v10238_v50  ;;  %8899 = vmatpush3.bf16.msra.mxu0 %v9493_v21  ;;  %v9523_v21 = vld [vmem:[#allocation23 + $0x50] ss:$8 sps:$4 sm:$0xff]  }
 0x447   :  { %8900 = vmatprep.subr.bf16.mxu0 %v10238_v50 }
 0x44a   :  { %8901 = vmatpush3.bf16.msra.mxu0 %v9494_v51  ;;  %v9528_v51 = vld [vmem:[#allocation23 + $0x44] ss:$8 sps:$4 sm:$0xff]  }
 0x44b   :  { %8902 = vmatprep.subr.bf16.mxu0 %v10238_v50 }
 0x44e   :  { %8903 = vmatpush3.bf16.msra.mxu0 %v9495_v52  ;;  %v9526_v52 = vld [vmem:[#allocation23 + $0x40] ss:$8 sps:$4 sm:$0xff]  }
 0x44f   :  { %8904 = vmatprep.subr.bf16.mxu0 %v10238_v50 }
 0x452   :  { %8905 = vmatpush3.bf16.msra.mxu0 %v9496_v55  ;;  %v9531_v55 = vld [vmem:[#allocation23 + $0x34] ss:$8 sps:$4 sm:$0xff]  }
 0x453   :  { %8906 = vmatprep.subr.bf16.mxu0 %v10238_v50 }
 0x456   :  { %8907 = vmatpush3.bf16.msra.mxu0 %v9497_v20  ;;  %v9534_v20 = vld [vmem:[#allocation23 + $0x24] ss:$8 sps:$4 sm:$0xff]  }
 0x457   :  { %8908 = vmatprep.subr.bf16.mxu0 %v10238_v50 }
 0x45a   :  { %8909 = vmatpush3.bf16.msra.mxu0 %v9498_v56  ;;  %v9532_v56 = vld [vmem:[#allocation23 + $0x20] ss:$8 sps:$4 sm:$0xff]  }
 0x45b   :  { %8910 = vmatprep.subr.bf16.mxu0 %v10238_v50 }
 0x45e   :  { %8911 = vmatpush3.bf16.msra.mxu0 %v9499_v2 }
 0x45f   :  { %8912 = vmatprep.subr.bf16.mxu0 %v10238_v50 }
 0x462   :  { %8913 = vmatpush3.bf16.msra.mxu0 %v9500_v10  ;;  %v9540_v10 = vld [vmem:[#allocation23 + $0x4] ss:$8 sps:$4 sm:$0xff]  }
 0x463   :  { %8938 = vmatprep.subr.bf16.mxu0 %v10238_v50 }
 0x505   :  { %v8836_v58 = vpop.f32.mrf.mxu0 }
 0x507   :  { %v8837_v59 = vpop.f32.mrf.mxu0 }
 0x508   :  { %v8838_v60 = vadd.f32 %v8837_v59, %v8836_v58  ;;  %v9537_v58 = vld [vmem:[#allocation23 + $0x14] ss:$8 sps:$4 sm:$0xff]   ;;  %v8338_v59 = vld [vmem:[%s10714_s14] ss:$0 sm:$0xff] }
 0x509   :  { %v8839_v61 = vpop.f32.mrf.mxu0 }
 0x50a   :  { %v3846_v62 = vadd.f32 %v8838_v60, %v8303_v16  ;;  %v9535_v16 = vld [vmem:[#allocation23 + $0x10] ss:$8 sps:$4 sm:$0xff]  }
 0x50b   :  { %v8840_v63 = vpop.f32.mrf.mxu0 }
 0x50c   :  { %v3851_v0 = vmax.f32 %v3846_v62, 0.0 }
 0x50e   :  { %v3852_v1 = vpack.c.bf16 %v3851_v0, %v3851_v0 }
 0x510   :  { %8895 = vmatmul.mubr.bf16.vlgmr.msra.gmra.mxu1 %v3852_v1 }
 0x511   :  { %8934 = vmatprep.mubr.msk.bf16.mxu1 %vm10239_vm0, %v10238_v50  ;;  %8919 = vmatpush3.bf16.msra.mxu1 %v9501_v3  ;;  %v9538_v3 = vld [vmem:[#allocation23] ss:$8 sps:$4 sm:$0xff]  }
 0x512   :  { %8920 = vmatprep.subr.bf16.mxu1 %v10238_v50 }
 0x515   :  { %8921 = vmatpush3.bf16.msra.mxu1 %v9502_v4  ;;  %v10240_v4 = vmov 0  }
 0x516   :  { %8922 = vmatprep.subr.bf16.mxu1 %v10238_v50 }
 0x519   :  { %8923 = vmatpush3.bf16.msra.mxu1 %v9503_v5  ;;  %v9541_v5 = vld [vmem:[#allocation25 + $0xe0] ss:$16 sps:$4 sm:$0xff]  }
 0x51a   :  { %8924 = vmatprep.subr.bf16.mxu1 %v10238_v50 }
 0x51d   :  { %8925 = vmatpush3.bf16.msra.mxu1 %v9504_v6  ;;  %v9543_v6 = vld [vmem:[#allocation25 + $0xe4] ss:$16 sps:$4 sm:$0xff]  }
 0x51e   :  { %8926 = vmatprep.subr.bf16.mxu1 %v10238_v50 }
 0x521   :  { %8927 = vmatpush3.bf16.msra.mxu1 %v9505_v7  ;;  %v9546_v7 = vld [vmem:[#allocation25 + $0xec] ss:$16 sps:$4 sm:$0xff]  }
 0x522   :  { %8928 = vmatprep.subr.bf16.mxu1 %v10238_v50 }
 0x525   :  { %8929 = vmatpush3.bf16.msra.mxu1 %v9506_v54  ;;  %v9549_v54 = vld [vmem:[#allocation25 + $0xc4] ss:$16 sps:$4 sm:$0xff]  }
 0x526   :  { %8930 = vmatprep.subr.bf16.mxu1 %v10238_v50 }
 0x529   :  { %8931 = vmatpush3.bf16.msra.mxu1 %v9507_v23  ;;  %v9571_v23 = vld [vmem:[#allocation25 + $0x40] ss:$16 sps:$4 sm:$0xff]  }
 0x52a   :  { %8932 = vmatprep.subr.bf16.mxu1 %v10238_v50 }
 0x52d   :  { %8933 = vmatpush3.bf16.msra.mxu1 %v9508_v13  ;;  %v9579_v13 = vld [vmem:[#allocation25 + $0x24] ss:$16 sps:$4 sm:$0xff]  }
 0x52e   :  { %4413 = vmatprep.subr.bf16.mxu1 %v9519_v39 }
 0x5d0   :  { %v3958_v47 = vpop.f32.mrf.mxu1 }
 0x5d1   :  { %v3959_v18 = vadd.f32 %v8320_v8, %v3958_v47  ;;  %v9547_v8 = vld [vmem:[#allocation25 + $0xc0] ss:$16 sps:$4 sm:$0xff]   ;;  %v9555_v47 = vld [vmem:[#allocation25 + $0xa4] ss:$16 sps:$4 sm:$0xff]  }
 0x5d2   :  { %v8896_v49 = vpop.f32.mrf.mxu1 }
 0x5d3   :  { %v3964_v19 = vmax.f32 %v3959_v18, 0.0  ;;  %v9553_v18 = vld [vmem:[#allocation25 + $0xa0] ss:$16 sps:$4 sm:$0xff]   ;;  %v9561_v49 = vld [vmem:[#allocation25 + $0x84] ss:$16 sps:$4 sm:$0xff]  }
 0x5d4   :  { %v3961_v22 = vpop.f32.mrf.mxu1 }
 0x5d5   :  { %v3965_v17 = vpack.c.bf16 %v3964_v19, %v3964_v19  ;;  %v9559_v19 = vld [vmem:[#allocation25 + $0x80] ss:$16 sps:$4 sm:$0xff]   ;;  %v9567_v22 = vld [vmem:[#allocation25 + $0x64] ss:$16 sps:$4 sm:$0xff]  }
 0x5d6   :  { %v8897_v53 = vpop.f32.mrf.mxu1 }
 0x5d7   :  { %8915 = vmatmul.mubr.bf16.vlgmr.msra.gmra.mxu0 %v3965_v17  ;;  %v9565_v17 = vld [vmem:[#allocation25 + $0x60] ss:$16 sps:$4 sm:$0xff]   ;;  %v9573_v53 = vld [vmem:[#allocation25 + $0x44] ss:$16 sps:$4 sm:$0xff]  }
 0x5d8   :  { %8954 = vmatprep.mubr.msk.bf16.mxu0 %vm10239_vm0, %v10238_v50  ;;  %8939 = vmatpush3.bf16.msra.mxu0 %v9509_v24  ;;  %v9577_v24 = vld [vmem:[#allocation25 + $0x20] ss:$16 sps:$4 sm:$0xff]  }
 0x5d9   :  { %8940 = vmatprep.subr.bf16.mxu0 %v10238_v50 }
 0x5dc   :  { %8941 = vmatpush3.bf16.msra.mxu0 %v9510_v25  ;;  %v9585_v25 = vld [vmem:[#allocation25 + $0x4] ss:$16 sps:$4 sm:$0xff]  }
 0x5dd   :  { %8942 = vmatprep.subr.bf16.mxu0 %v10238_v50 }
 0x5e0   :  { %8943 = vmatpush3.bf16.msra.mxu0 %v9511_v26  ;;  %v9583_v26 = vld [vmem:[#allocation25] ss:$16 sps:$4 sm:$0xff]  }
 0x5e1   :  { %8944 = vmatprep.subr.bf16.mxu0 %v10238_v50 }
 0x5e4   :  { %8945 = vmatpush3.bf16.msra.mxu0 %v9512_v27  ;;  %v9591_v27 = vld [vmem:[#allocation25 + $0x1e4] ss:$16 sps:$4 sm:$0xff]  }
 0x5e5   :  { %8946 = vmatprep.subr.bf16.mxu0 %v10238_v50 }
 0x5e8   :  { %8947 = vmatpush3.bf16.msra.mxu0 %v9513_v28  ;;  %v9589_v28 = vld [vmem:[#allocation25 + $0x1e0] ss:$16 sps:$4 sm:$0xff]  }
 0x5e9   :  { %8948 = vmatprep.subr.bf16.mxu0 %v10238_v50 }
 0x5ec   :  { %8949 = vmatpush3.bf16.msra.mxu0 %v9514_v29  ;;  %v9597_v29 = vld [vmem:[#allocation25 + $0x1c4] ss:$16 sps:$4 sm:$0xff]  }
 0x5ed   :  { %8950 = vmatprep.subr.bf16.mxu0 %v10238_v50 }
 0x5f0   :  { %8951 = vmatpush3.bf16.msra.mxu0 %v9515_v43  ;;  %v9619_v43 = vld [vmem:[#allocation25 + $0x140] ss:$16 sps:$4 sm:$0xff]  }
 0x5f1   :  { %8952 = vmatprep.subr.bf16.mxu0 %v10238_v50  ;;  %v9529_v50 = vld [vmem:[#allocation23 + $0x30] ss:$8 sps:$4 sm:$0xff]  }
 0x5f4   :  { %8953 = vmatpush3.bf16.msra.mxu0 %v9516_v44  ;;  %v8347_v44 = vld [vmem:[%s10716_s16] ss:$0 sm:$0xff] }
 0x5f5   :  { %4864 = vmatprep.subr.bf16.mxu0 %v9543_v6  ;;  %v9606_v6 = vld [vmem:[#allocation25 + $0x1ac] ss:$16 sps:$4 sm:$0xff]  }
 0x697   :  { %v4071_v31 = vpop.f32.mrf.mxu0 }
 0x698   :  { %v4072_v37 = vadd.f32 %v8329_v30, %v4071_v31  ;;  %v9595_v30 = vld [vmem:[#allocation25 + $0x1c0] ss:$16 sps:$4 sm:$0xff]   ;;  %v9603_v31 = vld [vmem:[#allocation25 + $0x1a4] ss:$16 sps:$4 sm:$0xff]  }
 0x699   :  { %v8916_v40 = vpop.f32.mrf.mxu0 }
 0x69a   :  { %v4077_v32 = vmax.f32 %v4072_v37, 0.0  ;;  %v9601_v37 = vld [vmem:[#allocation25 + $0x1a0] ss:$16 sps:$4 sm:$0xff]   ;;  %v9609_v40 = vld [vmem:[#allocation25 + $0x184] ss:$16 sps:$4 sm:$0xff]  }
 0x69b   :  { %v4074_v34 = vpop.f32.mrf.mxu0 }
 0x69c   :  { %v4078_v41 = vpack.c.bf16 %v4077_v32, %v4077_v32  ;;  %v9607_v32 = vld [vmem:[#allocation25 + $0x180] ss:$16 sps:$4 sm:$0xff]   ;;  %v9615_v34 = vld [vmem:[#allocation25 + $0x164] ss:$16 sps:$4 sm:$0xff]  }
 0x69d   :  { %v8917_v57 = vpop.f32.mrf.mxu0 }
 0x69e   :  { %8935 = vmatmul.mubr.bf16.vlgmr.msra.gmra.mxu1 %v4078_v41  ;;  %v9613_v41 = vld [vmem:[#allocation25 + $0x160] ss:$16 sps:$4 sm:$0xff]   ;;  %v9621_v57 = vld [vmem:[#allocation25 + $0x144] ss:$16 sps:$4 sm:$0xff]  }
 0x69f   :  { %4414 = vmatpush1.bf16.msra.mxu1 %v9517_v45  ;;  %4445 = vmatprep.mubr.bf16.mxu1 %v10240_v4  ;;  %v9600_v4 = vld [vmem:[#allocation25 + $0x1cc] ss:$16 sps:$4 sm:$0xff]  }
 0x6a0   :  { %4415 = vmatprep.subr.bf16.mxu1 %v9522_v46 }
 0x6a3   :  { %4416 = vmatpush1.bf16.msra.mxu1 %v9520_v36 }
 0x6a4   :  { %4417 = vmatprep.subr.bf16.mxu1 %v9525_v48 }
 0x6a7   :  { %4418 = vmatpush1.bf16.msra.mxu1 %v9523_v21  ;;  %v9544_v21 = vld [vmem:[#allocation25 + $0xe8] ss:$16 sps:$4 sm:$0xff]  }
 0x6a8   :  { %4419 = vmatprep.subr.bf16.mxu1 %v9528_v51 }
 0x6ab   :  { %4420 = vmatpush1.bf16.msra.mxu1 %v9526_v52  ;;  %v9552_v52 = vld [vmem:[#allocation25 + $0xcc] ss:$16 sps:$4 sm:$0xff]  }
 0x6ac   :  { %4421 = vmatprep.subr.bf16.mxu1 %v9531_v55 }
 0x6af   :  { %4422 = vmatpush1.bf16.msra.mxu1 %v9529_v50  ;;  %v9550_v50 = vld [vmem:[#allocation25 + $0xc8] ss:$16 sps:$4 sm:$0xff]  }
 0x6b0   :  { %4423 = vmatprep.subr.bf16.mxu1 %v9534_v20  ;;  %v9558_v20 = vld [vmem:[#allocation25 + $0xac] ss:$16 sps:$4 sm:$0xff]  }
 0x6b3   :  { %4424 = vmatpush1.bf16.msra.mxu1 %v9532_v56  ;;  %v9556_v56 = vld [vmem:[#allocation25 + $0xa8] ss:$16 sps:$4 sm:$0xff]  }
 0x6b4   :  { %4425 = vmatprep.subr.bf16.mxu1 %v9537_v58  ;;  %v9564_v58 = vld [vmem:[#allocation25 + $0x8c] ss:$16 sps:$4 sm:$0xff]  }
 0x6b7   :  { %4426 = vmatpush1.bf16.msra.mxu1 %v9535_v16  ;;  %v9562_v16 = vld [vmem:[#allocation25 + $0x88] ss:$16 sps:$4 sm:$0xff]  }
 0x6b8   :  { %4427 = vmatprep.subr.bf16.mxu1 %v9540_v10  ;;  %v9594_v10 = vld [vmem:[#allocation25 + $0x1ec] ss:$16 sps:$4 sm:$0xff]  }
 0x6bb   :  { %4428 = vmatpush1.bf16.msra.mxu1 %v9538_v3  ;;  %v9592_v3 = vld [vmem:[#allocation25 + $0x1e8] ss:$16 sps:$4 sm:$0xff]  }
 0x6bc   :  { %4905 = vmatprep.subr.bf16.mxu1 %v9546_v7  ;;  %v9604_v7 = vld [vmem:[#allocation25 + $0x1a8] ss:$16 sps:$4 sm:$0xff]  }
 0x75e   :  { %v4184_v60 = vpop.f32.mrf.mxu1 }
 0x75f   :  { %v4185_v61 = vadd.f32 %v8338_v59, %v4184_v60  ;;  %v9570_v59 = vld [vmem:[#allocation25 + $0x6c] ss:$16 sps:$4 sm:$0xff]   ;;  %v9568_v60 = vld [vmem:[#allocation25 + $0x68] ss:$16 sps:$4 sm:$0xff]  }
 0x760   :  { %v8936_v62 = vpop.f32.mrf.mxu1 }
 0x761   :  { %v4190_v63 = vmax.f32 %v4185_v61, 0.0  ;;  %v9576_v61 = vld [vmem:[#allocation25 + $0x4c] ss:$16 sps:$4 sm:$0xff]   ;;  %v9574_v62 = vld [vmem:[#allocation25 + $0x48] ss:$16 sps:$4 sm:$0xff]  }
 0x762   :  { %v4187_v0 = vpop.f32.mrf.mxu1 }
 0x763   :  { %v4191_v1 = vpack.c.bf16 %v4190_v63, %v4190_v63  ;;  %v9582_v63 = vld [vmem:[#allocation25 + $0x2c] ss:$16 sps:$4 sm:$0xff]   ;;  %v9580_v0 = vld [vmem:[#allocation25 + $0x28] ss:$16 sps:$4 sm:$0xff]  }
 0x764   :  { %v8937_v2 = vpop.f32.mrf.mxu1 }
 0x765   :  { %8955 = vmatmul.mubr.bf16.vlgmr.msra.gmra.mxu0 %v4191_v1  ;;  %v9588_v1 = vld [vmem:[#allocation25 + $0xc] ss:$16 sps:$4 sm:$0xff]   ;;  %v9586_v2 = vld [vmem:[#allocation25 + $0x8] ss:$16 sps:$4 sm:$0xff]  }
 0x766   :  { %4865 = vmatpush1.bf16.msra.mxu0 %v9541_v5  ;;  %v9598_v5 = vld [vmem:[#allocation25 + $0x1c8] ss:$16 sps:$4 sm:$0xff]  }
 0x767   :  { %4866 = vmatprep.subr.bf16.mxu0 %v9549_v54  ;;  %v9612_v54 = vld [vmem:[#allocation25 + $0x18c] ss:$16 sps:$4 sm:$0xff]  }
 0x76a   :  { %4867 = vmatpush1.bf16.msra.mxu0 %v9547_v8  ;;  %v9610_v8 = vld [vmem:[#allocation25 + $0x188] ss:$16 sps:$4 sm:$0xff]  }
 0x76b   :  { %4868 = vmatprep.subr.bf16.mxu0 %v9555_v47  ;;  %v9618_v47 = vld [vmem:[#allocation25 + $0x16c] ss:$16 sps:$4 sm:$0xff]  }
 0x76e   :  { %4869 = vmatpush1.bf16.msra.mxu0 %v9553_v18  ;;  %v9616_v18 = vld [vmem:[#allocation25 + $0x168] ss:$16 sps:$4 sm:$0xff]  }
 0x76f   :  { %4870 = vmatprep.subr.bf16.mxu0 %v9561_v49  ;;  %v9624_v49 = vld [vmem:[#allocation25 + $0x14c] ss:$16 sps:$4 sm:$0xff]  }
 0x772   :  { %4871 = vmatpush1.bf16.msra.mxu0 %v9559_v19  ;;  %v9622_v19 = vld [vmem:[#allocation25 + $0x148] ss:$16 sps:$4 sm:$0xff]  }
 0x773   :  { %4872 = vmatprep.subr.bf16.mxu0 %v9567_v22  ;;  %v9627_v22 = vld [vmem:[#allocation25 + $0x124] ss:$16 sps:$4 sm:$0xff]  }
 0x776   :  { %4873 = vmatpush1.bf16.msra.mxu0 %v9565_v17  ;;  %v9630_v17 = vld [vmem:[#allocation25 + $0x12c] ss:$16 sps:$4 sm:$0xff]  }
 0x777   :  { %4874 = vmatprep.subr.bf16.mxu0 %v9573_v53  ;;  %v9625_v53 = vld [vmem:[#allocation25 + $0x120] ss:$16 sps:$4 sm:$0xff]  }
 0x77a   :  { %4875 = vmatpush1.bf16.msra.mxu0 %v9571_v23  ;;  %v9628_v23 = vld [vmem:[#allocation25 + $0x128] ss:$16 sps:$4 sm:$0xff]  }
 0x77b   :  { %4876 = vmatprep.subr.bf16.mxu0 %v9579_v13  ;;  %v9633_v13 = vld [vmem:[#allocation25 + $0x104] ss:$16 sps:$4 sm:$0xff]  }
 0x77e   :  { %4877 = vmatpush1.bf16.msra.mxu0 %v9577_v24  ;;  %v9636_v24 = vld [vmem:[#allocation25 + $0x10c] ss:$16 sps:$4 sm:$0xff]  }
 0x77f   :  { %4878 = vmatprep.subr.bf16.mxu0 %v9585_v25  ;;  %v9631_v25 = vld [vmem:[#allocation25 + $0x100] ss:$16 sps:$4 sm:$0xff]  }
 0x782   :  { %4879 = vmatpush1.bf16.msra.mxu0 %v9583_v26  ;;  %v9634_v26 = vld [vmem:[#allocation25 + $0x108] ss:$16 sps:$4 sm:$0xff]  }
 0x783   :  { %4880 = vmatprep.subr.bf16.mxu0 %v9591_v27  ;;  %v5010_v27 = vld [vmem:[#allocation26 + $0x1c0] sm:$0xff] }
 0x786   :  { %4881 = vmatpush2.bf16.msra.mxu0 %v9589_v28  ;;  %v5014_v28 = vld [vmem:[#allocation26 + $0x1e0] sm:$0xff] }
 0x787   :  { %4882 = vmatprep.subr.bf16.mxu0 %v9597_v29  ;;  %v5138_v29 = vld [vmem:[#allocation26 + $0x5c0] sm:$0xff] }
 0x78a   :  { %4883 = vmatpush2.bf16.msra.mxu0 %v9595_v30  ;;  %v8492_v30 = vcombine.low %v5010_v27, %v5014_v28 }
 0x78b   :  { %4884 = vmatprep.subr.bf16.mxu0 %v9603_v31  ;;  %v8493_v31 = vcombine.high %v5010_v27, %v5014_v28 }
 0x78e   :  { %4885 = vmatpush2.bf16.msra.mxu0 %v9601_v37  ;;  %v5142_v37 = vld [vmem:[#allocation26 + $0x5e0] sm:$0xff] }
 0x78f   :  { %4886 = vmatprep.subr.bf16.mxu0 %v9609_v40  ;;  %v8620_v40 = vcombine.low %v5138_v29, %v5142_v37 }
 0x792   :  { %4887 = vmatpush2.bf16.msra.mxu0 %v9607_v32  ;;  %v8621_v32 = vcombine.high %v5138_v29, %v5142_v37  ;;  %v4966_v37 = vld [vmem:[#allocation26 + $0x60] sm:$0xff] }
 0x793   :  { %4888 = vmatprep.subr.bf16.mxu0 %v9615_v34  ;;  %v4321_v34 = vld [vmem:[%s10718_s18] sm:$0x3] }
 0x796   :  { %4889 = vmatpush2.bf16.msra.mxu0 %v9613_v41  ;;  %v4326_v41 = vrot.slane %v4321_v34, %v10482_v11 }
 0x797   :  { %4890 = vmatprep.subr.bf16.mxu0 %v9621_v57  ;;  %v4330_v57 = vrot.slane %v4321_v34, %v10488_v14 }
 0x79a   :  { %4891 = vmatpush2.bf16.msra.mxu0 %v9619_v43 }
 0x79b   :  { %4892 = vmatprep.subr.bf16.mxu0 %v9627_v22 }
 0x79e   :  { %4893 = vmatpush2.bf16.msra.mxu0 %v9625_v53 }
 0x79f   :  { %4894 = vmatprep.subr.bf16.mxu0 %v9633_v13  ;;  %v4970_v13 = vld [vmem:[#allocation26 + $0x80] sm:$0xff] }
 0x7a2   :  { %4895 = vmatpush2.bf16.msra.mxu0 %v9631_v25  ;;  %v5098_v25 = vld [vmem:[#allocation26 + $0x480] sm:$0xff] }
 0x7a3   :  { %6532 = vmatprep.subr.bf16.mxu0 %v8493_v31  ;;  %v4962_v31 = vld [vmem:[#allocation26 + $0x40] sm:$0xff] }
 0x825   :  { %v4297_v45 = vpop.f32.mrf.mxu0 }
 0x826   :  { %v4298_v39 = vadd.f32 %v8347_v44, %v4297_v45 }
 0x827   :  { %v8956_v46 = vpop.f32.mrf.mxu0 }
 0x828   :  { %v4303_v36 = vmax.f32 %v4298_v39, 0.0 }
 0x829   :  { %v4300_v48 = vpop.f32.mrf.mxu0 }
 0x82a   :  { %v4304_v51 = vpack.c.bf16 %v4303_v36, %v4303_v36  ;;  %v5002_v48 = vld [vmem:[#allocation26 + $0x180] sm:$0xff] }
 0x82b   :  { %v8957_v55 = vpop.f32.mrf.mxu0 }
 0x82c   :  { %4446 = vmatmul.mubr.bf16.vlgmr.msra.gmra.mxu1 %v4304_v51  ;;  %v5006_v51 = vld [vmem:[#allocation26 + $0x1a0] sm:$0xff] }
 0x82d   :  { %4906 = vmatpush1.bf16.msra.mxu1 %v9544_v21  ;;  %v5134_v55 = vld [vmem:[#allocation26 + $0x5a0] sm:$0xff] }
 0x82e   :  { %4907 = vmatprep.subr.bf16.mxu1 %v9552_v52  ;;  %v5130_v52 = vld [vmem:[#allocation26 + $0x580] sm:$0xff] }
 0x831   :  { %4908 = vmatpush1.bf16.msra.mxu1 %v9550_v50 }
 0x832   :  { %4909 = vmatprep.subr.bf16.mxu1 %v9558_v20 }
 0x835   :  { %4910 = vmatpush1.bf16.msra.mxu1 %v9556_v56 }
 0x836   :  { %4911 = vmatprep.subr.bf16.mxu1 %v9564_v58  ;;  %v8485_v58 = vcombine.high %v5002_v48, %v5006_v51 }
 0x839   :  { %4912 = vmatpush1.bf16.msra.mxu1 %v9562_v16  ;;  %v8613_v16 = vcombine.high %v5130_v52, %v5134_v55 }
 0x83a   :  { %4913 = vmatprep.subr.bf16.mxu1 %v9570_v59  ;;  %v4994_v59 = vld [vmem:[#allocation26 + $0x140] sm:$0xff] }
 0x83d   :  { %4914 = vmatpush1.bf16.msra.mxu1 %v9568_v60  ;;  %v4998_v60 = vld [vmem:[#allocation26 + $0x160] sm:$0xff] }
 0x83e   :  { %4915 = vmatprep.subr.bf16.mxu1 %v9576_v61  ;;  %v5122_v61 = vld [vmem:[#allocation26 + $0x540] sm:$0xff] }
 0x841   :  { %4916 = vmatpush1.bf16.msra.mxu1 %v9574_v62  ;;  %v5126_v62 = vld [vmem:[#allocation26 + $0x560] sm:$0xff] }
 0x842   :  { %4917 = vmatprep.subr.bf16.mxu1 %v9582_v63  ;;  %v8484_v63 = vcombine.low %v5002_v48, %v5006_v51 }
 0x845   :  { %4918 = vmatpush1.bf16.msra.mxu1 %v9580_v0  ;;  %v8612_v0 = vcombine.low %v5130_v52, %v5134_v55  ;;  %v5074_v52 = vld [vmem:[#allocation26 + $0x3c0] sm:$0xff] }
 0x846   :  { %4919 = vmatprep.subr.bf16.mxu1 %v9588_v1  ;;  %v8477_v1 = vcombine.high %v4994_v59, %v4998_v60  ;;  %v5078_v55 = vld [vmem:[#allocation26 + $0x3e0] sm:$0xff] }
 0x849   :  { %4920 = vmatpush1.bf16.msra.mxu1 %v9586_v2  ;;  %v8605_v2 = vcombine.high %v5122_v61, %v5126_v62 }
 0x84a   :  { %4921 = vmatprep.subr.bf16.mxu1 %v9594_v10  ;;  %v4986_v10 = vld [vmem:[#allocation26 + $0x100] sm:$0xff] }
 0x84d   :  { %4922 = vmatpush2.bf16.msra.mxu1 %v9592_v3  ;;  %v4990_v3 = vld [vmem:[#allocation26 + $0x120] sm:$0xff] }
 0x84e   :  { %4923 = vmatprep.subr.bf16.mxu1 %v9600_v4  ;;  %v5114_v4 = vld [vmem:[#allocation26 + $0x500] sm:$0xff]  ;;  %v8468_v22 = vcombine.low %v4986_v10, %v4990_v3 }
 0x851   :  { %4924 = vmatpush2.bf16.msra.mxu1 %v9598_v5  ;;  %v5118_v5 = vld [vmem:[#allocation26 + $0x520] sm:$0xff] }
 0x852   :  { %4925 = vmatprep.subr.bf16.mxu1 %v9606_v6  ;;  %v8476_v6 = vcombine.low %v4994_v59, %v4998_v60  ;;  %v5066_v60 = vld [vmem:[#allocation26 + $0x380] sm:$0xff] }
 0x855   :  { %4926 = vmatpush2.bf16.msra.mxu1 %v9604_v7  ;;  %v8604_v7 = vcombine.low %v5122_v61, %v5126_v62  ;;  %v5070_v61 = vld [vmem:[#allocation26 + $0x3a0] sm:$0xff] }
 0x856   :  { %4927 = vmatprep.subr.bf16.mxu1 %v9612_v54  ;;  %v8469_v54 = vcombine.high %v4986_v10, %v4990_v3  ;;  %v5194_v62 = vld [vmem:[#allocation26 + $0x780] sm:$0xff] }
 0x857   :  { %v5058_v3 = vld [vmem:[#allocation26 + $0x340] sm:$0xff] }
 0x859   :  { %4928 = vmatpush2.bf16.msra.mxu1 %v9610_v8  ;;  %v8597_v8 = vcombine.high %v5114_v4, %v5118_v5 }
 0x85a   :  { %4929 = vmatprep.subr.bf16.mxu1 %v9618_v47  ;;  %v4978_v47 = vld [vmem:[#allocation26 + $0xc0] sm:$0xff] }
 0x85d   :  { %4930 = vmatpush2.bf16.msra.mxu1 %v9616_v18  ;;  %v4982_v18 = vld [vmem:[#allocation26 + $0xe0] sm:$0xff] }
 0x85e   :  { %4931 = vmatprep.subr.bf16.mxu1 %v9624_v49  ;;  %v5106_v49 = vld [vmem:[#allocation26 + $0x4c0] sm:$0xff]  ;;  %v8461_v53 = vcombine.high %v4978_v47, %v4982_v18  ;;  %v8460_v27 = vcombine.low %v4978_v47, %v4982_v18 }
 0x85f   :  { %v5050_v18 = vld [vmem:[#allocation26 + $0x300] sm:$0xff] }
 0x861   :  { %4932 = vmatpush2.bf16.msra.mxu1 %v9622_v19  ;;  %v5110_v19 = vld [vmem:[#allocation26 + $0x4e0] sm:$0xff] }
 0x862   :  { %4933 = vmatprep.subr.bf16.mxu1 %v9630_v17  ;;  %v8596_v17 = vcombine.low %v5114_v4, %v5118_v5  ;;  %v8588_v28 = vcombine.low %v5106_v49, %v5110_v19  ;;  %v5062_v4 = vld [vmem:[#allocation26 + $0x360] sm:$0xff] }
 0x863   :  { %v5186_v5 = vld [vmem:[#allocation26 + $0x740] sm:$0xff] }
 0x865   :  { %4934 = vmatpush2.bf16.msra.mxu1 %v9628_v23  ;;  %v8589_v23 = vcombine.high %v5106_v49, %v5110_v19  ;;  %v5054_v49 = vld [vmem:[#allocation26 + $0x320] sm:$0xff] }
 0x866   :  { %4935 = vmatprep.subr.bf16.mxu1 %v9636_v24  ;;  %v4974_v24 = vld [vmem:[#allocation26 + $0xa0] sm:$0xff] }
 0x867   :  { %v8453_v29 = vcombine.high %v4970_v13, %v4974_v24  ;;  %v8452_v34 = vcombine.low %v4970_v13, %v4974_v24  ;;  %v5178_v19 = vld [vmem:[#allocation26 + $0x700] sm:$0xff] }
 0x868   :  { %v5042_v24 = vld [vmem:[#allocation26 + $0x2c0] sm:$0xff] }
 0x869   :  { %4936 = vmatpush2.bf16.msra.mxu1 %v9634_v26  ;;  %v5102_v26 = vld [vmem:[#allocation26 + $0x4a0] sm:$0xff] }
 0x86a   :  { %6573 = vmatprep.subr.bf16.mxu1 %v8621_v32  ;;  %v5094_v32 = vld [vmem:[#allocation26 + $0x460] sm:$0xff] }
 0x8ec   :  { %v4447_v43 = vpop.f32.mrf.mxu1 }
 0x8ed   :  { %v4448_v44 = vadd.f32 %v4447_v43, %v4326_v41  ;;  %v8580_v41 = vcombine.low %v5098_v25, %v5102_v26 }
 0x8ee   :  { %v4449_v45 = vpop.f32.mrf.mxu1 }
 0x8ef   :  { %v4450_v39 = vadd.f32 %v4449_v45, %v4330_v57  ;;  %v4454_v46 = vmax.f32 %v4448_v44, 0.0  ;;  %v8445_v57 = vcombine.high %v4962_v31, %v4966_v37  ;;  %v4954_v44 = vld [vmem:[#allocation26] sm:$0xff] }
 0x8f0   :  { %v4451_v36 = vpop.f32.mrf.mxu1  ;;  %v4958_v45 = vld [vmem:[#allocation26 + $0x20] sm:$0xff] }
 0x8f1   :  { %v4455_v21 = vmax.f32 %v4450_v39, 0.0  ;;  %v4456_v56 = vpack.c.bf16 %v4454_v46, %v4454_v46  ;;  %v5082_v39 = vld [vmem:[#allocation26 + $0x400] sm:$0xff]  ;;  %v8444_v36 = vcombine.low %v4962_v31, %v4966_v37 }
 0x8f2   :  { %v4452_v50 = vpop.f32.mrf.mxu1  ;;  %v5086_v46 = vld [vmem:[#allocation26 + $0x420] sm:$0xff] }
 0x8f3   :  { %v4457_v20 = vpack.c.bf16 %v4455_v21, %v4455_v21  ;;  %v8437_v21 = vcombine.high %v4954_v44, %v4958_v45  ;;  %v8565_v51 = vcombine.high %v5082_v39, %v5086_v46  ;;  %v5202_v50 = vld [vmem:[#allocation26 + $0x7c0] sm:$0xff] }
 0x8f4   :  { %v5034_v37 = vld [vmem:[#allocation26 + $0x280] sm:$0xff] }
 0x8f5   :  { %4896 = vmatprep.mubr.bf16.mxu0 %v4457_v20  ;;  %4937 = vmatprep.mubr.bf16.mxu1 %v4457_v20  ;;  %v5206_v20 = vld [vmem:[#allocation26 + $0x7e0] sm:$0xff] }
 0x8f6   :  { %4897 = vmatmul.mubr.bf16.vlgmr.msra.gmra.mxu0 %v4456_v56  ;;  %4938 = vmatmul.mubr.bf16.vlgmr.msra.gmra.mxu1 %v4456_v56  ;;  %v8436_v56 = vcombine.low %v4954_v44, %v4958_v45  ;;  %v8685_v59 = vcombine.high %v5202_v50, %v5206_v20 }
 0x8f7   :  { %6533 = vmatpush1.bf16.msra.mxu0 %v8492_v30  ;;  %6574 = vmatpush1.bf16.msra.mxu1 %v8620_v40  ;;  %v8581_v30 = vcombine.high %v5098_v25, %v5102_v26  ;;  %v5090_v40 = vld [vmem:[#allocation26 + $0x440] sm:$0xff] }
 0x8f8   :  { %6534 = vmatprep.subr.bf16.mxu0 %v8485_v58  ;;  %6575 = vmatprep.subr.bf16.mxu1 %v8613_v16  ;;  %v8573_v43 = vcombine.high %v5090_v40, %v5094_v32  ;;  %v8572_v48 = vcombine.low %v5090_v40, %v5094_v32  ;;  %v8564_v58 = vcombine.low %v5082_v39, %v5086_v46  ;;  %v5046_v25 = vld [vmem:[#allocation26 + $0x2e0] sm:$0xff] }
 0x8f9   :  { %v8557_v16 = vcombine.high %v5074_v52, %v5078_v55  ;;  %v5170_v26 = vld [vmem:[#allocation26 + $0x6c0] sm:$0xff] }
 0x8fa   :  { %v5038_v40 = vld [vmem:[#allocation26 + $0x2a0] sm:$0xff] }
 0x8fb   :  { %6535 = vmatpush1.bf16.msra.mxu0 %v8484_v63  ;;  %6576 = vmatpush1.bf16.msra.mxu1 %v8612_v0  ;;  %v5198_v63 = vld [vmem:[#allocation26 + $0x7a0] sm:$0xff]  ;;  %v8556_v0 = vcombine.low %v5074_v52, %v5078_v55  ;;  %v8516_v45 = vcombine.low %v5034_v37, %v5038_v40 }
 0x8fc   :  { %6536 = vmatprep.subr.bf16.mxu0 %v8477_v1  ;;  %6577 = vmatprep.subr.bf16.mxu1 %v8605_v2  ;;  %v8684_v1 = vcombine.low %v5202_v50, %v5206_v20  ;;  %v8549_v2 = vcombine.high %v5066_v60, %v5070_v61  ;;  %v8677_v10 = vcombine.high %v5194_v62, %v5198_v63  ;;  %v5162_v32 = vld [vmem:[#allocation26 + $0x680] sm:$0xff] }
 0x8fd   :  { %v5026_v46 = vld [vmem:[#allocation26 + $0x240] sm:$0xff] }
 0x8fe   :  { %v5018_v20 = vld [vmem:[#allocation26 + $0x200] sm:$0xff] }
 0x8ff   :  { %6537 = vmatpush1.bf16.msra.mxu0 %v8476_v6  ;;  %6578 = vmatpush1.bf16.msra.mxu1 %v8604_v7  ;;  %v5190_v6 = vld [vmem:[#allocation26 + $0x760] sm:$0xff]  ;;  %v8548_v7 = vcombine.low %v5066_v60, %v5070_v61 }
 0x900   :  { %6538 = vmatprep.subr.bf16.mxu0 %v8469_v54  ;;  %6579 = vmatprep.subr.bf16.mxu1 %v8597_v8  ;;  %v8676_v54 = vcombine.low %v5194_v62, %v5198_v63  ;;  %v8541_v8 = vcombine.high %v5058_v3, %v5062_v4  ;;  %v8669_v47 = vcombine.high %v5186_v5, %v5190_v6  ;;  %v5011_v63 = vld [vmem:[#allocation26 + $0x1c8] sm:$0xff] }
 0x903   :  { %6539 = vmatpush1.bf16.msra.mxu0 %v8468_v22  ;;  %6580 = vmatpush1.bf16.msra.mxu1 %v8596_v17  ;;  %v5182_v22 = vld [vmem:[#allocation26 + $0x720] sm:$0xff]  ;;  %v8540_v17 = vcombine.low %v5058_v3, %v5062_v4  ;;  %v5143_v3 = vld [vmem:[#allocation26 + $0x5e8] sm:$0xff] }
 0x904   :  { %6540 = vmatprep.subr.bf16.mxu0 %v8461_v53  ;;  %6581 = vmatprep.subr.bf16.mxu1 %v8589_v23  ;;  %v8668_v53 = vcombine.low %v5186_v5, %v5190_v6  ;;  %v8533_v23 = vcombine.high %v5050_v18, %v5054_v49  ;;  %v8661_v13 = vcombine.high %v5178_v19, %v5182_v22  ;;  %v4522_v6 = vld [vmem:[%s10720_s20] sm:$0xf] }
 0x907   :  { %6541 = vmatpush1.bf16.msra.mxu0 %v8460_v27  ;;  %6582 = vmatpush1.bf16.msra.mxu1 %v8588_v28  ;;  %v5174_v27 = vld [vmem:[#allocation26 + $0x6e0] sm:$0xff]  ;;  %v8532_v28 = vcombine.low %v5050_v18, %v5054_v49 }
 0x908   :  { %6542 = vmatprep.subr.bf16.mxu0 %v8453_v29  ;;  %6583 = vmatprep.subr.bf16.mxu1 %v8581_v30  ;;  %v8660_v29 = vcombine.low %v5178_v19, %v5182_v22  ;;  %v8525_v30 = vcombine.high %v5042_v24, %v5046_v25  ;;  %v8653_v31 = vcombine.high %v5170_v26, %v5174_v27 }
 0x90b   :  { %6543 = vmatpush1.bf16.msra.mxu0 %v8452_v34  ;;  %6584 = vmatpush1.bf16.msra.mxu1 %v8580_v41  ;;  %v5166_v34 = vld [vmem:[#allocation26 + $0x6a0] sm:$0xff]  ;;  %v8524_v41 = vcombine.low %v5042_v24, %v5046_v25 }
 0x90c   :  { %6544 = vmatprep.subr.bf16.mxu0 %v8445_v57  ;;  %6585 = vmatprep.subr.bf16.mxu1 %v8573_v43  ;;  %v8652_v57 = vcombine.low %v5170_v26, %v5174_v27  ;;  %v8517_v43 = vcombine.high %v5034_v37, %v5038_v40  ;;  %v8645_v44 = vcombine.high %v5162_v32, %v5166_v34  ;;  %v5007_v40 = vld [vmem:[#allocation26 + $0x1a8] sm:$0xff] }
 0x90d   :  { %v8644_v39 = vcombine.low %v5162_v32, %v5166_v34  ;;  %v5131_v32 = vld [vmem:[#allocation26 + $0x588] sm:$0xff] }
 0x90e   :  { %v5135_v34 = vld [vmem:[#allocation26 + $0x5a8] sm:$0xff] }
 0x90f   :  { %6545 = vmatpush1.bf16.msra.mxu0 %v8444_v36  ;;  %6586 = vmatpush1.bf16.msra.mxu1 %v8572_v48  ;;  %v5030_v36 = vld [vmem:[#allocation26 + $0x260] sm:$0xff] }
 0x910   :  { %6546 = vmatprep.subr.bf16.mxu0 %v8437_v21  ;;  %6587 = vmatprep.subr.bf16.mxu1 %v8565_v51  ;;  %v5154_v48 = vld [vmem:[#allocation26 + $0x640] sm:$0xff]  ;;  %v8509_v21 = vcombine.high %v5026_v46, %v5030_v36  ;;  %v8508_v52 = vcombine.low %v5026_v46, %v5030_v36  ;;  %v8615_v46 = vcombine.high %v5131_v32, %v5135_v34  ;;  %v4999_v36 = vld [vmem:[#allocation26 + $0x168] sm:$0xff] }
 0x911   :  { %v5158_v51 = vld [vmem:[#allocation26 + $0x660] sm:$0xff] }
 0x912   :  { %v8636_v55 = vcombine.low %v5154_v48, %v5158_v51  ;;  %v8637_v50 = vcombine.high %v5154_v48, %v5158_v51  ;;  %v5123_v48 = vld [vmem:[#allocation26 + $0x548] sm:$0xff] }
 0x913   :  { %6547 = vmatpush1.bf16.msra.mxu0 %v8436_v56  ;;  %6588 = vmatpush1.bf16.msra.mxu1 %v8564_v58  ;;  %v5022_v56 = vld [vmem:[#allocation26 + $0x220] sm:$0xff] }
 0x914   :  { %6548 = vmatprep.subr.bf16.mxu0 %v8557_v16  ;;  %6589 = vmatprep.subr.bf16.mxu1 %v8685_v59  ;;  %v5146_v58 = vld [vmem:[#allocation26 + $0x600] sm:$0xff]  ;;  %v8501_v16 = vcombine.high %v5018_v20, %v5022_v56  ;;  %v8500_v60 = vcombine.low %v5018_v20, %v5022_v56  ;;  %v4987_v20 = vld [vmem:[#allocation26 + $0x108] sm:$0xff] }
 0x915   :  { %v5150_v59 = vld [vmem:[#allocation26 + $0x620] sm:$0xff]  ;;  %v4991_v56 = vld [vmem:[#allocation26 + $0x128] sm:$0xff] }
 0x916   :  { %v8628_v61 = vcombine.low %v5146_v58, %v5150_v59  ;;  %v8629_v62 = vcombine.high %v5146_v58, %v5150_v59  ;;  %v5115_v58 = vld [vmem:[#allocation26 + $0x508] sm:$0xff] }
 0x917   :  { %6549 = vmatpush2.bf16.msra.mxu0 %v8556_v0  ;;  %6590 = vmatpush2.bf16.msra.mxu1 %v8684_v1  ;;  %v5015_v0 = vld [vmem:[#allocation26 + $0x1e8] sm:$0xff] }
 0x918   :  { %6550 = vmatprep.subr.bf16.mxu0 %v8549_v2  ;;  %6591 = vmatprep.subr.bf16.mxu1 %v8677_v10  ;;  %v5139_v1 = vld [vmem:[#allocation26 + $0x5c8] sm:$0xff]  ;;  %v8494_v2 = vcombine.low %v5011_v63, %v5015_v0  ;;  %v8495_v10 = vcombine.high %v5011_v63, %v5015_v0 }
 0x919   :  { %v8622_v4 = vcombine.low %v5139_v1, %v5143_v3  ;;  %v8623_v5 = vcombine.high %v5139_v1, %v5143_v3  ;;  %v4979_v63 = vld [vmem:[#allocation26 + $0xc8] sm:$0xff] }
 0x91a   :  { %v4983_v0 = vld [vmem:[#allocation26 + $0xe8] sm:$0xff] }
 0x91b   :  { %6551 = vmatpush2.bf16.msra.mxu0 %v8548_v7  ;;  %6592 = vmatpush2.bf16.msra.mxu1 %v8676_v54  ;;  %v4527_v7 = vrot.slane %v4522_v6, %v10482_v11  ;;  %v4535_v54 = vrot.slane %v4522_v6, %v10485_v12  ;;  %v5107_v1 = vld [vmem:[#allocation26 + $0x4c8] sm:$0xff] }
 0x91c   :  { %6552 = vmatprep.subr.bf16.mxu0 %v8541_v8  ;;  %6593 = vmatprep.subr.bf16.mxu1 %v8669_v47  ;;  %v4531_v8 = vrot.slane %v4522_v6, %v10488_v14  ;;  %v4539_v47 = vrot.slane %v4522_v6, %v10491_v15  ;;  %v4971_v6 = vld [vmem:[#allocation26 + $0x88] sm:$0xff] }
 0x91f   :  { %6553 = vmatpush2.bf16.msra.mxu0 %v8540_v17  ;;  %6594 = vmatpush2.bf16.msra.mxu1 %v8668_v53 }
 0x920   :  { %6554 = vmatprep.subr.bf16.mxu0 %v8533_v23  ;;  %6595 = vmatprep.subr.bf16.mxu1 %v8661_v13 }
 0x923   :  { %6555 = vmatpush2.bf16.msra.mxu0 %v8532_v28  ;;  %6596 = vmatpush2.bf16.msra.mxu1 %v8660_v29 }
 0x924   :  { %6556 = vmatprep.subr.bf16.mxu0 %v8525_v30  ;;  %6597 = vmatprep.subr.bf16.mxu1 %v8653_v31  ;;  %v5003_v30 = vld [vmem:[#allocation26 + $0x188] sm:$0xff] }
 0x925   :  { %v8486_v51 = vcombine.low %v5003_v30, %v5007_v40 }
 0x927   :  { %6557 = vmatpush2.bf16.msra.mxu0 %v8524_v41  ;;  %6598 = vmatpush2.bf16.msra.mxu1 %v8652_v57 }
 0x928   :  { %6558 = vmatprep.subr.bf16.mxu0 %v8517_v43  ;;  %6599 = vmatprep.subr.bf16.mxu1 %v8645_v44 }
 0x92b   :  { %6559 = vmatpush2.bf16.msra.mxu0 %v8516_v45  ;;  %6600 = vmatpush2.bf16.msra.mxu1 %v8644_v39  ;;  %v4995_v45 = vld [vmem:[#allocation26 + $0x148] sm:$0xff]  ;;  %v8487_v39 = vcombine.high %v5003_v30, %v5007_v40 }
 0x92c   :  { %6560 = vmatprep.subr.bf16.mxu0 %v8509_v21  ;;  %6601 = vmatprep.subr.bf16.mxu1 %v8637_v50  ;;  %v5127_v21 = vld [vmem:[#allocation26 + $0x568] sm:$0xff]  ;;  %v8478_v59 = vcombine.low %v4995_v45, %v4999_v36 }
 0x92d   :  { %v8607_v50 = vcombine.high %v5123_v48, %v5127_v21  ;;  %v5087_v30 = vld [vmem:[#allocation26 + $0x428] sm:$0xff] }
 0x92f   :  { %6561 = vmatpush2.bf16.msra.mxu0 %v8508_v52  ;;  %6602 = vmatpush2.bf16.msra.mxu1 %v8636_v55  ;;  %v8614_v52 = vcombine.low %v5131_v32, %v5135_v34  ;;  %v8479_v55 = vcombine.high %v4995_v45, %v4999_v36  ;;  %v5075_v34 = vld [vmem:[#allocation26 + $0x3c8] sm:$0xff] }
 0x930   :  { %6562 = vmatprep.subr.bf16.mxu0 %v8501_v16  ;;  %6603 = vmatprep.subr.bf16.mxu1 %v8629_v62  ;;  %v5119_v16 = vld [vmem:[#allocation26 + $0x528] sm:$0xff] }
 0x931   :  { %v8599_v62 = vcombine.high %v5115_v58, %v5119_v16  ;;  %v8598_v3 = vcombine.low %v5115_v58, %v5119_v16  ;;  %v5079_v45 = vld [vmem:[#allocation26 + $0x3e8] sm:$0xff] }
 0x933   :  { %6563 = vmatpush2.bf16.msra.mxu0 %v8500_v60  ;;  %6604 = vmatpush2.bf16.msra.mxu1 %v8628_v61  ;;  %v8606_v60 = vcombine.low %v5123_v48, %v5127_v21  ;;  %v8471_v61 = vcombine.high %v4987_v20, %v4991_v56  ;;  %v8559_v21 = vcombine.high %v5075_v34, %v5079_v45 }
 0x934   :  { %6614 = vmatprep.subr.bf16.mxu0 %v8495_v10  ;;  %6655 = vmatprep.subr.bf16.mxu1 %v8623_v5  ;;  %v8470_v10 = vcombine.low %v4987_v20, %v4991_v56  ;;  %v5199_v20 = vld [vmem:[#allocation26 + $0x7a8] sm:$0xff]  ;;  %v8558_v56 = vcombine.low %v5075_v34, %v5079_v45 }
 0x935   :  { %v5159_v34 = vld [vmem:[#allocation26 + $0x668] sm:$0xff] }
 0x9b6   :  { %v4898_v18 = vpop.f32.mrf.mxu0  ;;  %v4939_v49 = vpop.f32.mrf.mxu1 }
 0x9b7   :  { %v4899_v19 = vadd.f32 %v4898_v18, %v4527_v7  ;;  %v4940_v22 = vadd.f32 %v4939_v49, %v4535_v54  ;;  %v4975_v7 = vld [vmem:[#allocation26 + $0xa8] sm:$0xff] }
 0x9b8   :  { %v4900_v17 = vpop.f32.mrf.mxu0  ;;  %v4941_v53 = vpop.f32.mrf.mxu1  ;;  %v5099_v54 = vld [vmem:[#allocation26 + $0x488] sm:$0xff]  ;;  %v8455_v49 = vcombine.high %v4971_v6, %v4975_v7 }
 0x9b9   :  { %v4901_v23 = vadd.f32 %v4900_v17, %v4531_v8  ;;  %v4942_v13 = vadd.f32 %v4941_v53, %v4539_v47  ;;  %v4946_v24 = vmax.f32 %v4899_v19, 0.0  ;;  %v4948_v25 = vmax.f32 %v4940_v22, 0.0  ;;  %v5103_v8 = vld [vmem:[#allocation26 + $0x4a8] sm:$0xff] }
 0x9ba   :  { %v4902_v26 = vpop.f32.mrf.mxu0  ;;  %v4943_v27 = vpop.f32.mrf.mxu1  ;;  %v8462_v47 = vcombine.low %v4979_v63, %v4983_v0  ;;  %v8583_v19 = vcombine.high %v5099_v54, %v5103_v8  ;;  %v4963_v22 = vld [vmem:[#allocation26 + $0x48] sm:$0xff] }
 0x9bb   :  { %v4947_v28 = vmax.f32 %v4901_v23, 0.0  ;;  %v4949_v29 = vmax.f32 %v4942_v13, 0.0  ;;  %v10641_v43 = vpack.c.bf16 %v4946_v24, %v4946_v24  ;;  %v10643_v44 = vpack.c.bf16 %v4948_v25, %v4948_v25  ;;  %v4967_v17 = vld [vmem:[#allocation26 + $0x68] sm:$0xff] }
 0x9bc   :  { %v4903_v31 = vpop.f32.mrf.mxu0  ;;  %v4944_v37 = vpop.f32.mrf.mxu1  ;;  %v5091_v53 = vld [vmem:[#allocation26 + $0x448] sm:$0xff]  ;;  %v8454_v13 = vcombine.low %v4971_v6, %v4975_v7  ;;  %v8582_v24 = vcombine.low %v5099_v54, %v5103_v8  ;;  %v8447_v25 = vcombine.high %v4963_v22, %v4967_v17 }
 0x9bd   :  { %v10637_v41 = vpack.c.bf16 %v4947_v28, %v4947_v28  ;;  %v10639_v57 = vpack.c.bf16 %v4949_v29, %v4949_v29  ;;  %v5095_v23 = vld [vmem:[#allocation26 + $0x468] sm:$0xff]  ;;  %v8446_v31 = vcombine.low %v4963_v22, %v4967_v17 }
 0x9be   :  { %v8575_v26 = vcombine.high %v5091_v53, %v5095_v23  ;;  %v4955_v27 = vld [vmem:[#allocation26 + $0x8] sm:$0xff]  ;;  %v8574_v37 = vcombine.low %v5091_v53, %v5095_v23 }
 0x9bf   :  { %6564 = vmatprep.mubr.bf16.mxu0 %v10637_v41  ;;  %6605 = vmatprep.mubr.bf16.mxu1 %v10639_v57  ;;  %v4959_v28 = vld [vmem:[#allocation26 + $0x28] sm:$0xff] }
 0x9c0   :  { %6565 = vmatmul.mubr.bf16.vlgmr.msra.gmra.mxu0 %v10641_v43  ;;  %6606 = vmatmul.mubr.bf16.vlgmr.msra.gmra.mxu1 %v10643_v44  ;;  %v5083_v29 = vld [vmem:[#allocation26 + $0x408] sm:$0xff]  ;;  %v8439_v40 = vcombine.high %v4955_v27, %v4959_v28  ;;  %v8438_v36 = vcombine.low %v4955_v27, %v4959_v28 }
 0x9c1   :  { %6615 = vmatpush1.bf16.msra.mxu0 %v8494_v2  ;;  %6656 = vmatpush1.bf16.msra.mxu1 %v8622_v4  ;;  %v5111_v2 = vld [vmem:[#allocation26 + $0x4e8] sm:$0xff]  ;;  %v8463_v4 = vcombine.high %v4979_v63, %v4983_v0  ;;  %v8567_v32 = vcombine.high %v5083_v29, %v5087_v30  ;;  %v8566_v48 = vcombine.low %v5083_v29, %v5087_v30 }
 0x9c2   :  { %6646 = vmatprep.mubr.bf16.mxu0 %v10637_v41  ;;  %6687 = vmatprep.mubr.bf16.mxu1 %v10639_v57  ;;  %v8591_v5 = vcombine.high %v5107_v1, %v5111_v2  ;;  %v8590_v18 = vcombine.low %v5107_v1, %v5111_v2  ;;  %v5191_v63 = vld [vmem:[#allocation26 + $0x768] sm:$0xff] }
 0x9c3   :  { %6616 = vmatprep.subr.bf16.mxu0 %v8487_v39  ;;  %6657 = vmatprep.subr.bf16.mxu1 %v8615_v46  ;;  %v5203_v39 = vld [vmem:[#allocation26 + $0x7c8] sm:$0xff] }
 0x9c4   :  { %v5207_v46 = vld [vmem:[#allocation26 + $0x7e8] sm:$0xff] }
 0x9c5   :  { %6617 = vmatpush1.bf16.msra.mxu0 %v8486_v51  ;;  %6658 = vmatpush1.bf16.msra.mxu1 %v8614_v52  ;;  %v8687_v51 = vcombine.high %v5203_v39, %v5207_v46  ;;  %v5067_v52 = vld [vmem:[#allocation26 + $0x388] sm:$0xff]  ;;  %v8686_v58 = vcombine.low %v5203_v39, %v5207_v46 }
 0x9c6   :  { %6618 = vmatprep.subr.bf16.mxu0 %v8479_v55  ;;  %6659 = vmatprep.subr.bf16.mxu1 %v8607_v50  ;;  %v5071_v55 = vld [vmem:[#allocation26 + $0x3a8] sm:$0xff] }
 0x9c7   :  { %v5195_v50 = vld [vmem:[#allocation26 + $0x788] sm:$0xff]  ;;  %v8551_v16 = vcombine.high %v5067_v52, %v5071_v55  ;;  %v8550_v0 = vcombine.low %v5067_v52, %v5071_v55 }
 0x9c8   :  { %v8678_v1 = vcombine.low %v5195_v50, %v5199_v20  ;;  %v5183_v6 = vld [vmem:[#allocation26 + $0x728] sm:$0xff] }
 0x9c9   :  { %6619 = vmatpush1.bf16.msra.mxu0 %v8478_v59  ;;  %6660 = vmatpush1.bf16.msra.mxu1 %v8606_v60  ;;  %v8679_v59 = vcombine.high %v5195_v50, %v5199_v20  ;;  %v5059_v60 = vld [vmem:[#allocation26 + $0x348] sm:$0xff] }
 0x9ca   :  { %6620 = vmatprep.subr.bf16.mxu0 %v8471_v61  ;;  %6661 = vmatprep.subr.bf16.mxu1 %v8599_v62  ;;  %v5063_v61 = vld [vmem:[#allocation26 + $0x368] sm:$0xff] }
 0x9cb   :  { %v5187_v62 = vld [vmem:[#allocation26 + $0x748] sm:$0xff]  ;;  %v8543_v2 = vcombine.high %v5059_v60, %v5063_v61  ;;  %v8542_v7 = vcombine.low %v5059_v60, %v5063_v61  ;;  %v5144_v60 = vld [vmem:[#allocation26 + $0x5f0] sm:$0xff] }
 0x9cc   :  { %v8670_v54 = vcombine.low %v5187_v62, %v5191_v63  ;;  %v5175_v22 = vld [vmem:[#allocation26 + $0x6e8] sm:$0xff] }
 0x9cd   :  { %6621 = vmatpush1.bf16.msra.mxu0 %v8470_v10  ;;  %6662 = vmatpush1.bf16.msra.mxu1 %v8598_v3  ;;  %v8671_v10 = vcombine.high %v5187_v62, %v5191_v63  ;;  %v5051_v3 = vld [vmem:[#allocation26 + $0x308] sm:$0xff] }
 0x9ce   :  { %6622 = vmatprep.subr.bf16.mxu0 %v8463_v4  ;;  %6663 = vmatprep.subr.bf16.mxu1 %v8591_v5  ;;  %v5055_v4 = vld [vmem:[#allocation26 + $0x328] sm:$0xff] }
 0x9cf   :  { %v5179_v5 = vld [vmem:[#allocation26 + $0x708] sm:$0xff]  ;;  %v8535_v8 = vcombine.high %v5051_v3, %v5055_v4  ;;  %v8534_v17 = vcombine.low %v5051_v3, %v5055_v4  ;;  %v5136_v3 = vld [vmem:[#allocation26 + $0x5b0] sm:$0xff] }
 0x9d0   :  { %v8662_v53 = vcombine.low %v5179_v5, %v5183_v6  ;;  %v5167_v27 = vld [vmem:[#allocation26 + $0x6a8] sm:$0xff] }
 0x9d1   :  { %6623 = vmatpush1.bf16.msra.mxu0 %v8462_v47  ;;  %6664 = vmatpush1.bf16.msra.mxu1 %v8590_v18  ;;  %v8663_v47 = vcombine.high %v5179_v5, %v5183_v6  ;;  %v5043_v18 = vld [vmem:[#allocation26 + $0x2c8] sm:$0xff] }
 0x9d2   :  { %6624 = vmatprep.subr.bf16.mxu0 %v8455_v49  ;;  %6665 = vmatprep.subr.bf16.mxu1 %v8583_v19  ;;  %v5047_v49 = vld [vmem:[#allocation26 + $0x2e8] sm:$0xff] }
 0x9d3   :  { %v5171_v19 = vld [vmem:[#allocation26 + $0x6c8] sm:$0xff]  ;;  %v8527_v23 = vcombine.high %v5043_v18, %v5047_v49  ;;  %v8526_v28 = vcombine.low %v5043_v18, %v5047_v49  ;;  %v5128_v18 = vld [vmem:[#allocation26 + $0x570] sm:$0xff] }
 0x9d4   :  { %v8654_v29 = vcombine.low %v5171_v19, %v5175_v22  ;;  %v5151_v52 = vld [vmem:[#allocation26 + $0x628] sm:$0xff] }
 0x9d5   :  { %6625 = vmatpush1.bf16.msra.mxu0 %v8454_v13  ;;  %6666 = vmatpush1.bf16.msra.mxu1 %v8582_v24  ;;  %v8655_v13 = vcombine.high %v5171_v19, %v5175_v22  ;;  %v5035_v24 = vld [vmem:[#allocation26 + $0x288] sm:$0xff] }
 0x9d6   :  { %6626 = vmatprep.subr.bf16.mxu0 %v8447_v25  ;;  %6667 = vmatprep.subr.bf16.mxu1 %v8575_v26  ;;  %v5039_v25 = vld [vmem:[#allocation26 + $0x2a8] sm:$0xff] }
 0x9d7   :  { %v5163_v26 = vld [vmem:[#allocation26 + $0x688] sm:$0xff]  ;;  %v8519_v30 = vcombine.high %v5035_v24, %v5039_v25  ;;  %v8518_v45 = vcombine.low %v5035_v24, %v5039_v25  ;;  %v5120_v24 = vld [vmem:[#allocation26 + $0x530] sm:$0xff] }
 0x9d8   :  { %v8646_v39 = vcombine.low %v5163_v26, %v5167_v27 }
 0x9d9   :  { %6627 = vmatpush1.bf16.msra.mxu0 %v8446_v31  ;;  %6668 = vmatpush1.bf16.msra.mxu1 %v8574_v37  ;;  %v8647_v31 = vcombine.high %v5163_v26, %v5167_v27  ;;  %v5027_v37 = vld [vmem:[#allocation26 + $0x248] sm:$0xff] }
 0x9da   :  { %6628 = vmatprep.subr.bf16.mxu0 %v8439_v40  ;;  %6669 = vmatprep.subr.bf16.mxu1 %v8567_v32  ;;  %v5031_v40 = vld [vmem:[#allocation26 + $0x268] sm:$0xff] }
 0x9db   :  { %v5155_v32 = vld [vmem:[#allocation26 + $0x648] sm:$0xff]  ;;  %v8511_v46 = vcombine.high %v5027_v37, %v5031_v40  ;;  %v8510_v55 = vcombine.low %v5027_v37, %v5031_v40  ;;  %v5112_v37 = vld [vmem:[#allocation26 + $0x4f0] sm:$0xff] }
 0x9dc   :  { %v8638_v50 = vcombine.low %v5155_v32, %v5159_v34 }
 0x9dd   :  { %6629 = vmatpush1.bf16.msra.mxu0 %v8438_v36  ;;  %6670 = vmatpush1.bf16.msra.mxu1 %v8566_v48  ;;  %v8639_v36 = vcombine.high %v5155_v32, %v5159_v34  ;;  %v5019_v48 = vld [vmem:[#allocation26 + $0x208] sm:$0xff] }
 0x9de   :  { %6630 = vmatprep.subr.bf16.mxu0 %v8559_v21  ;;  %6671 = vmatprep.subr.bf16.mxu1 %v8687_v51  ;;  %v5023_v21 = vld [vmem:[#allocation26 + $0x228] sm:$0xff] }
 0x9df   :  { %v5147_v51 = vld [vmem:[#allocation26 + $0x608] sm:$0xff]  ;;  %v8503_v20 = vcombine.high %v5019_v48, %v5023_v21  ;;  %v8502_v61 = vcombine.low %v5019_v48, %v5023_v21  ;;  %v5104_v48 = vld [vmem:[#allocation26 + $0x4b0] sm:$0xff] }
 0x9e0   :  { %v8630_v62 = vcombine.low %v5147_v51, %v5151_v52 }
 0x9e1   :  { %6631 = vmatpush2.bf16.msra.mxu0 %v8558_v56  ;;  %6672 = vmatpush2.bf16.msra.mxu1 %v8686_v58  ;;  %v8631_v56 = vcombine.high %v5147_v51, %v5151_v52  ;;  %v5012_v58 = vld [vmem:[#allocation26 + $0x1d0] sm:$0xff] }
 0x9e2   :  { %6632 = vmatprep.subr.bf16.mxu0 %v8551_v16  ;;  %6673 = vmatprep.subr.bf16.mxu1 %v8679_v59  ;;  %v5016_v16 = vld [vmem:[#allocation26 + $0x1f0] sm:$0xff] }
 0x9e3   :  { %v5140_v59 = vld [vmem:[#allocation26 + $0x5d0] sm:$0xff]  ;;  %v8497_v63 = vcombine.high %v5012_v58, %v5016_v16  ;;  %v8496_v4 = vcombine.low %v5012_v58, %v5016_v16 }
 0x9e4   :  { %v8624_v5 = vcombine.low %v5140_v59, %v5144_v60  ;;  %v5096_v58 = vld [vmem:[#allocation26 + $0x470] sm:$0xff] }
 0x9e5   :  { %6633 = vmatpush2.bf16.msra.mxu0 %v8550_v0  ;;  %6674 = vmatpush2.bf16.msra.mxu1 %v8678_v1  ;;  %v8625_v0 = vcombine.high %v5140_v59, %v5144_v60  ;;  %v5004_v1 = vld [vmem:[#allocation26 + $0x190] sm:$0xff] }
 0x9e6   :  { %6634 = vmatprep.subr.bf16.mxu0 %v8543_v2  ;;  %6675 = vmatprep.subr.bf16.mxu1 %v8671_v10  ;;  %v5008_v2 = vld [vmem:[#allocation26 + $0x1b0] sm:$0xff] }
 0x9e7   :  { %v5132_v10 = vld [vmem:[#allocation26 + $0x590] sm:$0xff]  ;;  %v8489_v6 = vcombine.high %v5004_v1, %v5008_v2  ;;  %v8488_v49 = vcombine.low %v5004_v1, %v5008_v2 }
 0x9e8   :  { %v8616_v19 = vcombine.low %v5132_v10, %v5136_v3  ;;  %v5088_v1 = vld [vmem:[#allocation26 + $0x430] sm:$0xff] }
 0x9e9   :  { %6635 = vmatpush2.bf16.msra.mxu0 %v8542_v7  ;;  %6676 = vmatpush2.bf16.msra.mxu1 %v8670_v54  ;;  %v8617_v7 = vcombine.high %v5132_v10, %v5136_v3  ;;  %v4996_v54 = vld [vmem:[#allocation26 + $0x150] sm:$0xff] }
 0x9ea   :  { %6636 = vmatprep.subr.bf16.mxu0 %v8535_v8  ;;  %6677 = vmatprep.subr.bf16.mxu1 %v8663_v47  ;;  %v5000_v8 = vld [vmem:[#allocation26 + $0x170] sm:$0xff] }
 0x9eb   :  { %v5124_v47 = vld [vmem:[#allocation26 + $0x550] sm:$0xff]  ;;  %v8481_v22 = vcombine.high %v4996_v54, %v5000_v8  ;;  %v8480_v25 = vcombine.low %v4996_v54, %v5000_v8 }
 0x9ec   :  { %v8608_v26 = vcombine.low %v5124_v47, %v5128_v18  ;;  %v5208_v54 = vld [vmem:[#allocation26 + $0x7f0] sm:$0xff] }
 0x9ed   :  { %6637 = vmatpush2.bf16.msra.mxu0 %v8534_v17  ;;  %6678 = vmatpush2.bf16.msra.mxu1 %v8662_v53  ;;  %v8609_v17 = vcombine.high %v5124_v47, %v5128_v18  ;;  %v4988_v53 = vld [vmem:[#allocation26 + $0x110] sm:$0xff] }
 0x9ee   :  { %6638 = vmatprep.subr.bf16.mxu0 %v8527_v23  ;;  %6679 = vmatprep.subr.bf16.mxu1 %v8655_v13  ;;  %v4992_v23 = vld [vmem:[#allocation26 + $0x130] sm:$0xff] }
 0x9ef   :  { %v5116_v13 = vld [vmem:[#allocation26 + $0x510] sm:$0xff]  ;;  %v8473_v27 = vcombine.high %v4988_v53, %v4992_v23  ;;  %v8472_v40 = vcombine.low %v4988_v53, %v4992_v23 }
 0x9f0   :  { %v8600_v32 = vcombine.low %v5116_v13, %v5120_v24  ;;  %v5200_v53 = vld [vmem:[#allocation26 + $0x7b0] sm:$0xff] }
 0x9f1   :  { %6639 = vmatpush2.bf16.msra.mxu0 %v8526_v28  ;;  %6680 = vmatpush2.bf16.msra.mxu1 %v8654_v29  ;;  %v8601_v28 = vcombine.high %v5116_v13, %v5120_v24  ;;  %v4980_v29 = vld [vmem:[#allocation26 + $0xd0] sm:$0xff] }
 0x9f2   :  { %6640 = vmatprep.subr.bf16.mxu0 %v8519_v30  ;;  %6681 = vmatprep.subr.bf16.mxu1 %v8647_v31  ;;  %v4984_v30 = vld [vmem:[#allocation26 + $0xf0] sm:$0xff] }
 0x9f3   :  { %v5108_v31 = vld [vmem:[#allocation26 + $0x4d0] sm:$0xff]  ;;  %v8465_v34 = vcombine.high %v4980_v29, %v4984_v30  ;;  %v8464_v21 = vcombine.low %v4980_v29, %v4984_v30 }
 0x9f4   :  { %v8592_v51 = vcombine.low %v5108_v31, %v5112_v37  ;;  %v5192_v29 = vld [vmem:[#allocation26 + $0x770] sm:$0xff] }
 0x9f5   :  { %6641 = vmatpush2.bf16.msra.mxu0 %v8518_v45  ;;  %6682 = vmatpush2.bf16.msra.mxu1 %v8646_v39  ;;  %v8593_v45 = vcombine.high %v5108_v31, %v5112_v37  ;;  %v4972_v39 = vld [vmem:[#allocation26 + $0x90] sm:$0xff] }
 0x9f6   :  { %6642 = vmatprep.subr.bf16.mxu0 %v8511_v46  ;;  %6683 = vmatprep.subr.bf16.mxu1 %v8639_v36  ;;  %v4976_v46 = vld [vmem:[#allocation26 + $0xb0] sm:$0xff] }
 0x9f7   :  { %v5100_v36 = vld [vmem:[#allocation26 + $0x490] sm:$0xff]  ;;  %v8457_v52 = vcombine.high %v4972_v39, %v4976_v46  ;;  %v8456_v16 = vcombine.low %v4972_v39, %v4976_v46 }
 0x9f8   :  { %v8584_v59 = vcombine.low %v5100_v36, %v5104_v48  ;;  %v5184_v39 = vld [vmem:[#allocation26 + $0x730] sm:$0xff] }
 0x9f9   :  { %6643 = vmatpush2.bf16.msra.mxu0 %v8510_v55  ;;  %6684 = vmatpush2.bf16.msra.mxu1 %v8638_v50  ;;  %v8585_v55 = vcombine.high %v5100_v36, %v5104_v48  ;;  %v4964_v50 = vld [vmem:[#allocation26 + $0x50] sm:$0xff] }
 0x9fa   :  { %6644 = vmatprep.subr.bf16.mxu0 %v8503_v20  ;;  %6685 = vmatprep.subr.bf16.mxu1 %v8631_v56  ;;  %v4968_v20 = vld [vmem:[#allocation26 + $0x70] sm:$0xff] }
 0x9fb   :  { %v5092_v56 = vld [vmem:[#allocation26 + $0x450] sm:$0xff]  ;;  %v8449_v60 = vcombine.high %v4964_v50, %v4968_v20  ;;  %v8448_v2 = vcombine.low %v4964_v50, %v4968_v20 }
 0x9fc   :  { %v8576_v10 = vcombine.low %v5092_v56, %v5096_v58  ;;  %v5176_v50 = vld [vmem:[#allocation26 + $0x6f0] sm:$0xff] }
 0x9fd   :  { %6645 = vmatpush2.bf16.msra.mxu0 %v8502_v61  ;;  %6686 = vmatpush2.bf16.msra.mxu1 %v8630_v62  ;;  %v8577_v61 = vcombine.high %v5092_v56, %v5096_v58  ;;  %v4956_v62 = vld [vmem:[#allocation26 + $0x10] sm:$0xff] }
 0x9fe   :  { %6696 = vmatprep.subr.bf16.mxu0 %v8497_v63  ;;  %6737 = vmatprep.subr.bf16.mxu1 %v8625_v0  ;;  %v4960_v63 = vld [vmem:[#allocation26 + $0x30] sm:$0xff] }
 0x9ff   :  { %v5084_v0 = vld [vmem:[#allocation26 + $0x410] sm:$0xff]  ;;  %v8441_v3 = vcombine.high %v4956_v62, %v4960_v63  ;;  %v8440_v8 = vcombine.low %v4956_v62, %v4960_v63 }
 0xa00   :  { %6647 = vmatmul.mubr.bf16.vlgmr.msra.gmra.mxu0 %v10641_v43  ;;  %6688 = vmatmul.mubr.bf16.vlgmr.msra.gmra.mxu1 %v10643_v44  ;;  %v8568_v47 = vcombine.low %v5084_v0, %v5088_v1  ;;  %v5168_v62 = vld [vmem:[#allocation26 + $0x6b0] sm:$0xff] }
 0xa01   :  { %6697 = vmatpush1.bf16.msra.mxu0 %v8496_v4  ;;  %6728 = vmatprep.mubr.bf16.mxu0 %v10637_v41  ;;  %v8569_v4 = vcombine.high %v5084_v0, %v5088_v1 }
 0xa02   :  { %6738 = vmatpush1.bf16.msra.mxu1 %v8624_v5  ;;  %6769 = vmatprep.mubr.bf16.mxu1 %v10639_v57  ;;  %v5076_v5 = vld [vmem:[#allocation26 + $0x3d0] sm:$0xff] }
 0xa03   :  { %6698 = vmatprep.subr.bf16.mxu0 %v8489_v6  ;;  %6739 = vmatprep.subr.bf16.mxu1 %v8617_v7  ;;  %v5080_v6 = vld [vmem:[#allocation26 + $0x3f0] sm:$0xff] }
 0xa04   :  { %v5204_v7 = vld [vmem:[#allocation26 + $0x7d0] sm:$0xff]  ;;  %v8561_v18 = vcombine.high %v5076_v5, %v5080_v6  ;;  %v8560_v23 = vcombine.low %v5076_v5, %v5080_v6 }
 0xa05   :  { %6699 = vmatpush1.bf16.msra.mxu0 %v8488_v49  ;;  %v8689_v49 = vcombine.high %v5204_v7, %v5208_v54  ;;  %v8688_v13 = vcombine.low %v5204_v7, %v5208_v54  ;;  %v5160_v5 = vld [vmem:[#allocation26 + $0x670] sm:$0xff] }
 0xa06   :  { %6740 = vmatpush1.bf16.msra.mxu1 %v8616_v19  ;;  %6700 = vmatprep.subr.bf16.mxu0 %v8481_v22  ;;  %v5068_v19 = vld [vmem:[#allocation26 + $0x390] sm:$0xff] }
 0xa07   :  { %6741 = vmatprep.subr.bf16.mxu1 %v8609_v17  ;;  %v5072_v22 = vld [vmem:[#allocation26 + $0x3b0] sm:$0xff] }
 0xa08   :  { %v5196_v17 = vld [vmem:[#allocation26 + $0x790] sm:$0xff]  ;;  %v8553_v24 = vcombine.high %v5068_v19, %v5072_v22  ;;  %v8552_v30 = vcombine.low %v5068_v19, %v5072_v22 }
 0xa09   :  { %6701 = vmatpush1.bf16.msra.mxu0 %v8480_v25  ;;  %v8681_v25 = vcombine.high %v5196_v17, %v5200_v53  ;;  %v8680_v31 = vcombine.low %v5196_v17, %v5200_v53  ;;  %v5152_v19 = vld [vmem:[#allocation26 + $0x630] sm:$0xff] }
 0xa0a   :  { %6742 = vmatpush1.bf16.msra.mxu1 %v8608_v26  ;;  %6702 = vmatprep.subr.bf16.mxu0 %v8473_v27  ;;  %v5060_v26 = vld [vmem:[#allocation26 + $0x350] sm:$0xff] }
 0xa0b   :  { %6743 = vmatprep.subr.bf16.mxu1 %v8601_v28  ;;  %v5064_v27 = vld [vmem:[#allocation26 + $0x370] sm:$0xff] }
 0xa0c   :  { %v5188_v28 = vld [vmem:[#allocation26 + $0x750] sm:$0xff]  ;;  %v8545_v37 = vcombine.high %v5060_v26, %v5064_v27  ;;  %v8544_v46 = vcombine.low %v5060_v26, %v5064_v27  ;;  %v5145_v26 = vld [vmem:[#allocation26 + $0x5f8] sm:$0xff] }
 0xa0d   :  { %6703 = vmatpush1.bf16.msra.mxu0 %v8472_v40  ;;  %v8673_v40 = vcombine.high %v5188_v28, %v5192_v29  ;;  %v8672_v36 = vcombine.low %v5188_v28, %v5192_v29 }
 0xa0e   :  { %6744 = vmatpush1.bf16.msra.mxu1 %v8600_v32  ;;  %6704 = vmatprep.subr.bf16.mxu0 %v8465_v34  ;;  %v5052_v32 = vld [vmem:[#allocation26 + $0x310] sm:$0xff] }
 0xa0f   :  { %6745 = vmatprep.subr.bf16.mxu1 %v8593_v45  ;;  %v5056_v34 = vld [vmem:[#allocation26 + $0x330] sm:$0xff] }
 0xa10   :  { %v5180_v45 = vld [vmem:[#allocation26 + $0x710] sm:$0xff]  ;;  %v8537_v48 = vcombine.high %v5052_v32, %v5056_v34  ;;  %v8536_v20 = vcombine.low %v5052_v32, %v5056_v34  ;;  %v5133_v32 = vld [vmem:[#allocation26 + $0x598] sm:$0xff] }
 0xa11   :  { %6705 = vmatpush1.bf16.msra.mxu0 %v8464_v21  ;;  %v8665_v21 = vcombine.high %v5180_v45, %v5184_v39  ;;  %v8664_v56 = vcombine.low %v5180_v45, %v5184_v39  ;;  %v5137_v34 = vld [vmem:[#allocation26 + $0x5b8] sm:$0xff] }
 0xa12   :  { %6746 = vmatpush1.bf16.msra.mxu1 %v8592_v51  ;;  %6706 = vmatprep.subr.bf16.mxu0 %v8457_v52  ;;  %v5044_v51 = vld [vmem:[#allocation26 + $0x2d0] sm:$0xff] }
 0xa13   :  { %6747 = vmatprep.subr.bf16.mxu1 %v8585_v55  ;;  %v5048_v52 = vld [vmem:[#allocation26 + $0x2f0] sm:$0xff] }
 0xa14   :  { %v5172_v55 = vld [vmem:[#allocation26 + $0x6d0] sm:$0xff]  ;;  %v8529_v58 = vcombine.high %v5044_v51, %v5048_v52  ;;  %v8528_v63 = vcombine.low %v5044_v51, %v5048_v52  ;;  %v5129_v51 = vld [vmem:[#allocation26 + $0x578] sm:$0xff] }
 0xa15   :  { %6707 = vmatpush1.bf16.msra.mxu0 %v8456_v16  ;;  %v8657_v16 = vcombine.high %v5172_v55, %v5176_v50  ;;  %v8656_v0 = vcombine.low %v5172_v55, %v5176_v50  ;;  %v8618_v55 = vcombine.low %v5133_v32, %v5137_v34 }
 0xa16   :  { %6748 = vmatpush1.bf16.msra.mxu1 %v8584_v59  ;;  %6708 = vmatprep.subr.bf16.mxu0 %v8449_v60  ;;  %v5036_v59 = vld [vmem:[#allocation26 + $0x290] sm:$0xff] }
 0xa17   :  { %6749 = vmatprep.subr.bf16.mxu1 %v8577_v61  ;;  %v5040_v60 = vld [vmem:[#allocation26 + $0x2b0] sm:$0xff] }
 0xa18   :  { %v5164_v61 = vld [vmem:[#allocation26 + $0x690] sm:$0xff]  ;;  %v8521_v1 = vcombine.high %v5036_v59, %v5040_v60  ;;  %v8520_v6 = vcombine.low %v5036_v59, %v5040_v60  ;;  %v5121_v59 = vld [vmem:[#allocation26 + $0x538] sm:$0xff] }
 0xa19   :  { %6709 = vmatpush1.bf16.msra.mxu0 %v8448_v2  ;;  %v8649_v2 = vcombine.high %v5164_v61, %v5168_v62  ;;  %v8648_v7 = vcombine.low %v5164_v61, %v5168_v62 }
 0xa1a   :  { %6750 = vmatpush1.bf16.msra.mxu1 %v8576_v10  ;;  %6710 = vmatprep.subr.bf16.mxu0 %v8441_v3  ;;  %v5028_v10 = vld [vmem:[#allocation26 + $0x250] sm:$0xff] }
 0xa1b   :  { %6751 = vmatprep.subr.bf16.mxu1 %v8569_v4  ;;  %v5032_v3 = vld [vmem:[#allocation26 + $0x270] sm:$0xff] }
 0xa1c   :  { %v5156_v4 = vld [vmem:[#allocation26 + $0x650] sm:$0xff]  ;;  %v8513_v54 = vcombine.high %v5028_v10, %v5032_v3  ;;  %v8512_v22 = vcombine.low %v5028_v10, %v5032_v3 }
 0xa1d   :  { %6711 = vmatpush1.bf16.msra.mxu0 %v8440_v8  ;;  %v8641_v8 = vcombine.high %v5156_v4, %v5160_v5  ;;  %v8640_v17 = vcombine.low %v5156_v4, %v5160_v5  ;;  %v4973_v5 = vld [vmem:[#allocation26 + $0x98] sm:$0xff] }
 0xa1e   :  { %6752 = vmatpush1.bf16.msra.mxu1 %v8568_v47  ;;  %6712 = vmatprep.subr.bf16.mxu0 %v8561_v18  ;;  %v5020_v47 = vld [vmem:[#allocation26 + $0x210] sm:$0xff] }
 0xa1f   :  { %6753 = vmatprep.subr.bf16.mxu1 %v8689_v49  ;;  %v5024_v18 = vld [vmem:[#allocation26 + $0x230] sm:$0xff] }
 0xa20   :  { %v5148_v49 = vld [vmem:[#allocation26 + $0x610] sm:$0xff]  ;;  %v8505_v53 = vcombine.high %v5020_v47, %v5024_v18  ;;  %v8504_v27 = vcombine.low %v5020_v47, %v5024_v18 }
 0xa21   :  { %6713 = vmatpush2.bf16.msra.mxu0 %v8560_v23  ;;  %v8633_v23 = vcombine.high %v5148_v49, %v5152_v19  ;;  %v8632_v28 = vcombine.low %v5148_v49, %v5152_v19  ;;  %v4965_v19 = vld [vmem:[#allocation26 + $0x58] sm:$0xff] }
 0xa22   :  { %6754 = vmatpush2.bf16.msra.mxu1 %v8688_v13  ;;  %6714 = vmatprep.subr.bf16.mxu0 %v8553_v24  ;;  %v5013_v13 = vld [vmem:[#allocation26 + $0x1d8] sm:$0xff] }
 0xa23   :  { %6755 = vmatprep.subr.bf16.mxu1 %v8681_v25  ;;  %v5017_v24 = vld [vmem:[#allocation26 + $0x1f8] sm:$0xff] }
 0xa24   :  { %v5141_v25 = vld [vmem:[#allocation26 + $0x5d8] sm:$0xff]  ;;  %v8499_v29 = vcombine.high %v5013_v13, %v5017_v24 }
 0xa25   :  { %6715 = vmatpush2.bf16.msra.mxu0 %v8552_v30  ;;  %v8627_v30 = vcombine.high %v5141_v25, %v5145_v26  ;;  %v8626_v45 = vcombine.low %v5141_v25, %v5145_v26  ;;  %v4957_v26 = vld [vmem:[#allocation26 + $0x18] sm:$0xff] }
 0xa26   :  { %6756 = vmatpush2.bf16.msra.mxu1 %v8680_v31  ;;  %6716 = vmatprep.subr.bf16.mxu0 %v8545_v37  ;;  %v5005_v31 = vld [vmem:[#allocation26 + $0x198] sm:$0xff] }
 0xa27   :  { %6757 = vmatprep.subr.bf16.mxu1 %v8673_v40  ;;  %v5009_v37 = vld [vmem:[#allocation26 + $0x1b8] sm:$0xff]  ;;  %v8498_v40 = vcombine.low %v5013_v13, %v5017_v24 }
 0xa28   :  { %v8491_v39 = vcombine.high %v5005_v31, %v5009_v37  ;;  %v8490_v52 = vcombine.low %v5005_v31, %v5009_v37 }
 0xa29   :  { %6717 = vmatpush2.bf16.msra.mxu0 %v8544_v46  ;;  %v4997_v46 = vld [vmem:[#allocation26 + $0x158] sm:$0xff] }
 0xa2a   :  { %6758 = vmatpush2.bf16.msra.mxu1 %v8672_v36  ;;  %6718 = vmatprep.subr.bf16.mxu0 %v8537_v48  ;;  %v5001_v36 = vld [vmem:[#allocation26 + $0x178] sm:$0xff]  ;;  %v8619_v48 = vcombine.high %v5133_v32, %v5137_v34 }
 0xa2b   :  { %6759 = vmatprep.subr.bf16.mxu1 %v8665_v21  ;;  %v5125_v21 = vld [vmem:[#allocation26 + $0x558] sm:$0xff]  ;;  %v8483_v50 = vcombine.high %v4997_v46, %v5001_v36  ;;  %v8482_v60 = vcombine.low %v4997_v46, %v5001_v36 }
 0xa2c   :  { %v8610_v61 = vcombine.low %v5125_v21, %v5129_v51  ;;  %v5077_v32 = vld [vmem:[#allocation26 + $0x3d8] sm:$0xff] }
 0xa2d   :  { %6719 = vmatpush2.bf16.msra.mxu0 %v8536_v20  ;;  %v8611_v20 = vcombine.high %v5125_v21, %v5129_v51  ;;  %v5081_v34 = vld [vmem:[#allocation26 + $0x3f8] sm:$0xff] }
 0xa2e   :  { %6760 = vmatpush2.bf16.msra.mxu1 %v8664_v56  ;;  %6720 = vmatprep.subr.bf16.mxu0 %v8529_v58  ;;  %v4989_v56 = vld [vmem:[#allocation26 + $0x118] sm:$0xff] }
 0xa2f   :  { %6761 = vmatprep.subr.bf16.mxu1 %v8657_v16  ;;  %v4993_v58 = vld [vmem:[#allocation26 + $0x138] sm:$0xff] }
 0xa30   :  { %v5117_v16 = vld [vmem:[#allocation26 + $0x518] sm:$0xff]  ;;  %v8475_v62 = vcombine.high %v4989_v56, %v4993_v58 }
 0xa31   :  { %6721 = vmatpush2.bf16.msra.mxu0 %v8528_v63  ;;  %v4981_v63 = vld [vmem:[#allocation26 + $0xd8] sm:$0xff]  ;;  %v8602_v10 = vcombine.low %v5117_v16, %v5121_v59 }
 0xa32   :  { %6762 = vmatpush2.bf16.msra.mxu1 %v8656_v0  ;;  %6722 = vmatprep.subr.bf16.mxu0 %v8521_v1  ;;  %v4985_v0 = vld [vmem:[#allocation26 + $0xf8] sm:$0xff] }
 0xa33   :  { %6763 = vmatprep.subr.bf16.mxu1 %v8649_v2  ;;  %v5109_v1 = vld [vmem:[#allocation26 + $0x4d8] sm:$0xff]  ;;  %v8467_v3 = vcombine.high %v4981_v63, %v4985_v0 }
 0xa34   :  { %v5113_v2 = vld [vmem:[#allocation26 + $0x4f8] sm:$0xff] }
 0xa35   :  { %6723 = vmatpush2.bf16.msra.mxu0 %v8520_v6  ;;  %v8595_v4 = vcombine.high %v5109_v1, %v5113_v2  ;;  %v4977_v6 = vld [vmem:[#allocation26 + $0xb8] sm:$0xff]  ;;  %v8594_v47 = vcombine.low %v5109_v1, %v5113_v2 }
 0xa36   :  { %6764 = vmatpush2.bf16.msra.mxu1 %v8648_v7  ;;  %6724 = vmatprep.subr.bf16.mxu0 %v8513_v54  ;;  %v5101_v7 = vld [vmem:[#allocation26 + $0x498] sm:$0xff]  ;;  %v8459_v18 = vcombine.high %v4973_v5, %v4977_v6 }
 0xa37   :  { %6765 = vmatprep.subr.bf16.mxu1 %v8641_v8  ;;  %v5105_v54 = vld [vmem:[#allocation26 + $0x4b8] sm:$0xff]  ;;  %v8466_v8 = vcombine.low %v4981_v63, %v4985_v0 }
 0xa38   :  { %v8587_v49 = vcombine.high %v5101_v7, %v5105_v54  ;;  %v8586_v13 = vcombine.low %v5101_v7, %v5105_v54  ;;  %v5069_v51 = vld [vmem:[#allocation26 + $0x398] sm:$0xff] }
 0xa39   :  { %6725 = vmatpush2.bf16.msra.mxu0 %v8512_v22  ;;  %v4969_v22 = vld [vmem:[#allocation26 + $0x78] sm:$0xff] }
 0xa3a   :  { %6766 = vmatpush2.bf16.msra.mxu1 %v8640_v17  ;;  %6726 = vmatprep.subr.bf16.mxu0 %v8505_v53  ;;  %v5093_v17 = vld [vmem:[#allocation26 + $0x458] sm:$0xff]  ;;  %v8451_v24 = vcombine.high %v4965_v19, %v4969_v22 }
 0xa3b   :  { %6767 = vmatprep.subr.bf16.mxu1 %v8633_v23  ;;  %v5097_v53 = vld [vmem:[#allocation26 + $0x478] sm:$0xff]  ;;  %v8458_v23 = vcombine.low %v4973_v5, %v4977_v6 }
 0xa3c   :  { %v8579_v25 = vcombine.high %v5093_v17, %v5097_v53  ;;  %v8578_v31 = vcombine.low %v5093_v17, %v5097_v53  ;;  %v5053_v2 = vld [vmem:[#allocation26 + $0x318] sm:$0xff] }
 0xa3d   :  { %6727 = vmatpush2.bf16.msra.mxu0 %v8504_v27  ;;  %v4961_v27 = vld [vmem:[#allocation26 + $0x38] sm:$0xff] }
 0xa3e   :  { %6768 = vmatpush2.bf16.msra.mxu1 %v8632_v28  ;;  %6778 = vmatprep.subr.bf16.mxu0 %v8499_v29  ;;  %v5085_v28 = vld [vmem:[#allocation26 + $0x418] sm:$0xff]  ;;  %v8443_v37 = vcombine.high %v4957_v26, %v4961_v27  ;;  %v8442_v46 = vcombine.low %v4957_v26, %v4961_v27 }
 0xa3f   :  { %6819 = vmatprep.subr.bf16.mxu1 %v8627_v30  ;;  %v5089_v29 = vld [vmem:[#allocation26 + $0x438] sm:$0xff]  ;;  %v8450_v30 = vcombine.low %v4965_v19, %v4969_v22 }
 0xa40   :  { %6729 = vmatmul.mubr.bf16.vlgmr.msra.gmra.mxu0 %v10641_v43  ;;  %v8570_v36 = vcombine.low %v5085_v28, %v5089_v29  ;;  %v5045_v54 = vld [vmem:[#allocation26 + $0x2d8] sm:$0xff] }
 0xa41   :  { %6770 = vmatmul.mubr.bf16.vlgmr.msra.gmra.mxu1 %v10643_v44  ;;  %6779 = vmatpush1.bf16.msra.mxu0 %v8498_v40  ;;  %v8571_v40 = vcombine.high %v5085_v28, %v5089_v29  ;;  %v5037_v53 = vld [vmem:[#allocation26 + $0x298] sm:$0xff] }
 0xa42   :  { %6810 = vmatprep.mubr.bf16.mxu0 %v10637_v41  ;;  %6820 = vmatpush1.bf16.msra.mxu1 %v8626_v45  ;;  %v8603_v41 = vcombine.high %v5117_v16, %v5121_v59  ;;  %v5205_v45 = vld [vmem:[#allocation26 + $0x7d8] sm:$0xff] }
 0xa43   :  { %6851 = vmatprep.mubr.bf16.mxu1 %v10639_v57  ;;  %6780 = vmatprep.subr.bf16.mxu0 %v8491_v39  ;;  %v8474_v57 = vcombine.low %v4989_v56, %v4993_v58  ;;  %v5209_v39 = vld [vmem:[#allocation26 + $0x7f8] sm:$0xff] }
 0xa44   :  { %6821 = vmatprep.subr.bf16.mxu1 %v8619_v48  ;;  %v8563_v48 = vcombine.high %v5077_v32, %v5081_v34  ;;  %v8691_v21 = vcombine.high %v5205_v45, %v5209_v39  ;;  %v8690_v56 = vcombine.low %v5205_v45, %v5209_v39  ;;  %v5061_v59 = vld [vmem:[#allocation26 + $0x358] sm:$0xff] }
 0xa45   :  { %6781 = vmatpush1.bf16.msra.mxu0 %v8490_v52  ;;  %v5073_v52 = vld [vmem:[#allocation26 + $0x3b8] sm:$0xff] }
 0xa46   :  { %6822 = vmatpush1.bf16.msra.mxu1 %v8618_v55  ;;  %6782 = vmatprep.subr.bf16.mxu0 %v8483_v50  ;;  %v5197_v55 = vld [vmem:[#allocation26 + $0x798] sm:$0xff]  ;;  %v8555_v58 = vcombine.high %v5069_v51, %v5073_v52 }
 0xa47   :  { %6823 = vmatprep.subr.bf16.mxu1 %v8611_v20  ;;  %v5201_v50 = vld [vmem:[#allocation26 + $0x7b8] sm:$0xff]  ;;  %v8562_v20 = vcombine.low %v5077_v32, %v5081_v34 }
 0xa48   :  { %v8683_v16 = vcombine.high %v5197_v55, %v5201_v50  ;;  %v8682_v63 = vcombine.low %v5197_v55, %v5201_v50  ;;  %v5029_v29 = vld [vmem:[#allocation26 + $0x258] sm:$0xff] }
 0xa49   :  { %6783 = vmatpush1.bf16.msra.mxu0 %v8482_v60  ;;  %v5065_v60 = vld [vmem:[#allocation26 + $0x378] sm:$0xff] }
 0xa4a   :  { %6824 = vmatpush1.bf16.msra.mxu1 %v8610_v61  ;;  %6784 = vmatprep.subr.bf16.mxu0 %v8475_v62  ;;  %v5189_v61 = vld [vmem:[#allocation26 + $0x758] sm:$0xff]  ;;  %v8547_v0 = vcombine.high %v5061_v59, %v5065_v60 }
 0xa4b   :  { %6825 = vmatprep.subr.bf16.mxu1 %v8603_v41  ;;  %v5193_v62 = vld [vmem:[#allocation26 + $0x778] sm:$0xff]  ;;  %v8554_v41 = vcombine.low %v5069_v51, %v5073_v52 }
 0xa4c   :  { %v8675_v1 = vcombine.high %v5189_v61, %v5193_v62  ;;  %v8674_v5 = vcombine.low %v5189_v61, %v5193_v62  ;;  %v5021_v39 = vld [vmem:[#allocation26 + $0x218] sm:$0xff] }
 0xa4d   :  { %6785 = vmatpush1.bf16.msra.mxu0 %v8474_v57  ;;  %v5057_v57 = vld [vmem:[#allocation26 + $0x338] sm:$0xff] }
 0xa4e   :  { %6826 = vmatpush1.bf16.msra.mxu1 %v8602_v10  ;;  %6786 = vmatprep.subr.bf16.mxu0 %v8467_v3  ;;  %v5181_v10 = vld [vmem:[#allocation26 + $0x718] sm:$0xff]  ;;  %v8539_v6 = vcombine.high %v5053_v2, %v5057_v57 }
 0xa4f   :  { %6827 = vmatprep.subr.bf16.mxu1 %v8595_v4  ;;  %v5185_v3 = vld [vmem:[#allocation26 + $0x738] sm:$0xff]  ;;  %v8546_v4 = vcombine.low %v5061_v59, %v5065_v60  ;;  %v10662_v59 = vld [vmem:[%s10722_s22] sm:$0xff] }
 0xa50   :  { %v8667_v7 = vcombine.high %v5181_v10, %v5185_v3  ;;  %v8666_v19 = vcombine.low %v5181_v10, %v5185_v3  ;;  %v9642_v60 = vld [vmem:[#allocation28 + $0x64] ss:$8 sps:$4 sm:$0xff]   ;;  %v9649_v61 = vld [vmem:[#allocation28 + $0x170] ss:$8 sps:$4 sm:$0xff]   ;;  %v5219_v62 = vrot.slane %v10662_v59, %v10488_v14  ;;  %v9645_v10 = vld [vmem:[#allocation28 + $0x54] ss:$8 sps:$4 sm:$0xff]  }
 0xa51   :  { %6787 = vmatpush1.bf16.msra.mxu0 %v8466_v8  ;;  %v5049_v8 = vld [vmem:[#allocation26 + $0x2f8] sm:$0xff]  ;;  %v9655_v3 = vld [vmem:[#allocation28 + $0x160] ss:$8 sps:$4 sm:$0xff]  }
 0xa52   :  { %6828 = vmatpush1.bf16.msra.mxu1 %v8594_v47  ;;  %6788 = vmatprep.subr.bf16.mxu0 %v8459_v18  ;;  %v5173_v47 = vld [vmem:[#allocation26 + $0x6d8] sm:$0xff]  ;;  %v8531_v22 = vcombine.high %v5045_v54, %v5049_v8 }
 0xa53   :  { %6829 = vmatprep.subr.bf16.mxu1 %v8587_v49  ;;  %v5177_v18 = vld [vmem:[#allocation26 + $0x6f8] sm:$0xff]  ;;  %v8538_v49 = vcombine.low %v5053_v2, %v5057_v57 }
 0xa54   :  { %v8659_v17 = vcombine.high %v5173_v47, %v5177_v18  ;;  %v8658_v26 = vcombine.low %v5173_v47, %v5177_v18  ;;  %v9661_v18 = vld [vmem:[#allocation28 + $0x150] ss:$8 sps:$4 sm:$0xff]  }
 0xa55   :  { %6789 = vmatpush1.bf16.msra.mxu0 %v8458_v23  ;;  %v5041_v23 = vld [vmem:[#allocation26 + $0x2b8] sm:$0xff] }
 0xa56   :  { %6830 = vmatpush1.bf16.msra.mxu1 %v8586_v13  ;;  %6790 = vmatprep.subr.bf16.mxu0 %v8451_v24  ;;  %v5165_v13 = vld [vmem:[#allocation26 + $0x698] sm:$0xff]  ;;  %v8523_v27 = vcombine.high %v5037_v53, %v5041_v23 }
 0xa57   :  { %6831 = vmatprep.subr.bf16.mxu1 %v8579_v25  ;;  %v5169_v24 = vld [vmem:[#allocation26 + $0x6b8] sm:$0xff]  ;;  %v8530_v25 = vcombine.low %v5045_v54, %v5049_v8 }
 0xa58   :  { %v8651_v28 = vcombine.high %v5165_v13, %v5169_v24  ;;  %v8650_v32 = vcombine.low %v5165_v13, %v5169_v24  ;;  %v9643_v54 = vld [vmem:[#allocation28 + $0x50] ss:$8 sps:$4 sm:$0xff]   ;;  %v9675_v13 = vld [vmem:[#allocation28 + $0x134] ss:$8 sps:$4 sm:$0xff]  }
 0xa59   :  { %6791 = vmatpush1.bf16.msra.mxu0 %v8450_v30  ;;  %v5033_v30 = vld [vmem:[#allocation26 + $0x278] sm:$0xff] }
 0xa5a   :  { %6832 = vmatpush1.bf16.msra.mxu1 %v8578_v31  ;;  %6792 = vmatprep.subr.bf16.mxu0 %v8443_v37  ;;  %v5157_v31 = vld [vmem:[#allocation26 + $0x658] sm:$0xff]  ;;  %v8515_v34 = vcombine.high %v5029_v29, %v5033_v30 }
 0xa5b   :  { %6833 = vmatprep.subr.bf16.mxu1 %v8571_v40  ;;  %v5161_v37 = vld [vmem:[#allocation26 + $0x678] sm:$0xff]  ;;  %v8522_v40 = vcombine.low %v5037_v53, %v5041_v23  ;;  %v9667_v23 = vld [vmem:[#allocation28 + $0x140] ss:$8 sps:$4 sm:$0xff]  }
 0xa5c   :  { %v8643_v45 = vcombine.high %v5157_v31, %v5161_v37  ;;  %v8642_v51 = vcombine.low %v5157_v31, %v5161_v37  ;;  %v9654_v53 = vld [vmem:[#allocation28 + $0x34] ss:$8 sps:$4 sm:$0xff]   ;;  %v9652_v24 = vld [vmem:[#allocation28 + $0x30] ss:$8 sps:$4 sm:$0xff]  }
 0xa5d   :  { %6793 = vmatpush1.bf16.msra.mxu0 %v8442_v46  ;;  %v5025_v46 = vld [vmem:[#allocation26 + $0x238] sm:$0xff] }
 0xa5e   :  { %6834 = vmatpush1.bf16.msra.mxu1 %v8570_v36  ;;  %6794 = vmatprep.subr.bf16.mxu0 %v8563_v48  ;;  %v5149_v36 = vld [vmem:[#allocation26 + $0x618] sm:$0xff]  ;;  %v8507_v52 = vcombine.high %v5021_v39, %v5025_v46  ;;  %v8506_v50 = vcombine.low %v5021_v39, %v5025_v46  ;;  %v9691_v46 = vld [vmem:[#allocation28 + $0x100] ss:$8 sps:$4 sm:$0xff]  }
 0xa5f   :  { %6835 = vmatprep.subr.bf16.mxu1 %v8691_v21  ;;  %v5153_v48 = vld [vmem:[#allocation26 + $0x638] sm:$0xff]  ;;  %v8514_v21 = vcombine.low %v5029_v29, %v5033_v30  ;;  %v9679_v30 = vld [vmem:[#allocation28 + $0x120] ss:$8 sps:$4 sm:$0xff]  }
 0xa60   :  { %v8635_v55 = vcombine.high %v5149_v36, %v5153_v48  ;;  %v9666_v29 = vld [vmem:[#allocation28 + $0x14] ss:$8 sps:$4 sm:$0xff]   ;;  %v9664_v37 = vld [vmem:[#allocation28 + $0x10] ss:$8 sps:$4 sm:$0xff]  }
 0xa61   :  { %6795 = vmatpush2.bf16.msra.mxu0 %v8562_v20  ;;  %v8634_v20 = vcombine.low %v5149_v36, %v5153_v48  ;;  %v9687_v31 = vld [vmem:[#allocation28 + $0x114] ss:$8 sps:$4 sm:$0xff]   ;;  %v9676_v48 = vld [vmem:[#allocation28 + $0xf0] ss:$8 sps:$4 sm:$0xff]  }
 0xa62   :  { %6836 = vmatpush2.bf16.msra.mxu1 %v8690_v56  ;;  %6796 = vmatprep.subr.bf16.mxu0 %v8555_v58  ;;  %v9639_v56 = vld [vmem:[#allocation28 + $0x74] ss:$8 sps:$4 sm:$0xff]  }
 0xa63   :  { %6837 = vmatprep.subr.bf16.mxu1 %v8683_v16  ;;  %v9651_v58 = vld [vmem:[#allocation28 + $0x174] ss:$8 sps:$4 sm:$0xff]   ;;  %v9637_v16 = vld [vmem:[#allocation28 + $0x70] ss:$8 sps:$4 sm:$0xff]  }
 0xa64   :  { %v9678_v39 = vld [vmem:[#allocation28 + $0xf4] ss:$8 sps:$4 sm:$0xff]  }
 0xa65   :  { %6797 = vmatpush2.bf16.msra.mxu0 %v8554_v41  ;;  %v9657_v41 = vld [vmem:[#allocation28 + $0x164] ss:$8 sps:$4 sm:$0xff]   ;;  %v9699_v36 = vld [vmem:[#allocation28 + $0x1f4] ss:$8 sps:$4 sm:$0xff]  }
 0xa66   :  { %6838 = vmatpush2.bf16.msra.mxu1 %v8682_v63  ;;  %6798 = vmatprep.subr.bf16.mxu0 %v8547_v0 }
 0xa67   :  { %6839 = vmatprep.subr.bf16.mxu1 %v8675_v1  ;;  %v9640_v1 = vld [vmem:[#allocation28 + $0x60] ss:$8 sps:$4 sm:$0xff]  }
 0xa69   :  { %6799 = vmatpush2.bf16.msra.mxu0 %v8546_v4 }
 0xa6a   :  { %6840 = vmatpush2.bf16.msra.mxu1 %v8674_v5  ;;  %6800 = vmatprep.subr.bf16.mxu0 %v8539_v6  ;;  %v9663_v5 = vld [vmem:[#allocation28 + $0x154] ss:$8 sps:$4 sm:$0xff]  }
 0xa6b   :  { %6841 = vmatprep.subr.bf16.mxu1 %v8667_v7 }
 0xa6d   :  { %6801 = vmatpush2.bf16.msra.mxu0 %v8538_v49 }
 0xa6e   :  { %6842 = vmatpush2.bf16.msra.mxu1 %v8666_v19  ;;  %6802 = vmatprep.subr.bf16.mxu0 %v8531_v22  ;;  %v9669_v19 = vld [vmem:[#allocation28 + $0x144] ss:$8 sps:$4 sm:$0xff]  }
 0xa6f   :  { %6843 = vmatprep.subr.bf16.mxu1 %v8659_v17  ;;  %v9646_v17 = vld [vmem:[#allocation28 + $0x40] ss:$8 sps:$4 sm:$0xff]  }
 0xa71   :  { %6803 = vmatpush2.bf16.msra.mxu0 %v8530_v25  ;;  %v9660_v25 = vld [vmem:[#allocation28 + $0x24] ss:$8 sps:$4 sm:$0xff]  }
 0xa72   :  { %6844 = vmatpush2.bf16.msra.mxu1 %v8658_v26  ;;  %6804 = vmatprep.subr.bf16.mxu0 %v8523_v27  ;;  %v9673_v26 = vld [vmem:[#allocation28 + $0x130] ss:$8 sps:$4 sm:$0xff]   ;;  %v9681_v27 = vld [vmem:[#allocation28 + $0x124] ss:$8 sps:$4 sm:$0xff]  }
 0xa73   :  { %6845 = vmatprep.subr.bf16.mxu1 %v8651_v28  ;;  %v9658_v28 = vld [vmem:[#allocation28 + $0x20] ss:$8 sps:$4 sm:$0xff]  }
 0xa75   :  { %6805 = vmatpush2.bf16.msra.mxu0 %v8522_v40  ;;  %v9672_v40 = vld [vmem:[#allocation28 + $0x4] ss:$8 sps:$4 sm:$0xff]  }
 0xa76   :  { %6846 = vmatpush2.bf16.msra.mxu1 %v8650_v32  ;;  %6806 = vmatprep.subr.bf16.mxu0 %v8515_v34  ;;  %v9685_v32 = vld [vmem:[#allocation28 + $0x110] ss:$8 sps:$4 sm:$0xff]   ;;  %v9693_v34 = vld [vmem:[#allocation28 + $0x104] ss:$8 sps:$4 sm:$0xff]  }
 0xa77   :  { %6847 = vmatprep.subr.bf16.mxu1 %v8643_v45  ;;  %v9670_v45 = vld [vmem:[#allocation28] ss:$8 sps:$4 sm:$0xff]  }
 0xa79   :  { %6807 = vmatpush2.bf16.msra.mxu0 %v8514_v21  ;;  %v9684_v21 = vld [vmem:[#allocation28 + $0xe4] ss:$8 sps:$4 sm:$0xff]  }
 0xa7a   :  { %6848 = vmatpush2.bf16.msra.mxu1 %v8642_v51  ;;  %6808 = vmatprep.subr.bf16.mxu0 %v8507_v52  ;;  %v9697_v51 = vld [vmem:[#allocation28 + $0x1f0] ss:$8 sps:$4 sm:$0xff]   ;;  %v9705_v52 = vld [vmem:[#allocation28 + $0x1e4] ss:$8 sps:$4 sm:$0xff]  }
 0xa7b   :  { %6849 = vmatprep.subr.bf16.mxu1 %v8635_v55  ;;  %v9682_v55 = vld [vmem:[#allocation28 + $0xe0] ss:$8 sps:$4 sm:$0xff]  }
 0xa7d   :  { %6809 = vmatpush2.bf16.msra.mxu0 %v8506_v50  ;;  %v9690_v50 = vld [vmem:[#allocation28 + $0xd4] ss:$8 sps:$4 sm:$0xff]  }
 0xa7e   :  { %6850 = vmatpush2.bf16.msra.mxu1 %v8634_v20  ;;  %7656 = vmatprep.subr.bf16.mxu0 %v9639_v56  ;;  %v9703_v20 = vld [vmem:[#allocation28 + $0x1e0] ss:$8 sps:$4 sm:$0xff]   ;;  %v9711_v56 = vld [vmem:[#allocation28 + $0x1d4] ss:$8 sps:$4 sm:$0xff]  }
 0xa7f   :  { %7697 = vmatprep.subr.bf16.mxu1 %v9651_v58  ;;  %v9688_v58 = vld [vmem:[#allocation28 + $0xd0] ss:$8 sps:$4 sm:$0xff]  }
 0xa80   :  { %6811 = vmatmul.mubr.bf16.vlgmr.msra.gmra.mxu0 %v10641_v43  ;;  %v10667_v63 = vpop.f32.mrf.mxu0  ;;  %v10669_v0 = vpop.f32.mrf.mxu1 }
 0xa81   :  { %6852 = vmatmul.mubr.bf16.vlgmr.msra.gmra.mxu1 %v10643_v44  ;;  %7657 = vmatpush1.bf16.msra.mxu0 %v9637_v16  ;;  %v9648_v44 = vld [vmem:[#allocation28 + $0x44] ss:$8 sps:$4 sm:$0xff]  }
 0xa82   :  { %v6568_v2 = vpop.f32.mrf.mxu0  ;;  %v6609_v57 = vpop.f32.mrf.mxu1  ;;  %7658 = vmatprep.subr.bf16.mxu0 %v9642_v60  ;;  %7698 = vmatpush1.bf16.msra.mxu1 %v9649_v61  ;;  %v9696_v16 = vld [vmem:[#allocation28 + $0xc4] ss:$8 sps:$4 sm:$0xff]   ;;  %v9709_v60 = vld [vmem:[#allocation28 + $0x1d0] ss:$8 sps:$4 sm:$0xff]  }
 0xa83   :  { %v6569_v4 = vadd.f32 %v6568_v2, %v5219_v62  ;;  %7699 = vmatprep.subr.bf16.mxu1 %v9657_v41  ;;  %v9717_v61 = vld [vmem:[#allocation28 + $0x1c4] ss:$8 sps:$4 sm:$0xff]   ;;  %v9694_v62 = vld [vmem:[#allocation28 + $0xc0] ss:$8 sps:$4 sm:$0xff]   ;;  %v9702_v41 = vld [vmem:[#allocation28 + $0xb4] ss:$8 sps:$4 sm:$0xff]  }
 0xa84   :  { %v6570_v6 = vpop.f32.mrf.mxu0  ;;  %v6611_v7 = vpop.f32.mrf.mxu1  ;;  %v9723_v2 = vld [vmem:[#allocation28 + $0x1b4] ss:$8 sps:$4 sm:$0xff]  }
 0xa85   :  { %v6610_v43 = vadd.f32 %v6609_v57, %v6569_v4  ;;  %7659 = vmatpush1.bf16.msra.mxu0 %v9640_v1  ;;  %v9715_v1 = vld [vmem:[#allocation28 + $0x1c0] ss:$8 sps:$4 sm:$0xff]   ;;  %v9700_v57 = vld [vmem:[#allocation28 + $0xb0] ss:$8 sps:$4 sm:$0xff]  }
 0xa86   :  { %v6571_v8 = vpop.f32.mrf.mxu0  ;;  %v6612_v47 = vpop.f32.mrf.mxu1  ;;  %7660 = vmatprep.subr.bf16.mxu0 %v9645_v10  ;;  %7700 = vmatpush1.bf16.msra.mxu1 %v9655_v3  ;;  %v5215_v10 = vrot.slane %v10662_v59, %v10482_v11  ;;  %v9708_v3 = vld [vmem:[#allocation28 + $0xa4] ss:$8 sps:$4 sm:$0xff]   ;;  %v9721_v4 = vld [vmem:[#allocation28 + $0x1b0] ss:$8 sps:$4 sm:$0xff]   ;;  %v9706_v6 = vld [vmem:[#allocation28 + $0xa0] ss:$8 sps:$4 sm:$0xff]  }
 0xa87   :  { %v6861_v49 = vmax.f32 %v6610_v43, 0.0  ;;  %7701 = vmatprep.subr.bf16.mxu1 %v9663_v5  ;;  %v9726_v5 = vld [vmem:[#allocation28 + $0x1a4] ss:$8 sps:$4 sm:$0xff]   ;;  %v9714_v43 = vld [vmem:[#allocation28 + $0x94] ss:$8 sps:$4 sm:$0xff]  }
 0xa88   :  { %v6567_v7 = vadd.f32 %v10667_v63, %v5215_v10  ;;  %v9729_v8 = vld [vmem:[#allocation28 + $0x194] ss:$8 sps:$4 sm:$0xff]   ;;  %v9712_v47 = vld [vmem:[#allocation28 + $0x90] ss:$8 sps:$4 sm:$0xff]   ;;  %v9730_v63 = vld [vmem:[#allocation28 + $0x180] ss:$8 sps:$4 sm:$0xff]  }
 0xa89   :  { %v6869_v22 = vpack.c.bf16 %v6861_v49, %v6861_v49  ;;  %7661 = vmatpush1.bf16.msra.mxu0 %v9643_v54  ;;  %v9724_v54 = vld [vmem:[#allocation28 + $0x1a0] ss:$8 sps:$4 sm:$0xff]   ;;  %v9727_v49 = vld [vmem:[#allocation28 + $0x190] ss:$8 sps:$4 sm:$0xff]  }
 0xa8a   :  { %7662 = vmatprep.subr.bf16.mxu0 %v9648_v44  ;;  %7702 = vmatpush1.bf16.msra.mxu1 %v9661_v18  ;;  %v6608_v44 = vadd.f32 %v10669_v0, %v6567_v7  ;;  %v9720_v18 = vld [vmem:[#allocation28 + $0x84] ss:$8 sps:$4 sm:$0xff]   ;;  %v9733_v0 = vld [vmem:[#allocation28 + $0x270] ss:$8 sps:$4 sm:$0xff]  }
 0xa8b   :  { %7688 = vmatprep.mubr.bf16.mxu0 %v6869_v22  ;;  %7703 = vmatprep.subr.bf16.mxu1 %v9669_v19  ;;  %v9732_v19 = vld [vmem:[#allocation28 + $0x184] ss:$8 sps:$4 sm:$0xff]   ;;  %v9718_v22 = vld [vmem:[#allocation28 + $0x80] ss:$8 sps:$4 sm:$0xff]   ;;  %v9751_v10 = vld [vmem:[#allocation28 + $0x210] ss:$8 sps:$4 sm:$0xff]  }
 0xa8c   :  { %v9793_v7 = vld [vmem:[#allocation28 + $0x330] ss:$8 sps:$4 sm:$0xff]  }
 0xa8d   :  { %7663 = vmatpush1.bf16.msra.mxu0 %v9646_v17  ;;  %v6860_v17 = vmax.f32 %v6608_v44, 0.0  ;;  %v9762_v44 = vld [vmem:[#allocation28 + $0x2e4] ss:$8 sps:$4 sm:$0xff]  }
 0xa8e   :  { %7664 = vmatprep.subr.bf16.mxu0 %v9654_v53  ;;  %7704 = vmatpush1.bf16.msra.mxu1 %v9667_v23  ;;  %v9735_v53 = vld [vmem:[#allocation28 + $0x274] ss:$8 sps:$4 sm:$0xff]  }
 0xa8f   :  { %7705 = vmatprep.subr.bf16.mxu1 %v9675_v13  ;;  %v9783_v23 = vld [vmem:[#allocation28 + $0x374] ss:$8 sps:$4 sm:$0xff]   ;;  %v5223_v13 = vrot.slane %v10662_v59, %v10485_v12 }
 0xa91   :  { %7665 = vmatpush1.bf16.msra.mxu0 %v9652_v24  ;;  %v6868_v24 = vpack.c.bf16 %v6860_v17, %v6860_v17  ;;  %v9804_v17 = vld [vmem:[#allocation28 + $0x304] ss:$8 sps:$4 sm:$0xff]  }
 0xa92   :  { %7666 = vmatprep.subr.bf16.mxu0 %v9660_v25  ;;  %7706 = vmatpush1.bf16.msra.mxu1 %v9673_v26  ;;  %v9738_v25 = vld [vmem:[#allocation28 + $0x264] ss:$8 sps:$4 sm:$0xff]   ;;  %v5227_v26 = vrot.slane %v10662_v59, %v10491_v15 }
 0xa93   :  { %7707 = vmatprep.subr.bf16.mxu1 %v9681_v27 }
 0xa95   :  { %7667 = vmatpush1.bf16.msra.mxu0 %v9658_v28 }
 0xa96   :  { %7668 = vmatprep.subr.bf16.mxu0 %v9666_v29  ;;  %7708 = vmatpush1.bf16.msra.mxu1 %v9679_v30  ;;  %v9736_v30 = vld [vmem:[#allocation28 + $0x260] ss:$8 sps:$4 sm:$0xff]  }
 0xa97   :  { %7709 = vmatprep.subr.bf16.mxu1 %v9687_v31 }
 0xa99   :  { %7669 = vmatpush1.bf16.msra.mxu0 %v9664_v37 }
 0xa9a   :  { %7670 = vmatprep.subr.bf16.mxu0 %v9672_v40  ;;  %7710 = vmatpush1.bf16.msra.mxu1 %v9685_v32  ;;  %v9741_v40 = vld [vmem:[#allocation28 + $0x254] ss:$8 sps:$4 sm:$0xff]  }
 0xa9b   :  { %7711 = vmatprep.subr.bf16.mxu1 %v9693_v34 }
 0xa9d   :  { %7671 = vmatpush1.bf16.msra.mxu0 %v9670_v45 }
 0xa9e   :  { %7672 = vmatprep.subr.bf16.mxu0 %v9678_v39  ;;  %7712 = vmatpush1.bf16.msra.mxu1 %v9691_v46  ;;  %v9739_v46 = vld [vmem:[#allocation28 + $0x250] ss:$8 sps:$4 sm:$0xff]  }
 0xa9f   :  { %7713 = vmatprep.subr.bf16.mxu1 %v9699_v36 }
 0xaa1   :  { %7673 = vmatpush2.bf16.msra.mxu0 %v9676_v48 }
 0xaa2   :  { %7674 = vmatprep.subr.bf16.mxu0 %v9684_v21  ;;  %7714 = vmatpush2.bf16.msra.mxu1 %v9697_v51  ;;  %v9744_v21 = vld [vmem:[#allocation28 + $0x244] ss:$8 sps:$4 sm:$0xff]  }
 0xaa3   :  { %7715 = vmatprep.subr.bf16.mxu1 %v9705_v52 }
 0xaa5   :  { %7675 = vmatpush2.bf16.msra.mxu0 %v9682_v55  ;;  %v9742_v55 = vld [vmem:[#allocation28 + $0x240] ss:$8 sps:$4 sm:$0xff]  }
 0xaa6   :  { %7676 = vmatprep.subr.bf16.mxu0 %v9690_v50  ;;  %7716 = vmatpush2.bf16.msra.mxu1 %v9703_v20  ;;  %v9781_v50 = vld [vmem:[#allocation28 + $0x370] ss:$8 sps:$4 sm:$0xff]  }
 0xaa7   :  { %7717 = vmatprep.subr.bf16.mxu1 %v9711_v56  ;;  %v9747_v56 = vld [vmem:[#allocation28 + $0x234] ss:$8 sps:$4 sm:$0xff]  }
 0xaa9   :  { %7677 = vmatpush2.bf16.msra.mxu0 %v9688_v58  ;;  %v9786_v58 = vld [vmem:[#allocation28 + $0x364] ss:$8 sps:$4 sm:$0xff]  }
 0xaaa   :  { %7678 = vmatprep.subr.bf16.mxu0 %v9696_v16  ;;  %7718 = vmatpush2.bf16.msra.mxu1 %v9709_v60  ;;  %v9745_v16 = vld [vmem:[#allocation28 + $0x230] ss:$8 sps:$4 sm:$0xff]   ;;  %v9784_v60 = vld [vmem:[#allocation28 + $0x360] ss:$8 sps:$4 sm:$0xff]  }
 0xaab   :  { %7719 = vmatprep.subr.bf16.mxu1 %v9717_v61  ;;  %v9750_v61 = vld [vmem:[#allocation28 + $0x224] ss:$8 sps:$4 sm:$0xff]  }
 0xaad   :  { %7679 = vmatpush2.bf16.msra.mxu0 %v9694_v62  ;;  %v9789_v62 = vld [vmem:[#allocation28 + $0x354] ss:$8 sps:$4 sm:$0xff]  }
 0xaae   :  { %7680 = vmatprep.subr.bf16.mxu0 %v9702_v41  ;;  %7720 = vmatpush2.bf16.msra.mxu1 %v9715_v1  ;;  %v9748_v41 = vld [vmem:[#allocation28 + $0x220] ss:$8 sps:$4 sm:$0xff]   ;;  %v9787_v1 = vld [vmem:[#allocation28 + $0x350] ss:$8 sps:$4 sm:$0xff]  }
 0xaaf   :  { %7721 = vmatprep.subr.bf16.mxu1 %v9723_v2  ;;  %v9753_v2 = vld [vmem:[#allocation28 + $0x214] ss:$8 sps:$4 sm:$0xff]  }
 0xab1   :  { %7681 = vmatpush2.bf16.msra.mxu0 %v9700_v57  ;;  %v9792_v57 = vld [vmem:[#allocation28 + $0x344] ss:$8 sps:$4 sm:$0xff]  }
 0xab2   :  { %7682 = vmatprep.subr.bf16.mxu0 %v9708_v3  ;;  %7722 = vmatpush2.bf16.msra.mxu1 %v9721_v4  ;;  %v9790_v3 = vld [vmem:[#allocation28 + $0x340] ss:$8 sps:$4 sm:$0xff]   ;;  %v9756_v4 = vld [vmem:[#allocation28 + $0x204] ss:$8 sps:$4 sm:$0xff]  }
 0xab3   :  { %7723 = vmatprep.subr.bf16.mxu1 %v9726_v5  ;;  %v9795_v5 = vld [vmem:[#allocation28 + $0x334] ss:$8 sps:$4 sm:$0xff]  }
 0xab5   :  { %7683 = vmatpush2.bf16.msra.mxu0 %v9706_v6  ;;  %v9754_v6 = vld [vmem:[#allocation28 + $0x200] ss:$8 sps:$4 sm:$0xff]  }
 0xab6   :  { %7684 = vmatprep.subr.bf16.mxu0 %v9714_v43  ;;  %7724 = vmatpush2.bf16.msra.mxu1 %v9724_v54  ;;  %v9759_v43 = vld [vmem:[#allocation28 + $0x2f4] ss:$8 sps:$4 sm:$0xff]   ;;  %v9798_v54 = vld [vmem:[#allocation28 + $0x324] ss:$8 sps:$4 sm:$0xff]  }
 0xab7   :  { %7725 = vmatprep.subr.bf16.mxu1 %v9729_v8  ;;  %v9757_v8 = vld [vmem:[#allocation28 + $0x2f0] ss:$8 sps:$4 sm:$0xff]  }
 0xab9   :  { %7685 = vmatpush2.bf16.msra.mxu0 %v9712_v47  ;;  %v9796_v47 = vld [vmem:[#allocation28 + $0x320] ss:$8 sps:$4 sm:$0xff]  }
 0xaba   :  { %7686 = vmatprep.subr.bf16.mxu0 %v9720_v18  ;;  %7726 = vmatpush2.bf16.msra.mxu1 %v9727_v49  ;;  %v9801_v18 = vld [vmem:[#allocation28 + $0x314] ss:$8 sps:$4 sm:$0xff]   ;;  %v9760_v49 = vld [vmem:[#allocation28 + $0x2e0] ss:$8 sps:$4 sm:$0xff]  }
 0xabb   :  { %7727 = vmatprep.subr.bf16.mxu1 %v9732_v19  ;;  %v9799_v19 = vld [vmem:[#allocation28 + $0x310] ss:$8 sps:$4 sm:$0xff]  }
 0xabd   :  { %7687 = vmatpush2.bf16.msra.mxu0 %v9718_v22  ;;  %v9765_v22 = vld [vmem:[#allocation28 + $0x2d4] ss:$8 sps:$4 sm:$0xff]  }
 0xabe   :  { %7728 = vmatpush2.bf16.msra.mxu1 %v9730_v63  ;;  %7738 = vmatprep.subr.bf16.mxu0 %v9735_v53  ;;  %v9763_v63 = vld [vmem:[#allocation28 + $0x2d0] ss:$8 sps:$4 sm:$0xff]   ;;  %v9802_v53 = vld [vmem:[#allocation28 + $0x300] ss:$8 sps:$4 sm:$0xff]  }
 0xabf   :  { %7779 = vmatprep.subr.bf16.mxu1 %v9783_v23  ;;  %v9768_v23 = vld [vmem:[#allocation28 + $0x2c4] ss:$8 sps:$4 sm:$0xff]  }
 0xac0   :  { %v6648_v27 = vpop.f32.mrf.mxu0  ;;  %v6689_v28 = vpop.f32.mrf.mxu1  ;;  %7689 = vmatmul.mubr.bf16.vlgmr.msra.gmra.mxu0 %v6868_v24  ;;  %v9805_v24 = vld [vmem:[#allocation28 + $0x3f0] ss:$8 sps:$4 sm:$0xff]  }
 0xac1   :  { %v6649_v29 = vadd.f32 %v6648_v27, %v5223_v13  ;;  %7739 = vmatpush1.bf16.msra.mxu0 %v9733_v0  ;;  %v9807_v13 = vld [vmem:[#allocation28 + $0x3f4] ss:$8 sps:$4 sm:$0xff]   ;;  %v9766_v0 = vld [vmem:[#allocation28 + $0x2c0] ss:$8 sps:$4 sm:$0xff]   ;;  %v9769_v27 = vld [vmem:[#allocation28 + $0x2b0] ss:$8 sps:$4 sm:$0xff]  }
 0xac2   :  { %v6650_v31 = vpop.f32.mrf.mxu0  ;;  %v6691_v37 = vpop.f32.mrf.mxu1  ;;  %7740 = vmatprep.subr.bf16.mxu0 %v9738_v25  ;;  %v9771_v25 = vld [vmem:[#allocation28 + $0x2b4] ss:$8 sps:$4 sm:$0xff]  }
 0xac3   :  { %v6690_v12 = vadd.f32 %v6689_v28, %v6649_v29  ;;  %v6651_v32 = vadd.f32 %v6650_v31, %v5227_v26  ;;  %v9810_v26 = vld [vmem:[#allocation28 + $0x3e4] ss:$8 sps:$4 sm:$0xff]   ;;  %v9808_v28 = vld [vmem:[#allocation28 + $0x3e0] ss:$8 sps:$4 sm:$0xff]  }
 0xac4   :  { %v6652_v34 = vpop.f32.mrf.mxu0  ;;  %v6693_v45 = vpop.f32.mrf.mxu1  ;;  %v9774_v29 = vld [vmem:[#allocation28 + $0x2a4] ss:$8 sps:$4 sm:$0xff]   ;;  %v9772_v31 = vld [vmem:[#allocation28 + $0x2a0] ss:$8 sps:$4 sm:$0xff]  }
 0xac5   :  { %v6692_v39 = vadd.f32 %v6691_v37, %v6651_v32  ;;  %7741 = vmatpush1.bf16.msra.mxu0 %v9736_v30  ;;  %v6862_v36 = vmax.f32 %v6690_v12, 0.0  ;;  %v9813_v30 = vld [vmem:[#allocation28 + $0x3d4] ss:$8 sps:$4 sm:$0xff]   ;;  %v9811_v37 = vld [vmem:[#allocation28 + $0x3d0] ss:$8 sps:$4 sm:$0xff]  }
 0xac6   :  { %v6653_v15 = vpop.f32.mrf.mxu0  ;;  %v6694_v48 = vpop.f32.mrf.mxu1  ;;  %7742 = vmatprep.subr.bf16.mxu0 %v9741_v40  ;;  %v9777_v40 = vld [vmem:[#allocation28 + $0x294] ss:$8 sps:$4 sm:$0xff]   ;;  %v9816_v12 = vld [vmem:[#allocation28 + $0x3c4] ss:$8 sps:$4 sm:$0xff]   ;;  %v9775_v32 = vld [vmem:[#allocation28 + $0x290] ss:$8 sps:$4 sm:$0xff]  }
 0xac7   :  { %v6863_v51 = vmax.f32 %v6692_v39, 0.0  ;;  %v6870_v20 = vpack.c.bf16 %v6862_v36, %v6862_v36  ;;  %v9814_v34 = vld [vmem:[#allocation28 + $0x3c0] ss:$8 sps:$4 sm:$0xff]   ;;  %v9780_v45 = vld [vmem:[#allocation28 + $0x284] ss:$8 sps:$4 sm:$0xff]   ;;  %v5231_v48 = vrot.slane %v10662_v59, %v451_v33 }
 0xac8   :  { %v9819_v39 = vld [vmem:[#allocation28 + $0x3b4] ss:$8 sps:$4 sm:$0xff]   ;;  %v9817_v36 = vld [vmem:[#allocation28 + $0x3b0] ss:$8 sps:$4 sm:$0xff]   ;;  %v9822_v15 = vld [vmem:[#allocation28 + $0x3a4] ss:$8 sps:$4 sm:$0xff]  }
 0xac9   :  { %v6871_v52 = vpack.c.bf16 %v6863_v51, %v6863_v51  ;;  %7743 = vmatpush1.bf16.msra.mxu0 %v9739_v46  ;;  %v9778_v46 = vld [vmem:[#allocation28 + $0x280] ss:$8 sps:$4 sm:$0xff]   ;;  %v9825_v51 = vld [vmem:[#allocation28 + $0x394] ss:$8 sps:$4 sm:$0xff]  }
 0xaca   :  { %7744 = vmatprep.subr.bf16.mxu0 %v9744_v21  ;;  %v9820_v21 = vld [vmem:[#allocation28 + $0x3a0] ss:$8 sps:$4 sm:$0xff]  }
 0xacb   :  { %7729 = vmatprep.mubr.bf16.mxu1 %v6871_v52  ;;  %v5235_v52 = vrot.slane %v10662_v59, %v455_v38 }
 0xacc   :  { %7730 = vmatmul.mubr.bf16.vlgmr.msra.gmra.mxu1 %v6870_v20 }
 0xacd   :  { %7745 = vmatpush1.bf16.msra.mxu0 %v9742_v55  ;;  %7780 = vmatpush1.bf16.msra.mxu1 %v9781_v50 }
 0xace   :  { %7746 = vmatprep.subr.bf16.mxu0 %v9747_v56  ;;  %7781 = vmatprep.subr.bf16.mxu1 %v9786_v58  ;;  %v9823_v56 = vld [vmem:[#allocation28 + $0x390] ss:$8 sps:$4 sm:$0xff]  }
 0xad1   :  { %7747 = vmatpush1.bf16.msra.mxu0 %v9745_v16  ;;  %7782 = vmatpush1.bf16.msra.mxu1 %v9784_v60  ;;  %v9828_v16 = vld [vmem:[#allocation28 + $0x384] ss:$8 sps:$4 sm:$0xff]  }
 0xad2   :  { %7748 = vmatprep.subr.bf16.mxu0 %v9750_v61  ;;  %7783 = vmatprep.subr.bf16.mxu1 %v9789_v62 }
 0xad5   :  { %7749 = vmatpush1.bf16.msra.mxu0 %v9748_v41  ;;  %7784 = vmatpush1.bf16.msra.mxu1 %v9787_v1 }
 0xad6   :  { %7750 = vmatprep.subr.bf16.mxu0 %v9753_v2  ;;  %7785 = vmatprep.subr.bf16.mxu1 %v9792_v57  ;;  %v9826_v2 = vld [vmem:[#allocation28 + $0x380] ss:$8 sps:$4 sm:$0xff]  }
 0xad9   :  { %7751 = vmatpush1.bf16.msra.mxu0 %v9751_v10  ;;  %7786 = vmatpush1.bf16.msra.mxu1 %v9790_v3 }
 0xada   :  { %7752 = vmatprep.subr.bf16.mxu0 %v9756_v4  ;;  %7787 = vmatprep.subr.bf16.mxu1 %v9795_v5 }
 0xadd   :  { %7753 = vmatpush1.bf16.msra.mxu0 %v9754_v6  ;;  %7788 = vmatpush1.bf16.msra.mxu1 %v9793_v7  ;;  %v5239_v6 = vrot.slane %v10662_v59, %v459_v35  ;;  %v5243_v7 = vrot.slane %v10662_v59, %v463_v42  ;;  %v7004_v59 = vld [vmem:[%s10724_s24] sm:$0x3]  ;;  %s10241_s24 = smov [#allocation29]  }
 0xade   :  { %7754 = vmatprep.subr.bf16.mxu0 %v9759_v43  ;;  %7789 = vmatprep.subr.bf16.mxu1 %v9798_v54  ;;  %s7836_s2 = sshll.u32 %s10241_s24, 4  ;;  %s7837_s2 = int_to_ptr.vmem [resolvable:$true] %s7836_s2 }
 0xadf   :  { %s10173_s8 = scalar_lea.vmem %s7837_s2, 256  ;;  %p10178_p2 = scmp.lt.s32.totalorder %s7837_s2, %s7837_s2 }
 0xae0   :  { %p10174_p1 = scmp.ne.s32.totalorder %s7837_s2, %s10173_s8  ;;  %p10179_p3 = scmp.lt.s32.totalorder %s10173_s8, %s10173_s8 }
 0xae1   :  { %7755 = vmatpush2.bf16.msra.mxu0 %v9757_v8  ;;  %7790 = vmatpush1.bf16.msra.mxu1 %v9796_v47 }
 0xae2   :  { %7756 = vmatprep.subr.bf16.mxu0 %v9762_v44  ;;  %7791 = vmatprep.subr.bf16.mxu1 %v9801_v18  ;;  %p10180_p4 = por %p10179_p3, %p10178_p2 }
 0xae4   :  { %p10181_p5 = pnand %p10180_p4, %p10174_p1 }
 0xae5   :  { %7757 = vmatpush2.bf16.msra.mxu0 %v9760_v49  ;;  %7792 = vmatpush1.bf16.msra.mxu1 %v9799_v19 }
 0xae6   :  { %7758 = vmatprep.subr.bf16.mxu0 %v9765_v22  ;;  %7793 = vmatprep.subr.bf16.mxu1 %v9804_v17 }
 0xae9   :  { %7759 = vmatpush2.bf16.msra.mxu0 %v9763_v63  ;;  %7794 = vmatpush1.bf16.msra.mxu1 %v9802_v53 }
 0xaea   :  { %7760 = vmatprep.subr.bf16.mxu0 %v9768_v23  ;;  %7795 = vmatprep.subr.bf16.mxu1 %v9807_v13 }
 0xaed   :  { %7761 = vmatpush2.bf16.msra.mxu0 %v9766_v0  ;;  %7796 = vmatpush2.bf16.msra.mxu1 %v9805_v24 }
 0xaee   :  { %7762 = vmatprep.subr.bf16.mxu0 %v9771_v25  ;;  %7797 = vmatprep.subr.bf16.mxu1 %v9810_v26  ;;  %v7009_v26 = vrot.slane %v7004_v59, %v10482_v11 }
 0xaf1   :  { %7763 = vmatpush2.bf16.msra.mxu0 %v9769_v27  ;;  %7798 = vmatpush2.bf16.msra.mxu1 %v9808_v28  ;;  %v7013_v27 = vrot.slane %v7004_v59, %v10488_v14 }
 0xaf2   :  { %7764 = vmatprep.subr.bf16.mxu0 %v9774_v29  ;;  %7799 = vmatprep.subr.bf16.mxu1 %v9813_v30 }
 0xaf5   :  { %7765 = vmatpush2.bf16.msra.mxu0 %v9772_v31  ;;  %7800 = vmatpush2.bf16.msra.mxu1 %v9811_v37 }
 0xaf6   :  { %7766 = vmatprep.subr.bf16.mxu0 %v9777_v40  ;;  %7801 = vmatprep.subr.bf16.mxu1 %v9816_v12 }
 0xaf9   :  { %7767 = vmatpush2.bf16.msra.mxu0 %v9775_v32  ;;  %7802 = vmatpush2.bf16.msra.mxu1 %v9814_v34 }
 0xafa   :  { %7768 = vmatprep.subr.bf16.mxu0 %v9780_v45  ;;  %7803 = vmatprep.subr.bf16.mxu1 %v9819_v39 }
 0xafd   :  { %7769 = vmatpush2.bf16.msra.mxu0 %v9778_v46  ;;  %7804 = vmatpush2.bf16.msra.mxu1 %v9817_v36 }
 0xafe   :  { %7805 = vmatprep.subr.bf16.mxu1 %v9822_v15 }
 0xb00   :  { %v6730_v55 = vpop.f32.mrf.mxu0 }
 0xb01   :  { %v6731_v50 = vadd.f32 %v6730_v55, %v5231_v48  ;;  %v6771_v20 = vpop.f32.mrf.mxu1  ;;  %7806 = vmatpush2.bf16.msra.mxu1 %v9820_v21 }
 0xb02   :  { %v6732_v58 = vpop.f32.mrf.mxu0  ;;  %7807 = vmatprep.subr.bf16.mxu1 %v9825_v51 }
 0xb03   :  { %v6772_v60 = vadd.f32 %v6771_v20, %v6731_v50  ;;  %v6733_v61 = vadd.f32 %v6732_v58, %v5235_v52  ;;  %v6773_v33 = vpop.f32.mrf.mxu1 }
 0xb04   :  { %v6734_v62 = vpop.f32.mrf.mxu0 }
 0xb05   :  { %v6774_v41 = vadd.f32 %v6773_v33, %v6733_v61  ;;  %v6775_v1 = vpop.f32.mrf.mxu1  ;;  %7808 = vmatpush2.bf16.msra.mxu1 %v9823_v56  ;;  %v6864_v57 = vmax.f32 %v6772_v60, 0.0 }
 0xb06   :  { %v6735_v10 = vpop.f32.mrf.mxu0  ;;  %7809 = vmatprep.subr.bf16.mxu1 %v9828_v16 }
 0xb07   :  { %v6865_v38 = vmax.f32 %v6774_v41, 0.0  ;;  %v6776_v3 = vpop.f32.mrf.mxu1  ;;  %v6872_v5 = vpack.c.bf16 %v6864_v57, %v6864_v57 }
 0xb09   :  { %v6873_v4 = vpack.c.bf16 %v6865_v38, %v6865_v38  ;;  %7810 = vmatpush2.bf16.msra.mxu1 %v9826_v2 }
 0xb0b   :  { %7770 = vmatprep.mubr.bf16.mxu0 %v6873_v4 }
 0xb0c   :  { %7771 = vmatmul.mubr.bf16.vlgmr.msra.gmra.mxu0 %v6872_v5 }
 0xb40   :  { %v6812_v43 = vpop.f32.mrf.mxu0 }
 0xb41   :  { %v6813_v54 = vadd.f32 %v6812_v43, %v5239_v6  ;;  %v6853_v8 = vpop.f32.mrf.mxu1 }
 0xb42   :  { %v6814_v47 = vpop.f32.mrf.mxu0 }
 0xb43   :  { %v6854_v44 = vadd.f32 %v6853_v8, %v6813_v54  ;;  %v6815_v18 = vadd.f32 %v6814_v47, %v5243_v7  ;;  %v6855_v49 = vpop.f32.mrf.mxu1 }
 0xb44   :  { %v6816_v19 = vpop.f32.mrf.mxu0 }
 0xb45   :  { %v6856_v22 = vadd.f32 %v6855_v49, %v6815_v18  ;;  %v6857_v17 = vpop.f32.mrf.mxu1  ;;  %v6866_v63 = vmax.f32 %v6854_v44, 0.0 }
 0xb46   :  { %v6817_v53 = vpop.f32.mrf.mxu0 }
 0xb47   :  { %v6867_v23 = vmax.f32 %v6856_v22, 0.0  ;;  %v6858_v13 = vpop.f32.mrf.mxu1  ;;  %v6874_v35 = vpack.c.bf16 %v6866_v63, %v6866_v63 }
 0xb49   :  { %v6875_v0 = vpack.c.bf16 %v6867_v23, %v6867_v23 }
 0xb4b   :  { %7811 = vmatprep.mubr.bf16.mxu1 %v6875_v0 }
 0xb4c   :  { %7812 = vmatmul.mubr.bf16.vlgmr.msra.gmra.mxu1 %v6874_v35 }
 0xb80   :  { %v7690_v9 = vpop.f32.mrf.mxu0 }
 0xb81   :  { %v7691_v28 = vadd.f32 %v7690_v9, %v7009_v26 }
 0xb82   :  { %v7692_v42 = vpop.f32.mrf.mxu0 }
 0xb83   :  { %v7693_v30 = vadd.f32 %v7692_v42, %v7013_v27 }
 0xb84   :  { %v7694_v24 = vpop.f32.mrf.mxu0 }
 0xb86   :  { %v7695_v25 = vpop.f32.mrf.mxu0 }
 0xb8c   :  { %v7731_v29 = vpop.f32.mrf.mxu1 }
 0xb8d   :  { %v7732_v31 = vadd.f32 %v7731_v29, %v7691_v28 }
 0xb8e   :  { %v7733_v37 = vpop.f32.mrf.mxu1 }
 0xb8f   :  { %v7734_v40 = vadd.f32 %v7733_v37, %v7693_v30 }
 0xb90   :  { %v7735_v12 = vpop.f32.mrf.mxu1 }
 0xb92   :  { %v7736_v32 = vpop.f32.mrf.mxu1 }
 0xbcc   :  { %v7772_v34 = vpop.f32.mrf.mxu0 }
 0xbcd   :  { %v7773_v36 = vadd.f32 %v7772_v34, %v7732_v31 }
 0xbce   :  { %v7774_v45 = vpop.f32.mrf.mxu0 }
 0xbcf   :  { %v7775_v48 = vadd.f32 %v7774_v45, %v7734_v40 }
 0xbd0   :  { %v7776_v39 = vpop.f32.mrf.mxu0 }
 0xbd2   :  { %v7777_v46 = vpop.f32.mrf.mxu0 }
 0xc0c   :  { %v7813_v15 = vpop.f32.mrf.mxu1 }
 0xc0d   :  { %v7814_v21 = vadd.f32 %v7813_v15, %v7773_v36 }
 0xc0e   :  { %v7815_v51 = vpop.f32.mrf.mxu1 }
 0xc0f   :  { %v7820_v11 = vmul.f32 0.5, %v7814_v21  ;;  %v7816_v52 = vadd.f32 %v7815_v51, %v7775_v48 }
 0xc10   :  { %v7817_v14 = vpop.f32.mrf.mxu1 }
 0xc11   :  { %9829 = vtanh.f32 %v7820_v11  ;;  %v7821_v55 = vmul.f32 0.5, %v7816_v52 }
 0xc12   :  { %v7818_v50 = vpop.f32.mrf.mxu1 }
 0xc13   :  { %9831 = vtanh.f32 %v7821_v55 }
 0xc1e   :  { %v9830_v20 = vpop.eup %9829 }
 0xc1f   :  { %v7824_v56 = vmul.f32 0.5, %v9830_v20 }
 0xc20   :  { %v9832_v58 = vpop.eup %9831 }
 0xc21   :  { %v7825_v16 = vmul.f32 0.5, %v9832_v58  ;;  %v7826_v60 = vadd.f32 0.5, %v7824_v56 }
 0xc23   :  { %v7827_v61 = vadd.f32 0.5, %v7825_v16  ;;  %7828 = vst [vmem:[#allocation29] sm:$0xff] %v7826_v60 }
 0xc25   :  { %7829 = vst [vmem:[#allocation29 + $0x8] sm:$0xff] %v7827_v61 }
 0xc26   :  { %10184 = shalt.err (!%p10181_p5)
}
 0xc27   :  { %7839 = dma.vmem_to_hbm [thread:$0]  %s7837_s2, 256, %s10725_s25, [#allocation4]  }
 0xc28   :  { %10211 = dma.done.wait [#allocation4], 256  }
 0xc29   :  { %10212 = vsyncadd [#allocation4], 4294967040 }
 0xc2a   :  { %7843 = vsyncpa [#allocation3], 1 }
 0xc2b   :  { %7844 = vsyncpa [#allocation6], 1 }
 0xc2c   :  { %7845 = vsyncpa [#allocation9], 1 }
 0xc2d   :  { %7846 = vsyncpa [#allocation12], 1 }
 0xc2e   :  { %7847 = vsyncpa [#allocation15], 1 }
 0xc2f   :  { %7848 = vsyncpa [#allocation18], 1 }
 0xc30   :  { %7849 = vsyncpa [#allocation21], 1 }
 0xc31   :  { %7850 = vsyncpa [#allocation24], 1 }
 0xc32   :  { %7851 = vsyncpa [#allocation27], 1 }
 0xc33   :  { %7852 = vsyncpa [#allocation4], 1 }

</bundles_post_ra>
